<compile_context>
chip_gen: v7x
topology: tpu7x:2x2x1
jax: 0.10.0
libtpu: 0.0.40
codegen_flags: <defaults>
</compile_context>

<pallas_src>
import jax
import jax.numpy as jnp
import numpy as np
from jax.experimental import pallas as pl
from jax.experimental.pallas import tpu as pltpu

_K = 5            # conv kernel size (both convs)
_H1 = _W1 = 28    # conv1 input spatial size
_H2 = _W2 = 12    # conv2 input spatial size (after pool1)
_P1 = 12          # pool1 output spatial size
_P2 = 4           # pool2 output spatial size


def _make_lenet_kernel(n):
    """Fully fused forward kernel for a static batch size `n`.

    Flat spatial index convention: r = b*H*W + h*W + w using the *input*
    strides of the current conv; rows whose (h, w) fall outside the valid conv
    output are garbage but are never selected by the pool decimation masks.
    """
    r1 = n * _H1 * _W1 - ((_K - 1) * _W1 + (_K - 1))   # conv1 output rows (1452 @ n=2)
    r2 = n * _H2 * _W2 - ((_K - 1) * _W2 + (_K - 1))   # conv2 output rows (236  @ n=2)
    mw1 = r1 - 1 - _W1                                  # pool1 source width   (1423)
    mw2 = r2 - 1 - _W2                                  # pool2 source width   (223)
    pc1 = (_P1 - 1) * 2 * _W1 + 2 * _P1 - 1             # per-batch pool1 span (639)

    def kernel(x_ref, w1_ref, b1_ref, w2_ref, b2_ref, sel1_ref, sel2_ref,
               wf1_ref, bf1_ref, wf2_ref, bf2_ref, wf3_ref, bf3_ref, o_ref):
        f32 = jnp.float32

        # ---- conv1 (1 -> 6, 5x5 valid) + ReLU, lane-dense (6, r1) ----------------
        x = x_ref[...]                                          # (1, n*784)
        xb = jnp.broadcast_to(x, (6, n * _H1 * _W1))            # sublane-bcast once
        w1 = w1_ref[...]                                        # (6, 25)
        acc1 = jnp.broadcast_to(b1_ref[...], (6, r1))
        for i in range(_K):
            for j in range(_K):
                off = i * _W1 + j
                t = i * _K + j
                acc1 = acc1 + w1[:, t:t + 1] * xb[:, off:off + r1]   # rank-1 tap
        acc1 = jnp.maximum(acc1, 0.0)                           # (6, r1)

        # ---- maxpool1 2x2/2: pairwise maxes + per-batch selection matmul ---------
        m = jnp.maximum(acc1[:, :r1 - 1], acc1[:, 1:r1])        # pair along w
        m = jnp.maximum(m[:, :mw1], m[:, _W1:_W1 + mw1])        # pair along h
        rows1 = jax.lax.broadcasted_iota(jnp.int32, (pc1, _P1 * _P1), 0)
        d1 = (rows1 == sel1_ref[...]).astype(f32)               # (639, 144) 0/1 mask
        p1 = jnp.concatenate(
            [jnp.dot(m[:, b * _H1 * _W1: b * _H1 * _W1 + pc1], d1,
                     preferred_element_type=f32) for b in range(n)],
            axis=1)                                             # (6, n*144)

        # ---- conv2 (6 -> 16, 5x5 valid) + ReLU: 25 shifted (16,6)@(6,r2) GEMMs ---
        w2 = w2_ref[...]                                        # (25, 16, 6)
        acc2 = jnp.broadcast_to(b2_ref[...], (16, r2))
        for i in range(_K):
            for j in range(_K):
                off = i * _W2 + j
                acc2 = acc2 + jnp.dot(w2[i * _K + j], p1[:, off:off + r2],
                                      preferred_element_type=f32)
        acc2 = jnp.maximum(acc2, 0.0)                           # (16, r2)

        # ---- maxpool2 2x2/2 -> (16, n*16), spatial-major cols (col = s*n + b) ----
        m2 = jnp.maximum(acc2[:, :r2 - 1], acc2[:, 1:r2])
        m2 = jnp.maximum(m2[:, :mw2], m2[:, _W2:_W2 + mw2])     # (16, 223)
        rows2 = jax.lax.broadcasted_iota(jnp.int32, (mw2, n * _P2 * _P2), 0)
        d2 = (rows2 == sel2_ref[...]).astype(f32)               # (223, n*16)
        p2t = jnp.dot(m2, d2, preferred_element_type=f32)       # (16, n*16)

        # ---- flatten to PyTorch view(-1,256) order: rows s*16+c, cols b ----------
        p2_cols = jnp.concatenate(
            [p2t[:, s * n:(s + 1) * n] for s in range(_P2 * _P2)], axis=0)  # (256, n)

        # ---- fc1 -> relu -> fc2 -> relu -> fc3, transposed (features, batch) -----
        h1 = jnp.maximum(jnp.dot(wf1_ref[...], p2_cols,
                                 preferred_element_type=f32) + bf1_ref[...], 0.0)  # (120, n)
        h2 = jnp.maximum(jnp.dot(wf2_ref[...], h1,
                                 preferred_element_type=f32) + bf2_ref[...], 0.0)  # (84, n)
        out_t = jnp.dot(wf3_ref[...], h2,
                        preferred_element_type=f32) + bf3_ref[...]                 # (10, n)
        o_ref[...] = out_t.astype(o_ref.dtype)

    return kernel


def _prepare_inputs(params, x_nchw):
    """One-time layout prep (outside the kernel; folded/fused by XLA)."""
    n = x_nchw.shape[0]
    f32 = jnp.float32
    x_flat = x_nchw.astype(f32).reshape(1, n * _H1 * _W1)        # col = b*784 + h*28 + w
    w1 = params['conv1_w'].astype(f32).reshape(6, 25)            # [co, i*5+j]
    b1 = params['conv1_b'].astype(f32).reshape(6, 1)
    w2 = jnp.transpose(params['conv2_w'].astype(f32),
                       (2, 3, 0, 1)).reshape(25, 16, 6)          # [i*5+j, co, ci]
    b2 = params['conv2_b'].astype(f32).reshape(16, 1)
    # fc1 columns re-permuted from PyTorch's c*16+s to s*16+c (matches p2_cols rows).
    wf1 = jnp.transpose(params['fc1_w'].astype(f32).reshape(120, 16, 16),
                        (0, 2, 1)).reshape(120, 256)
    bf1 = params['fc1_b'].astype(f32).reshape(120, 1)
    wf2 = params['fc2_w'].astype(f32)                            # (84, 120), used as-is
    bf2 = params['fc2_b'].astype(f32).reshape(84, 1)
    wf3 = params['fc3_w'].astype(f32)                            # (10, 84), used as-is
    bf3 = params['fc3_b'].astype(f32).reshape(10, 1)

    # Pool selection index rows (static; only depend on n / geometry).
    oh, ow = np.meshgrid(np.arange(_P1), np.arange(_P1), indexing='ij')
    sel1 = (oh * 2 * _W1 + ow * 2).reshape(1, _P1 * _P1).astype(np.int32)      # per-batch
    s_idx, b_idx = np.meshgrid(np.arange(_P2 * _P2), np.arange(n), indexing='ij')
    sel2 = (b_idx * _H2 * _W2 + (s_idx // _P2) * 2 * _W2
            + (s_idx % _P2) * 2).reshape(1, n * _P2 * _P2).astype(np.int32)    # col = s*n+b
    sel1 = jnp.asarray(sel1)
    sel2 = jnp.asarray(sel2)
    return (x_flat, w1, b1, w2, b2, sel1, sel2, wf1, bf1, wf2, bf2, wf3, bf3)


@jax.jit
def net_forward(params, x_nchw):
    n = x_nchw.shape[0]
    inputs = _prepare_inputs(params, x_nchw)
    out_t = pl.pallas_call(
        _make_lenet_kernel(n),
        out_shape=jax.ShapeDtypeStruct((10, n), jnp.float32),
        in_specs=[pl.BlockSpec(memory_space=pltpu.MemorySpace.VMEM)] * len(inputs),
        out_specs=pl.BlockSpec(memory_space=pltpu.MemorySpace.VMEM),
    )(*inputs)
    return out_t.T                                               # (n, 10)


def net_reference(params, x_nchw):
    """Pure-JAX reference mirroring the PyTorch forward."""
    dn = ('NCHW', 'OIHW', 'NCHW')
    x = jax.lax.conv_general_dilated(x_nchw, params['conv1_w'], (1, 1), 'VALID',
                                     dimension_numbers=dn)
    x = jax.nn.relu(x + params['conv1_b'][None, :, None, None])
    x = jax.lax.reduce_window(x, -jnp.inf, jax.lax.max, (1, 1, 2, 2), (1, 1, 2, 2), 'VALID')
    x = jax.lax.conv_general_dilated(x, params['conv2_w'], (1, 1), 'VALID',
                                     dimension_numbers=dn)
    x = jax.nn.relu(x + params['conv2_b'][None, :, None, None])
    x = jax.lax.reduce_window(x, -jnp.inf, jax.lax.max, (1, 1, 2, 2), (1, 1, 2, 2), 'VALID')
    x = x.reshape(x.shape[0], 16 * 4 * 4)
    x = jax.nn.relu(x @ params['fc1_w'].T + params['fc1_b'])
    x = jax.nn.relu(x @ params['fc2_w'].T + params['fc2_b'])
    x = x @ params['fc3_w'].T + params['fc3_b']
    return x


def init_params(key):
    """Deterministic synthetic weights (PyTorch-style uniform +-1/sqrt(fan_in))."""
    ks = jax.random.split(key, 10)

    def u(k, shape, fan_in):
        bound = 1.0 / np.sqrt(fan_in)
        return jax.random.uniform(k, shape, jnp.float32, -bound, bound)

    return {
        'conv1_w': u(ks[0], (6, 1, 5, 5), 1 * 5 * 5),
        'conv1_b': u(ks[1], (6,), 1 * 5 * 5),
        'conv2_w': u(ks[2], (16, 6, 5, 5), 6 * 5 * 5),
        'conv2_b': u(ks[3], (16,), 6 * 5 * 5),
        'fc1_w':   u(ks[4], (120, 16 * 4 * 4), 16 * 4 * 4),
        'fc1_b':   u(ks[5], (120,), 16 * 4 * 4),
        'fc2_w':   u(ks[6], (84, 120), 120),
        'fc2_b':   u(ks[7], (84,), 120),
        'fc3_w':   u(ks[8], (10, 84), 84),
        'fc3_b':   u(ks[9], (10,), 84),
    }


if __name__ == "__main__":
    key = jax.random.PRNGKey(0)
    kp, kx = jax.random.split(key)
    params = init_params(kp)

    # fc1 expects 16*4*4 features -> spatial input must be 28x28 (LeNet / MNIST size).
    x = jax.random.normal(kx, (2, 1, 28, 28), dtype=jnp.float32)

    out = jax.block_until_ready(net_forward(params, x))
    ref = jax.block_until_ready(net_reference(params, x))

    assert out.shape == (2, 10), out.shape
    np.testing.assert_allclose(np.asarray(out), np.asarray(ref), rtol=2e-4, atol=2e-4)
    print("KERNEL_OK")
</pallas_src>

<mosaic_0001>
module attributes {stable_mosaic.version = 11 : i64} {
  func.func @kernel(%arg0: memref<1x1568xf32, #tpu.memory_space<vmem>>, %arg1: memref<6x25xf32, #tpu.memory_space<vmem>>, %arg2: memref<6x1xf32, #tpu.memory_space<vmem>>, %arg3: memref<25x16x6xf32, #tpu.memory_space<vmem>>, %arg4: memref<16x1xf32, #tpu.memory_space<vmem>>, %arg5: memref<1x144xi32, #tpu.memory_space<vmem>>, %arg6: memref<1x32xi32, #tpu.memory_space<vmem>>, %arg7: memref<120x256xf32, #tpu.memory_space<vmem>>, %arg8: memref<120x1xf32, #tpu.memory_space<vmem>>, %arg9: memref<84x120xf32, #tpu.memory_space<vmem>>, %arg10: memref<84x1xf32, #tpu.memory_space<vmem>>, %arg11: memref<10x84xf32, #tpu.memory_space<vmem>>, %arg12: memref<10x1xf32, #tpu.memory_space<vmem>>, %arg13: memref<10x2xf32, #tpu.memory_space<vmem>>) attributes {dimension_semantics = [], scalar_prefetch = 0 : i64, scratch_operands = 0 : i64, tpu.core_type = #tpu.core_type<tc>} {
    %c0 = arith.constant 0 : index
    %c0_0 = arith.constant 0 : index
    %0 = vector.load %arg0[%c0, %c0_0] : memref<1x1568xf32, #tpu.memory_space<vmem>>, vector<1x1568xf32>
    %1 = vector.shape_cast %0 : vector<1x1568xf32> to vector<1x1568xf32>
    %2 = vector.broadcast %1 : vector<1x1568xf32> to vector<6x1568xf32>
    %c0_1 = arith.constant 0 : index
    %c0_2 = arith.constant 0 : index
    %3 = vector.load %arg1[%c0_1, %c0_2] : memref<6x25xf32, #tpu.memory_space<vmem>>, vector<6x25xf32>
    %c0_3 = arith.constant 0 : index
    %c0_4 = arith.constant 0 : index
    %4 = vector.load %arg2[%c0_3, %c0_4] : memref<6x1xf32, #tpu.memory_space<vmem>>, vector<6x1xf32>
    %5 = vector.shape_cast %4 : vector<6x1xf32> to vector<6x1xf32>
    %6 = vector.broadcast %5 : vector<6x1xf32> to vector<6x1452xf32>
    %7 = vector.extract_strided_slice %3 {offsets = [0, 0], sizes = [6, 1], strides = [1, 1]} : vector<6x25xf32> to vector<6x1xf32>
    %8 = vector.extract_strided_slice %2 {offsets = [0, 0], sizes = [6, 1452], strides = [1, 1]} : vector<6x1568xf32> to vector<6x1452xf32>
    %9 = vector.broadcast %7 : vector<6x1xf32> to vector<6x1452xf32>
    %10 = arith.mulf %9, %8 : vector<6x1452xf32>
    %11 = arith.addf %6, %10 : vector<6x1452xf32>
    %12 = vector.extract_strided_slice %3 {offsets = [0, 1], sizes = [6, 1], strides = [1, 1]} : vector<6x25xf32> to vector<6x1xf32>
    %13 = vector.extract_strided_slice %2 {offsets = [0, 1], sizes = [6, 1452], strides = [1, 1]} : vector<6x1568xf32> to vector<6x1452xf32>
    %14 = vector.broadcast %12 : vector<6x1xf32> to vector<6x1452xf32>
    %15 = arith.mulf %14, %13 : vector<6x1452xf32>
    %16 = arith.addf %11, %15 : vector<6x1452xf32>
    %17 = vector.extract_strided_slice %3 {offsets = [0, 2], sizes = [6, 1], strides = [1, 1]} : vector<6x25xf32> to vector<6x1xf32>
    %18 = vector.extract_strided_slice %2 {offsets = [0, 2], sizes = [6, 1452], strides = [1, 1]} : vector<6x1568xf32> to vector<6x1452xf32>
    %19 = vector.broadcast %17 : vector<6x1xf32> to vector<6x1452xf32>
    %20 = arith.mulf %19, %18 : vector<6x1452xf32>
    %21 = arith.addf %16, %20 : vector<6x1452xf32>
    %22 = vector.extract_strided_slice %3 {offsets = [0, 3], sizes = [6, 1], strides = [1, 1]} : vector<6x25xf32> to vector<6x1xf32>
    %23 = vector.extract_strided_slice %2 {offsets = [0, 3], sizes = [6, 1452], strides = [1, 1]} : vector<6x1568xf32> to vector<6x1452xf32>
    %24 = vector.broadcast %22 : vector<6x1xf32> to vector<6x1452xf32>
    %25 = arith.mulf %24, %23 : vector<6x1452xf32>
    %26 = arith.addf %21, %25 : vector<6x1452xf32>
    %27 = vector.extract_strided_slice %3 {offsets = [0, 4], sizes = [6, 1], strides = [1, 1]} : vector<6x25xf32> to vector<6x1xf32>
    %28 = vector.extract_strided_slice %2 {offsets = [0, 4], sizes = [6, 1452], strides = [1, 1]} : vector<6x1568xf32> to vector<6x1452xf32>
    %29 = vector.broadcast %27 : vector<6x1xf32> to vector<6x1452xf32>
    %30 = arith.mulf %29, %28 : vector<6x1452xf32>
    %31 = arith.addf %26, %30 : vector<6x1452xf32>
    %32 = vector.extract_strided_slice %3 {offsets = [0, 5], sizes = [6, 1], strides = [1, 1]} : vector<6x25xf32> to vector<6x1xf32>
    %33 = vector.extract_strided_slice %2 {offsets = [0, 28], sizes = [6, 1452], strides = [1, 1]} : vector<6x1568xf32> to vector<6x1452xf32>
    %34 = vector.broadcast %32 : vector<6x1xf32> to vector<6x1452xf32>
    %35 = arith.mulf %34, %33 : vector<6x1452xf32>
    %36 = arith.addf %31, %35 : vector<6x1452xf32>
    %37 = vector.extract_strided_slice %3 {offsets = [0, 6], sizes = [6, 1], strides = [1, 1]} : vector<6x25xf32> to vector<6x1xf32>
    %38 = vector.extract_strided_slice %2 {offsets = [0, 29], sizes = [6, 1452], strides = [1, 1]} : vector<6x1568xf32> to vector<6x1452xf32>
    %39 = vector.broadcast %37 : vector<6x1xf32> to vector<6x1452xf32>
    %40 = arith.mulf %39, %38 : vector<6x1452xf32>
    %41 = arith.addf %36, %40 : vector<6x1452xf32>
    %42 = vector.extract_strided_slice %3 {offsets = [0, 7], sizes = [6, 1], strides = [1, 1]} : vector<6x25xf32> to vector<6x1xf32>
    %43 = vector.extract_strided_slice %2 {offsets = [0, 30], sizes = [6, 1452], strides = [1, 1]} : vector<6x1568xf32> to vector<6x1452xf32>
    %44 = vector.broadcast %42 : vector<6x1xf32> to vector<6x1452xf32>
    %45 = arith.mulf %44, %43 : vector<6x1452xf32>
    %46 = arith.addf %41, %45 : vector<6x1452xf32>
    %47 = vector.extract_strided_slice %3 {offsets = [0, 8], sizes = [6, 1], strides = [1, 1]} : vector<6x25xf32> to vector<6x1xf32>
    %48 = vector.extract_strided_slice %2 {offsets = [0, 31], sizes = [6, 1452], strides = [1, 1]} : vector<6x1568xf32> to vector<6x1452xf32>
    %49 = vector.broadcast %47 : vector<6x1xf32> to vector<6x1452xf32>
    %50 = arith.mulf %49, %48 : vector<6x1452xf32>
    %51 = arith.addf %46, %50 : vector<6x1452xf32>
    %52 = vector.extract_strided_slice %3 {offsets = [0, 9], sizes = [6, 1], strides = [1, 1]} : vector<6x25xf32> to vector<6x1xf32>
    %53 = vector.extract_strided_slice %2 {offsets = [0, 32], sizes = [6, 1452], strides = [1, 1]} : vector<6x1568xf32> to vector<6x1452xf32>
    %54 = vector.broadcast %52 : vector<6x1xf32> to vector<6x1452xf32>
    %55 = arith.mulf %54, %53 : vector<6x1452xf32>
    %56 = arith.addf %51, %55 : vector<6x1452xf32>
    %57 = vector.extract_strided_slice %3 {offsets = [0, 10], sizes = [6, 1], strides = [1, 1]} : vector<6x25xf32> to vector<6x1xf32>
    %58 = vector.extract_strided_slice %2 {offsets = [0, 56], sizes = [6, 1452], strides = [1, 1]} : vector<6x1568xf32> to vector<6x1452xf32>
    %59 = vector.broadcast %57 : vector<6x1xf32> to vector<6x1452xf32>
    %60 = arith.mulf %59, %58 : vector<6x1452xf32>
    %61 = arith.addf %56, %60 : vector<6x1452xf32>
    %62 = vector.extract_strided_slice %3 {offsets = [0, 11], sizes = [6, 1], strides = [1, 1]} : vector<6x25xf32> to vector<6x1xf32>
    %63 = vector.extract_strided_slice %2 {offsets = [0, 57], sizes = [6, 1452], strides = [1, 1]} : vector<6x1568xf32> to vector<6x1452xf32>
    %64 = vector.broadcast %62 : vector<6x1xf32> to vector<6x1452xf32>
    %65 = arith.mulf %64, %63 : vector<6x1452xf32>
    %66 = arith.addf %61, %65 : vector<6x1452xf32>
    %67 = vector.extract_strided_slice %3 {offsets = [0, 12], sizes = [6, 1], strides = [1, 1]} : vector<6x25xf32> to vector<6x1xf32>
    %68 = vector.extract_strided_slice %2 {offsets = [0, 58], sizes = [6, 1452], strides = [1, 1]} : vector<6x1568xf32> to vector<6x1452xf32>
    %69 = vector.broadcast %67 : vector<6x1xf32> to vector<6x1452xf32>
    %70 = arith.mulf %69, %68 : vector<6x1452xf32>
    %71 = arith.addf %66, %70 : vector<6x1452xf32>
    %72 = vector.extract_strided_slice %3 {offsets = [0, 13], sizes = [6, 1], strides = [1, 1]} : vector<6x25xf32> to vector<6x1xf32>
    %73 = vector.extract_strided_slice %2 {offsets = [0, 59], sizes = [6, 1452], strides = [1, 1]} : vector<6x1568xf32> to vector<6x1452xf32>
    %74 = vector.broadcast %72 : vector<6x1xf32> to vector<6x1452xf32>
    %75 = arith.mulf %74, %73 : vector<6x1452xf32>
    %76 = arith.addf %71, %75 : vector<6x1452xf32>
    %77 = vector.extract_strided_slice %3 {offsets = [0, 14], sizes = [6, 1], strides = [1, 1]} : vector<6x25xf32> to vector<6x1xf32>
    %78 = vector.extract_strided_slice %2 {offsets = [0, 60], sizes = [6, 1452], strides = [1, 1]} : vector<6x1568xf32> to vector<6x1452xf32>
    %79 = vector.broadcast %77 : vector<6x1xf32> to vector<6x1452xf32>
    %80 = arith.mulf %79, %78 : vector<6x1452xf32>
    %81 = arith.addf %76, %80 : vector<6x1452xf32>
    %82 = vector.extract_strided_slice %3 {offsets = [0, 15], sizes = [6, 1], strides = [1, 1]} : vector<6x25xf32> to vector<6x1xf32>
    %83 = vector.extract_strided_slice %2 {offsets = [0, 84], sizes = [6, 1452], strides = [1, 1]} : vector<6x1568xf32> to vector<6x1452xf32>
    %84 = vector.broadcast %82 : vector<6x1xf32> to vector<6x1452xf32>
    %85 = arith.mulf %84, %83 : vector<6x1452xf32>
    %86 = arith.addf %81, %85 : vector<6x1452xf32>
    %87 = vector.extract_strided_slice %3 {offsets = [0, 16], sizes = [6, 1], strides = [1, 1]} : vector<6x25xf32> to vector<6x1xf32>
    %88 = vector.extract_strided_slice %2 {offsets = [0, 85], sizes = [6, 1452], strides = [1, 1]} : vector<6x1568xf32> to vector<6x1452xf32>
    %89 = vector.broadcast %87 : vector<6x1xf32> to vector<6x1452xf32>
    %90 = arith.mulf %89, %88 : vector<6x1452xf32>
    %91 = arith.addf %86, %90 : vector<6x1452xf32>
    %92 = vector.extract_strided_slice %3 {offsets = [0, 17], sizes = [6, 1], strides = [1, 1]} : vector<6x25xf32> to vector<6x1xf32>
    %93 = vector.extract_strided_slice %2 {offsets = [0, 86], sizes = [6, 1452], strides = [1, 1]} : vector<6x1568xf32> to vector<6x1452xf32>
    %94 = vector.broadcast %92 : vector<6x1xf32> to vector<6x1452xf32>
    %95 = arith.mulf %94, %93 : vector<6x1452xf32>
    %96 = arith.addf %91, %95 : vector<6x1452xf32>
    %97 = vector.extract_strided_slice %3 {offsets = [0, 18], sizes = [6, 1], strides = [1, 1]} : vector<6x25xf32> to vector<6x1xf32>
    %98 = vector.extract_strided_slice %2 {offsets = [0, 87], sizes = [6, 1452], strides = [1, 1]} : vector<6x1568xf32> to vector<6x1452xf32>
    %99 = vector.broadcast %97 : vector<6x1xf32> to vector<6x1452xf32>
    %100 = arith.mulf %99, %98 : vector<6x1452xf32>
    %101 = arith.addf %96, %100 : vector<6x1452xf32>
    %102 = vector.extract_strided_slice %3 {offsets = [0, 19], sizes = [6, 1], strides = [1, 1]} : vector<6x25xf32> to vector<6x1xf32>
    %103 = vector.extract_strided_slice %2 {offsets = [0, 88], sizes = [6, 1452], strides = [1, 1]} : vector<6x1568xf32> to vector<6x1452xf32>
    %104 = vector.broadcast %102 : vector<6x1xf32> to vector<6x1452xf32>
    %105 = arith.mulf %104, %103 : vector<6x1452xf32>
    %106 = arith.addf %101, %105 : vector<6x1452xf32>
    %107 = vector.extract_strided_slice %3 {offsets = [0, 20], sizes = [6, 1], strides = [1, 1]} : vector<6x25xf32> to vector<6x1xf32>
    %108 = vector.extract_strided_slice %2 {offsets = [0, 112], sizes = [6, 1452], strides = [1, 1]} : vector<6x1568xf32> to vector<6x1452xf32>
    %109 = vector.broadcast %107 : vector<6x1xf32> to vector<6x1452xf32>
    %110 = arith.mulf %109, %108 : vector<6x1452xf32>
    %111 = arith.addf %106, %110 : vector<6x1452xf32>
    %112 = vector.extract_strided_slice %3 {offsets = [0, 21], sizes = [6, 1], strides = [1, 1]} : vector<6x25xf32> to vector<6x1xf32>
    %113 = vector.extract_strided_slice %2 {offsets = [0, 113], sizes = [6, 1452], strides = [1, 1]} : vector<6x1568xf32> to vector<6x1452xf32>
    %114 = vector.broadcast %112 : vector<6x1xf32> to vector<6x1452xf32>
    %115 = arith.mulf %114, %113 : vector<6x1452xf32>
    %116 = arith.addf %111, %115 : vector<6x1452xf32>
    %117 = vector.extract_strided_slice %3 {offsets = [0, 22], sizes = [6, 1], strides = [1, 1]} : vector<6x25xf32> to vector<6x1xf32>
    %118 = vector.extract_strided_slice %2 {offsets = [0, 114], sizes = [6, 1452], strides = [1, 1]} : vector<6x1568xf32> to vector<6x1452xf32>
    %119 = vector.broadcast %117 : vector<6x1xf32> to vector<6x1452xf32>
    %120 = arith.mulf %119, %118 : vector<6x1452xf32>
    %121 = arith.addf %116, %120 : vector<6x1452xf32>
    %122 = vector.extract_strided_slice %3 {offsets = [0, 23], sizes = [6, 1], strides = [1, 1]} : vector<6x25xf32> to vector<6x1xf32>
    %123 = vector.extract_strided_slice %2 {offsets = [0, 115], sizes = [6, 1452], strides = [1, 1]} : vector<6x1568xf32> to vector<6x1452xf32>
    %124 = vector.broadcast %122 : vector<6x1xf32> to vector<6x1452xf32>
    %125 = arith.mulf %124, %123 : vector<6x1452xf32>
    %126 = arith.addf %121, %125 : vector<6x1452xf32>
    %127 = vector.extract_strided_slice %3 {offsets = [0, 24], sizes = [6, 1], strides = [1, 1]} : vector<6x25xf32> to vector<6x1xf32>
    %128 = vector.extract_strided_slice %2 {offsets = [0, 116], sizes = [6, 1452], strides = [1, 1]} : vector<6x1568xf32> to vector<6x1452xf32>
    %129 = vector.broadcast %127 : vector<6x1xf32> to vector<6x1452xf32>
    %130 = arith.mulf %129, %128 : vector<6x1452xf32>
    %131 = arith.addf %126, %130 : vector<6x1452xf32>
    %cst = arith.constant 0.000000e+00 : f32
    %132 = vector.broadcast %cst : f32 to vector<6x1452xf32>
    %133 = arith.maximumf %131, %132 : vector<6x1452xf32>
    %134 = vector.extract_strided_slice %133 {offsets = [0, 0], sizes = [6, 1451], strides = [1, 1]} : vector<6x1452xf32> to vector<6x1451xf32>
    %135 = vector.extract_strided_slice %133 {offsets = [0, 1], sizes = [6, 1451], strides = [1, 1]} : vector<6x1452xf32> to vector<6x1451xf32>
    %136 = arith.maximumf %134, %135 : vector<6x1451xf32>
    %137 = vector.extract_strided_slice %136 {offsets = [0, 0], sizes = [6, 1423], strides = [1, 1]} : vector<6x1451xf32> to vector<6x1423xf32>
    %138 = vector.extract_strided_slice %136 {offsets = [0, 28], sizes = [6, 1423], strides = [1, 1]} : vector<6x1451xf32> to vector<6x1423xf32>
    %139 = arith.maximumf %137, %138 : vector<6x1423xf32>
    %140 = tpu.iota {dimensions = array<i32: 0>} : vector<639x144xi32>
    %c0_5 = arith.constant 0 : index
    %c0_6 = arith.constant 0 : index
    %141 = vector.load %arg5[%c0_5, %c0_6] : memref<1x144xi32, #tpu.memory_space<vmem>>, vector<1x144xi32>
    %142 = vector.broadcast %141 : vector<1x144xi32> to vector<639x144xi32>
    %143 = arith.cmpi eq, %140, %142 : vector<639x144xi32>
    %144 = arith.extui %143 : vector<639x144xi1> to vector<639x144xi32>
    %145 = arith.sitofp %144 : vector<639x144xi32> to vector<639x144xf32>
    %146 = vector.extract_strided_slice %139 {offsets = [0, 0], sizes = [6, 639], strides = [1, 1]} : vector<6x1423xf32> to vector<6x639xf32>
    %cst_7 = arith.constant dense<0.000000e+00> : vector<6x144xf32>
    %147 = tpu.matmul %146, %145, %cst_7 {dimension_numbers = #tpu.dot_dimension_numbers<[1], [0], [0], [1], [0, 0, 1, 1], [], []>} : vector<6x639xf32>, vector<639x144xf32>, vector<6x144xf32> -> vector<6x144xf32>
    %148 = vector.extract_strided_slice %139 {offsets = [0, 784], sizes = [6, 639], strides = [1, 1]} : vector<6x1423xf32> to vector<6x639xf32>
    %cst_8 = arith.constant dense<0.000000e+00> : vector<6x144xf32>
    %149 = tpu.matmul %148, %145, %cst_8 {dimension_numbers = #tpu.dot_dimension_numbers<[1], [0], [0], [1], [0, 0, 1, 1], [], []>} : vector<6x639xf32>, vector<639x144xf32>, vector<6x144xf32> -> vector<6x144xf32>
    %150 = tpu.concatenate %147, %149 in 1 : vector<6x144xf32>, vector<6x144xf32> -> vector<6x288xf32>
    %c0_9 = arith.constant 0 : index
    %c0_10 = arith.constant 0 : index
    %c0_11 = arith.constant 0 : index
    %151 = vector.load %arg3[%c0_9, %c0_10, %c0_11] : memref<25x16x6xf32, #tpu.memory_space<vmem>>, vector<25x16x6xf32>
    %c0_12 = arith.constant 0 : index
    %c0_13 = arith.constant 0 : index
    %152 = vector.load %arg4[%c0_12, %c0_13] : memref<16x1xf32, #tpu.memory_space<vmem>>, vector<16x1xf32>
    %153 = vector.shape_cast %152 : vector<16x1xf32> to vector<16x1xf32>
    %154 = vector.broadcast %153 : vector<16x1xf32> to vector<16x236xf32>
    %155 = vector.extract_strided_slice %151 {offsets = [0, 0, 0], sizes = [1, 16, 6], strides = [1, 1, 1]} : vector<25x16x6xf32> to vector<1x16x6xf32>
    %156 = vector.shape_cast %155 : vector<1x16x6xf32> to vector<16x6xf32>
    %157 = vector.extract_strided_slice %150 {offsets = [0, 0], sizes = [6, 236], strides = [1, 1]} : vector<6x288xf32> to vector<6x236xf32>
    %cst_14 = arith.constant dense<0.000000e+00> : vector<16x236xf32>
    %158 = tpu.matmul %156, %157, %cst_14 {dimension_numbers = #tpu.dot_dimension_numbers<[1], [0], [0], [1], [0, 0, 1, 1], [], []>} : vector<16x6xf32>, vector<6x236xf32>, vector<16x236xf32> -> vector<16x236xf32>
    %159 = arith.addf %154, %158 : vector<16x236xf32>
    %160 = vector.extract_strided_slice %151 {offsets = [1, 0, 0], sizes = [1, 16, 6], strides = [1, 1, 1]} : vector<25x16x6xf32> to vector<1x16x6xf32>
    %161 = vector.shape_cast %160 : vector<1x16x6xf32> to vector<16x6xf32>
    %162 = vector.extract_strided_slice %150 {offsets = [0, 1], sizes = [6, 236], strides = [1, 1]} : vector<6x288xf32> to vector<6x236xf32>
    %cst_15 = arith.constant dense<0.000000e+00> : vector<16x236xf32>
    %163 = tpu.matmul %161, %162, %cst_15 {dimension_numbers = #tpu.dot_dimension_numbers<[1], [0], [0], [1], [0, 0, 1, 1], [], []>} : vector<16x6xf32>, vector<6x236xf32>, vector<16x236xf32> -> vector<16x236xf32>
    %164 = arith.addf %159, %163 : vector<16x236xf32>
    %165 = vector.extract_strided_slice %151 {offsets = [2, 0, 0], sizes = [1, 16, 6], strides = [1, 1, 1]} : vector<25x16x6xf32> to vector<1x16x6xf32>
    %166 = vector.shape_cast %165 : vector<1x16x6xf32> to vector<16x6xf32>
    %167 = vector.extract_strided_slice %150 {offsets = [0, 2], sizes = [6, 236], strides = [1, 1]} : vector<6x288xf32> to vector<6x236xf32>
    %cst_16 = arith.constant dense<0.000000e+00> : vector<16x236xf32>
    %168 = tpu.matmul %166, %167, %cst_16 {dimension_numbers = #tpu.dot_dimension_numbers<[1], [0], [0], [1], [0, 0, 1, 1], [], []>} : vector<16x6xf32>, vector<6x236xf32>, vector<16x236xf32> -> vector<16x236xf32>
    %169 = arith.addf %164, %168 : vector<16x236xf32>
    %170 = vector.extract_strided_slice %151 {offsets = [3, 0, 0], sizes = [1, 16, 6], strides = [1, 1, 1]} : vector<25x16x6xf32> to vector<1x16x6xf32>
    %171 = vector.shape_cast %170 : vector<1x16x6xf32> to vector<16x6xf32>
    %172 = vector.extract_strided_slice %150 {offsets = [0, 3], sizes = [6, 236], strides = [1, 1]} : vector<6x288xf32> to vector<6x236xf32>
    %cst_17 = arith.constant dense<0.000000e+00> : vector<16x236xf32>
    %173 = tpu.matmul %171, %172, %cst_17 {dimension_numbers = #tpu.dot_dimension_numbers<[1], [0], [0], [1], [0, 0, 1, 1], [], []>} : vector<16x6xf32>, vector<6x236xf32>, vector<16x236xf32> -> vector<16x236xf32>
    %174 = arith.addf %169, %173 : vector<16x236xf32>
    %175 = vector.extract_strided_slice %151 {offsets = [4, 0, 0], sizes = [1, 16, 6], strides = [1, 1, 1]} : vector<25x16x6xf32> to vector<1x16x6xf32>
    %176 = vector.shape_cast %175 : vector<1x16x6xf32> to vector<16x6xf32>
    %177 = vector.extract_strided_slice %150 {offsets = [0, 4], sizes = [6, 236], strides = [1, 1]} : vector<6x288xf32> to vector<6x236xf32>
    %cst_18 = arith.constant dense<0.000000e+00> : vector<16x236xf32>
    %178 = tpu.matmul %176, %177, %cst_18 {dimension_numbers = #tpu.dot_dimension_numbers<[1], [0], [0], [1], [0, 0, 1, 1], [], []>} : vector<16x6xf32>, vector<6x236xf32>, vector<16x236xf32> -> vector<16x236xf32>
    %179 = arith.addf %174, %178 : vector<16x236xf32>
    %180 = vector.extract_strided_slice %151 {offsets = [5, 0, 0], sizes = [1, 16, 6], strides = [1, 1, 1]} : vector<25x16x6xf32> to vector<1x16x6xf32>
    %181 = vector.shape_cast %180 : vector<1x16x6xf32> to vector<16x6xf32>
    %182 = vector.extract_strided_slice %150 {offsets = [0, 12], sizes = [6, 236], strides = [1, 1]} : vector<6x288xf32> to vector<6x236xf32>
    %cst_19 = arith.constant dense<0.000000e+00> : vector<16x236xf32>
    %183 = tpu.matmul %181, %182, %cst_19 {dimension_numbers = #tpu.dot_dimension_numbers<[1], [0], [0], [1], [0, 0, 1, 1], [], []>} : vector<16x6xf32>, vector<6x236xf32>, vector<16x236xf32> -> vector<16x236xf32>
    %184 = arith.addf %179, %183 : vector<16x236xf32>
    %185 = vector.extract_strided_slice %151 {offsets = [6, 0, 0], sizes = [1, 16, 6], strides = [1, 1, 1]} : vector<25x16x6xf32> to vector<1x16x6xf32>
    %186 = vector.shape_cast %185 : vector<1x16x6xf32> to vector<16x6xf32>
    %187 = vector.extract_strided_slice %150 {offsets = [0, 13], sizes = [6, 236], strides = [1, 1]} : vector<6x288xf32> to vector<6x236xf32>
    %cst_20 = arith.constant dense<0.000000e+00> : vector<16x236xf32>
    %188 = tpu.matmul %186, %187, %cst_20 {dimension_numbers = #tpu.dot_dimension_numbers<[1], [0], [0], [1], [0, 0, 1, 1], [], []>} : vector<16x6xf32>, vector<6x236xf32>, vector<16x236xf32> -> vector<16x236xf32>
    %189 = arith.addf %184, %188 : vector<16x236xf32>
    %190 = vector.extract_strided_slice %151 {offsets = [7, 0, 0], sizes = [1, 16, 6], strides = [1, 1, 1]} : vector<25x16x6xf32> to vector<1x16x6xf32>
    %191 = vector.shape_cast %190 : vector<1x16x6xf32> to vector<16x6xf32>
    %192 = vector.extract_strided_slice %150 {offsets = [0, 14], sizes = [6, 236], strides = [1, 1]} : vector<6x288xf32> to vector<6x236xf32>
    %cst_21 = arith.constant dense<0.000000e+00> : vector<16x236xf32>
    %193 = tpu.matmul %191, %192, %cst_21 {dimension_numbers = #tpu.dot_dimension_numbers<[1], [0], [0], [1], [0, 0, 1, 1], [], []>} : vector<16x6xf32>, vector<6x236xf32>, vector<16x236xf32> -> vector<16x236xf32>
    %194 = arith.addf %189, %193 : vector<16x236xf32>
    %195 = vector.extract_strided_slice %151 {offsets = [8, 0, 0], sizes = [1, 16, 6], strides = [1, 1, 1]} : vector<25x16x6xf32> to vector<1x16x6xf32>
    %196 = vector.shape_cast %195 : vector<1x16x6xf32> to vector<16x6xf32>
    %197 = vector.extract_strided_slice %150 {offsets = [0, 15], sizes = [6, 236], strides = [1, 1]} : vector<6x288xf32> to vector<6x236xf32>
    %cst_22 = arith.constant dense<0.000000e+00> : vector<16x236xf32>
    %198 = tpu.matmul %196, %197, %cst_22 {dimension_numbers = #tpu.dot_dimension_numbers<[1], [0], [0], [1], [0, 0, 1, 1], [], []>} : vector<16x6xf32>, vector<6x236xf32>, vector<16x236xf32> -> vector<16x236xf32>
    %199 = arith.addf %194, %198 : vector<16x236xf32>
    %200 = vector.extract_strided_slice %151 {offsets = [9, 0, 0], sizes = [1, 16, 6], strides = [1, 1, 1]} : vector<25x16x6xf32> to vector<1x16x6xf32>
    %201 = vector.shape_cast %200 : vector<1x16x6xf32> to vector<16x6xf32>
    %202 = vector.extract_strided_slice %150 {offsets = [0, 16], sizes = [6, 236], strides = [1, 1]} : vector<6x288xf32> to vector<6x236xf32>
    %cst_23 = arith.constant dense<0.000000e+00> : vector<16x236xf32>
    %203 = tpu.matmul %201, %202, %cst_23 {dimension_numbers = #tpu.dot_dimension_numbers<[1], [0], [0], [1], [0, 0, 1, 1], [], []>} : vector<16x6xf32>, vector<6x236xf32>, vector<16x236xf32> -> vector<16x236xf32>
    %204 = arith.addf %199, %203 : vector<16x236xf32>
    %205 = vector.extract_strided_slice %151 {offsets = [10, 0, 0], sizes = [1, 16, 6], strides = [1, 1, 1]} : vector<25x16x6xf32> to vector<1x16x6xf32>
    %206 = vector.shape_cast %205 : vector<1x16x6xf32> to vector<16x6xf32>
    %207 = vector.extract_strided_slice %150 {offsets = [0, 24], sizes = [6, 236], strides = [1, 1]} : vector<6x288xf32> to vector<6x236xf32>
    %cst_24 = arith.constant dense<0.000000e+00> : vector<16x236xf32>
    %208 = tpu.matmul %206, %207, %cst_24 {dimension_numbers = #tpu.dot_dimension_numbers<[1], [0], [0], [1], [0, 0, 1, 1], [], []>} : vector<16x6xf32>, vector<6x236xf32>, vector<16x236xf32> -> vector<16x236xf32>
    %209 = arith.addf %204, %208 : vector<16x236xf32>
    %210 = vector.extract_strided_slice %151 {offsets = [11, 0, 0], sizes = [1, 16, 6], strides = [1, 1, 1]} : vector<25x16x6xf32> to vector<1x16x6xf32>
    %211 = vector.shape_cast %210 : vector<1x16x6xf32> to vector<16x6xf32>
    %212 = vector.extract_strided_slice %150 {offsets = [0, 25], sizes = [6, 236], strides = [1, 1]} : vector<6x288xf32> to vector<6x236xf32>
    %cst_25 = arith.constant dense<0.000000e+00> : vector<16x236xf32>
    %213 = tpu.matmul %211, %212, %cst_25 {dimension_numbers = #tpu.dot_dimension_numbers<[1], [0], [0], [1], [0, 0, 1, 1], [], []>} : vector<16x6xf32>, vector<6x236xf32>, vector<16x236xf32> -> vector<16x236xf32>
    %214 = arith.addf %209, %213 : vector<16x236xf32>
    %215 = vector.extract_strided_slice %151 {offsets = [12, 0, 0], sizes = [1, 16, 6], strides = [1, 1, 1]} : vector<25x16x6xf32> to vector<1x16x6xf32>
    %216 = vector.shape_cast %215 : vector<1x16x6xf32> to vector<16x6xf32>
    %217 = vector.extract_strided_slice %150 {offsets = [0, 26], sizes = [6, 236], strides = [1, 1]} : vector<6x288xf32> to vector<6x236xf32>
    %cst_26 = arith.constant dense<0.000000e+00> : vector<16x236xf32>
    %218 = tpu.matmul %216, %217, %cst_26 {dimension_numbers = #tpu.dot_dimension_numbers<[1], [0], [0], [1], [0, 0, 1, 1], [], []>} : vector<16x6xf32>, vector<6x236xf32>, vector<16x236xf32> -> vector<16x236xf32>
    %219 = arith.addf %214, %218 : vector<16x236xf32>
    %220 = vector.extract_strided_slice %151 {offsets = [13, 0, 0], sizes = [1, 16, 6], strides = [1, 1, 1]} : vector<25x16x6xf32> to vector<1x16x6xf32>
    %221 = vector.shape_cast %220 : vector<1x16x6xf32> to vector<16x6xf32>
    %222 = vector.extract_strided_slice %150 {offsets = [0, 27], sizes = [6, 236], strides = [1, 1]} : vector<6x288xf32> to vector<6x236xf32>
    %cst_27 = arith.constant dense<0.000000e+00> : vector<16x236xf32>
    %223 = tpu.matmul %221, %222, %cst_27 {dimension_numbers = #tpu.dot_dimension_numbers<[1], [0], [0], [1], [0, 0, 1, 1], [], []>} : vector<16x6xf32>, vector<6x236xf32>, vector<16x236xf32> -> vector<16x236xf32>
    %224 = arith.addf %219, %223 : vector<16x236xf32>
    %225 = vector.extract_strided_slice %151 {offsets = [14, 0, 0], sizes = [1, 16, 6], strides = [1, 1, 1]} : vector<25x16x6xf32> to vector<1x16x6xf32>
    %226 = vector.shape_cast %225 : vector<1x16x6xf32> to vector<16x6xf32>
    %227 = vector.extract_strided_slice %150 {offsets = [0, 28], sizes = [6, 236], strides = [1, 1]} : vector<6x288xf32> to vector<6x236xf32>
    %cst_28 = arith.constant dense<0.000000e+00> : vector<16x236xf32>
    %228 = tpu.matmul %226, %227, %cst_28 {dimension_numbers = #tpu.dot_dimension_numbers<[1], [0], [0], [1], [0, 0, 1, 1], [], []>} : vector<16x6xf32>, vector<6x236xf32>, vector<16x236xf32> -> vector<16x236xf32>
    %229 = arith.addf %224, %228 : vector<16x236xf32>
    %230 = vector.extract_strided_slice %151 {offsets = [15, 0, 0], sizes = [1, 16, 6], strides = [1, 1, 1]} : vector<25x16x6xf32> to vector<1x16x6xf32>
    %231 = vector.shape_cast %230 : vector<1x16x6xf32> to vector<16x6xf32>
    %232 = vector.extract_strided_slice %150 {offsets = [0, 36], sizes = [6, 236], strides = [1, 1]} : vector<6x288xf32> to vector<6x236xf32>
    %cst_29 = arith.constant dense<0.000000e+00> : vector<16x236xf32>
    %233 = tpu.matmul %231, %232, %cst_29 {dimension_numbers = #tpu.dot_dimension_numbers<[1], [0], [0], [1], [0, 0, 1, 1], [], []>} : vector<16x6xf32>, vector<6x236xf32>, vector<16x236xf32> -> vector<16x236xf32>
    %234 = arith.addf %229, %233 : vector<16x236xf32>
    %235 = vector.extract_strided_slice %151 {offsets = [16, 0, 0], sizes = [1, 16, 6], strides = [1, 1, 1]} : vector<25x16x6xf32> to vector<1x16x6xf32>
    %236 = vector.shape_cast %235 : vector<1x16x6xf32> to vector<16x6xf32>
    %237 = vector.extract_strided_slice %150 {offsets = [0, 37], sizes = [6, 236], strides = [1, 1]} : vector<6x288xf32> to vector<6x236xf32>
    %cst_30 = arith.constant dense<0.000000e+00> : vector<16x236xf32>
    %238 = tpu.matmul %236, %237, %cst_30 {dimension_numbers = #tpu.dot_dimension_numbers<[1], [0], [0], [1], [0, 0, 1, 1], [], []>} : vector<16x6xf32>, vector<6x236xf32>, vector<16x236xf32> -> vector<16x236xf32>
    %239 = arith.addf %234, %238 : vector<16x236xf32>
    %240 = vector.extract_strided_slice %151 {offsets = [17, 0, 0], sizes = [1, 16, 6], strides = [1, 1, 1]} : vector<25x16x6xf32> to vector<1x16x6xf32>
    %241 = vector.shape_cast %240 : vector<1x16x6xf32> to vector<16x6xf32>
    %242 = vector.extract_strided_slice %150 {offsets = [0, 38], sizes = [6, 236], strides = [1, 1]} : vector<6x288xf32> to vector<6x236xf32>
    %cst_31 = arith.constant dense<0.000000e+00> : vector<16x236xf32>
    %243 = tpu.matmul %241, %242, %cst_31 {dimension_numbers = #tpu.dot_dimension_numbers<[1], [0], [0], [1], [0, 0, 1, 1], [], []>} : vector<16x6xf32>, vector<6x236xf32>, vector<16x236xf32> -> vector<16x236xf32>
    %244 = arith.addf %239, %243 : vector<16x236xf32>
    %245 = vector.extract_strided_slice %151 {offsets = [18, 0, 0], sizes = [1, 16, 6], strides = [1, 1, 1]} : vector<25x16x6xf32> to vector<1x16x6xf32>
    %246 = vector.shape_cast %245 : vector<1x16x6xf32> to vector<16x6xf32>
    %247 = vector.extract_strided_slice %150 {offsets = [0, 39], sizes = [6, 236], strides = [1, 1]} : vector<6x288xf32> to vector<6x236xf32>
    %cst_32 = arith.constant dense<0.000000e+00> : vector<16x236xf32>
    %248 = tpu.matmul %246, %247, %cst_32 {dimension_numbers = #tpu.dot_dimension_numbers<[1], [0], [0], [1], [0, 0, 1, 1], [], []>} : vector<16x6xf32>, vector<6x236xf32>, vector<16x236xf32> -> vector<16x236xf32>
    %249 = arith.addf %244, %248 : vector<16x236xf32>
    %250 = vector.extract_strided_slice %151 {offsets = [19, 0, 0], sizes = [1, 16, 6], strides = [1, 1, 1]} : vector<25x16x6xf32> to vector<1x16x6xf32>
    %251 = vector.shape_cast %250 : vector<1x16x6xf32> to vector<16x6xf32>
    %252 = vector.extract_strided_slice %150 {offsets = [0, 40], sizes = [6, 236], strides = [1, 1]} : vector<6x288xf32> to vector<6x236xf32>
    %cst_33 = arith.constant dense<0.000000e+00> : vector<16x236xf32>
    %253 = tpu.matmul %251, %252, %cst_33 {dimension_numbers = #tpu.dot_dimension_numbers<[1], [0], [0], [1], [0, 0, 1, 1], [], []>} : vector<16x6xf32>, vector<6x236xf32>, vector<16x236xf32> -> vector<16x236xf32>
    %254 = arith.addf %249, %253 : vector<16x236xf32>
    %255 = vector.extract_strided_slice %151 {offsets = [20, 0, 0], sizes = [1, 16, 6], strides = [1, 1, 1]} : vector<25x16x6xf32> to vector<1x16x6xf32>
    %256 = vector.shape_cast %255 : vector<1x16x6xf32> to vector<16x6xf32>
    %257 = vector.extract_strided_slice %150 {offsets = [0, 48], sizes = [6, 236], strides = [1, 1]} : vector<6x288xf32> to vector<6x236xf32>
    %cst_34 = arith.constant dense<0.000000e+00> : vector<16x236xf32>
    %258 = tpu.matmul %256, %257, %cst_34 {dimension_numbers = #tpu.dot_dimension_numbers<[1], [0], [0], [1], [0, 0, 1, 1], [], []>} : vector<16x6xf32>, vector<6x236xf32>, vector<16x236xf32> -> vector<16x236xf32>
    %259 = arith.addf %254, %258 : vector<16x236xf32>
    %260 = vector.extract_strided_slice %151 {offsets = [21, 0, 0], sizes = [1, 16, 6], strides = [1, 1, 1]} : vector<25x16x6xf32> to vector<1x16x6xf32>
    %261 = vector.shape_cast %260 : vector<1x16x6xf32> to vector<16x6xf32>
    %262 = vector.extract_strided_slice %150 {offsets = [0, 49], sizes = [6, 236], strides = [1, 1]} : vector<6x288xf32> to vector<6x236xf32>
    %cst_35 = arith.constant dense<0.000000e+00> : vector<16x236xf32>
    %263 = tpu.matmul %261, %262, %cst_35 {dimension_numbers = #tpu.dot_dimension_numbers<[1], [0], [0], [1], [0, 0, 1, 1], [], []>} : vector<16x6xf32>, vector<6x236xf32>, vector<16x236xf32> -> vector<16x236xf32>
    %264 = arith.addf %259, %263 : vector<16x236xf32>
    %265 = vector.extract_strided_slice %151 {offsets = [22, 0, 0], sizes = [1, 16, 6], strides = [1, 1, 1]} : vector<25x16x6xf32> to vector<1x16x6xf32>
    %266 = vector.shape_cast %265 : vector<1x16x6xf32> to vector<16x6xf32>
    %267 = vector.extract_strided_slice %150 {offsets = [0, 50], sizes = [6, 236], strides = [1, 1]} : vector<6x288xf32> to vector<6x236xf32>
    %cst_36 = arith.constant dense<0.000000e+00> : vector<16x236xf32>
    %268 = tpu.matmul %266, %267, %cst_36 {dimension_numbers = #tpu.dot_dimension_numbers<[1], [0], [0], [1], [0, 0, 1, 1], [], []>} : vector<16x6xf32>, vector<6x236xf32>, vector<16x236xf32> -> vector<16x236xf32>
    %269 = arith.addf %264, %268 : vector<16x236xf32>
    %270 = vector.extract_strided_slice %151 {offsets = [23, 0, 0], sizes = [1, 16, 6], strides = [1, 1, 1]} : vector<25x16x6xf32> to vector<1x16x6xf32>
    %271 = vector.shape_cast %270 : vector<1x16x6xf32> to vector<16x6xf32>
    %272 = vector.extract_strided_slice %150 {offsets = [0, 51], sizes = [6, 236], strides = [1, 1]} : vector<6x288xf32> to vector<6x236xf32>
    %cst_37 = arith.constant dense<0.000000e+00> : vector<16x236xf32>
    %273 = tpu.matmul %271, %272, %cst_37 {dimension_numbers = #tpu.dot_dimension_numbers<[1], [0], [0], [1], [0, 0, 1, 1], [], []>} : vector<16x6xf32>, vector<6x236xf32>, vector<16x236xf32> -> vector<16x236xf32>
    %274 = arith.addf %269, %273 : vector<16x236xf32>
    %275 = vector.extract_strided_slice %151 {offsets = [24, 0, 0], sizes = [1, 16, 6], strides = [1, 1, 1]} : vector<25x16x6xf32> to vector<1x16x6xf32>
    %276 = vector.shape_cast %275 : vector<1x16x6xf32> to vector<16x6xf32>
    %277 = vector.extract_strided_slice %150 {offsets = [0, 52], sizes = [6, 236], strides = [1, 1]} : vector<6x288xf32> to vector<6x236xf32>
    %cst_38 = arith.constant dense<0.000000e+00> : vector<16x236xf32>
    %278 = tpu.matmul %276, %277, %cst_38 {dimension_numbers = #tpu.dot_dimension_numbers<[1], [0], [0], [1], [0, 0, 1, 1], [], []>} : vector<16x6xf32>, vector<6x236xf32>, vector<16x236xf32> -> vector<16x236xf32>
    %279 = arith.addf %274, %278 : vector<16x236xf32>
    %cst_39 = arith.constant 0.000000e+00 : f32
    %280 = vector.broadcast %cst_39 : f32 to vector<16x236xf32>
    %281 = arith.maximumf %279, %280 : vector<16x236xf32>
    %282 = vector.extract_strided_slice %281 {offsets = [0, 0], sizes = [16, 235], strides = [1, 1]} : vector<16x236xf32> to vector<16x235xf32>
    %283 = vector.extract_strided_slice %281 {offsets = [0, 1], sizes = [16, 235], strides = [1, 1]} : vector<16x236xf32> to vector<16x235xf32>
    %284 = arith.maximumf %282, %283 : vector<16x235xf32>
    %285 = vector.extract_strided_slice %284 {offsets = [0, 0], sizes = [16, 223], strides = [1, 1]} : vector<16x235xf32> to vector<16x223xf32>
    %286 = vector.extract_strided_slice %284 {offsets = [0, 12], sizes = [16, 223], strides = [1, 1]} : vector<16x235xf32> to vector<16x223xf32>
    %287 = arith.maximumf %285, %286 : vector<16x223xf32>
    %288 = tpu.iota {dimensions = array<i32: 0>} : vector<223x32xi32>
    %c0_40 = arith.constant 0 : index
    %c0_41 = arith.constant 0 : index
    %289 = vector.load %arg6[%c0_40, %c0_41] : memref<1x32xi32, #tpu.memory_space<vmem>>, vector<1x32xi32>
    %290 = vector.broadcast %289 : vector<1x32xi32> to vector<223x32xi32>
    %291 = arith.cmpi eq, %288, %290 : vector<223x32xi32>
    %292 = arith.extui %291 : vector<223x32xi1> to vector<223x32xi32>
    %293 = arith.sitofp %292 : vector<223x32xi32> to vector<223x32xf32>
    %cst_42 = arith.constant dense<0.000000e+00> : vector<16x32xf32>
    %294 = tpu.matmul %287, %293, %cst_42 {dimension_numbers = #tpu.dot_dimension_numbers<[1], [0], [0], [1], [0, 0, 1, 1], [], []>} : vector<16x223xf32>, vector<223x32xf32>, vector<16x32xf32> -> vector<16x32xf32>
    %295 = vector.extract_strided_slice %294 {offsets = [0, 0], sizes = [16, 2], strides = [1, 1]} : vector<16x32xf32> to vector<16x2xf32>
    %296 = vector.extract_strided_slice %294 {offsets = [0, 2], sizes = [16, 2], strides = [1, 1]} : vector<16x32xf32> to vector<16x2xf32>
    %297 = vector.extract_strided_slice %294 {offsets = [0, 4], sizes = [16, 2], strides = [1, 1]} : vector<16x32xf32> to vector<16x2xf32>
    %298 = vector.extract_strided_slice %294 {offsets = [0, 6], sizes = [16, 2], strides = [1, 1]} : vector<16x32xf32> to vector<16x2xf32>
    %299 = vector.extract_strided_slice %294 {offsets = [0, 8], sizes = [16, 2], strides = [1, 1]} : vector<16x32xf32> to vector<16x2xf32>
    %300 = vector.extract_strided_slice %294 {offsets = [0, 10], sizes = [16, 2], strides = [1, 1]} : vector<16x32xf32> to vector<16x2xf32>
    %301 = vector.extract_strided_slice %294 {offsets = [0, 12], sizes = [16, 2], strides = [1, 1]} : vector<16x32xf32> to vector<16x2xf32>
    %302 = vector.extract_strided_slice %294 {offsets = [0, 14], sizes = [16, 2], strides = [1, 1]} : vector<16x32xf32> to vector<16x2xf32>
    %303 = vector.extract_strided_slice %294 {offsets = [0, 16], sizes = [16, 2], strides = [1, 1]} : vector<16x32xf32> to vector<16x2xf32>
    %304 = vector.extract_strided_slice %294 {offsets = [0, 18], sizes = [16, 2], strides = [1, 1]} : vector<16x32xf32> to vector<16x2xf32>
    %305 = vector.extract_strided_slice %294 {offsets = [0, 20], sizes = [16, 2], strides = [1, 1]} : vector<16x32xf32> to vector<16x2xf32>
    %306 = vector.extract_strided_slice %294 {offsets = [0, 22], sizes = [16, 2], strides = [1, 1]} : vector<16x32xf32> to vector<16x2xf32>
    %307 = vector.extract_strided_slice %294 {offsets = [0, 24], sizes = [16, 2], strides = [1, 1]} : vector<16x32xf32> to vector<16x2xf32>
    %308 = vector.extract_strided_slice %294 {offsets = [0, 26], sizes = [16, 2], strides = [1, 1]} : vector<16x32xf32> to vector<16x2xf32>
    %309 = vector.extract_strided_slice %294 {offsets = [0, 28], sizes = [16, 2], strides = [1, 1]} : vector<16x32xf32> to vector<16x2xf32>
    %310 = vector.extract_strided_slice %294 {offsets = [0, 30], sizes = [16, 2], strides = [1, 1]} : vector<16x32xf32> to vector<16x2xf32>
    %311 = tpu.concatenate %295, %296, %297, %298, %299, %300, %301, %302, %303, %304, %305, %306, %307, %308, %309, %310 in 0 : vector<16x2xf32>, vector<16x2xf32>, vector<16x2xf32>, vector<16x2xf32>, vector<16x2xf32>, vector<16x2xf32>, vector<16x2xf32>, vector<16x2xf32>, vector<16x2xf32>, vector<16x2xf32>, vector<16x2xf32>, vector<16x2xf32>, vector<16x2xf32>, vector<16x2xf32>, vector<16x2xf32>, vector<16x2xf32> -> vector<256x2xf32>
    %c0_43 = arith.constant 0 : index
    %c0_44 = arith.constant 0 : index
    %312 = vector.load %arg7[%c0_43, %c0_44] : memref<120x256xf32, #tpu.memory_space<vmem>>, vector<120x256xf32>
    %cst_45 = arith.constant dense<0.000000e+00> : vector<120x2xf32>
    %313 = tpu.matmul %312, %311, %cst_45 {dimension_numbers = #tpu.dot_dimension_numbers<[1], [0], [0], [1], [0, 0, 1, 1], [], []>} : vector<120x256xf32>, vector<256x2xf32>, vector<120x2xf32> -> vector<120x2xf32>
    %c0_46 = arith.constant 0 : index
    %c0_47 = arith.constant 0 : index
    %314 = vector.load %arg8[%c0_46, %c0_47] : memref<120x1xf32, #tpu.memory_space<vmem>>, vector<120x1xf32>
    %315 = vector.broadcast %314 : vector<120x1xf32> to vector<120x2xf32>
    %316 = arith.addf %313, %315 : vector<120x2xf32>
    %cst_48 = arith.constant 0.000000e+00 : f32
    %317 = vector.broadcast %cst_48 : f32 to vector<120x2xf32>
    %318 = arith.maximumf %316, %317 : vector<120x2xf32>
    %c0_49 = arith.constant 0 : index
    %c0_50 = arith.constant 0 : index
    %319 = vector.load %arg9[%c0_49, %c0_50] : memref<84x120xf32, #tpu.memory_space<vmem>>, vector<84x120xf32>
    %cst_51 = arith.constant dense<0.000000e+00> : vector<84x2xf32>
    %320 = tpu.matmul %319, %318, %cst_51 {dimension_numbers = #tpu.dot_dimension_numbers<[1], [0], [0], [1], [0, 0, 1, 1], [], []>} : vector<84x120xf32>, vector<120x2xf32>, vector<84x2xf32> -> vector<84x2xf32>
    %c0_52 = arith.constant 0 : index
    %c0_53 = arith.constant 0 : index
    %321 = vector.load %arg10[%c0_52, %c0_53] : memref<84x1xf32, #tpu.memory_space<vmem>>, vector<84x1xf32>
    %322 = vector.broadcast %321 : vector<84x1xf32> to vector<84x2xf32>
    %323 = arith.addf %320, %322 : vector<84x2xf32>
    %cst_54 = arith.constant 0.000000e+00 : f32
    %324 = vector.broadcast %cst_54 : f32 to vector<84x2xf32>
    %325 = arith.maximumf %323, %324 : vector<84x2xf32>
    %c0_55 = arith.constant 0 : index
    %c0_56 = arith.constant 0 : index
    %326 = vector.load %arg11[%c0_55, %c0_56] : memref<10x84xf32, #tpu.memory_space<vmem>>, vector<10x84xf32>
    %cst_57 = arith.constant dense<0.000000e+00> : vector<10x2xf32>
    %327 = tpu.matmul %326, %325, %cst_57 {dimension_numbers = #tpu.dot_dimension_numbers<[1], [0], [0], [1], [0, 0, 1, 1], [], []>} : vector<10x84xf32>, vector<84x2xf32>, vector<10x2xf32> -> vector<10x2xf32>
    %c0_58 = arith.constant 0 : index
    %c0_59 = arith.constant 0 : index
    %328 = vector.load %arg12[%c0_58, %c0_59] : memref<10x1xf32, #tpu.memory_space<vmem>>, vector<10x1xf32>
    %329 = vector.broadcast %328 : vector<10x1xf32> to vector<10x2xf32>
    %330 = arith.addf %327, %329 : vector<10x2xf32>
    %c0_60 = arith.constant 0 : index
    %c0_61 = arith.constant 0 : index
    %331 = vector.load %arg13[%c0_60, %c0_61] : memref<10x2xf32, #tpu.memory_space<vmem>>, vector<10x2xf32>
    tpu.vector_store %arg13[%c0_60, %c0_61], %330 {strides = array<i32>} : memref<10x2xf32, #tpu.memory_space<vmem>>, vector<10x2xf32>,
    return
  }
}

</mosaic_0001>

<bundles_post_ra>
// kernel: net_forward.1
= control target key start
LH: loop header
LB: loop body
LE: loop exit
PB: predicated region body
PF: predicated region fallthrough
CT: control target
= control target key end

     0   :  { %v8588_v0 = vmov 1   ;;  %v8589_v2 = vmov 3   ;;  %v8590_v3 = vmov 2   ;;  %v8591_v4 = vmov 4   ;;  %s8614_s15 = smov 126   ;;  %s8615_s16 = smov 125   ;;  %s13449_s1 = inlined_call_operand.vmem [shape: f32[6,25], index: 1, kind: input, shape index: {}]   ;;  %s13450_s0 = inlined_call_operand.vmem [shape: f32[1,1568], index: 0, kind: input, shape index: {}]   ;;  %s13451_s2 = inlined_call_operand.vmem [shape: f32[6,1], index: 2, kind: input, shape index: {}]   ;;  %s13452_s5 = inlined_call_operand.vmem [shape: s32[1,144], index: 5, kind: input, shape index: {}]   ;;  %s13453_s3 = inlined_call_operand.vmem [shape: f32[25,16,6], index: 3, kind: input, shape index: {}]   ;;  %s13454_s4 = inlined_call_operand.vmem [shape: f32[16,1], index: 4, kind: input, shape index: {}]   ;;  %s13455_s6 = inlined_call_operand.vmem [shape: s32[1,32], index: 6, kind: input, shape index: {}]   ;;  %s13456_s7 = inlined_call_operand.vmem [shape: f32[120,256], index: 7, kind: input, shape index: {}]   ;;  %s13457_s8 = inlined_call_operand.vmem [shape: f32[120,1], index: 8, kind: input, shape index: {}]   ;;  %s13458_s10 = inlined_call_operand.vmem [shape: f32[84,1], index: 10, kind: input, shape index: {}]   ;;  %s13459_s12 = inlined_call_operand.vmem [shape: f32[10,1], index: 12, kind: input, shape index: {}]   ;;  %s13460_s9 = inlined_call_operand.vmem [shape: f32[84,120], index: 9, kind: input, shape index: {}]   ;;  %s13461_s11 = inlined_call_operand.vmem [shape: f32[10,84], index: 11, kind: input, shape index: {}]   ;;  %s13462_s13 = inlined_call_operand.vmem [shape: f32[10,2], index: 13, kind: output, shape index: {}]  }
   0x1   :  { %8451 = vset.pattern.permute.xlu0 %v8588_v0  ;;  %v8740_v1 = vld [vmem:[%s13449_s1] sm:$0x3f]  ;;  %8453 = vset.pattern.permute.xlu1 %v8589_v2  ;;  %v55_v5 = vlaneseq  ;;  %v8592_v8 = vmov 5   ;;  %v8593_v9 = vmov 6   ;;  %v8594_v18 = vmov 7   ;;  %s13681_s17 = smov 124  }
   0x2   :  { %145 = vperm.xlu0 %8451, %v8740_v1   ;;  %321 = vperm.xlu1 %8453, %v8740_v1   ;;  %v8757_v11 = vld [vmem:[%s13450_s0] sm:$0xff]  ;;  %v8595_v19 = vmov 9   ;;  %v8596_v20 = vmov 8   ;;  %v8597_v21 = vmov 12   ;;  %v8598_v22 = vmov 10   ;;  %s8617_s18 = smov 100  }
   0x3   :  { %v8746_v6 = vshrl.u32 %v55_v5, 7  ;;  %v8599_v23 = vmov 15   ;;  %v8600_v24 = vmov 11   ;;  %v8601_v25 = vmov 18   ;;  %v47_v37 = vld [vmem:[%s13451_s2] sm:$0x3f] }
   0x4   :  { %v8602_v26 = vmov 13   ;;  %v8603_v27 = vmov 21   ;;  %v8604_v28 = vmov 14   ;;  %v8605_v29 = vmov 24   ;;  %v8807_v39 = vld [vmem:[%s13450_s0 + $0x8] sm:$0x1f] }
   0x5   :  { %13794 = vst [vmem:[#allocation2_spill] sm:$0xff] %v8746_v6  ;;  %v8749_v7 = vsub.s32 1, %v8746_v6  ;;  %v8752_v10 = vsub.s32 0, %v8746_v6  ;;  %v65_v12 = vsub.s32 2, %v8746_v6  ;;  %v69_v13 = vsub.s32 3, %v8746_v6  ;;  %s8613_s2 = smov 127  }
   0x6   :  { %8452 = vset.pattern.permute.xlu0 %v8590_v3  ;;  %8454 = vset.pattern.permute.xlu1 %v8591_v4  ;;  %v8606_v30 = vmov 16   ;;  %v8607_v31 = vmov 0   ;;  %v8608_v32 = vmov 17   ;;  %v8609_v33 = vmov 19   ;;  %s8618_s19 = smov 99   ;;  %s8619_s20 = smov 98  }
   0x7   :  { %233 = vperm.xlu0 %8452, %v8740_v1   ;;  %409 = vperm.xlu1 %8454, %v8740_v1   ;;  %13795 = vst [vmem:[#allocation3_spill] sm:$0xff] %v8749_v7  ;;  %13796 = vst [vmem:[#allocation4_spill] sm:$0xff] %v8752_v10  ;;  %v8765_v14 = vrot.slane %v8757_v11, %v8749_v7  ;;  %v8770_v15 = vrot.slane %v8757_v11, %v69_v13  ;;  %v8610_v34 = vmov 20   ;;  %v8611_v35 = vmov 22   ;;  %s8620_s21 = smov 97   ;;  %s13637_s22 = smov 96  }
   0x8   :  { %v8775_v16 = vrot.slane %v8757_v11, %v65_v12  ;;  %v8779_v17 = vrot.slane %v8757_v11, %v8752_v10  ;;  %v8612_v36 = vmov 23   ;;  %v85_v38 = vsub.s32 7, %v8746_v6  ;;  %s13643_s23 = smov 72   ;;  %s13548_s24 = smov 71  }
   0x9   :  { %13797 = vst [vmem:[#allocation5_spill] sm:$0xff] %v8765_v14  ;;  %13798 = vst [vmem:[#allocation6_spill] sm:$0xff] %v8770_v15  ;;  %v8811_v40 = vrot.slane %v8807_v39, %v8752_v10  ;;  %v81_v43 = vsub.s32 6, %v8746_v6  ;;  %v8826_v46 = vrot.slane %v8807_v39, %v65_v12  ;;  %v8830_v47 = vrot.slane %v8807_v39, %v8749_v7  ;;  %s13540_s25 = smov 70   ;;  %s13532_s26 = smov 69  }
   0xa   :  { %13799 = vst [vmem:[#allocation7_spill] sm:$0xff] %v8775_v16  ;;  %13800 = vst [vmem:[#allocation8_spill] sm:$0xff] %v8779_v17  ;;  %v8814_v41 = vrot.slane %v8757_v11, %v85_v38  ;;  %v8841_v50 = vrot.slane %v8807_v39, %v69_v13  ;;  %s13524_s1 = smov 68   ;;  %s13516_s27 = smov 44   ;;  %vm13703_vm0 = vcmask 1039360   ;;  %vm13710_vm1 = vcmask 1031168  }
   0xb   :  { %8455 = vset.pattern.permute.xlu1 %v8592_v8  ;;  %8456 = vset.pattern.permute.xlu0 %v8593_v9  ;;  %v8844_v51 = vrot.slane %v8757_v11, %v81_v43  ;;  %s8628_s28 = smov 43   ;;  %s8629_s29 = smov 42   ;;  %vm13749_vm2 = vcmask 1022976   ;;  %vm13728_vm3 = vcmask 1014784   ;;  %vm13751_vm4 = vcmask 818176  }
   0xc   :  { %497 = vperm.xlu1 %8455, %v8740_v1   ;;  %585 = vperm.xlu0 %8456, %v8740_v1   ;;  %13802 = vst [vmem:[#allocation10_spill] sm:$0xff] %v8841_v50  ;;  %s8630_s30 = smov 41   ;;  %s8631_s14 = smov 40   ;;  %vm636_vm5 = vcmask 809984   ;;  %vm13742_vm6 = vcmask 801792   ;;  %vm13613_vm7 = vcmask 793600  }
   0xd   :  { %vm13610_vm8 = vcmask 785408   ;;  %vm13604_vm9 = vcmask 588800   ;;  %vm13606_vm10 = vcmask 580608   ;;  %vm13607_vm11 = vcmask 572416  }
   0xe   :  { %vm13608_vm12 = vcmask 564224   ;;  %vm13609_vm13 = vcmask 556032   ;;  %vm13612_vm14 = vcmask 359424   ;;  %vm1525_vm15 = vcmask 351232  }
  0x10   :  { %8457 = vset.pattern.permute.xlu1 %v8594_v18  ;;  %8459 = vset.pattern.permute.xlu0 %v8595_v19 }
  0x11   :  { %673 = vperm.xlu1 %8457, %v8740_v1   ;;  %849 = vperm.xlu0 %8459, %v8740_v1  }
  0x15   :  { %8458 = vset.pattern.permute.xlu1 %v8596_v20  ;;  %8462 = vset.pattern.permute.xlu0 %v8597_v21 }
  0x16   :  { %761 = vperm.xlu1 %8458, %v8740_v1   ;;  %1113 = vperm.xlu0 %8462, %v8740_v1  }
  0x1a   :  { %8460 = vset.pattern.permute.xlu1 %v8598_v22  ;;  %8465 = vset.pattern.permute.xlu0 %v8599_v23 }
  0x1b   :  { %937 = vperm.xlu1 %8460, %v8740_v1   ;;  %1377 = vperm.xlu0 %8465, %v8740_v1  }
  0x1f   :  { %8461 = vset.pattern.permute.xlu1 %v8600_v24  ;;  %8468 = vset.pattern.permute.xlu0 %v8601_v25 }
  0x20   :  { %1025 = vperm.xlu1 %8461, %v8740_v1   ;;  %1656 = vperm.xlu0 %8468, %v8740_v1  }
  0x24   :  { %8463 = vset.pattern.permute.xlu1 %v8602_v26  ;;  %8471 = vset.pattern.permute.xlu0 %v8603_v27 }
  0x25   :  { %1201 = vperm.xlu1 %8463, %v8740_v1   ;;  %1935 = vperm.xlu0 %8471, %v8740_v1  }
  0x29   :  { %8464 = vset.pattern.permute.xlu1 %v8604_v28  ;;  %8474 = vset.pattern.permute.xlu0 %v8605_v29 }
  0x2a   :  { %1289 = vperm.xlu1 %8464, %v8740_v1   ;;  %2214 = vperm.xlu0 %8474, %v8740_v1  }
  0x2e   :  { %8466 = vset.pattern.permute.xlu1 %v8606_v30  ;;  %8511 = vset.pattern.permute.xlu0 %v8607_v31 }
  0x2f   :  { %1470 = vperm.xlu1 %8466, %v8740_v1  }
  0x33   :  { %8467 = vset.pattern.permute.xlu1 %v8608_v32 }
  0x34   :  { %1563 = vperm.xlu1 %8467, %v8740_v1  }
  0x38   :  { %8469 = vset.pattern.permute.xlu1 %v8609_v33 }
  0x39   :  { %1749 = vperm.xlu1 %8469, %v8740_v1  }
  0x3d   :  { %8470 = vset.pattern.permute.xlu1 %v8610_v34 }
  0x3e   :  { %1842 = vperm.xlu1 %8470, %v8740_v1  }
  0x42   :  { %8472 = vset.pattern.permute.xlu1 %v8611_v35 }
  0x43   :  { %2028 = vperm.xlu1 %8472, %v8740_v1  }
  0x47   :  { %8473 = vset.pattern.permute.xlu1 %v8612_v36 }
  0x48   :  { %2121 = vperm.xlu1 %8473, %v8740_v1  }
  0x4c   :  { %8475 = vset.pattern.permute.xlu1 %v8607_v31 }
  0x4d   :  { %117 = vperm.xlu1 %8475, %v8740_v1  }
  0x51   :  { %50 = vperm.xlu1 %8475, %v47_v37  }
  0x81   :  { %v8816_v42 = vpop.permute.xlu0 %145  ;;  %v8868_v59 = vpop.permute.xlu1 %321 }
  0x82   :  { %13801 = vst [vmem:[#allocation9_spill] sm:$0xff] %v8816_v42  ;;  %v156_v44 = vmul.f32 %v8816_v42, %v8811_v40  ;;  %v155_v45 = vmul.f32 %v8816_v42, %v8814_v41  ;;  %v158_v48 = vmul.f32 %v8816_v42, %v8826_v46  ;;  %v157_v49 = vmul.f32 %v8816_v42, %v8830_v47 }
  0x83   :  { %v159_v53 = vmul.f32 %v8816_v42, %v8841_v50  ;;  %v154_v54 = vmul.f32 %v8816_v42, %v8844_v51  ;;  %13804 = vst [vmem:[#allocation12_spill] sm:$0xff] %v8868_v59  ;;  %v331_v62 = vmul.f32 %v8868_v59, %v8814_v41  ;;  %v332_v63 = vmul.f32 %v8868_v59, %v8811_v40 }
  0x84   :  { %188 = vrot.lane.b32.xlu1 %v156_v44, %s8613_s2  ;;  %186 = vrot.lane.b32.xlu0 %v155_v45, %s8613_s2  ;;  %v333_v2 = vmul.f32 %v8868_v59, %v8830_v47  ;;  %v334_v3 = vmul.f32 %v8868_v59, %v8826_v46  ;;  %v335_v4 = vmul.f32 %v8868_v59, %v8841_v50 }
  0x85   :  { %v330_v5 = vmul.f32 %v8868_v59, %v8844_v51 }
  0x86   :  { %v8848_v52 = vpop.permute.xlu0 %233  ;;  %v8880_v0 = vpop.permute.xlu1 %409 }
  0x87   :  { %13803 = vst [vmem:[#allocation11_spill] sm:$0xff] %v8848_v52  ;;  %v243_v55 = vmul.f32 %v8848_v52, %v8814_v41  ;;  %v244_v56 = vmul.f32 %v8848_v52, %v8811_v40  ;;  %v245_v57 = vmul.f32 %v8848_v52, %v8830_v47  ;;  %v246_v58 = vmul.f32 %v8848_v52, %v8826_v46 }
  0x88   :  { %192 = vrot.lane.b32.xlu1 %v158_v48, %s8613_s2  ;;  %190 = vrot.lane.b32.xlu0 %v157_v49, %s8613_s2  ;;  %v247_v60 = vmul.f32 %v8848_v52, %v8841_v50  ;;  %v242_v61 = vmul.f32 %v8848_v52, %v8844_v51  ;;  %13805 = vst [vmem:[#allocation13_spill] sm:$0xff] %v8880_v0 }
  0x89   :  { %v419_v9 = vmul.f32 %v8880_v0, %v8814_v41  ;;  %v420_v11 = vmul.f32 %v8880_v0, %v8811_v40  ;;  %v421_v13 = vmul.f32 %v8880_v0, %v8830_v47  ;;  %v422_v18 = vmul.f32 %v8880_v0, %v8826_v46 }
  0x8a   :  { %v423_v19 = vmul.f32 %v8880_v0, %v8841_v50  ;;  %v418_v20 = vmul.f32 %v8880_v0, %v8844_v51 }
  0x8b   :  { %v8884_v1 = vpop.permute.xlu1 %497  ;;  %v8936_v27 = vpop.permute.xlu0 %585 }
  0x8c   :  { %194 = vrot.lane.b32.xlu0 %v159_v53, %s8613_s2  ;;  %184 = vrot.lane.b32.xlu1 %v154_v54, %s8613_s2  ;;  %13806 = vst [vmem:[#allocation14_spill] sm:$0xff] %v8884_v1  ;;  %v507_v22 = vmul.f32 %v8884_v1, %v8814_v41  ;;  %v508_v23 = vmul.f32 %v8884_v1, %v8811_v40  ;;  %13811 = vst [vmem:[#allocation19_spill] sm:$0xff] %v8936_v27 }
  0x8d   :  { %v509_v25 = vmul.f32 %v8884_v1, %v8830_v47  ;;  %v510_v26 = vmul.f32 %v8884_v1, %v8826_v46  ;;  %v511_v28 = vmul.f32 %v8884_v1, %v8841_v50  ;;  %v506_v29 = vmul.f32 %v8884_v1, %v8844_v51 }
  0x8e   :  { %v595_v31 = vmul.f32 %v8936_v27, %v8814_v41  ;;  %v596_v32 = vmul.f32 %v8936_v27, %v8811_v40  ;;  %v597_v34 = vmul.f32 %v8936_v27, %v8830_v47  ;;  %v598_v35 = vmul.f32 %v8936_v27, %v8826_v46 }
  0x8f   :  { %v599_v36 = vmul.f32 %v8936_v27, %v8841_v50  ;;  %v594_v37 = vmul.f32 %v8936_v27, %v8844_v51 }
  0x90   :  { %274 = vrot.lane.b32.xlu0 %v243_v55, %s8614_s15  ;;  %276 = vrot.lane.b32.xlu1 %v244_v56, %s8614_s15  ;;  %v8896_v8 = vpop.permute.xlu1 %673  ;;  %v8986_v55 = vpop.permute.xlu0 %849 }
  0x91   :  { %13807 = vst [vmem:[#allocation15_spill] sm:$0xff] %v8896_v8  ;;  %v683_v43 = vmul.f32 %v8896_v8, %v8814_v41  ;;  %v684_v44 = vmul.f32 %v8896_v8, %v8811_v40  ;;  %v685_v48 = vmul.f32 %v8896_v8, %v8830_v47  ;;  %v686_v49 = vmul.f32 %v8896_v8, %v8826_v46 }
  0x92   :  { %v687_v53 = vmul.f32 %v8896_v8, %v8841_v50  ;;  %v682_v54 = vmul.f32 %v8896_v8, %v8844_v51  ;;  %13816 = vst [vmem:[#allocation24_spill] sm:$0xff] %v8986_v55 }
  0x94   :  { %278 = vrot.lane.b32.xlu0 %v245_v57, %s8614_s15  ;;  %280 = vrot.lane.b32.xlu1 %v246_v58, %s8614_s15 }
  0x95   :  { %v8906_v12 = vpop.permute.xlu1 %761 }
  0x96   :  { %13808 = vst [vmem:[#allocation16_spill] sm:$0xff] %v8906_v12  ;;  %v771_v57 = vmul.f32 %v8906_v12, %v8814_v41  ;;  %v772_v58 = vmul.f32 %v8906_v12, %v8811_v40 }
  0x98   :  { %282 = vrot.lane.b32.xlu0 %v247_v60, %s8614_s15  ;;  %272 = vrot.lane.b32.xlu1 %v242_v61, %s8614_s15  ;;  %v8998_v60 = vpop.permute.xlu0 %1113 }
  0x99   :  { %13818 = vst [vmem:[#allocation26_spill] sm:$0xff] %v8998_v60 }
  0x9a   :  { %v8918_v21 = vpop.permute.xlu1 %937 }
  0x9b   :  { %13809 = vst [vmem:[#allocation17_spill] sm:$0xff] %v8918_v21 }
  0x9c   :  { %362 = vrot.lane.b32.xlu0 %v331_v62, %s8615_s16  ;;  %364 = vrot.lane.b32.xlu1 %v332_v63, %s8615_s16  ;;  %v773_v62 = vmul.f32 %v8906_v12, %v8830_v47  ;;  %v774_v63 = vmul.f32 %v8906_v12, %v8826_v46 }
  0x9f   :  { %v8928_v24 = vpop.permute.xlu1 %1025 }
  0xa0   :  { %366 = vrot.lane.b32.xlu0 %v333_v2, %s8615_s16  ;;  %368 = vrot.lane.b32.xlu1 %v334_v3, %s8615_s16  ;;  %13810 = vst [vmem:[#allocation18_spill] sm:$0xff] %v8928_v24  ;;  %v775_v2 = vmul.f32 %v8906_v12, %v8841_v50  ;;  %v770_v3 = vmul.f32 %v8906_v12, %v8844_v51 }
  0xa4   :  { %370 = vrot.lane.b32.xlu0 %v335_v4, %s8615_s16  ;;  %360 = vrot.lane.b32.xlu1 %v330_v5, %s8615_s16  ;;  %v8942_v30 = vpop.permute.xlu1 %1201  ;;  %v9012_v4 = vpop.permute.xlu0 %1377 }
  0xa5   :  { %13812 = vst [vmem:[#allocation20_spill] sm:$0xff] %v8942_v30  ;;  %13820 = vst [vmem:[#allocation28_spill] sm:$0xff] %v9012_v4  ;;  %v1390_v8 = vmul.f32 %v9012_v4, %v8826_v46 }
  0xa8   :  { %450 = vrot.lane.b32.xlu0 %v419_v9, %s13681_s17  ;;  %452 = vrot.lane.b32.xlu1 %v420_v11, %s13681_s17  ;;  %v859_v9 = vmul.f32 %v8986_v55, %v8814_v41  ;;  %v860_v11 = vmul.f32 %v8986_v55, %v8811_v40 }
  0xa9   :  { %v8952_v33 = vpop.permute.xlu1 %1289 }
  0xaa   :  { %13813 = vst [vmem:[#allocation21_spill] sm:$0xff] %v8952_v33 }
  0xac   :  { %454 = vrot.lane.b32.xlu0 %v421_v13, %s13681_s17  ;;  %456 = vrot.lane.b32.xlu1 %v422_v18, %s13681_s17  ;;  %v9024_v13 = vpop.permute.xlu0 %1656 }
  0xad   :  { %13822 = vst [vmem:[#allocation30_spill] sm:$0xff] %v9024_v13 }
  0xae   :  { %v8964_v38 = vpop.permute.xlu1 %1470 }
  0xaf   :  { %13814 = vst [vmem:[#allocation22_spill] sm:$0xff] %v8964_v38  ;;  %v1483_v52 = vmul.f32 %v8964_v38, %v8826_v46 }
  0xb0   :  { %458 = vrot.lane.b32.xlu0 %v423_v19, %s13681_s17  ;;  %448 = vrot.lane.b32.xlu1 %v418_v20, %s13681_s17  ;;  %v861_v19 = vmul.f32 %v8986_v55, %v8830_v47  ;;  %v862_v20 = vmul.f32 %v8986_v55, %v8826_v46 }
  0xb3   :  { %v8974_v45 = vpop.permute.xlu1 %1563 }
  0xb4   :  { %538 = vrot.lane.b32.xlu0 %v507_v22, %s8617_s18  ;;  %540 = vrot.lane.b32.xlu1 %v508_v23, %s8617_s18  ;;  %13815 = vst [vmem:[#allocation23_spill] sm:$0xff] %v8974_v45  ;;  %v863_v22 = vmul.f32 %v8986_v55, %v8841_v50  ;;  %v858_v23 = vmul.f32 %v8986_v55, %v8844_v51 }
  0xb8   :  { %542 = vrot.lane.b32.xlu0 %v509_v25, %s8617_s18  ;;  %544 = vrot.lane.b32.xlu1 %v510_v26, %s8617_s18  ;;  %v8988_v56 = vpop.permute.xlu1 %1749  ;;  %v9038_v25 = vpop.permute.xlu0 %1935 }
  0xb9   :  { %13817 = vst [vmem:[#allocation25_spill] sm:$0xff] %v8988_v56  ;;  %13824 = vst [vmem:[#allocation32_spill] sm:$0xff] %v9038_v25 }
  0xbc   :  { %546 = vrot.lane.b32.xlu0 %v511_v28, %s8617_s18  ;;  %536 = vrot.lane.b32.xlu1 %v506_v29, %s8617_s18  ;;  %v947_v28 = vmul.f32 %v8918_v21, %v8814_v41  ;;  %v948_v29 = vmul.f32 %v8918_v21, %v8811_v40 }
  0xbd   :  { %v9000_v61 = vpop.permute.xlu1 %1842 }
  0xbe   :  { %13819 = vst [vmem:[#allocation27_spill] sm:$0xff] %v9000_v61 }
  0xc0   :  { %626 = vrot.lane.b32.xlu0 %v595_v31, %s8618_s19  ;;  %628 = vrot.lane.b32.xlu1 %v596_v32, %s8618_s19  ;;  %v9052_v32 = vpop.permute.xlu0 %2214 }
  0xc1   :  { %13827 = vst [vmem:[#allocation35_spill] sm:$0xff] %v9052_v32 }
  0xc2   :  { %v9014_v5 = vpop.permute.xlu1 %2028 }
  0xc3   :  { %13821 = vst [vmem:[#allocation29_spill] sm:$0xff] %v9014_v5 }
  0xc4   :  { %630 = vrot.lane.b32.xlu0 %v597_v34, %s8618_s19  ;;  %632 = vrot.lane.b32.xlu1 %v598_v35, %s8618_s19  ;;  %v949_v34 = vmul.f32 %v8918_v21, %v8830_v47  ;;  %v950_v35 = vmul.f32 %v8918_v21, %v8826_v46 }
  0xc7   :  { %v9026_v18 = vpop.permute.xlu1 %2121 }
  0xc8   :  { %634 = vrot.lane.b32.xlu0 %v599_v36, %s8618_s19  ;;  %624 = vrot.lane.b32.xlu1 %v594_v37, %s8618_s19  ;;  %13823 = vst [vmem:[#allocation31_spill] sm:$0xff] %v9026_v18 }
  0xcc   :  { %714 = vrot.lane.b32.xlu0 %v683_v43, %s8619_s20  ;;  %716 = vrot.lane.b32.xlu1 %v684_v44, %s8619_s20  ;;  %v9040_v26 = vpop.permute.xlu1 %117  ;;  %v951_v43 = vmul.f32 %v8918_v21, %v8841_v50  ;;  %v946_v44 = vmul.f32 %v8918_v21, %v8844_v51 }
  0xcd   :  { %13825 = vst [vmem:[#allocation33_spill] sm:$0xff] %v9040_v26 }
  0xd0   :  { %718 = vrot.lane.b32.xlu0 %v685_v48, %s8619_s20  ;;  %720 = vrot.lane.b32.xlu1 %v686_v49, %s8619_s20  ;;  %v9050_v31 = vpop.permute.xlu1 %50 }
  0xd1   :  { %13826 = vst [vmem:[#allocation34_spill] sm:$0xff] %v9050_v31 }
  0xd4   :  { %722 = vrot.lane.b32.xlu0 %v687_v53, %s8619_s20  ;;  %712 = vrot.lane.b32.xlu1 %v682_v54, %s8619_s20  ;;  %v1035_v53 = vmul.f32 %v8928_v24, %v8814_v41  ;;  %v1036_v54 = vmul.f32 %v8928_v24, %v8811_v40 }
  0xd8   :  { %802 = vrot.lane.b32.xlu0 %v771_v57, %s8620_s21  ;;  %804 = vrot.lane.b32.xlu1 %v772_v58, %s8620_s21 }
  0xdc   :  { %806 = vrot.lane.b32.xlu0 %v773_v62, %s8620_s21  ;;  %808 = vrot.lane.b32.xlu1 %v774_v63, %s8620_s21  ;;  %v1037_v62 = vmul.f32 %v8928_v24, %v8830_v47  ;;  %v1038_v63 = vmul.f32 %v8928_v24, %v8826_v46 }
  0xe0   :  { %810 = vrot.lane.b32.xlu0 %v775_v2, %s8620_s21  ;;  %800 = vrot.lane.b32.xlu1 %v770_v3, %s8620_s21 }
  0xe4   :  { %890 = vrot.lane.b32.xlu0 %v859_v9, %s13637_s22  ;;  %892 = vrot.lane.b32.xlu1 %v860_v11, %s13637_s22  ;;  %v1039_v9 = vmul.f32 %v8928_v24, %v8841_v50  ;;  %v1034_v11 = vmul.f32 %v8928_v24, %v8844_v51 }
  0xe8   :  { %894 = vrot.lane.b32.xlu0 %v861_v19, %s13637_s22  ;;  %896 = vrot.lane.b32.xlu1 %v862_v20, %s13637_s22 }
  0xec   :  { %898 = vrot.lane.b32.xlu0 %v863_v22, %s13637_s22  ;;  %888 = vrot.lane.b32.xlu1 %v858_v23, %s13637_s22  ;;  %v1123_v22 = vmul.f32 %v8998_v60, %v8814_v41  ;;  %v1124_v23 = vmul.f32 %v8998_v60, %v8811_v40 }
  0xf0   :  { %978 = vrot.lane.b32.xlu0 %v947_v28, %s13643_s23  ;;  %980 = vrot.lane.b32.xlu1 %v948_v29, %s13643_s23 }
  0xf4   :  { %982 = vrot.lane.b32.xlu0 %v949_v34, %s13643_s23  ;;  %984 = vrot.lane.b32.xlu1 %v950_v35, %s13643_s23  ;;  %v1125_v34 = vmul.f32 %v8998_v60, %v8830_v47  ;;  %v1126_v35 = vmul.f32 %v8998_v60, %v8826_v46 }
  0xf6   :  { %v9060_v36 = vpop.permute.xlu1 %188  ;;  %v9062_v37 = vpop.permute.xlu0 %186 }
  0xf8   :  { %986 = vrot.lane.b32.xlu0 %v951_v43, %s13643_s23  ;;  %976 = vrot.lane.b32.xlu1 %v946_v44, %s13643_s23 }
  0xfa   :  { %v9070_v48 = vpop.permute.xlu1 %192  ;;  %v9072_v49 = vpop.permute.xlu0 %190 }
  0xfc   :  { %1066 = vrot.lane.b32.xlu0 %v1035_v53, %s13548_s24  ;;  %1068 = vrot.lane.b32.xlu1 %v1036_v54, %s13548_s24  ;;  %v1127_v53 = vmul.f32 %v8998_v60, %v8841_v50  ;;  %v1122_v54 = vmul.f32 %v8998_v60, %v8844_v51  ;;  %v1302_v60 = vmul.f32 %v8952_v33, %v8826_v46 }
  0xfe   :  { %v9080_v57 = vpop.permute.xlu0 %194  ;;  %v9082_v58 = vpop.permute.xlu1 %184 }
  0xff   :  { %13828 = vst [vmem:[#allocation36_spill] sm:$0xff] %v9082_v58 }
 0x100   :  { %1070 = vrot.lane.b32.xlu0 %v1037_v62, %s13548_s24  ;;  %1072 = vrot.lane.b32.xlu1 %v1038_v63, %s13548_s24 }
 0x102   :  { %v9090_v2 = vpop.permute.xlu0 %274  ;;  %v9092_v3 = vpop.permute.xlu1 %276 }
 0x104   :  { %1074 = vrot.lane.b32.xlu0 %v1039_v9, %s13548_s24  ;;  %1064 = vrot.lane.b32.xlu1 %v1034_v11, %s13548_s24  ;;  %v1211_v9 = vmul.f32 %v8942_v30, %v8814_v41  ;;  %v1212_v11 = vmul.f32 %v8942_v30, %v8811_v40  ;;  %s13616_s24 = smov 12  }
 0x106   :  { %v9100_v19 = vpop.permute.xlu0 %278  ;;  %v9102_v20 = vpop.permute.xlu1 %280 }
 0x108   :  { %1154 = vrot.lane.b32.xlu0 %v1123_v22, %s13540_s25  ;;  %1156 = vrot.lane.b32.xlu1 %v1124_v23, %s13540_s25 }
 0x10a   :  { %v9110_v28 = vpop.permute.xlu0 %282  ;;  %v9112_v29 = vpop.permute.xlu1 %272 }
 0x10b   :  { %13829 = vst [vmem:[#allocation37_spill] sm:$0xff] %v9112_v29 }
 0x10c   :  { %1158 = vrot.lane.b32.xlu0 %v1125_v34, %s13540_s25  ;;  %1160 = vrot.lane.b32.xlu1 %v1126_v35, %s13540_s25  ;;  %v1213_v34 = vmul.f32 %v8942_v30, %v8830_v47  ;;  %v1214_v35 = vmul.f32 %v8942_v30, %v8826_v46 }
 0x10e   :  { %v9120_v43 = vpop.permute.xlu0 %362  ;;  %v9122_v44 = vpop.permute.xlu1 %364 }
 0x110   :  { %1162 = vrot.lane.b32.xlu0 %v1127_v53, %s13540_s25  ;;  %1152 = vrot.lane.b32.xlu1 %v1122_v54, %s13540_s25  ;;  %s13614_s25 = smov 13  }
 0x112   :  { %v9130_v62 = vpop.permute.xlu0 %366  ;;  %v9132_v63 = vpop.permute.xlu1 %368 }
 0x114   :  { %1242 = vrot.lane.b32.xlu0 %v1211_v9, %s13532_s26  ;;  %1244 = vrot.lane.b32.xlu1 %v1212_v11, %s13532_s26  ;;  %v1215_v9 = vmul.f32 %v8942_v30, %v8841_v50  ;;  %v1210_v11 = vmul.f32 %v8942_v30, %v8844_v51 }
 0x116   :  { %v9140_v22 = vpop.permute.xlu0 %370  ;;  %v9142_v23 = vpop.permute.xlu1 %360 }
 0x117   :  { %13830 = vst [vmem:[#allocation38_spill] sm:$0xff] %v9142_v23 }
 0x118   :  { %1246 = vrot.lane.b32.xlu0 %v1213_v34, %s13532_s26  ;;  %1248 = vrot.lane.b32.xlu1 %v1214_v35, %s13532_s26  ;;  %v1299_v34 = vmul.f32 %v8952_v33, %v8814_v41  ;;  %v1300_v35 = vmul.f32 %v8952_v33, %v8811_v40 }
 0x11a   :  { %v9150_v53 = vpop.permute.xlu0 %450  ;;  %v9152_v54 = vpop.permute.xlu1 %452 }
 0x11c   :  { %1250 = vrot.lane.b32.xlu0 %v1215_v9, %s13532_s26  ;;  %1240 = vrot.lane.b32.xlu1 %v1210_v11, %s13532_s26  ;;  %v1301_v11 = vmul.f32 %v8952_v33, %v8830_v47  ;;  %s13677_s26 = smov 14  }
 0x11e   :  { %v9160_v7 = vpop.permute.xlu0 %454  ;;  %v9162_v10 = vpop.permute.xlu1 %456 }
 0x120   :  { %1330 = vrot.lane.b32.xlu0 %v1299_v34, %s13524_s1  ;;  %1332 = vrot.lane.b32.xlu1 %v1300_v35, %s13524_s1  ;;  %v1303_v34 = vmul.f32 %v8952_v33, %v8841_v50  ;;  %v1298_v35 = vmul.f32 %v8952_v33, %v8844_v51 }
 0x122   :  { %v9170_v30 = vpop.permute.xlu0 %458  ;;  %v9172_v9 = vpop.permute.xlu1 %448 }
 0x123   :  { %13831 = vst [vmem:[#allocation39_spill] sm:$0xff] %v9172_v9 }
 0x124   :  { %1334 = vrot.lane.b32.xlu0 %v1301_v11, %s13524_s1  ;;  %1336 = vrot.lane.b32.xlu1 %v1302_v60, %s13524_s1  ;;  %v1387_v60 = vmul.f32 %v9012_v4, %v8814_v41  ;;  %v1388_v11 = vmul.f32 %v9012_v4, %v8811_v40 }
 0x126   :  { %v9180_v24 = vpop.permute.xlu0 %538  ;;  %v9182_v21 = vpop.permute.xlu1 %540 }
 0x128   :  { %1338 = vrot.lane.b32.xlu0 %v1303_v34, %s13524_s1  ;;  %1328 = vrot.lane.b32.xlu1 %v1298_v35, %s13524_s1  ;;  %v1389_v35 = vmul.f32 %v9012_v4, %v8830_v47  ;;  %s13674_s1 = smov 15  }
 0x12a   :  { %v9190_v55 = vpop.permute.xlu0 %542  ;;  %v9192_v12 = vpop.permute.xlu1 %544 }
 0x12c   :  { %1418 = vrot.lane.b32.xlu0 %v1387_v60, %s13516_s27  ;;  %1420 = vrot.lane.b32.xlu1 %v1388_v11, %s13516_s27  ;;  %v1391_v60 = vmul.f32 %v9012_v4, %v8841_v50  ;;  %v1386_v11 = vmul.f32 %v9012_v4, %v8844_v51 }
 0x12e   :  { %v9200_v33 = vpop.permute.xlu0 %546  ;;  %v9202_v34 = vpop.permute.xlu1 %536 }
 0x12f   :  { %13832 = vst [vmem:[#allocation40_spill] sm:$0xff] %v9202_v34 }
 0x130   :  { %1422 = vrot.lane.b32.xlu0 %v1389_v35, %s13516_s27  ;;  %1424 = vrot.lane.b32.xlu1 %v1390_v8, %s13516_s27  ;;  %v1480_v8 = vmul.f32 %v8964_v38, %v8814_v41  ;;  %v1481_v35 = vmul.f32 %v8964_v38, %v8811_v40 }
 0x132   :  { %v9210_v27 = vpop.permute.xlu0 %626  ;;  %v9212_v1 = vpop.permute.xlu1 %628 }
 0x134   :  { %1426 = vrot.lane.b32.xlu0 %v1391_v60, %s13516_s27  ;;  %1416 = vrot.lane.b32.xlu1 %v1386_v11, %s13516_s27  ;;  %v1482_v11 = vmul.f32 %v8964_v38, %v8830_v47  ;;  %s8632_s27 = smov 16  }
 0x136   :  { %v9220_v0 = vpop.permute.xlu0 %630  ;;  %v9222_v59 = vpop.permute.xlu1 %632 }
 0x138   :  { %1513 = vrot.lane.b32.xlu0 %v1480_v8, %s8628_s28  ;;  %1515 = vrot.lane.b32.xlu1 %v1481_v35, %s8628_s28  ;;  %v1484_v8 = vmul.f32 %v8964_v38, %v8841_v50  ;;  %v1479_v35 = vmul.f32 %v8964_v38, %v8844_v51 }
 0x13a   :  { %v9230_v4 = vpop.permute.xlu0 %634  ;;  %v9232_v60 = vpop.permute.xlu1 %624 }
 0x13b   :  { %13833 = vst [vmem:[#allocation41_spill] sm:$0xff] %v9232_v60 }
 0x13c   :  { %1517 = vrot.lane.b32.xlu0 %v1482_v11, %s8628_s28  ;;  %1519 = vrot.lane.b32.xlu1 %v1483_v52, %s8628_s28  ;;  %v1573_v52 = vmul.f32 %v8974_v45, %v8814_v41  ;;  %v1574_v11 = vmul.f32 %v8974_v45, %v8811_v40 }
 0x13e   :  { %v9240_v17 = vpop.permute.xlu0 %714  ;;  %v9242_v16 = vpop.permute.xlu1 %716 }
 0x13f   :  { %13834 = vst [vmem:[#allocation42_spill] sm:$0xff] %v9240_v17 }
 0x140   :  { %1521 = vrot.lane.b32.xlu0 %v1484_v8, %s8628_s28  ;;  %1511 = vrot.lane.b32.xlu1 %v1479_v35, %s8628_s28  ;;  %v1575_v35 = vmul.f32 %v8974_v45, %v8830_v47 }
 0x142   :  { %v9250_v15 = vpop.permute.xlu0 %718  ;;  %v9252_v42 = vpop.permute.xlu1 %720 }
 0x143   :  { %13835 = vst [vmem:[#allocation43_spill] sm:$0xff] %v9250_v15  ;;  %13836 = vst [vmem:[#allocation44_spill] sm:$0xff] %v9252_v42  ;;  %v1576_v42 = vmul.f32 %v8974_v45, %v8826_v46 }
 0x144   :  { %1606 = vrot.lane.b32.xlu0 %v1573_v52, %s8629_s29  ;;  %1608 = vrot.lane.b32.xlu1 %v1574_v11, %s8629_s29  ;;  %v1577_v52 = vmul.f32 %v8974_v45, %v8841_v50  ;;  %v1572_v11 = vmul.f32 %v8974_v45, %v8844_v51 }
 0x146   :  { %v9260_v14 = vpop.permute.xlu0 %722  ;;  %v9262_v8 = vpop.permute.xlu1 %712 }
 0x147   :  { %13837 = vst [vmem:[#allocation45_spill] sm:$0xff] %v9260_v14  ;;  %13838 = vst [vmem:[#allocation46_spill] sm:$0xff] %v9262_v8 }
 0x148   :  { %1610 = vrot.lane.b32.xlu0 %v1575_v35, %s8629_s29  ;;  %1612 = vrot.lane.b32.xlu1 %v1576_v42, %s8629_s29  ;;  %v1666_v42 = vmul.f32 %v9024_v13, %v8814_v41  ;;  %v1667_v35 = vmul.f32 %v9024_v13, %v8811_v40 }
 0x14a   :  { %v9270_v15 = vpop.permute.xlu0 %802  ;;  %v9272_v17 = vpop.permute.xlu1 %804 }
 0x14b   :  { %13839 = vst [vmem:[#allocation47_spill] sm:$0xff] %v9270_v15  ;;  %13840 = vst [vmem:[#allocation48_spill] sm:$0xff] %v9272_v17 }
 0x14c   :  { %1614 = vrot.lane.b32.xlu0 %v1577_v52, %s8629_s29  ;;  %1604 = vrot.lane.b32.xlu1 %v1572_v11, %s8629_s29  ;;  %v1668_v11 = vmul.f32 %v9024_v13, %v8830_v47 }
 0x14e   :  { %v9280_v8 = vpop.permute.xlu0 %806  ;;  %v9282_v14 = vpop.permute.xlu1 %808 }
 0x14f   :  { %13841 = vst [vmem:[#allocation49_spill] sm:$0xff] %v9280_v8  ;;  %13842 = vst [vmem:[#allocation50_spill] sm:$0xff] %v9282_v14  ;;  %v1669_v14 = vmul.f32 %v9024_v13, %v8826_v46 }
 0x150   :  { %1699 = vrot.lane.b32.xlu0 %v1666_v42, %s8630_s30  ;;  %1701 = vrot.lane.b32.xlu1 %v1667_v35, %s8630_s30  ;;  %v1670_v42 = vmul.f32 %v9024_v13, %v8841_v50  ;;  %v1665_v35 = vmul.f32 %v9024_v13, %v8844_v51 }
 0x152   :  { %v9290_v15 = vpop.permute.xlu0 %810  ;;  %v9292_v52 = vpop.permute.xlu1 %800 }
 0x153   :  { %13843 = vst [vmem:[#allocation51_spill] sm:$0xff] %v9290_v15  ;;  %13844 = vst [vmem:[#allocation52_spill] sm:$0xff] %v9292_v52 }
 0x154   :  { %1703 = vrot.lane.b32.xlu0 %v1668_v11, %s8630_s30  ;;  %1705 = vrot.lane.b32.xlu1 %v1669_v14, %s8630_s30  ;;  %v1759_v14 = vmul.f32 %v8988_v56, %v8814_v41  ;;  %v1760_v11 = vmul.f32 %v8988_v56, %v8811_v40 }
 0x156   :  { %v9300_v8 = vpop.permute.xlu0 %890  ;;  %v9302_v17 = vpop.permute.xlu1 %892 }
 0x157   :  { %13845 = vst [vmem:[#allocation53_spill] sm:$0xff] %v9300_v8  ;;  %13846 = vst [vmem:[#allocation54_spill] sm:$0xff] %v9302_v17 }
 0x158   :  { %1707 = vrot.lane.b32.xlu0 %v1670_v42, %s8630_s30  ;;  %1697 = vrot.lane.b32.xlu1 %v1665_v35, %s8630_s30  ;;  %v1761_v35 = vmul.f32 %v8988_v56, %v8830_v47 }
 0x15a   :  { %v9310_v52 = vpop.permute.xlu0 %894  ;;  %v9312_v15 = vpop.permute.xlu1 %896 }
 0x15b   :  { %13847 = vst [vmem:[#allocation55_spill] sm:$0xff] %v9310_v52  ;;  %13848 = vst [vmem:[#allocation56_spill] sm:$0xff] %v9312_v15  ;;  %v1762_v15 = vmul.f32 %v8988_v56, %v8826_v46 }
 0x15c   :  { %1792 = vrot.lane.b32.xlu0 %v1759_v14, %s8631_s14  ;;  %1794 = vrot.lane.b32.xlu1 %v1760_v11, %s8631_s14  ;;  %v1763_v14 = vmul.f32 %v8988_v56, %v8841_v50  ;;  %v1758_v11 = vmul.f32 %v8988_v56, %v8844_v51 }
 0x15e   :  { %v9320_v8 = vpop.permute.xlu0 %898  ;;  %v9322_v42 = vpop.permute.xlu1 %888 }
 0x15f   :  { %13849 = vst [vmem:[#allocation57_spill] sm:$0xff] %v9320_v8  ;;  %13850 = vst [vmem:[#allocation58_spill] sm:$0xff] %v9322_v42 }
 0x160   :  { %1796 = vrot.lane.b32.xlu0 %v1761_v35, %s8631_s14  ;;  %1798 = vrot.lane.b32.xlu1 %v1762_v15, %s8631_s14  ;;  %v1852_v15 = vmul.f32 %v9000_v61, %v8814_v41  ;;  %v1853_v35 = vmul.f32 %v9000_v61, %v8811_v40 }
 0x162   :  { %v9330_v52 = vpop.permute.xlu0 %978  ;;  %v9332_v17 = vpop.permute.xlu1 %980 }
 0x163   :  { %13851 = vst [vmem:[#allocation59_spill] sm:$0xff] %v9330_v52  ;;  %13852 = vst [vmem:[#allocation60_spill] sm:$0xff] %v9332_v17 }
 0x164   :  { %1800 = vrot.lane.b32.xlu0 %v1763_v14, %s8631_s14  ;;  %1790 = vrot.lane.b32.xlu1 %v1758_v11, %s8631_s14  ;;  %v1854_v11 = vmul.f32 %v9000_v61, %v8830_v47 }
 0x166   :  { %v9340_v42 = vpop.permute.xlu0 %982  ;;  %v9342_v8 = vpop.permute.xlu1 %984 }
 0x167   :  { %13853 = vst [vmem:[#allocation61_spill] sm:$0xff] %v9340_v42  ;;  %13854 = vst [vmem:[#allocation62_spill] sm:$0xff] %v9342_v8  ;;  %v1855_v8 = vmul.f32 %v9000_v61, %v8826_v46 }
 0x168   :  { %1885 = vrot.lane.b32.xlu0 %v1852_v15, %s8632_s27  ;;  %1887 = vrot.lane.b32.xlu1 %v1853_v35, %s8632_s27  ;;  %v1856_v15 = vmul.f32 %v9000_v61, %v8841_v50  ;;  %v1851_v35 = vmul.f32 %v9000_v61, %v8844_v51 }
 0x16a   :  { %v9350_v52 = vpop.permute.xlu0 %986  ;;  %v9352_v14 = vpop.permute.xlu1 %976 }
 0x16b   :  { %13855 = vst [vmem:[#allocation63_spill] sm:$0xff] %v9350_v52  ;;  %13856 = vst [vmem:[#allocation64_spill] sm:$0xff] %v9352_v14 }
 0x16c   :  { %1889 = vrot.lane.b32.xlu0 %v1854_v11, %s8632_s27  ;;  %1891 = vrot.lane.b32.xlu1 %v1855_v8, %s8632_s27  ;;  %v1945_v8 = vmul.f32 %v9038_v25, %v8814_v41  ;;  %v1946_v11 = vmul.f32 %v9038_v25, %v8811_v40 }
 0x16e   :  { %v9360_v42 = vpop.permute.xlu0 %1066  ;;  %v9362_v17 = vpop.permute.xlu1 %1068 }
 0x16f   :  { %13857 = vst [vmem:[#allocation65_spill] sm:$0xff] %v9360_v42  ;;  %13858 = vst [vmem:[#allocation66_spill] sm:$0xff] %v9362_v17 }
 0x170   :  { %1893 = vrot.lane.b32.xlu0 %v1856_v15, %s8632_s27  ;;  %1883 = vrot.lane.b32.xlu1 %v1851_v35, %s8632_s27  ;;  %v1947_v35 = vmul.f32 %v9038_v25, %v8830_v47 }
 0x172   :  { %v9370_v14 = vpop.permute.xlu0 %1070  ;;  %v9372_v52 = vpop.permute.xlu1 %1072 }
 0x173   :  { %13859 = vst [vmem:[#allocation67_spill] sm:$0xff] %v9370_v14  ;;  %13860 = vst [vmem:[#allocation68_spill] sm:$0xff] %v9372_v52  ;;  %v1948_v52 = vmul.f32 %v9038_v25, %v8826_v46 }
 0x174   :  { %1978 = vrot.lane.b32.xlu0 %v1945_v8, %s13674_s1  ;;  %1980 = vrot.lane.b32.xlu1 %v1946_v11, %s13674_s1  ;;  %v1949_v8 = vmul.f32 %v9038_v25, %v8841_v50  ;;  %v1944_v11 = vmul.f32 %v9038_v25, %v8844_v51 }
 0x176   :  { %v9380_v42 = vpop.permute.xlu0 %1074  ;;  %v9382_v15 = vpop.permute.xlu1 %1064 }
 0x177   :  { %13861 = vst [vmem:[#allocation69_spill] sm:$0xff] %v9380_v42  ;;  %13862 = vst [vmem:[#allocation70_spill] sm:$0xff] %v9382_v15 }
 0x178   :  { %1982 = vrot.lane.b32.xlu0 %v1947_v35, %s13674_s1  ;;  %1984 = vrot.lane.b32.xlu1 %v1948_v52, %s13674_s1  ;;  %v2038_v52 = vmul.f32 %v9014_v5, %v8814_v41  ;;  %v2039_v35 = vmul.f32 %v9014_v5, %v8811_v40 }
 0x17a   :  { %v9390_v14 = vpop.permute.xlu0 %1154  ;;  %v9392_v17 = vpop.permute.xlu1 %1156 }
 0x17b   :  { %13863 = vst [vmem:[#allocation71_spill] sm:$0xff] %v9390_v14  ;;  %13864 = vst [vmem:[#allocation72_spill] sm:$0xff] %v9392_v17 }
 0x17c   :  { %1986 = vrot.lane.b32.xlu0 %v1949_v8, %s13674_s1  ;;  %1976 = vrot.lane.b32.xlu1 %v1944_v11, %s13674_s1  ;;  %v2040_v11 = vmul.f32 %v9014_v5, %v8830_v47 }
 0x17e   :  { %v9400_v15 = vpop.permute.xlu0 %1158  ;;  %v9402_v42 = vpop.permute.xlu1 %1160 }
 0x17f   :  { %13865 = vst [vmem:[#allocation73_spill] sm:$0xff] %v9400_v15  ;;  %13866 = vst [vmem:[#allocation74_spill] sm:$0xff] %v9402_v42  ;;  %v2041_v42 = vmul.f32 %v9014_v5, %v8826_v46 }
 0x180   :  { %2071 = vrot.lane.b32.xlu0 %v2038_v52, %s13677_s26  ;;  %2073 = vrot.lane.b32.xlu1 %v2039_v35, %s13677_s26  ;;  %v2042_v52 = vmul.f32 %v9014_v5, %v8841_v50  ;;  %v2037_v35 = vmul.f32 %v9014_v5, %v8844_v51 }
 0x182   :  { %v9410_v14 = vpop.permute.xlu0 %1162  ;;  %v9412_v8 = vpop.permute.xlu1 %1152 }
 0x183   :  { %13867 = vst [vmem:[#allocation75_spill] sm:$0xff] %v9410_v14  ;;  %13868 = vst [vmem:[#allocation76_spill] sm:$0xff] %v9412_v8 }
 0x184   :  { %2075 = vrot.lane.b32.xlu0 %v2040_v11, %s13677_s26  ;;  %2077 = vrot.lane.b32.xlu1 %v2041_v42, %s13677_s26  ;;  %v2131_v42 = vmul.f32 %v9026_v18, %v8814_v41  ;;  %v2132_v11 = vmul.f32 %v9026_v18, %v8811_v40 }
 0x186   :  { %v9420_v15 = vpop.permute.xlu0 %1242  ;;  %v9422_v17 = vpop.permute.xlu1 %1244 }
 0x187   :  { %13869 = vst [vmem:[#allocation77_spill] sm:$0xff] %v9420_v15  ;;  %13870 = vst [vmem:[#allocation78_spill] sm:$0xff] %v9422_v17 }
 0x188   :  { %2079 = vrot.lane.b32.xlu0 %v2042_v52, %s13677_s26  ;;  %2069 = vrot.lane.b32.xlu1 %v2037_v35, %s13677_s26  ;;  %v2133_v35 = vmul.f32 %v9026_v18, %v8830_v47 }
 0x18a   :  { %v9430_v8 = vpop.permute.xlu0 %1246  ;;  %v9432_v14 = vpop.permute.xlu1 %1248 }
 0x18b   :  { %13871 = vst [vmem:[#allocation79_spill] sm:$0xff] %v9430_v8  ;;  %13872 = vst [vmem:[#allocation80_spill] sm:$0xff] %v9432_v14  ;;  %v2134_v14 = vmul.f32 %v9026_v18, %v8826_v46 }
 0x18c   :  { %2164 = vrot.lane.b32.xlu0 %v2131_v42, %s13614_s25  ;;  %2166 = vrot.lane.b32.xlu1 %v2132_v11, %s13614_s25  ;;  %v2135_v42 = vmul.f32 %v9026_v18, %v8841_v50  ;;  %v2130_v11 = vmul.f32 %v9026_v18, %v8844_v51 }
 0x18e   :  { %v9440_v15 = vpop.permute.xlu0 %1250  ;;  %v9442_v52 = vpop.permute.xlu1 %1240 }
 0x18f   :  { %13873 = vst [vmem:[#allocation81_spill] sm:$0xff] %v9440_v15  ;;  %13874 = vst [vmem:[#allocation82_spill] sm:$0xff] %v9442_v52 }
 0x190   :  { %2168 = vrot.lane.b32.xlu0 %v2133_v35, %s13614_s25  ;;  %2170 = vrot.lane.b32.xlu1 %v2134_v14, %s13614_s25  ;;  %v2224_v14 = vmul.f32 %v9052_v32, %v8814_v41  ;;  %v2225_v35 = vmul.f32 %v9052_v32, %v8811_v40 }
 0x192   :  { %v9450_v8 = vpop.permute.xlu0 %1330  ;;  %v9452_v17 = vpop.permute.xlu1 %1332 }
 0x193   :  { %13875 = vst [vmem:[#allocation83_spill] sm:$0xff] %v9450_v8  ;;  %13876 = vst [vmem:[#allocation84_spill] sm:$0xff] %v9452_v17 }
 0x194   :  { %2172 = vrot.lane.b32.xlu0 %v2135_v42, %s13614_s25  ;;  %2162 = vrot.lane.b32.xlu1 %v2130_v11, %s13614_s25  ;;  %v2226_v11 = vmul.f32 %v9052_v32, %v8830_v47 }
 0x196   :  { %v9460_v52 = vpop.permute.xlu0 %1334  ;;  %v9462_v15 = vpop.permute.xlu1 %1336 }
 0x197   :  { %13877 = vst [vmem:[#allocation85_spill] sm:$0xff] %v9460_v52  ;;  %13878 = vst [vmem:[#allocation86_spill] sm:$0xff] %v9462_v15  ;;  %v2227_v15 = vmul.f32 %v9052_v32, %v8826_v46  ;;  %v13558_v52 = vsub.s32 4, %v8746_v6 }
 0x198   :  { %2257 = vrot.lane.b32.xlu0 %v2224_v14, %s13616_s24  ;;  %2259 = vrot.lane.b32.xlu1 %v2225_v35, %s13616_s24  ;;  %v2228_v35 = vmul.f32 %v9052_v32, %v8841_v50 }
 0x19a   :  { %v9470_v8 = vpop.permute.xlu0 %1338  ;;  %v9472_v42 = vpop.permute.xlu1 %1328 }
 0x19b   :  { %13879 = vst [vmem:[#allocation87_spill] sm:$0xff] %v9470_v8  ;;  %13880 = vst [vmem:[#allocation88_spill] sm:$0xff] %v9472_v42  ;;  %v2223_v42 = vmul.f32 %v9052_v32, %v8844_v51  ;;  %v9492_v8 = vrot.slane %v8807_v39, %v13558_v52 }
 0x19c   :  { %2261 = vrot.lane.b32.xlu0 %v2226_v11, %s13616_s24  ;;  %2263 = vrot.lane.b32.xlu1 %v2227_v15, %s13616_s24 }
 0x19d   :  { %13882 = vst [vmem:[#allocation90_spill] sm:$0xff] %v9492_v8  ;;  %v1578_v50 = vmul.f32 %v8974_v45, %v9492_v8 }
 0x19e   :  { %v9481_v17 = vpop.permute.xlu0 %1418  ;;  %v9483_v14 = vpop.permute.xlu1 %1420 }
 0x19f   :  { %13881 = vst [vmem:[#allocation89_spill] sm:$0xff] %v9481_v17  ;;  %v1485_v17 = vmul.f32 %v8964_v38, %v9492_v8 }
 0x1a0   :  { %2265 = vrot.lane.b32.xlu0 %v2228_v35, %s13616_s24  ;;  %2255 = vrot.lane.b32.xlu1 %v2223_v42, %s13616_s24  ;;  %v1671_v42 = vmul.f32 %v9024_v13, %v9492_v8  ;;  %v1764_v35 = vmul.f32 %v8988_v56, %v9492_v8 }
 0x1a2   :  { %v9496_v15 = vpop.permute.xlu0 %1422  ;;  %v9498_v11 = vpop.permute.xlu1 %1424 }
 0x1a4   :  { %1523 = vrot.lane.b32.xlu0 %v1485_v17, %s8628_s28  ;;  %1616 = vrot.lane.b32.xlu1 %v1578_v50, %s8629_s29  ;;  %v1857_v17 = vmul.f32 %v9000_v61, %v9492_v8  ;;  %v1950_v50 = vmul.f32 %v9038_v25, %v9492_v8 }
 0x1a6   :  { %v9506_v39 = vpop.permute.xlu0 %1426  ;;  %v9508_v52 = vpop.permute.xlu1 %1416 }
 0x1a7   :  { %13883 = vst [vmem:[#allocation91_spill] sm:$0xff] %v9508_v52 }
 0x1a8   :  { %1709 = vrot.lane.b32.xlu0 %v1671_v42, %s8630_s30  ;;  %1802 = vrot.lane.b32.xlu1 %v1764_v35, %s8631_s14  ;;  %v2043_v42 = vmul.f32 %v9014_v5, %v9492_v8  ;;  %v2136_v35 = vmul.f32 %v9026_v18, %v9492_v8 }
 0x1aa   :  { %v9516_v38 = vpop.permute.xlu0 %1513  ;;  %v9518_v45 = vpop.permute.xlu1 %1515 }
 0x1ac   :  { %1895 = vrot.lane.b32.xlu0 %v1857_v17, %s8632_s27  ;;  %1988 = vrot.lane.b32.xlu1 %v1950_v50, %s13674_s1 }
 0x1ae   :  { %v9526_v13 = vpop.permute.xlu0 %1517  ;;  %v9528_v56 = vpop.permute.xlu1 %1519 }
 0x1af   :  { %13884 = vst [vmem:[#allocation92_spill] sm:$0xff] %v9528_v56 }
 0x1b0   :  { %2081 = vrot.lane.b32.xlu0 %v2043_v42, %s13677_s26  ;;  %2174 = vrot.lane.b32.xlu1 %v2136_v35, %s13614_s25  ;;  %s14001_s25 = smov 69  }
 0x1b2   :  { %v9536_v61 = vpop.permute.xlu0 %1521  ;;  %v9538_v25 = vpop.permute.xlu1 %1511 }
 0x1b3   :  { %13885 = vst [vmem:[#allocation93_spill] sm:$0xff] %v9538_v25 }
 0x1b6   :  { %v9540_v17 = vpop.permute.xlu0 %1606  ;;  %v9542_v50 = vpop.permute.xlu1 %1608 }
 0x1b7   :  { %13886 = vst [vmem:[#allocation94_spill] sm:$0xff] %v9540_v17  ;;  %13887 = vst [vmem:[#allocation95_spill] sm:$0xff] %v9542_v50 }
 0x1ba   :  { %v9544_v6 = vpop.permute.xlu0 %1610  ;;  %v9546_v32 = vpop.permute.xlu1 %1612 }
 0x1bb   :  { %13888 = vst [vmem:[#allocation96_spill] sm:$0xff] %v9544_v6 }
 0x1be   :  { %v9548_v5 = vpop.permute.xlu0 %1614  ;;  %v9550_v56 = vpop.permute.xlu1 %1604 }
 0x1bf   :  { %13889 = vst [vmem:[#allocation97_spill] sm:$0xff] %v9550_v56  ;;  %v127_v56 = vmul.f32 %v9040_v26, %v8814_v41  ;;  %v204_v41 = vsel %vm13703_vm0, %v9062_v37, %v9060_v36 }
 0x1c2   :  { %v9552_v18 = vpop.permute.xlu0 %1699  ;;  %v9554_v42 = vpop.permute.xlu1 %1701 }
 0x1c3   :  { %13890 = vst [vmem:[#allocation98_spill] sm:$0xff] %v9552_v18  ;;  %13891 = vst [vmem:[#allocation99_spill] sm:$0xff] %v9554_v42  ;;  %v128_v18 = vmul.f32 %v9040_v26, %v8811_v40  ;;  %v205_v40 = vsel %vm13703_vm0, %v9060_v36, %v9072_v49  ;;  %v207_v36 = vsel %vm13703_vm0, %v9070_v48, %v9080_v57 }
 0x1c6   :  { %v9556_v35 = vpop.permute.xlu0 %1703  ;;  %v9558_v8 = vpop.permute.xlu1 %1705 }
 0x1c7   :  { %13892 = vst [vmem:[#allocation100_spill] sm:$0xff] %v9556_v35  ;;  %13893 = vst [vmem:[#allocation101_spill] sm:$0xff] %v9558_v8  ;;  %v129_v35 = vmul.f32 %v9040_v26, %v8830_v47  ;;  %v139_v47 = vadd.f32 %v127_v56, %v9050_v31  ;;  %v203_v56 = vsel %vm13703_vm0, %v9082_v58, %v9062_v37  ;;  %v13939_v58 = vld [vmem:[#allocation77_spill] sm:$0xff] }
 0x1c8   :  { %v295_v37 = vsel %vm13710_vm1, %v9102_v20, %v9110_v28 }
 0x1ca   :  { %v9560_v25 = vpop.permute.xlu0 %1707  ;;  %v9562_v17 = vpop.permute.xlu1 %1697 }
 0x1cb   :  { %13894 = vst [vmem:[#allocation102_spill] sm:$0xff] %v9562_v17  ;;  %v130_v17 = vmul.f32 %v9040_v26, %v8826_v46  ;;  %v141_v46 = vadd.f32 %v129_v35, %v9050_v31  ;;  %v227_v35 = vadd.f32 %v204_v41, %v139_v47 }
 0x1ce   :  { %v9564_v50 = vpop.permute.xlu0 %1792  ;;  %v9566_v6 = vpop.permute.xlu1 %1794 }
 0x1cf   :  { %13895 = vst [vmem:[#allocation103_spill] sm:$0xff] %v9564_v50  ;;  %13896 = vst [vmem:[#allocation104_spill] sm:$0xff] %v9566_v6  ;;  %v126_v50 = vmul.f32 %v9040_v26, %v8844_v51 }
 0x1d1   :  { %v138_v6 = vadd.f32 %v126_v50, %v9050_v31 }
 0x1d2   :  { %v9574_v42 = vpop.permute.xlu0 %1796  ;;  %v9576_v8 = vpop.permute.xlu1 %1798 }
 0x1d3   :  { %13897 = vst [vmem:[#allocation105_spill] sm:$0xff] %v9574_v42  ;;  %13898 = vst [vmem:[#allocation106_spill] sm:$0xff] %v9576_v8  ;;  %v140_v8 = vadd.f32 %v128_v18, %v9050_v31  ;;  %v206_v42 = vsel %vm13703_vm0, %v9072_v49, %v9070_v48  ;;  %v292_v18 = vsel %vm13710_vm1, %v9090_v2, %v9092_v3 }
 0x1d4   :  { %v293_v49 = vsel %vm13710_vm1, %v9092_v3, %v9100_v19  ;;  %v294_v48 = vsel %vm13710_vm1, %v9100_v19, %v9102_v20  ;;  %v229_v41 = vadd.f32 %v206_v42, %v141_v46  ;;  %v315_v50 = vadd.f32 %v292_v18, %v227_v35 }
 0x1d5   :  { %v380_v19 = vsel %vm13749_vm2, %v9120_v43, %v9122_v44  ;;  %v381_v20 = vsel %vm13749_vm2, %v9122_v44, %v9130_v62  ;;  %v468_v44 = vsel %vm13728_vm3, %v9150_v53, %v9152_v54 }
 0x1d6   :  { %v9591_v51 = vpop.permute.xlu0 %1800  ;;  %v9593_v26 = vpop.permute.xlu1 %1790  ;;  %v317_v42 = vadd.f32 %v294_v48, %v229_v41 }
 0x1d7   :  { %13899 = vst [vmem:[#allocation107_spill] sm:$0xff] %v9591_v51  ;;  %13900 = vst [vmem:[#allocation108_spill] sm:$0xff] %v9593_v26  ;;  %v228_v51 = vadd.f32 %v205_v40, %v140_v8  ;;  %v142_v26 = vadd.f32 %v130_v17, %v9050_v31  ;;  %v291_v8 = vsel %vm13710_vm1, %v9112_v29, %v9090_v2  ;;  %v13935_v29 = vld [vmem:[#allocation74_spill] sm:$0xff] }
 0x1d8   :  { %v226_v40 = vadd.f32 %v203_v56, %v138_v6  ;;  %v382_v2 = vsel %vm13749_vm2, %v9130_v62, %v9132_v63  ;;  %v383_v6 = vsel %vm13749_vm2, %v9132_v63, %v9140_v22  ;;  %v379_v56 = vsel %vm13749_vm2, %v9142_v23, %v9120_v43  ;;  %v13934_v23 = vld [vmem:[#allocation73_spill] sm:$0xff] }
 0x1d9   :  { %v230_v17 = vadd.f32 %v207_v36, %v142_v26  ;;  %v316_v26 = vadd.f32 %v293_v49, %v228_v51  ;;  %v469_v62 = vsel %vm13728_vm3, %v9152_v54, %v9160_v7  ;;  %v470_v63 = vsel %vm13728_vm3, %v9160_v7, %v9162_v10 }
 0x1da   :  { %v9621_v47 = vpop.permute.xlu0 %1885  ;;  %v9623_v3 = vpop.permute.xlu1 %1887  ;;  %v314_v36 = vadd.f32 %v291_v8, %v226_v40  ;;  %v403_v51 = vadd.f32 %v380_v19, %v315_v50  ;;  %v405_v35 = vadd.f32 %v382_v2, %v317_v42  ;;  %v467_v54 = vsel %vm13728_vm3, %v9172_v9, %v9150_v53  ;;  %v13933_v9 = vld [vmem:[#allocation71_spill] sm:$0xff] }
 0x1db   :  { %v318_v46 = vadd.f32 %v295_v37, %v230_v17  ;;  %v404_v18 = vadd.f32 %v381_v20, %v316_v26  ;;  %v471_v37 = vsel %vm13728_vm3, %v9162_v10, %v9170_v30  ;;  %v556_v7 = vsel %vm13751_vm4, %v9180_v24, %v9182_v21 }
 0x1dc   :  { %v557_v8 = vsel %vm13751_vm4, %v9182_v21, %v9190_v55  ;;  %v402_v41 = vadd.f32 %v379_v56, %v314_v36  ;;  %v491_v17 = vadd.f32 %v468_v44, %v403_v51  ;;  %v493_v50 = vadd.f32 %v470_v63, %v405_v35  ;;  %v13902_v51 = vld [vmem:[#allocation42_spill] sm:$0xff]  ;;  %v13904_v35 = vld [vmem:[#allocation44_spill] sm:$0xff] }
 0x1dd   :  { %v406_v49 = vadd.f32 %v383_v6, %v318_v46  ;;  %v492_v40 = vadd.f32 %v469_v62, %v404_v18  ;;  %v558_v10 = vsel %vm13751_vm4, %v9190_v55, %v9192_v12  ;;  %v559_v53 = vsel %vm13751_vm4, %v9192_v12, %v9200_v33  ;;  %v13903_v18 = vld [vmem:[#allocation43_spill] sm:$0xff] }
 0x1de   :  { %v9649_v48 = vpop.permute.xlu0 %1889  ;;  %v9651_v43 = vpop.permute.xlu1 %1891  ;;  %v555_v19 = vsel %vm13751_vm4, %v9202_v34, %v9180_v24  ;;  %v644_v21 = vsel %vm636_vm5, %v9210_v27, %v9212_v1  ;;  %v490_v2 = vadd.f32 %v467_v54, %v402_v41  ;;  %v579_v6 = vadd.f32 %v556_v7, %v491_v17  ;;  %v13929_v34 = vld [vmem:[#allocation68_spill] sm:$0xff] }
 0x1df   :  { %v494_v20 = vadd.f32 %v471_v37, %v406_v49  ;;  %v580_v26 = vadd.f32 %v557_v8, %v492_v40  ;;  %v645_v12 = vsel %vm636_vm5, %v9212_v1, %v9220_v0  ;;  %v646_v24 = vsel %vm636_vm5, %v9220_v0, %v9222_v59  ;;  %v13905_v49 = vld [vmem:[#allocation45_spill] sm:$0xff]  ;;  %v13906_v40 = vld [vmem:[#allocation46_spill] sm:$0xff] }
 0x1e0   :  { %v647_v55 = vsel %vm636_vm5, %v9222_v59, %v9230_v4  ;;  %v643_v36 = vsel %vm636_vm5, %v9232_v60, %v9210_v27  ;;  %v581_v56 = vadd.f32 %v558_v10, %v493_v50  ;;  %v578_v62 = vadd.f32 %v555_v19, %v490_v2  ;;  %v13907_v50 = vld [vmem:[#allocation48_spill] sm:$0xff]  ;;  %v13908_v10 = vld [vmem:[#allocation47_spill] sm:$0xff]  ;;  %v13909_v19 = vld [vmem:[#allocation49_spill] sm:$0xff] }
 0x1e1   :  { %v582_v44 = vadd.f32 %v559_v53, %v494_v20  ;;  %v667_v63 = vadd.f32 %v644_v21, %v579_v6  ;;  %v732_v1 = vsel %vm13742_vm6, %v13902_v51, %v9242_v16  ;;  %v733_v0 = vsel %vm13742_vm6, %v9242_v16, %v13903_v18  ;;  %v13910_v20 = vld [vmem:[#allocation50_spill] sm:$0xff] }
 0x1e2   :  { %v9677_v42 = vpop.permute.xlu0 %1893  ;;  %v9679_v46 = vpop.permute.xlu1 %1883  ;;  %v734_v59 = vsel %vm13742_vm6, %v13903_v18, %v13904_v35  ;;  %v735_v27 = vsel %vm13742_vm6, %v13904_v35, %v13905_v49  ;;  %v668_v37 = vadd.f32 %v645_v12, %v580_v26  ;;  %v669_v54 = vadd.f32 %v646_v24, %v581_v56  ;;  %v13912_v56 = vld [vmem:[#allocation52_spill] sm:$0xff]  ;;  %v13915_v35 = vld [vmem:[#allocation55_spill] sm:$0xff] }
 0x1e3   :  { %13901 = vst [vmem:[#allocation109_spill] sm:$0xff] %v9679_v46  ;;  %v670_v7 = vadd.f32 %v647_v55, %v582_v44  ;;  %v666_v8 = vadd.f32 %v643_v36, %v578_v62  ;;  %v731_v16 = vsel %vm13742_vm6, %v13906_v40, %v13902_v51  ;;  %v820_v53 = vsel %vm13613_vm7, %v13908_v10, %v13907_v50  ;;  %v13911_v55 = vld [vmem:[#allocation51_spill] sm:$0xff]  ;;  %v13913_v62 = vld [vmem:[#allocation54_spill] sm:$0xff]  ;;  %v13914_v51 = vld [vmem:[#allocation53_spill] sm:$0xff] }
 0x1e4   :  { %v821_v21 = vsel %vm13613_vm7, %v13907_v50, %v13909_v19  ;;  %v822_v2 = vsel %vm13613_vm7, %v13909_v19, %v13910_v20  ;;  %v755_v6 = vadd.f32 %v732_v1, %v667_v63  ;;  %v756_v26 = vadd.f32 %v733_v0, %v668_v37  ;;  %v13923_v40 = vld [vmem:[#allocation63_spill] sm:$0xff] }
 0x1e5   :  { %v757_v12 = vadd.f32 %v734_v59, %v669_v54  ;;  %v758_v24 = vadd.f32 %v735_v27, %v670_v7  ;;  %v823_v36 = vsel %vm13613_vm7, %v13910_v20, %v13911_v55  ;;  %v819_v44 = vsel %vm13613_vm7, %v13912_v56, %v13908_v10  ;;  %v13916_v7 = vld [vmem:[#allocation56_spill] sm:$0xff]  ;;  %v13917_v10 = vld [vmem:[#allocation57_spill] sm:$0xff]  ;;  %v13918_v20 = vld [vmem:[#allocation58_spill] sm:$0xff] }
 0x1e6   :  { %v9705_v41 = vpop.permute.xlu0 %1978  ;;  %v9707_v17 = vpop.permute.xlu1 %1980  ;;  %v908_v18 = vsel %vm13610_vm8, %v13914_v51, %v13913_v62  ;;  %v909_v63 = vsel %vm13610_vm8, %v13913_v62, %v13915_v35  ;;  %v754_v1 = vadd.f32 %v731_v16, %v666_v8  ;;  %v843_v0 = vadd.f32 %v820_v53, %v755_v6  ;;  %v13919_v16 = vld [vmem:[#allocation60_spill] sm:$0xff]  ;;  %v13920_v53 = vld [vmem:[#allocation59_spill] sm:$0xff]  ;;  %v13921_v62 = vld [vmem:[#allocation61_spill] sm:$0xff] }
 0x1e7   :  { %v844_v59 = vadd.f32 %v821_v21, %v756_v26  ;;  %v845_v27 = vadd.f32 %v822_v2, %v757_v12  ;;  %v910_v50 = vsel %vm13610_vm8, %v13915_v35, %v13916_v7  ;;  %v911_v19 = vsel %vm13610_vm8, %v13916_v7, %v13917_v10  ;;  %v13922_v56 = vld [vmem:[#allocation62_spill] sm:$0xff] }
 0x1e8   :  { %v907_v8 = vsel %vm13610_vm8, %v13918_v20, %v13914_v51  ;;  %v996_v21 = vsel %vm13604_vm9, %v13920_v53, %v13919_v16  ;;  %v846_v2 = vadd.f32 %v823_v36, %v758_v24  ;;  %v842_v6 = vadd.f32 %v819_v44, %v754_v1  ;;  %v13924_v20 = vld [vmem:[#allocation64_spill] sm:$0xff] }
 0x1e9   :  { %v931_v26 = vadd.f32 %v908_v18, %v843_v0  ;;  %v932_v12 = vadd.f32 %v909_v63, %v844_v59  ;;  %v997_v35 = vsel %vm13604_vm9, %v13919_v16, %v13921_v62  ;;  %v998_v7 = vsel %vm13604_vm9, %v13921_v62, %v13922_v56  ;;  %v13926_v0 = vld [vmem:[#allocation66_spill] sm:$0xff]  ;;  %v13927_v59 = vld [vmem:[#allocation65_spill] sm:$0xff]  ;;  %v13928_v62 = vld [vmem:[#allocation67_spill] sm:$0xff] }
 0x1ea   :  { %v9733_v37 = vpop.permute.xlu0 %1982  ;;  %v9735_v54 = vpop.permute.xlu1 %1984  ;;  %v999_v51 = vsel %vm13604_vm9, %v13922_v56, %v13923_v40  ;;  %v995_v60 = vsel %vm13604_vm9, %v13924_v20, %v13920_v53  ;;  %v933_v24 = vadd.f32 %v910_v50, %v845_v27  ;;  %v934_v36 = vadd.f32 %v911_v19, %v846_v2  ;;  %v13930_v50 = vld [vmem:[#allocation69_spill] sm:$0xff]  ;;  %v13932_v20 = vld [vmem:[#allocation72_spill] sm:$0xff]  ;;  %v13945_v40 = vld [vmem:[#allocation83_spill] sm:$0xff] }
 0x1eb   :  { %v930_v44 = vadd.f32 %v907_v8, %v842_v6  ;;  %v1019_v18 = vadd.f32 %v996_v21, %v931_v26  ;;  %v1084_v16 = vsel %vm13606_vm10, %v13927_v59, %v13926_v0  ;;  %v1085_v56 = vsel %vm13606_vm10, %v13926_v0, %v13928_v62  ;;  %v13931_v6 = vld [vmem:[#allocation70_spill] sm:$0xff] }
 0x1ec   :  { %v1086_v27 = vsel %vm13606_vm10, %v13928_v62, %v13929_v34  ;;  %v1087_v19 = vsel %vm13606_vm10, %v13929_v34, %v13930_v50  ;;  %v1020_v8 = vadd.f32 %v997_v35, %v932_v12  ;;  %v1021_v53 = vadd.f32 %v998_v7, %v933_v24  ;;  %v13944_v50 = vld [vmem:[#allocation84_spill] sm:$0xff] }
 0x1ed   :  { %v1022_v21 = vadd.f32 %v999_v51, %v934_v36  ;;  %v1018_v2 = vadd.f32 %v995_v60, %v930_v44  ;;  %v1083_v26 = vsel %vm13606_vm10, %v13931_v6, %v13927_v59  ;;  %v1172_v0 = vsel %vm13607_vm11, %v13933_v9, %v13932_v20  ;;  %v13936_v36 = vld [vmem:[#allocation75_spill] sm:$0xff]  ;;  %v13937_v59 = vld [vmem:[#allocation76_spill] sm:$0xff]  ;;  %v13938_v6 = vld [vmem:[#allocation78_spill] sm:$0xff] }
 0x1ee   :  { %v9761_v63 = vpop.permute.xlu0 %1986  ;;  %v9763_v1 = vpop.permute.xlu1 %1976  ;;  %v1173_v62 = vsel %vm13607_vm11, %v13932_v20, %v13934_v23  ;;  %v1174_v34 = vsel %vm13607_vm11, %v13934_v23, %v13935_v29  ;;  %v1107_v12 = vadd.f32 %v1084_v16, %v1019_v18  ;;  %v1108_v35 = vadd.f32 %v1085_v56, %v1020_v8  ;;  %v13940_v18 = vld [vmem:[#allocation79_spill] sm:$0xff] }
 0x1ef   :  { %13925 = vst [vmem:[#allocation42_spill] sm:$0xff] %v9763_v1  ;;  %v1109_v60 = vadd.f32 %v1086_v27, %v1021_v53  ;;  %v1110_v7 = vadd.f32 %v1087_v19, %v1022_v21  ;;  %vm1618_vm9 = vcmask 343040   ;;  %v1175_v44 = vsel %vm13607_vm11, %v13935_v29, %v13936_v36  ;;  %v13941_v53 = vld [vmem:[#allocation80_spill] sm:$0xff]  ;;  %v13942_v21 = vld [vmem:[#allocation81_spill] sm:$0xff] }
 0x1f0   :  { %v1171_v20 = vsel %vm13607_vm11, %v13937_v59, %v13933_v9  ;;  %v1260_v23 = vsel %vm13608_vm12, %v13939_v58, %v13938_v6  ;;  %v1261_v16 = vsel %vm13608_vm12, %v13938_v6, %v13940_v18  ;;  %v1106_v56 = vadd.f32 %v1083_v26, %v1018_v2  ;;  %v13943_v59 = vld [vmem:[#allocation82_spill] sm:$0xff] }
 0x1f1   :  { %v1195_v27 = vadd.f32 %v1172_v0, %v1107_v12  ;;  %v1196_v19 = vadd.f32 %v1173_v62, %v1108_v35  ;;  %v1197_v8 = vadd.f32 %v1174_v34, %v1109_v60  ;;  %vm13711_vm10 = vcmask 334848   ;;  %v13946_v35 = vld [vmem:[#allocation85_spill] sm:$0xff] }
 0x1f2   :  { %v9789_v51 = vpop.permute.xlu0 %2071  ;;  %v9791_v24 = vpop.permute.xlu1 %2073  ;;  %v1262_v29 = vsel %vm13608_vm12, %v13940_v18, %v13941_v53  ;;  %v1263_v9 = vsel %vm13608_vm12, %v13941_v53, %v13942_v21  ;;  %v1259_v36 = vsel %vm13608_vm12, %v13943_v59, %v13939_v58  ;;  %v1348_v2 = vsel %vm13609_vm13, %v13945_v40, %v13944_v50  ;;  %v13947_v18 = vld [vmem:[#allocation86_spill] sm:$0xff]  ;;  %v13948_v53 = vld [vmem:[#allocation87_spill] sm:$0xff] }
 0x1f3   :  { %v1198_v6 = vadd.f32 %v1175_v44, %v1110_v7  ;;  %v1194_v26 = vadd.f32 %v1171_v20, %v1106_v56  ;;  %v1283_v0 = vadd.f32 %v1260_v23, %v1195_v27  ;;  %v1284_v62 = vadd.f32 %v1261_v16, %v1196_v19  ;;  %v13949_v44 = vld [vmem:[#allocation88_spill] sm:$0xff]  ;;  %v13950_v19 = vld [vmem:[#allocation89_spill] sm:$0xff]  ;;  %v13966_v59 = vld [vmem:[#allocation106_spill] sm:$0xff] }
 0x1f4   :  { %vm13709_vm11 = vcmask 326656   ;;  %v1349_v60 = vsel %vm13609_vm13, %v13944_v50, %v13946_v35  ;;  %v1350_v58 = vsel %vm13609_vm13, %v13946_v35, %v13947_v18  ;;  %v1351_v7 = vsel %vm13609_vm13, %v13947_v18, %v13948_v53 }
 0x1f5   :  { %v1347_v20 = vsel %vm13609_vm13, %v13949_v44, %v13945_v40  ;;  %v1285_v23 = vadd.f32 %v1262_v29, %v1197_v8  ;;  %v1286_v16 = vadd.f32 %v1263_v9, %v1198_v6  ;;  %v1282_v56 = vadd.f32 %v1259_v36, %v1194_v26  ;;  %v13952_v26 = vld [vmem:[#allocation92_spill] sm:$0xff]  ;;  %v13965_v44 = vld [vmem:[#allocation105_spill] sm:$0xff] }
 0x1f6   :  { %v9817_v34 = vpop.permute.xlu0 %2075  ;;  %v9819_v12 = vpop.permute.xlu1 %2077  ;;  %v1371_v27 = vadd.f32 %v1348_v2, %v1283_v0  ;;  %vm13708_vm12 = vcmask 130048   ;;  %v1436_v50 = vsel %vm13612_vm14, %v13950_v19, %v9483_v14  ;;  %v1437_v35 = vsel %vm13612_vm14, %v9483_v14, %v9496_v15 }
 0x1f7   :  { %v1438_v18 = vsel %vm13612_vm14, %v9496_v15, %v9498_v11  ;;  %v1439_v40 = vsel %vm13612_vm14, %v9498_v11, %v9506_v39  ;;  %v1372_v8 = vadd.f32 %v1349_v60, %v1284_v62  ;;  %v1373_v36 = vadd.f32 %v1350_v58, %v1285_v23  ;;  %v13953_v23 = vld [vmem:[#allocation93_spill] sm:$0xff] }
 0x1f8   :  { %v1374_v29 = vadd.f32 %v1351_v7, %v1286_v16  ;;  %v1370_v9 = vadd.f32 %v1347_v20, %v1282_v56  ;;  %vm13707_vm13 = vcmask 121856   ;;  %v1435_v14 = vsel %vm13612_vm14, %v9508_v52, %v13950_v19  ;;  %v13954_v56 = vld [vmem:[#allocation95_spill] sm:$0xff]  ;;  %v13955_v19 = vld [vmem:[#allocation94_spill] sm:$0xff]  ;;  %v13956_v52 = vld [vmem:[#allocation96_spill] sm:$0xff] }
 0x1f9   :  { %v1533_v15 = vsel %vm1525_vm15, %v9516_v38, %v9518_v45  ;;  %v1534_v11 = vsel %vm1525_vm15, %v9518_v45, %v9526_v13  ;;  %v1535_v0 = vsel %vm1525_vm15, %v9526_v13, %v13952_v26  ;;  %v1459_v62 = vadd.f32 %v1436_v50, %v1371_v27 }
 0x1fa   :  { %v9845_v2 = vpop.permute.xlu0 %2079  ;;  %v9847_v6 = vpop.permute.xlu1 %2069  ;;  %v1460_v60 = vadd.f32 %v1437_v35, %v1372_v8  ;;  %v1461_v58 = vadd.f32 %v1438_v18, %v1373_v36  ;;  %v1462_v7 = vadd.f32 %v1439_v40, %v1374_v29  ;;  %vm13706_vm8 = vcmask 113664   ;;  %v13957_v29 = vld [vmem:[#allocation97_spill] sm:$0xff] }
 0x1fb   :  { %13951 = vst [vmem:[#allocation43_spill] sm:$0xff] %v9847_v6  ;;  %v1536_v20 = vsel %vm1525_vm15, %v13952_v26, %v9536_v61  ;;  %v1532_v16 = vsel %vm1525_vm15, %v13953_v23, %v9516_v38  ;;  %v1626_v45 = vsel %vm1618_vm9, %v13955_v19, %v13954_v56  ;;  %v1627_v13 = vsel %vm1618_vm9, %v13954_v56, %v13956_v52  ;;  %v13961_v56 = vld [vmem:[#allocation101_spill] sm:$0xff]  ;;  %v13963_v23 = vld [vmem:[#allocation103_spill] sm:$0xff] }
 0x1fc   :  { %v1458_v27 = vadd.f32 %v1435_v14, %v1370_v9  ;;  %v1557_v50 = vadd.f32 %v1533_v15, %v1459_v62  ;;  %v1558_v35 = vadd.f32 %v1534_v11, %v1460_v60  ;;  %v1559_v18 = vadd.f32 %v1535_v0, %v1461_v58  ;;  %v13958_v9 = vld [vmem:[#allocation99_spill] sm:$0xff]  ;;  %v13959_v14 = vld [vmem:[#allocation98_spill] sm:$0xff]  ;;  %v13960_v58 = vld [vmem:[#allocation100_spill] sm:$0xff] }
 0x1fd   :  { %vm13705_vm14 = vcmask 105472   ;;  %v1628_v38 = vsel %vm1618_vm9, %v13956_v52, %v9546_v32  ;;  %v1629_v36 = vsel %vm1618_vm9, %v9546_v32, %v9548_v5  ;;  %v1625_v26 = vsel %vm1618_vm9, %v13957_v29, %v13955_v19  ;;  %v13962_v29 = vld [vmem:[#allocation104_spill] sm:$0xff] }
 0x1fe   :  { %v9873_v40 = vpop.permute.xlu0 %2164  ;;  %v2167_v8 = vpop.permute.xlu1 %2166  ;;  %v1719_v15 = vsel %vm13711_vm10, %v13959_v14, %v13958_v9  ;;  %v1560_v11 = vadd.f32 %v1536_v20, %v1462_v7  ;;  %v1556_v0 = vadd.f32 %v1532_v16, %v1458_v27  ;;  %v1650_v62 = vadd.f32 %v1626_v45, %v1557_v50 }
 0x1ff   :  { %v1651_v60 = vadd.f32 %v1627_v13, %v1558_v35  ;;  %vm13704_vm7 = vcmask 97280   ;;  %v1720_v52 = vsel %vm13711_vm10, %v13958_v9, %v13960_v58  ;;  %v1721_v32 = vsel %vm13711_vm10, %v13960_v58, %v13961_v56  ;;  %v13964_v35 = vld [vmem:[#allocation102_spill] sm:$0xff] }
 0x200   :  { %v1722_v19 = vsel %vm13711_vm10, %v13961_v56, %v9560_v25  ;;  %v1812_v7 = vsel %vm13709_vm11, %v13963_v23, %v13962_v29  ;;  %v1652_v20 = vadd.f32 %v1628_v38, %v1559_v18  ;;  %v1653_v16 = vadd.f32 %v1629_v36, %v1560_v11  ;;  %v13967_v11 = vld [vmem:[#allocation107_spill] sm:$0xff] }
 0x201   :  { %v1649_v45 = vadd.f32 %v1625_v26, %v1556_v0  ;;  %v1743_v13 = vadd.f32 %v1719_v15, %v1650_v62  ;;  %v1718_v9 = vsel %vm13711_vm10, %v13964_v35, %v13959_v14  ;;  %v1813_v58 = vsel %vm13709_vm11, %v13962_v29, %v13965_v44 }
 0x202   :  { %v2169_v27 = vpop.permute.xlu0 %2168  ;;  %v2171_v50 = vpop.permute.xlu1 %2170  ;;  %v1814_v56 = vsel %vm13709_vm11, %v13965_v44, %v13966_v59  ;;  %v1905_v18 = vsel %vm13708_vm12, %v9621_v47, %v9623_v3  ;;  %v1744_v38 = vadd.f32 %v1720_v52, %v1651_v60  ;;  %v1745_v36 = vadd.f32 %v1721_v32, %v1652_v20 }
 0x203   :  { %v1746_v26 = vadd.f32 %v1722_v19, %v1653_v16  ;;  %v1836_v15 = vadd.f32 %v1812_v7, %v1743_v13  ;;  %v1815_v14 = vsel %vm13709_vm11, %v13966_v59, %v13967_v11  ;;  %v1906_v29 = vsel %vm13708_vm12, %v9623_v3, %v9649_v48  ;;  %v13969_v59 = vld [vmem:[#allocation108_spill] sm:$0xff] }
 0x204   :  { %v1907_v44 = vsel %vm13708_vm12, %v9649_v48, %v9651_v43  ;;  %v1998_v0 = vsel %vm13707_vm13, %v9705_v41, %v9707_v17  ;;  %v1742_v62 = vadd.f32 %v1718_v9, %v1649_v45  ;;  %v1837_v60 = vadd.f32 %v1813_v58, %v1744_v38 }
 0x205   :  { %v1838_v52 = vadd.f32 %v1814_v56, %v1745_v36  ;;  %v1929_v32 = vadd.f32 %v1905_v18, %v1836_v15  ;;  %v1811_v3 = vsel %vm13709_vm11, %v13969_v59, %v13963_v23  ;;  %v1999_v48 = vsel %vm13707_vm13, %v9707_v17, %v9733_v37 }
 0x206   :  { %v9923_v19 = vpop.permute.xlu0 %2172  ;;  %v9925_v7 = vpop.permute.xlu1 %2162  ;;  %v2000_v20 = vsel %vm13707_vm13, %v9733_v37, %v9735_v54  ;;  %v2091_v16 = vsel %vm13706_vm8, %v9789_v51, %v9791_v24  ;;  %v1839_v45 = vadd.f32 %v1815_v14, %v1746_v26  ;;  %v1930_v13 = vadd.f32 %v1906_v29, %v1837_v60 }
 0x207   :  { %13968 = vst [vmem:[#allocation44_spill] sm:$0xff] %v9925_v7  ;;  %v1931_v9 = vadd.f32 %v1907_v44, %v1838_v52  ;;  %v2022_v58 = vadd.f32 %v1998_v0, %v1929_v32  ;;  %v1908_v23 = vsel %vm13708_vm12, %v9651_v43, %v9677_v42  ;;  %v2092_v17 = vsel %vm13706_vm8, %v9791_v24, %v9817_v34 }
 0x208   :  { %v2093_v37 = vsel %vm13706_vm8, %v9817_v34, %v9819_v12  ;;  %v2184_v56 = vsel %vm13705_vm14, %v9873_v40, %v2167_v8  ;;  %v1904_v18 = vsel %vm13708_vm12, %v9679_v46, %v9621_v47  ;;  %v2023_v38 = vadd.f32 %v1999_v48, %v1930_v13 }
 0x209   :  { %v2024_v36 = vadd.f32 %v2000_v20, %v1931_v9  ;;  %v2115_v26 = vadd.f32 %v2091_v16, %v2022_v58  ;;  %v2001_v24 = vsel %vm13707_vm13, %v9735_v54, %v9761_v63  ;;  %v2185_v14 = vsel %vm13705_vm14, %v2167_v8, %v2169_v27 }
 0x20a   :  { %v2258_v15 = vpop.permute.xlu0 %2257  ;;  %v2260_v43 = vpop.permute.xlu1 %2259  ;;  %v2186_v34 = vsel %vm13705_vm14, %v2169_v27, %v2171_v50  ;;  %v1932_v44 = vadd.f32 %v1908_v23, %v1839_v45  ;;  %v2116_v0 = vadd.f32 %v2092_v17, %v2023_v38  ;;  %v1835_v47 = vadd.f32 %v1811_v3, %v1742_v62 }
 0x20b   :  { %v2277_v29 = vsel %vm13704_vm7, %v2258_v15, %v2260_v43  ;;  %v2117_v60 = vadd.f32 %v2093_v37, %v2024_v36  ;;  %v2208_v52 = vadd.f32 %v2184_v56, %v2115_v26  ;;  %v1997_v32 = vsel %vm13707_vm13, %v9763_v1, %v9705_v41 }
 0x20c   :  { %v2094_v48 = vsel %vm13706_vm8, %v9819_v12, %v9845_v2  ;;  %v2025_v54 = vadd.f32 %v2001_v24, %v1932_v44  ;;  %v2209_v20 = vadd.f32 %v2185_v14, %v2116_v0  ;;  %v1928_v45 = vadd.f32 %v1904_v18, %v1835_v47  ;;  %v13973_v44 = vld [vmem:[#allocation35_spill] sm:$0xff]  ;;  %v13974_v47 = vld [vmem:[#allocation5_spill] sm:$0xff] }
 0x20d   :  { %v2210_v8 = vadd.f32 %v2186_v34, %v2117_v60  ;;  %v9965_v16 = vadd.f32 %v2277_v29, %v2208_v52  ;;  %v2187_v9 = vsel %vm13705_vm14, %v2171_v50, %v9923_v19  ;;  %v2090_v17 = vsel %vm13706_vm8, %v9847_v6, %v9789_v51 }
 0x20e   :  { %v2262_v27 = vpop.permute.xlu0 %2261  ;;  %v2264_v13 = vpop.permute.xlu1 %2263  ;;  %v2118_v41 = vadd.f32 %v2094_v48, %v2025_v54  ;;  %v2021_v12 = vadd.f32 %v1997_v32, %v1928_v45  ;;  %v2183_v26 = vsel %vm13705_vm14, %v9925_v7, %v9873_v40  ;;  %v13972_v40 = vld [vmem:[#allocation90_spill] sm:$0xff]  ;;  %v13975_v32 = vld [vmem:[#allocation9_spill] sm:$0xff] }
 0x20f   :  { %v2278_v62 = vsel %vm13704_vm7, %v2260_v43, %v2262_v27  ;;  %v2279_v3 = vsel %vm13704_vm7, %v2262_v27, %v2264_v13  ;;  %v13622_v56 = vmax.f32 %v9965_v16, 0.0  ;;  %v2229_v0 = vmul.f32 %v13973_v44, %v13972_v40  ;;  %v13976_v54 = vld [vmem:[#allocation6_spill] sm:$0xff] }
 0x210   :  { %v9971_v58 = vadd.f32 %v2278_v62, %v2209_v20  ;;  %v9973_v23 = vadd.f32 %v2279_v3, %v2210_v8  ;;  %v2211_v37 = vadd.f32 %v2187_v9, %v2118_v41  ;;  %v2114_v24 = vadd.f32 %v2090_v17, %v2021_v12  ;;  %v10023_v8 = vld [vmem:[%s13450_s0] sm:$0xff]  ;;  %v13980_v9 = vld [vmem:[#allocation7_spill] sm:$0xff]  ;;  %v13981_v3 = vld [vmem:[#allocation8_spill] sm:$0xff]  ;;  %s13992_s0 = smov 71  }
 0x211   :  { %v149_v48 = vmul.f32 %v13975_v32, %v13974_v47  ;;  %v151_v20 = vmul.f32 %v13975_v32, %v13976_v54  ;;  %v13977_v27 = vld [vmem:[#allocation2_spill] sm:$0xff]  ;;  %v150_v62 = vmul.f32 %v13975_v32, %v13980_v9  ;;  %v148_v41 = vmul.f32 %v13975_v32, %v13981_v3  ;;  %v13982_v17 = vld [vmem:[#allocation11_spill] sm:$0xff] }
 0x212   :  { %v13621_v18 = vmax.f32 %v9971_v58, 0.0  ;;  %v13619_v50 = vmax.f32 %v9973_v23, 0.0  ;;  %v9981_v38 = vpop.permute.xlu0 %2265  ;;  %v9983_v36 = vpop.permute.xlu1 %2255  ;;  %v2207_v29 = vadd.f32 %v2183_v26, %v2114_v24  ;;  %v237_v26 = vmul.f32 %v13982_v17, %v13974_v47 }
 0x213   :  { %13970 = vst [vmem:[#allocation45_spill] sm:$0xff] %v9983_v36  ;;  %v2280_v43 = vsel %vm13704_vm7, %v2264_v13, %v9981_v38  ;;  %v2276_v34 = vsel %vm13704_vm7, %v9983_v36, %v2258_v15  ;;  %v13978_v13 = vsub.s32 4, %v13977_v27  ;;  %v239_v24 = vmul.f32 %v13982_v17, %v13976_v54 }
 0x214   :  { %v8476_v51 = vpack.i.bf16 %v13621_v18, %v13622_v56  ;;  %v9994_v14 = vadd.f32 %v2280_v43, %v2211_v37  ;;  %2348 = vrot.lane.b32.xlu1 %v13619_v50, %s8613_s2  ;;  %v10005_v52 = vadd.f32 %v2276_v34, %v2207_v29  ;;  %v238_v37 = vmul.f32 %v13982_v17, %v13980_v9 }
 0x215   :  { %v10028_v45 = vrot.slane %v10023_v8, %v13978_v13  ;;  %v236_v29 = vmul.f32 %v13982_v17, %v13981_v3  ;;  %v13984_v13 = vld [vmem:[#allocation13_spill] sm:$0xff] }
 0x216   :  { %13971 = vst [vmem:[#allocation48_spill] sm:$0xff] %v9994_v14  ;;  %8477 = vrot.lane.b32.xlu0 %v8476_v51, %s8613_s2  ;;  %v13618_v60 = vmax.f32 %v9994_v14, 0.0  ;;  %v13620_v15 = vmax.f32 %v10005_v52, 0.0  ;;  %v13983_v51 = vld [vmem:[#allocation12_spill] sm:$0xff] }
 0x217   :  { %13979 = vst [vmem:[#allocation47_spill] sm:$0xff] %v10028_v45  ;;  %v152_v12 = vmul.f32 %v13975_v32, %v10028_v45  ;;  %v240_v43 = vmul.f32 %v13982_v17, %v10028_v45  ;;  %v325_v34 = vmul.f32 %v13983_v51, %v13974_v47  ;;  %v327_v40 = vmul.f32 %v13983_v51, %v13976_v54 }
 0x218   :  { %2267 = vrot.lane.b32.xlu1 %v2229_v0, %s13616_s24  ;;  %v326_v0 = vmul.f32 %v13983_v51, %v13980_v9  ;;  %s13995_s24 = smov 70  }
 0x21a   :  { %2350 = vrot.lane.b32.xlu0 %v13618_v60, %s8613_s2 }
 0x21c   :  { %174 = vrot.lane.b32.xlu1 %v149_v48, %s8613_s2  ;;  %v324_v48 = vmul.f32 %v13983_v51, %v13981_v3 }
 0x21e   :  { %2342 = vrot.lane.b32.xlu0 %v13620_v15, %s8613_s2 }
 0x220   :  { %178 = vrot.lane.b32.xlu1 %v151_v20, %s8613_s2  ;;  %v328_v20 = vmul.f32 %v13983_v51, %v10028_v45 }
 0x222   :  { %176 = vrot.lane.b32.xlu0 %v150_v62, %s8613_s2  ;;  %v414_v62 = vmul.f32 %v13984_v13, %v13980_v9 }
 0x224   :  { %172 = vrot.lane.b32.xlu1 %v148_v41, %s8613_s2  ;;  %v413_v41 = vmul.f32 %v13984_v13, %v13974_v47 }
 0x226   :  { %180 = vrot.lane.b32.xlu0 %v152_v12, %s8613_s2  ;;  %v416_v12 = vmul.f32 %v13984_v13, %v10028_v45 }
 0x228   :  { %264 = vrot.lane.b32.xlu1 %v238_v37, %s8614_s15  ;;  %v415_v37 = vmul.f32 %v13984_v13, %v13976_v54 }
 0x22a   :  { %262 = vrot.lane.b32.xlu0 %v237_v26, %s8614_s15  ;;  %v13985_v26 = vld [vmem:[#allocation14_spill] sm:$0xff] }
 0x22c   :  { %268 = vrot.lane.b32.xlu1 %v240_v43, %s8614_s15  ;;  %v501_v43 = vmul.f32 %v13985_v26, %v13974_v47 }
 0x22e   :  { %266 = vrot.lane.b32.xlu0 %v239_v24, %s8614_s15  ;;  %v412_v24 = vmul.f32 %v13984_v13, %v13981_v3 }
 0x230   :  { %350 = vrot.lane.b32.xlu1 %v325_v34, %s8615_s16  ;;  %v503_v34 = vmul.f32 %v13985_v26, %v13976_v54 }
 0x232   :  { %260 = vrot.lane.b32.xlu0 %v236_v29, %s8614_s15  ;;  %v502_v29 = vmul.f32 %v13985_v26, %v13980_v9 }
 0x234   :  { %354 = vrot.lane.b32.xlu1 %v327_v40, %s8615_s16  ;;  %v500_v40 = vmul.f32 %v13985_v26, %v13981_v3 }
 0x236   :  { %352 = vrot.lane.b32.xlu0 %v326_v0, %s8615_s16  ;;  %v504_v0 = vmul.f32 %v13985_v26, %v10028_v45 }
 0x238   :  { %348 = vrot.lane.b32.xlu1 %v324_v48, %s8615_s16  ;;  %v13986_v48 = vld [vmem:[#allocation19_spill] sm:$0xff] }
 0x23a   :  { %356 = vrot.lane.b32.xlu0 %v328_v20, %s8615_s16  ;;  %v590_v20 = vmul.f32 %v13986_v48, %v13980_v9 }
 0x23c   :  { %440 = vrot.lane.b32.xlu1 %v414_v62, %s13681_s17  ;;  %v589_v62 = vmul.f32 %v13986_v48, %v13974_v47 }
 0x23e   :  { %438 = vrot.lane.b32.xlu0 %v413_v41, %s13681_s17  ;;  %v592_v41 = vmul.f32 %v13986_v48, %v10028_v45 }
 0x240   :  { %444 = vrot.lane.b32.xlu1 %v416_v12, %s13681_s17  ;;  %v591_v12 = vmul.f32 %v13986_v48, %v13976_v54 }
 0x242   :  { %442 = vrot.lane.b32.xlu0 %v415_v37, %s13681_s17  ;;  %v13987_v37 = vld [vmem:[#allocation15_spill] sm:$0xff] }
 0x244   :  { %526 = vrot.lane.b32.xlu1 %v501_v43, %s8617_s18  ;;  %v677_v43 = vmul.f32 %v13987_v37, %v13974_v47 }
 0x246   :  { %436 = vrot.lane.b32.xlu0 %v412_v24, %s13681_s17  ;;  %v588_v24 = vmul.f32 %v13986_v48, %v13981_v3 }
 0x248   :  { %530 = vrot.lane.b32.xlu1 %v503_v34, %s8617_s18  ;;  %v679_v34 = vmul.f32 %v13987_v37, %v13976_v54 }
 0x24a   :  { %528 = vrot.lane.b32.xlu0 %v502_v29, %s8617_s18  ;;  %v678_v29 = vmul.f32 %v13987_v37, %v13980_v9 }
 0x24c   :  { %524 = vrot.lane.b32.xlu1 %v500_v40, %s8617_s18  ;;  %v676_v40 = vmul.f32 %v13987_v37, %v13981_v3 }
 0x24e   :  { %532 = vrot.lane.b32.xlu0 %v504_v0, %s8617_s18  ;;  %v680_v0 = vmul.f32 %v13987_v37, %v10028_v45  ;;  %v14035_v37 = vld [vmem:[#allocation33_spill] sm:$0xff] }
 0x250   :  { %616 = vrot.lane.b32.xlu1 %v590_v20, %s8618_s19  ;;  %v13988_v20 = vld [vmem:[#allocation16_spill] sm:$0xff] }
 0x252   :  { %614 = vrot.lane.b32.xlu0 %v589_v62, %s8618_s19  ;;  %v766_v62 = vmul.f32 %v13988_v20, %v13980_v9 }
 0x254   :  { %620 = vrot.lane.b32.xlu1 %v592_v41, %s8618_s19  ;;  %v765_v41 = vmul.f32 %v13988_v20, %v13974_v47 }
 0x256   :  { %618 = vrot.lane.b32.xlu0 %v591_v12, %s8618_s19  ;;  %v768_v12 = vmul.f32 %v13988_v20, %v10028_v45 }
 0x258   :  { %702 = vrot.lane.b32.xlu1 %v677_v43, %s8619_s20  ;;  %v767_v43 = vmul.f32 %v13988_v20, %v13976_v54 }
 0x25a   :  { %612 = vrot.lane.b32.xlu0 %v588_v24, %s8618_s19  ;;  %v13989_v24 = vld [vmem:[#allocation24_spill] sm:$0xff] }
 0x25c   :  { %706 = vrot.lane.b32.xlu1 %v679_v34, %s8619_s20  ;;  %v853_v34 = vmul.f32 %v13989_v24, %v13974_v47 }
 0x25e   :  { %704 = vrot.lane.b32.xlu0 %v678_v29, %s8619_s20  ;;  %v764_v29 = vmul.f32 %v13988_v20, %v13981_v3 }
 0x260   :  { %700 = vrot.lane.b32.xlu1 %v676_v40, %s8619_s20  ;;  %v855_v40 = vmul.f32 %v13989_v24, %v13976_v54 }
 0x262   :  { %708 = vrot.lane.b32.xlu0 %v680_v0, %s8619_s20  ;;  %v10150_v0 = vpop.permute.xlu1 %1616 }
 0x264   :  { %792 = vrot.lane.b32.xlu1 %v766_v62, %s8620_s21  ;;  %v854_v62 = vmul.f32 %v13989_v24, %v13980_v9 }
 0x266   :  { %790 = vrot.lane.b32.xlu0 %v765_v41, %s8620_s21  ;;  %v10155_v41 = vpop.permute.xlu0 %1523 }
 0x268   :  { %796 = vrot.lane.b32.xlu1 %v768_v12, %s8620_s21  ;;  %v852_v12 = vmul.f32 %v13989_v24, %v13981_v3 }
 0x26a   :  { %794 = vrot.lane.b32.xlu0 %v767_v43, %s8620_s21  ;;  %v856_v43 = vmul.f32 %v13989_v24, %v10028_v45  ;;  %v10168_v60 = vpop.permute.xlu0 %1709 }
 0x26c   :  { %878 = vrot.lane.b32.xlu1 %v853_v34, %s13637_s22  ;;  %v10163_v34 = vpop.permute.xlu1 %1802 }
 0x26e   :  { %788 = vrot.lane.b32.xlu0 %v764_v29, %s8620_s21  ;;  %v13990_v29 = vld [vmem:[#allocation17_spill] sm:$0xff]  ;;  %v10181_v15 = vpop.permute.xlu0 %1895 }
 0x270   :  { %882 = vrot.lane.b32.xlu1 %v855_v40, %s13637_s22  ;;  %v942_v40 = vmul.f32 %v13990_v29, %v13980_v9  ;;  %v10176_v50 = vpop.permute.xlu1 %1988 }
 0x272   :  { %880 = vrot.lane.b32.xlu0 %v854_v62, %s13637_s22  ;;  %v941_v62 = vmul.f32 %v13990_v29, %v13974_v47  ;;  %v10194_v36 = vpop.permute.xlu0 %2081 }
 0x274   :  { %876 = vrot.lane.b32.xlu1 %v852_v12, %s13637_s22  ;;  %v944_v12 = vmul.f32 %v13990_v29, %v10028_v45  ;;  %v10189_v56 = vpop.permute.xlu1 %2174 }
 0x276   :  { %884 = vrot.lane.b32.xlu0 %v856_v43, %s13637_s22  ;;  %v943_v43 = vmul.f32 %v13990_v29, %v13976_v54  ;;  %s14009_s22 = smov 68  }
 0x278   :  { %968 = vrot.lane.b32.xlu1 %v942_v40, %s13643_s23  ;;  %v13991_v40 = vld [vmem:[#allocation18_spill] sm:$0xff] }
 0x279   :  { %v1029_v18 = vmul.f32 %v13991_v40, %v13974_v47 }
 0x27a   :  { %966 = vrot.lane.b32.xlu0 %v941_v62, %s13643_s23  ;;  %v940_v62 = vmul.f32 %v13990_v29, %v13981_v3 }
 0x27c   :  { %972 = vrot.lane.b32.xlu1 %v944_v12, %s13643_s23  ;;  %v1031_v12 = vmul.f32 %v13991_v40, %v13976_v54 }
 0x27e   :  { %970 = vrot.lane.b32.xlu0 %v943_v43, %s13643_s23  ;;  %v1030_v43 = vmul.f32 %v13991_v40, %v13980_v9 }
 0x280   :  { %1054 = vrot.lane.b32.xlu1 %v1029_v18, %s13992_s0  ;;  %v1028_v18 = vmul.f32 %v13991_v40, %v13981_v3 }
 0x282   :  { %964 = vrot.lane.b32.xlu0 %v940_v62, %s13643_s23  ;;  %v1032_v62 = vmul.f32 %v13991_v40, %v10028_v45  ;;  %s14015_s23 = smov 44  }
 0x284   :  { %1058 = vrot.lane.b32.xlu1 %v1031_v12, %s13992_s0  ;;  %v13993_v12 = vld [vmem:[#allocation26_spill] sm:$0xff] }
 0x285   :  { %v1118_v46 = vmul.f32 %v13993_v12, %v13980_v9 }
 0x286   :  { %v10199_v7 = vpop.permute.xlu1 %2348  ;;  %1056 = vrot.lane.b32.xlu0 %v1030_v43, %s13992_s0  ;;  %v1117_v43 = vmul.f32 %v13993_v12, %v13974_v47 }
 0x288   :  { %v10204_v6 = vpop.permute.xlu0 %8477  ;;  %1052 = vrot.lane.b32.xlu1 %v1028_v18, %s13992_s0  ;;  %v1120_v18 = vmul.f32 %v13993_v12, %v10028_v45 }
 0x28a   :  { %v10209_v1 = vpop.permute.xlu1 %2267  ;;  %1060 = vrot.lane.b32.xlu0 %v1032_v62, %s13992_s0  ;;  %v1119_v62 = vmul.f32 %v13993_v12, %v13976_v54 }
 0x28c   :  { %v10214_v59 = vpop.permute.xlu0 %2350  ;;  %1144 = vrot.lane.b32.xlu1 %v1118_v46, %s13995_s24  ;;  %v13999_v46 = vld [vmem:[#allocation20_spill] sm:$0xff] }
 0x28d   :  { %13994 = vst [vmem:[#allocation49_spill] sm:$0xff] %v10214_v59  ;;  %v1205_v24 = vmul.f32 %v13999_v46, %v13974_v47  ;;  %v1207_v29 = vmul.f32 %v13999_v46, %v13976_v54 }
 0x28e   :  { %v10219_v35 = vpop.permute.xlu1 %174  ;;  %1142 = vrot.lane.b32.xlu0 %v1117_v43, %s13995_s24  ;;  %v1116_v43 = vmul.f32 %v13993_v12, %v13981_v3 }
 0x28f   :  { %13996 = vst [vmem:[#allocation50_spill] sm:$0xff] %v10219_v35 }
 0x290   :  { %v10224_v14 = vpop.permute.xlu0 %2342  ;;  %1148 = vrot.lane.b32.xlu1 %v1120_v18, %s13995_s24 }
 0x291   :  { %13997 = vst [vmem:[#allocation51_spill] sm:$0xff] %v10224_v14 }
 0x292   :  { %v10229_v40 = vpop.permute.xlu1 %178  ;;  %1146 = vrot.lane.b32.xlu0 %v1119_v62, %s13995_s24  ;;  %v1206_v62 = vmul.f32 %v13999_v46, %v13980_v9 }
 0x293   :  { %13998 = vst [vmem:[#allocation54_spill] sm:$0xff] %v10229_v40 }
 0x294   :  { %v10234_v35 = vpop.permute.xlu0 %176  ;;  %1230 = vrot.lane.b32.xlu1 %v1205_v24, %s14001_s25 }
 0x295   :  { %14000 = vst [vmem:[#allocation53_spill] sm:$0xff] %v10234_v35  ;;  %v1204_v35 = vmul.f32 %v13999_v46, %v13981_v3 }
 0x296   :  { %1140 = vrot.lane.b32.xlu0 %v1116_v43, %s13995_s24  ;;  %v10240_v18 = vpop.permute.xlu1 %172 }
 0x297   :  { %14002 = vst [vmem:[#allocation55_spill] sm:$0xff] %v10240_v18  ;;  %v1208_v18 = vmul.f32 %v13999_v46, %v10028_v45 }
 0x298   :  { %v10244_v40 = vpop.permute.xlu0 %180  ;;  %1234 = vrot.lane.b32.xlu1 %v1207_v29, %s14001_s25 }
 0x299   :  { %14003 = vst [vmem:[#allocation56_spill] sm:$0xff] %v10244_v40  ;;  %v14007_v40 = vld [vmem:[#allocation21_spill] sm:$0xff] }
 0x29a   :  { %1232 = vrot.lane.b32.xlu0 %v1206_v62, %s14001_s25  ;;  %v10250_v24 = vpop.permute.xlu1 %264  ;;  %v1294_v12 = vmul.f32 %v14007_v40, %v13980_v9 }
 0x29b   :  { %14004 = vst [vmem:[#allocation57_spill] sm:$0xff] %v10250_v24  ;;  %v1293_v24 = vmul.f32 %v14007_v40, %v13974_v47 }
 0x29c   :  { %v10254_v43 = vpop.permute.xlu0 %262  ;;  %1228 = vrot.lane.b32.xlu1 %v1204_v35, %s14001_s25 }
 0x29d   :  { %14005 = vst [vmem:[#allocation60_spill] sm:$0xff] %v10254_v43  ;;  %v1296_v43 = vmul.f32 %v14007_v40, %v10028_v45 }
 0x29e   :  { %1236 = vrot.lane.b32.xlu0 %v1208_v18, %s14001_s25  ;;  %v10260_v29 = vpop.permute.xlu1 %268 }
 0x29f   :  { %14006 = vst [vmem:[#allocation59_spill] sm:$0xff] %v10260_v29  ;;  %v1295_v29 = vmul.f32 %v14007_v40, %v13976_v54 }
 0x2a0   :  { %v10264_v62 = vpop.permute.xlu0 %266  ;;  %1320 = vrot.lane.b32.xlu1 %v1294_v12, %s14009_s22 }
 0x2a1   :  { %14008 = vst [vmem:[#allocation61_spill] sm:$0xff] %v10264_v62  ;;  %v14013_v62 = vld [vmem:[#allocation28_spill] sm:$0xff] }
 0x2a2   :  { %1318 = vrot.lane.b32.xlu0 %v1293_v24, %s14009_s22  ;;  %v10270_v35 = vpop.permute.xlu1 %350  ;;  %v1381_v46 = vmul.f32 %v14013_v62, %v13974_v47 }
 0x2a3   :  { %14010 = vst [vmem:[#allocation62_spill] sm:$0xff] %v10270_v35  ;;  %v1292_v35 = vmul.f32 %v14007_v40, %v13981_v3 }
 0x2a4   :  { %v10274_v18 = vpop.permute.xlu0 %260  ;;  %1324 = vrot.lane.b32.xlu1 %v1296_v43, %s14009_s22 }
 0x2a5   :  { %14011 = vst [vmem:[#allocation66_spill] sm:$0xff] %v10274_v18  ;;  %v1383_v18 = vmul.f32 %v14013_v62, %v13976_v54 }
 0x2a6   :  { %1322 = vrot.lane.b32.xlu0 %v1295_v29, %s14009_s22  ;;  %v10280_v12 = vpop.permute.xlu1 %354 }
 0x2a7   :  { %14012 = vst [vmem:[#allocation65_spill] sm:$0xff] %v10280_v12  ;;  %v1382_v12 = vmul.f32 %v14013_v62, %v13980_v9 }
 0x2a8   :  { %v10284_v24 = vpop.permute.xlu0 %352  ;;  %1406 = vrot.lane.b32.xlu1 %v1381_v46, %s14015_s23 }
 0x2a9   :  { %14014 = vst [vmem:[#allocation67_spill] sm:$0xff] %v10284_v24  ;;  %v1380_v24 = vmul.f32 %v14013_v62, %v13981_v3 }
 0x2aa   :  { %1316 = vrot.lane.b32.xlu0 %v1292_v35, %s14009_s22  ;;  %v10290_v43 = vpop.permute.xlu1 %348 }
 0x2ab   :  { %14016 = vst [vmem:[#allocation68_spill] sm:$0xff] %v10290_v43  ;;  %v1384_v43 = vmul.f32 %v14013_v62, %v10028_v45 }
 0x2ac   :  { %v10294_v29 = vpop.permute.xlu0 %356  ;;  %1410 = vrot.lane.b32.xlu1 %v1383_v18, %s14015_s23 }
 0x2ad   :  { %14017 = vst [vmem:[#allocation72_spill] sm:$0xff] %v10294_v29  ;;  %v14021_v29 = vld [vmem:[#allocation22_spill] sm:$0xff] }
 0x2ae   :  { %1408 = vrot.lane.b32.xlu0 %v1382_v12, %s14015_s23  ;;  %v10300_v46 = vpop.permute.xlu1 %440  ;;  %v1475_v40 = vmul.f32 %v14021_v29, %v13980_v9 }
 0x2af   :  { %14018 = vst [vmem:[#allocation71_spill] sm:$0xff] %v10300_v46  ;;  %v1474_v46 = vmul.f32 %v14021_v29, %v13974_v47 }
 0x2b0   :  { %v10304_v35 = vpop.permute.xlu0 %438  ;;  %1404 = vrot.lane.b32.xlu1 %v1380_v24, %s14015_s23 }
 0x2b1   :  { %14019 = vst [vmem:[#allocation73_spill] sm:$0xff] %v10304_v35  ;;  %v1477_v35 = vmul.f32 %v14021_v29, %v10028_v45 }
 0x2b2   :  { %1412 = vrot.lane.b32.xlu0 %v1384_v43, %s14015_s23  ;;  %v10310_v18 = vpop.permute.xlu1 %444 }
 0x2b3   :  { %14020 = vst [vmem:[#allocation74_spill] sm:$0xff] %v10310_v18  ;;  %v1476_v18 = vmul.f32 %v14021_v29, %v13976_v54 }
 0x2b4   :  { %v10314_v12 = vpop.permute.xlu0 %442  ;;  %1503 = vrot.lane.b32.xlu1 %v1475_v40, %s8628_s28 }
 0x2b5   :  { %14022 = vst [vmem:[#allocation78_spill] sm:$0xff] %v10314_v12  ;;  %v14026_v12 = vld [vmem:[#allocation23_spill] sm:$0xff] }
 0x2b6   :  { %1501 = vrot.lane.b32.xlu0 %v1474_v46, %s8628_s28  ;;  %v10320_v24 = vpop.permute.xlu1 %526  ;;  %v1567_v62 = vmul.f32 %v14026_v12, %v13974_v47 }
 0x2b7   :  { %14023 = vst [vmem:[#allocation77_spill] sm:$0xff] %v10320_v24  ;;  %v1473_v24 = vmul.f32 %v14021_v29, %v13981_v3 }
 0x2b8   :  { %v10324_v43 = vpop.permute.xlu0 %436  ;;  %1507 = vrot.lane.b32.xlu1 %v1477_v35, %s8628_s28 }
 0x2b9   :  { %14024 = vst [vmem:[#allocation79_spill] sm:$0xff] %v10324_v43  ;;  %v1569_v43 = vmul.f32 %v14026_v12, %v13976_v54 }
 0x2ba   :  { %1505 = vrot.lane.b32.xlu0 %v1476_v18, %s8628_s28  ;;  %v10330_v40 = vpop.permute.xlu1 %530 }
 0x2bb   :  { %14025 = vst [vmem:[#allocation80_spill] sm:$0xff] %v10330_v40  ;;  %v1568_v40 = vmul.f32 %v14026_v12, %v13980_v9 }
 0x2bc   :  { %v10334_v46 = vpop.permute.xlu0 %528  ;;  %1594 = vrot.lane.b32.xlu1 %v1567_v62, %s8629_s29 }
 0x2bd   :  { %14027 = vst [vmem:[#allocation81_spill] sm:$0xff] %v10334_v46  ;;  %v1566_v46 = vmul.f32 %v14026_v12, %v13981_v3 }
 0x2be   :  { %1499 = vrot.lane.b32.xlu0 %v1473_v24, %s8628_s28  ;;  %v10340_v35 = vpop.permute.xlu1 %524 }
 0x2bf   :  { %14028 = vst [vmem:[#allocation84_spill] sm:$0xff] %v10340_v35  ;;  %v1570_v35 = vmul.f32 %v14026_v12, %v10028_v45 }
 0x2c0   :  { %v10344_v18 = vpop.permute.xlu0 %532  ;;  %1598 = vrot.lane.b32.xlu1 %v1569_v43, %s8629_s29 }
 0x2c1   :  { %14029 = vst [vmem:[#allocation83_spill] sm:$0xff] %v10344_v18  ;;  %v14033_v18 = vld [vmem:[#allocation30_spill] sm:$0xff] }
 0x2c2   :  { %1596 = vrot.lane.b32.xlu0 %v1568_v40, %s8629_s29  ;;  %v10350_v62 = vpop.permute.xlu1 %616  ;;  %v1661_v29 = vmul.f32 %v14033_v18, %v13980_v9  ;;  %v14034_v40 = vld [vmem:[#allocation10_spill] sm:$0xff] }
 0x2c3   :  { %14030 = vst [vmem:[#allocation85_spill] sm:$0xff] %v10350_v62  ;;  %v131_v62 = vmul.f32 %v14035_v37, %v14034_v40  ;;  %v1662_v40 = vmul.f32 %v14033_v18, %v13976_v54 }
 0x2c4   :  { %v10354_v24 = vpop.permute.xlu0 %614  ;;  %1592 = vrot.lane.b32.xlu1 %v1566_v46, %s8629_s29  ;;  %v1660_v46 = vmul.f32 %v14033_v18, %v13974_v47 }
 0x2c5   :  { %14031 = vst [vmem:[#allocation86_spill] sm:$0xff] %v10354_v24 }
 0x2c6   :  { %1600 = vrot.lane.b32.xlu0 %v1570_v35, %s8629_s29  ;;  %v10360_v43 = vpop.permute.xlu1 %620  ;;  %v1663_v35 = vmul.f32 %v14033_v18, %v10028_v45 }
 0x2c7   :  { %14032 = vst [vmem:[#allocation87_spill] sm:$0xff] %v10360_v43  ;;  %v143_v43 = vadd.f32 %v131_v62, %v9050_v31  ;;  %v1659_v62 = vmul.f32 %v14033_v18, %v13981_v3 }
 0x2c8   :  { %v10366_v20 = vpop.permute.xlu0 %618  ;;  %1689 = vrot.lane.b32.xlu1 %v1661_v29, %s8630_s30 }
 0x2c9   :  { %14036 = vst [vmem:[#allocation89_spill] sm:$0xff] %v10366_v20  ;;  %v231_v29 = vadd.f32 %v9080_v57, %v143_v43 }
 0x2ca   :  { %1687 = vrot.lane.b32.xlu0 %v1660_v46, %s8630_s30  ;;  %v10372_v24 = vpop.permute.xlu1 %702  ;;  %v14039_v46 = vld [vmem:[#allocation25_spill] sm:$0xff] }
 0x2cb   :  { %14037 = vst [vmem:[#allocation92_spill] sm:$0xff] %v10372_v24  ;;  %v1753_v24 = vmul.f32 %v14039_v46, %v13974_v47  ;;  %v319_v37 = vadd.f32 %v9110_v28, %v231_v29  ;;  %v1755_v43 = vmul.f32 %v14039_v46, %v13976_v54  ;;  %v1754_v28 = vmul.f32 %v14039_v46, %v13980_v9 }
 0x2cc   :  { %v10377_v12 = vpop.permute.xlu0 %612  ;;  %1693 = vrot.lane.b32.xlu1 %v1663_v35, %s8630_s30 }
 0x2cd   :  { %v407_v35 = vadd.f32 %v9140_v22, %v319_v37  ;;  %v1752_v37 = vmul.f32 %v14039_v46, %v13981_v3 }
 0x2ce   :  { %1691 = vrot.lane.b32.xlu0 %v1662_v40, %s8630_s30  ;;  %v10384_v20 = vpop.permute.xlu1 %706 }
 0x2cf   :  { %14038 = vst [vmem:[#allocation95_spill] sm:$0xff] %v10384_v20  ;;  %v495_v40 = vadd.f32 %v9170_v30, %v407_v35  ;;  %v1756_v30 = vmul.f32 %v14039_v46, %v10028_v45 }
 0x2d0   :  { %v10389_v26 = vpop.permute.xlu0 %704  ;;  %1780 = vrot.lane.b32.xlu1 %v1753_v24, %s8631_s14 }
 0x2d1   :  { %v583_v24 = vadd.f32 %v9200_v33, %v495_v40 }
 0x2d2   :  { %1685 = vrot.lane.b32.xlu0 %v1659_v62, %s8630_s30  ;;  %v10396_v57 = vpop.permute.xlu1 %700 }
 0x2d3   :  { %v671_v29 = vadd.f32 %v9230_v4, %v583_v24 }
 0x2d4   :  { %v10401_v20 = vpop.permute.xlu0 %708  ;;  %1784 = vrot.lane.b32.xlu1 %v1755_v43, %s8631_s14  ;;  %v14044_v43 = vld [vmem:[#allocation27_spill] sm:$0xff] }
 0x2d5   :  { %14040 = vst [vmem:[#allocation94_spill] sm:$0xff] %v10401_v20  ;;  %v759_v35 = vadd.f32 %v13905_v49, %v671_v29  ;;  %v1847_v40 = vmul.f32 %v14044_v43, %v13980_v9  ;;  %v1846_v4 = vmul.f32 %v14044_v43, %v13974_v47  ;;  %v14047_v29 = vld [vmem:[#allocation63_spill] sm:$0xff] }
 0x2d6   :  { %1782 = vrot.lane.b32.xlu0 %v1754_v28, %s8631_s14  ;;  %v10408_v22 = vpop.permute.xlu1 %792 }
 0x2d7   :  { %14041 = vst [vmem:[#allocation96_spill] sm:$0xff] %v10408_v22  ;;  %v847_v28 = vadd.f32 %v13911_v55, %v759_v35  ;;  %v1848_v55 = vmul.f32 %v14044_v43, %v13976_v54  ;;  %v14048_v35 = vld [vmem:[#allocation69_spill] sm:$0xff] }
 0x2d8   :  { %v10413_v62 = vpop.permute.xlu0 %790  ;;  %1778 = vrot.lane.b32.xlu1 %v1752_v37, %s8631_s14  ;;  %v1849_v37 = vmul.f32 %v14044_v43, %v10028_v45 }
 0x2d9   :  { %14042 = vst [vmem:[#allocation99_spill] sm:$0xff] %v10413_v62  ;;  %v935_v24 = vadd.f32 %v13917_v10, %v847_v28  ;;  %v14049_v28 = vld [vmem:[#allocation32_spill] sm:$0xff] }
 0x2da   :  { %1786 = vrot.lane.b32.xlu0 %v1756_v30, %s8631_s14  ;;  %v10420_v33 = vpop.permute.xlu1 %796 }
 0x2db   :  { %14043 = vst [vmem:[#allocation98_spill] sm:$0xff] %v10420_v33  ;;  %v1023_v30 = vadd.f32 %v14047_v29, %v935_v24  ;;  %v1845_v24 = vmul.f32 %v14044_v43, %v13981_v3 }
 0x2dc   :  { %v10425_v22 = vpop.permute.xlu0 %794  ;;  %1875 = vrot.lane.b32.xlu1 %v1847_v40, %s8632_s27 }
 0x2dd   :  { %14045 = vst [vmem:[#allocation100_spill] sm:$0xff] %v10425_v22  ;;  %v1111_v40 = vadd.f32 %v14048_v35, %v1023_v30  ;;  %v1941_v30 = vmul.f32 %v14049_v28, %v13976_v54 }
 0x2de   :  { %1873 = vrot.lane.b32.xlu0 %v1846_v4, %s8632_s27  ;;  %v10432_v49 = vpop.permute.xlu1 %878  ;;  %v1939_v4 = vmul.f32 %v14049_v28, %v13974_v47 }
 0x2df   :  { %14046 = vst [vmem:[#allocation101_spill] sm:$0xff] %v10432_v49  ;;  %v14050_v49 = vld [vmem:[#allocation75_spill] sm:$0xff] }
 0x2e0   :  { %v10437_v33 = vpop.permute.xlu0 %788  ;;  %1879 = vrot.lane.b32.xlu1 %v1849_v37, %s8632_s27  ;;  %v1199_v22 = vadd.f32 %v14050_v49, %v1111_v40  ;;  %v1940_v49 = vmul.f32 %v14049_v28, %v13980_v9 }
 0x2e2   :  { %1877 = vrot.lane.b32.xlu0 %v1848_v55, %s8632_s27  ;;  %v10444_v10 = vpop.permute.xlu1 %882  ;;  %v1287_v37 = vadd.f32 %v13942_v21, %v1199_v22  ;;  %v1537_v21 = vsel %vm1525_vm15, %v9536_v61, %v10155_v41 }
 0x2e4   :  { %v10449_v62 = vpop.permute.xlu0 %880  ;;  %1966 = vrot.lane.b32.xlu1 %v1939_v4, %s13674_s1  ;;  %v1375_v55 = vadd.f32 %v13948_v53, %v1287_v37  ;;  %v1938_v53 = vmul.f32 %v14049_v28, %v13981_v3  ;;  %v1942_v37 = vmul.f32 %v14049_v28, %v10028_v45 }
 0x2e6   :  { %1871 = vrot.lane.b32.xlu0 %v1845_v24, %s8632_s27  ;;  %v10456_v29 = vpop.permute.xlu1 %876  ;;  %v1463_v22 = vadd.f32 %v9506_v39, %v1375_v55  ;;  %v14051_v39 = vld [vmem:[#allocation29_spill] sm:$0xff] }
 0x2e7   :  { %v2033_v41 = vmul.f32 %v14051_v39, %v13980_v9 }
 0x2e8   :  { %v10461_v35 = vpop.permute.xlu0 %884  ;;  %1970 = vrot.lane.b32.xlu1 %v1941_v30, %s13674_s1  ;;  %v1561_v4 = vadd.f32 %v1537_v21, %v1463_v22  ;;  %v1630_v30 = vsel %vm1618_vm9, %v9548_v5, %v10150_v0  ;;  %v2032_v21 = vmul.f32 %v14051_v39, %v13974_v47  ;;  %v1723_v22 = vsel %vm13711_vm10, %v9560_v25, %v10168_v60  ;;  %v14053_v25 = vld [vmem:[#allocation31_spill] sm:$0xff] }
 0x2e9   :  { %v2125_v60 = vmul.f32 %v14053_v25, %v13974_v47 }
 0x2ea   :  { %1968 = vrot.lane.b32.xlu0 %v1940_v49, %s13674_s1  ;;  %v10471_v40 = vpop.permute.xlu1 %968  ;;  %v1654_v55 = vadd.f32 %v1630_v30, %v1561_v4  ;;  %v2034_v4 = vmul.f32 %v14051_v39, %v13976_v54  ;;  %v1816_v30 = vsel %vm13709_vm11, %v13967_v11, %v10163_v34 }
 0x2ec   :  { %v10475_v24 = vpop.permute.xlu0 %966  ;;  %1964 = vrot.lane.b32.xlu1 %v1938_v53, %s13674_s1  ;;  %v1747_v5 = vadd.f32 %v1723_v22, %v1654_v55  ;;  %v2031_v22 = vmul.f32 %v14051_v39, %v13981_v3 }
 0x2ee   :  { %1972 = vrot.lane.b32.xlu0 %v1942_v37, %s13674_s1  ;;  %v10481_v61 = vpop.permute.xlu1 %972  ;;  %v2035_v37 = vmul.f32 %v14051_v39, %v10028_v45  ;;  %s14054_s1 = smov 13  }
 0x2f0   :  { %v10488_v49 = vpop.permute.xlu0 %970  ;;  %2061 = vrot.lane.b32.xlu1 %v2033_v41, %s13677_s26 }
 0x2f2   :  { %2059 = vrot.lane.b32.xlu0 %v2032_v21, %s13677_s26  ;;  %v10497_v53 = vpop.permute.xlu1 %1054  ;;  %v1840_v21 = vadd.f32 %v1816_v30, %v1747_v5  ;;  %v2126_v5 = vmul.f32 %v14053_v25, %v13980_v9  ;;  %v8480_v30 = vunpack.i.h.bf16 %v10204_v6 }
 0x2f4   :  { %v10501_v0 = vpop.permute.xlu0 %964  ;;  %2065 = vrot.lane.b32.xlu1 %v2035_v37, %s13677_s26  ;;  %v1909_v37 = vsel %vm13708_vm12, %v9677_v42, %v10181_v15  ;;  %v2124_v42 = vmul.f32 %v14053_v25, %v13981_v3  ;;  %v2002_v15 = vsel %vm13707_vm13, %v9761_v63, %v10176_v50  ;;  %v2219_v63 = vmul.f32 %v13973_v44, %v13980_v9 }
 0x2f5   :  { %v1933_v11 = vadd.f32 %v1909_v37, %v1840_v21  ;;  %v8479_v21 = vunpack.i.l.bf16 %v10204_v6  ;;  %v2128_v37 = vmul.f32 %v14053_v25, %v10028_v45  ;;  %v2362_v50 = vsel %vm13703_vm0, %v8480_v30, %v10199_v7 }
 0x2f6   :  { %2063 = vrot.lane.b32.xlu0 %v2034_v4, %s13677_s26  ;;  %v10507_v41 = vpop.permute.xlu1 %1058 }
 0x2f7   :  { %14052 = vst [vmem:[#allocation104_spill] sm:$0xff] %v10507_v41  ;;  %v2127_v41 = vmul.f32 %v14053_v25, %v13976_v54  ;;  %v2361_v6 = vsel %vm13703_vm0, %v8479_v21, %v8480_v30  ;;  %v2221_v30 = vmul.f32 %v13973_v44, %v10028_v45 }
 0x2f8   :  { %v10514_v55 = vpop.permute.xlu0 %1056  ;;  %2152 = vrot.lane.b32.xlu1 %v2125_v60, %s14054_s1 }
 0x2fa   :  { %2057 = vrot.lane.b32.xlu0 %v2031_v22, %s13677_s26  ;;  %v10523_v4 = vpop.permute.xlu1 %1052  ;;  %v2026_v22 = vadd.f32 %v2002_v15, %v1933_v11  ;;  %s14058_s26 = smov 12  }
 0x2fc   :  { %v10527_v34 = vpop.permute.xlu0 %1060  ;;  %2156 = vrot.lane.b32.xlu1 %v2127_v41, %s14054_s1 }
 0x2fe   :  { %2154 = vrot.lane.b32.xlu0 %v2126_v5, %s14054_s1  ;;  %v10533_v60 = vpop.permute.xlu1 %1144  ;;  %v2095_v5 = vsel %vm13706_vm8, %v9845_v2, %v10194_v36  ;;  %v2218_v2 = vmul.f32 %v13973_v44, %v13974_v47  ;;  %v14059_v36 = vmax.f32 %v9965_v16, 0.0  ;;  %v2281_v16 = vsel %vm13704_vm7, %v9981_v38, %v10209_v1 }
 0x2ff   :  { %14055 = vst [vmem:[#allocation103_spill] sm:$0xff] %v10533_v60  ;;  %v2119_v11 = vadd.f32 %v2095_v5, %v2026_v22  ;;  %v2188_v22 = vsel %vm13705_vm14, %v9923_v19, %v10189_v56  ;;  %v2363_v56 = vsel %vm13703_vm0, %v10199_v7, %v10214_v59  ;;  %v14064_v38 = vmax.f32 %v10005_v52, 0.0  ;;  %v14088_v59 = vld [vmem:[#allocation33_spill] sm:$0xff] }
 0x300   :  { %v10542_v41 = vpop.permute.xlu0 %1142  ;;  %2150 = vrot.lane.b32.xlu1 %v2124_v42, %s14054_s1  ;;  %v10565_v15 = vmax.f32 %v14059_v36, %v2361_v6  ;;  %v2360_v6 = vsel %vm13703_vm0, %v10224_v14, %v8479_v21  ;;  %v2217_v21 = vmul.f32 %v13973_v44, %v13981_v3  ;;  %v77_v36 = vsub.s32 5, %v13977_v27 }
 0x301   :  { %14056 = vst [vmem:[#allocation105_spill] sm:$0xff] %v10542_v41  ;;  %v2212_v5 = vadd.f32 %v2188_v22, %v2119_v11  ;;  %v10601_v11 = vmax.f32 %v14064_v38, %v2360_v6 }
 0x302   :  { %2158 = vrot.lane.b32.xlu0 %v2128_v37, %s14054_s1  ;;  %v10551_v60 = vpop.permute.xlu1 %1148  ;;  %14060 = vst [vmem:[#allocation107_spill] sm:$0xff] %v10565_v15  ;;  %v14061_v37 = vmax.f32 %v9971_v58, 0.0  ;;  %v2220_v58 = vmul.f32 %v13973_v44, %v13976_v54  ;;  %v14093_v44 = vld [vmem:[#allocation4_spill] sm:$0xff] }
 0x303   :  { %14057 = vst [vmem:[#allocation106_spill] sm:$0xff] %v10551_v60  ;;  %14065 = vst [vmem:[#allocation9_spill] sm:$0xff] %v10601_v11 }
 0x304   :  { %v10558_v42 = vpop.permute.xlu0 %1146  ;;  %2247 = vrot.lane.b32.xlu1 %v2219_v63, %s14058_s26  ;;  %v10569_v60 = vmax.f32 %v14061_v37, %v2362_v50  ;;  %v10589_v50 = vadd.f32 %v2281_v16, %v2212_v5  ;;  %v10625_v5 = vrot.slane %v10023_v8, %v77_v36 }
 0x306   :  { %14062 = vst [vmem:[#allocation90_spill] sm:$0xff] %v10569_v60  ;;  %2245 = vrot.lane.b32.xlu0 %v2218_v2, %s14058_s26  ;;  %v10572_v41 = vpop.permute.xlu1 %1230  ;;  %14063 = vst [vmem:[#allocation5_spill] sm:$0xff] %v10589_v50  ;;  %v8481_v1 = vpack.i.bf16 %v10569_v60, %v10565_v15  ;;  %v13680_v37 = vmax.f32 %v10589_v50, 0.0  ;;  %v417_v8 = vmul.f32 %v13984_v13, %v10625_v5  ;;  %v14070_v13 = vld [vmem:[#allocation14_spill] sm:$0xff]  ;;  %v14092_v15 = vld [vmem:[#allocation28_spill] sm:$0xff] }
 0x307   :  { %14068 = vst [vmem:[#allocation2_spill] sm:$0xff] %v10625_v5 }
 0x308   :  { %v10582_v63 = vpop.permute.xlu0 %1140  ;;  %2251 = vrot.lane.b32.xlu1 %v2221_v30, %s14058_s26  ;;  %v14066_v30 = vmax.f32 %v9973_v23, 0.0 }
 0x30a   :  { %2249 = vrot.lane.b32.xlu0 %v2220_v58, %s14058_s26  ;;  %v10592_v19 = vpop.permute.xlu1 %1234  ;;  %v10612_v22 = vmax.f32 %v14066_v30, %v2363_v56  ;;  %v241_v58 = vmul.f32 %v13982_v17, %v10625_v5  ;;  %v329_v17 = vmul.f32 %v13983_v51, %v10625_v5  ;;  %v505_v30 = vmul.f32 %v14070_v13, %v10625_v5  ;;  %v14072_v51 = vld [vmem:[#allocation16_spill] sm:$0xff] }
 0x30c   :  { %v10603_v2 = vpop.permute.xlu0 %1232  ;;  %8482 = vrot.lane.b32.xlu1 %v8481_v1, %s8617_s18  ;;  %14067 = vst [vmem:[#allocation6_spill] sm:$0xff] %v10612_v22  ;;  %v8486_v52 = vpack.i.bf16 %v10601_v11, %v10612_v22  ;;  %v153_v1 = vmul.f32 %v13975_v32, %v10625_v5  ;;  %v593_v32 = vmul.f32 %v13986_v48, %v10625_v5  ;;  %v14073_v48 = vld [vmem:[#allocation15_spill] sm:$0xff]  ;;  %v14090_v11 = vld [vmem:[#allocation22_spill] sm:$0xff] }
 0x30e   :  { %2243 = vrot.lane.b32.xlu0 %v2217_v21, %s14058_s26  ;;  %v10615_v7 = vpop.permute.xlu1 %1228 }
 0x310   :  { %v10619_v16 = vpop.permute.xlu0 %1236  ;;  %2352 = vrot.lane.b32.xlu1 %v13680_v37, %s8613_s2 }
 0x312   :  { %8487 = vrot.lane.b32.xlu0 %v8486_v52, %s8617_s18  ;;  %v10628_v23 = vpop.permute.xlu1 %1320 }
 0x314   :  { %v10632_v6 = vpop.permute.xlu0 %1318  ;;  %270 = vrot.lane.b32.xlu1 %v241_v58, %s8614_s15  ;;  %v769_v58 = vmul.f32 %v14072_v51, %v10625_v5  ;;  %v14078_v51 = vld [vmem:[#allocation24_spill] sm:$0xff] }
 0x315   :  { %v857_v37 = vmul.f32 %v14078_v51, %v10625_v5  ;;  %v14085_v51 = vld [vmem:[#allocation21_spill] sm:$0xff] }
 0x316   :  { %182 = vrot.lane.b32.xlu0 %v153_v1, %s8613_s2  ;;  %v10638_v56 = vpop.permute.xlu1 %1324  ;;  %v1297_v45 = vmul.f32 %v14085_v51, %v10625_v5 }
 0x318   :  { %v10642_v38 = vpop.permute.xlu0 %1322  ;;  %446 = vrot.lane.b32.xlu1 %v417_v8, %s13681_s17  ;;  %v681_v8 = vmul.f32 %v14073_v48, %v10625_v5  ;;  %s14079_s17 = smov 96   ;;  %v14081_v48 = vld [vmem:[#allocation26_spill] sm:$0xff] }
 0x319   :  { %v1121_v14 = vmul.f32 %v14081_v48, %v10625_v5  ;;  %v14087_v48 = vld [vmem:[#allocation20_spill] sm:$0xff] }
 0x31a   :  { %358 = vrot.lane.b32.xlu0 %v329_v17, %s8615_s16  ;;  %v10648_v21 = vpop.permute.xlu1 %1406  ;;  %v1209_v50 = vmul.f32 %v14087_v48, %v10625_v5  ;;  %v120_v48 = vmul.f32 %v14088_v59, %v13981_v3 }
 0x31c   :  { %v10652_v36 = vpop.permute.xlu0 %1316  ;;  %622 = vrot.lane.b32.xlu1 %v593_v32, %s8618_s19  ;;  %v14075_v32 = vld [vmem:[#allocation17_spill] sm:$0xff]  ;;  %s14077_s19 = smov 72  }
 0x31d   :  { %14069 = vst [vmem:[#allocation7_spill] sm:$0xff] %v10652_v36  ;;  %v945_v13 = vmul.f32 %v14075_v32, %v10625_v5  ;;  %v14083_v32 = vld [vmem:[#allocation18_spill] sm:$0xff] }
 0x31e   :  { %534 = vrot.lane.b32.xlu0 %v505_v30, %s8617_s18  ;;  %v10658_v52 = vpop.permute.xlu1 %1410  ;;  %v1033_v22 = vmul.f32 %v14083_v32, %v10625_v5  ;;  %v2538_v32 = vld [vmem:[%s13452_s5] sm:$0x3]  ;;  %s14127_s5 = smov 14  }
 0x31f   :  { %14071 = vst [vmem:[#allocation8_spill] sm:$0xff] %v10658_v52  ;;  %v14102_v52 = vld [vmem:[#allocation60_spill] sm:$0xff] }
 0x320   :  { %v10662_v1 = vpop.permute.xlu0 %1408  ;;  %798 = vrot.lane.b32.xlu1 %v769_v58, %s8620_s21 }
 0x322   :  { %710 = vrot.lane.b32.xlu0 %v681_v8, %s8619_s20  ;;  %v10668_v17 = vpop.permute.xlu1 %1404 }
 0x323   :  { %14074 = vst [vmem:[#allocation11_spill] sm:$0xff] %v10668_v17 }
 0x324   :  { %v10672_v30 = vpop.permute.xlu0 %1412  ;;  %974 = vrot.lane.b32.xlu1 %v945_v13, %s14077_s19  ;;  %s8653_s19 = smov 88  }
 0x325   :  { %14076 = vst [vmem:[#allocation12_spill] sm:$0xff] %v10672_v30  ;;  %v14096_v30 = vld [vmem:[#allocation50_spill] sm:$0xff] }
 0x326   :  { %886 = vrot.lane.b32.xlu0 %v857_v37, %s14079_s17  ;;  %v10678_v58 = vpop.permute.xlu1 %1503  ;;  %s8646_s17 = smov 103  }
 0x327   :  { %14080 = vst [vmem:[#allocation13_spill] sm:$0xff] %v10678_v58  ;;  %v14140_v58 = vld [vmem:[#allocation71_spill] sm:$0xff] }
 0x328   :  { %v10682_v8 = vpop.permute.xlu0 %1501  ;;  %1150 = vrot.lane.b32.xlu1 %v1121_v14, %s13995_s24  ;;  %v121_v14 = vmul.f32 %v14088_v59, %v13974_v47  ;;  %v123_v47 = vmul.f32 %v14088_v59, %v13976_v54  ;;  %s8650_s24 = smov 91  }
 0x329   :  { %14082 = vst [vmem:[#allocation19_spill] sm:$0xff] %v10682_v8 }
 0x32a   :  { %1062 = vrot.lane.b32.xlu0 %v1033_v22, %s13992_s0  ;;  %v10688_v13 = vpop.permute.xlu1 %1507  ;;  %v122_v22 = vmul.f32 %v14088_v59, %v13980_v9  ;;  %v1385_v9 = vmul.f32 %v14092_v15, %v10625_v5  ;;  %v14097_v59 = vld [vmem:[#allocation54_spill] sm:$0xff]  ;;  %s8655_s0 = smov 79  }
 0x32b   :  { %14084 = vst [vmem:[#allocation30_spill] sm:$0xff] %v10688_v13  ;;  %v14094_v13 = vld [vmem:[#allocation3_spill] sm:$0xff] }
 0x32c   :  { %v10692_v37 = vpop.permute.xlu0 %1505  ;;  %1326 = vrot.lane.b32.xlu1 %v1297_v45, %s14009_s22  ;;  %v1478_v45 = vmul.f32 %v14090_v11, %v10625_v5  ;;  %v133_v11 = vadd.f32 %v121_v14, %v9050_v31  ;;  %v134_v3 = vadd.f32 %v122_v22, %v9050_v31  ;;  %v14099_v14 = vld [vmem:[#allocation55_spill] sm:$0xff]  ;;  %v135_v22 = vadd.f32 %v123_v47, %v9050_v31  ;;  %s14135_s22 = smov 15  }
 0x32d   :  { %14086 = vst [vmem:[#allocation10_spill] sm:$0xff] %v10692_v37  ;;  %v10722_v37 = vrot.slane %v2538_v32, %v14094_v13  ;;  %v132_v13 = vadd.f32 %v120_v48, %v9050_v31  ;;  %v1757_v47 = vmul.f32 %v14039_v46, %v10625_v5 }
 0x32e   :  { %1238 = vrot.lane.b32.xlu0 %v1209_v50, %s14001_s25  ;;  %v10705_v51 = vpop.permute.xlu1 %1594  ;;  %v10719_v50 = vrot.slane %v2538_v32, %v14093_v44  ;;  %v1664_v44 = vmul.f32 %v14033_v18, %v10625_v5  ;;  %v197_v32 = vsel %vm13703_vm0, %v14099_v14, %v14096_v30  ;;  %v14104_v18 = vld [vmem:[#allocation23_spill] sm:$0xff]  ;;  %s8648_s25 = smov 101  }
 0x32f   :  { %14089 = vst [vmem:[#allocation25_spill] sm:$0xff] %v10705_v51  ;;  %v14095_v51 = vld [vmem:[#allocation53_spill] sm:$0xff]  ;;  %v1571_v48 = vmul.f32 %v14104_v18, %v10625_v5  ;;  %v10765_v18 = vadd.s32 8, %v13977_v27 }
 0x330   :  { %v10713_v60 = vpop.permute.xlu0 %1499  ;;  %1509 = vrot.lane.b32.xlu1 %v1478_v45, %s8628_s28  ;;  %v198_v54 = vsel %vm13703_vm0, %v14096_v30, %v14095_v51  ;;  %v199_v45 = vsel %vm13703_vm0, %v14095_v51, %v14097_v59  ;;  %v14101_v51 = vld [vmem:[#allocation57_spill] sm:$0xff]  ;;  %v1850_v30 = vmul.f32 %v14044_v43, %v10625_v5  ;;  %vm2547_vm7 = vcmp.eq.s32.totalorder %v13977_v27, %v10719_v50  ;;  %s14544_s28 = smov 124  }
 0x331   :  { %14091 = vst [vmem:[#allocation27_spill] sm:$0xff] %v10713_v60  ;;  %v14100_v60 = vld [vmem:[#allocation56_spill] sm:$0xff]  ;;  %v221_v14 = vadd.f32 %v198_v54, %v133_v11  ;;  %v222_v31 = vadd.f32 %v199_v45, %v134_v3  ;;  %14106 = vst [vmem:[#allocation75_spill] sm:$0xff] %v10765_v18  ;;  %v10772_v43 = vadd.s32 16, %v13977_v27  ;;  %vm2550_vm14 = vcmp.eq.s32.totalorder %v10765_v18, %v10722_v37  ;;  %v14111_v3 = vld [vmem:[#allocation66_spill] sm:$0xff] }
 0x332   :  { %1414 = vrot.lane.b32.xlu0 %v1385_v9, %s14015_s23  ;;  %v10733_v15 = vpop.permute.xlu1 %1598  ;;  %v200_v17 = vsel %vm13703_vm0, %v14097_v59, %v14100_v60  ;;  %v286_v9 = vsel %vm13710_vm1, %v14102_v52, %v14101_v51  ;;  %v2036_v59 = vmul.f32 %v14051_v39, %v10625_v5  ;;  %v1943_v60 = vmul.f32 %v14049_v28, %v10625_v5  ;;  %v14108_v28 = vld [vmem:[#allocation61_spill] sm:$0xff]  ;;  %s8638_s23 = smov 112  }
 0x333   :  { %14098 = vst [vmem:[#allocation63_spill] sm:$0xff] %v10733_v15  ;;  %v223_v8 = vadd.f32 %v200_v17, %v135_v22  ;;  %vm2548_vm0 = vcmp.eq.s32.totalorder %v13977_v27, %v10722_v37  ;;  %v309_v46 = vadd.f32 %v286_v9, %v221_v14  ;;  %14107 = vst [vmem:[#allocation29_spill] sm:$0xff] %v10772_v43  ;;  %v10785_v11 = vadd.s32 24, %v13977_v27 }
 0x334   :  { %v10748_v15 = vpop.permute.xlu0 %1596  ;;  %1695 = vrot.lane.b32.xlu1 %v1664_v44, %s8630_s30  ;;  %v287_v39 = vsel %vm13710_vm1, %v14101_v51, %v14108_v28  ;;  %vm2549_vm8 = vcmp.eq.s32.totalorder %v10765_v18, %v10719_v50  ;;  %v285_v54 = vsel %vm13710_vm1, %v14111_v3, %v14102_v52  ;;  %vm10790_vm13 = vmpackc.low %vm2550_vm14, %vm2548_vm0  ;;  %vm2552_vm12 = vcmp.eq.s32.totalorder %v10772_v43, %v10722_v37  ;;  %v14125_v3 = vld [vmem:[#allocation62_spill] sm:$0xff]  ;;  %s8643_s30 = smov 114  }
 0x335   :  { %14103 = vst [vmem:[#allocation69_spill] sm:$0xff] %v10748_v15  ;;  %v220_v15 = vadd.f32 %v197_v32, %v132_v13  ;;  %14110 = vst [vmem:[#allocation14_spill] sm:$0xff] %v10785_v11  ;;  %vm2551_vm11 = vcmp.eq.s32.totalorder %v10772_v43, %v10719_v50  ;;  %v10799_v13 = vadd.s32 32, %v13977_v27  ;;  %v14115_v32 = vld [vmem:[#allocation59_spill] sm:$0xff]  ;;  %v13714_v51 = vmov 1.0|1.0  }
 0x336   :  { %1602 = vrot.lane.b32.xlu0 %v1571_v48, %s8629_s29  ;;  %v10762_v44 = vpop.permute.xlu1 %1592  ;;  %v288_v22 = vsel %vm13710_vm1, %v14108_v28, %v14115_v32  ;;  %7987 = vmatprep.subr.msk.bf16.mxu1 %vm10790_vm13, %v13714_v51  ;;  %vm10813_vm0 = vmpackc.low %vm2549_vm8, %vm2547_vm7  ;;  %vm2554_vm14 = vcmp.eq.s32.totalorder %v10785_v11, %v10722_v37  ;;  %vm2553_vm1 = vcmp.eq.s32.totalorder %v10785_v11, %v10719_v50  ;;  %v10822_v48 = vadd.s32 40, %v13977_v27  ;;  %v14152_v32 = vld [vmem:[#allocation74_spill] sm:$0xff]  ;;  %s8641_s29 = smov 116  }
 0x337   :  { %14105 = vst [vmem:[#allocation32_spill] sm:$0xff] %v10762_v44  ;;  %14114 = vst [vmem:[#allocation16_spill] sm:$0xff] %v10799_v13  ;;  %7989 = vmatpush1.bf16.msk.msra.mxu1 %vm10813_vm0, %v13714_v51  ;;  %vm2556_vm7 = vcmp.eq.s32.totalorder %v10799_v13, %v10722_v37  ;;  %v10834_v14 = vadd.s32 48, %v13977_v27  ;;  %v10837_v28 = vadd.s32 56, %v13977_v27  ;;  %7825 = vmatprep.subr.msk.bf16.mxu0 %vm10790_vm13, %v13714_v51  ;;  %v14134_v43 = vmov 1.0|1.0  }
 0x338   :  { %v10777_v17 = vpop.permute.xlu0 %1600  ;;  %1881 = vrot.lane.b32.xlu1 %v1850_v30, %s8632_s27  ;;  %14119 = vst [vmem:[#allocation17_spill] sm:$0xff] %v10822_v48  ;;  %v310_v30 = vadd.f32 %v287_v39, %v222_v31  ;;  %vm10827_vm10 = vmpackc.low %vm2554_vm14, %vm2552_vm12  ;;  %v308_v31 = vadd.f32 %v285_v54, %v220_v15  ;;  %v14124_v39 = vld [vmem:[#allocation67_spill] sm:$0xff]  ;;  %vm2558_vm12 = vcmp.eq.s32.totalorder %v10822_v48, %v10722_v37  ;;  %v14130_v15 = vld [vmem:[#allocation65_spill] sm:$0xff] }
 0x339   :  { %14109 = vst [vmem:[#allocation31_spill] sm:$0xff] %v10777_v17  ;;  %14122 = vst [vmem:[#allocation24_spill] sm:$0xff] %v10834_v14  ;;  %v374_v11 = vsel %vm13749_vm2, %v14125_v3, %v14124_v39  ;;  %7991 = vmatprep.subr.msk.bf16.mxu1 %vm10827_vm10, %v13714_v51  ;;  %v375_v54 = vsel %vm13749_vm2, %v14124_v39, %v14130_v15  ;;  %7827 = vmatpush1.bf16.msk.msra.mxu0 %vm10813_vm0, %v14134_v43 }
 0x33a   :  { %1788 = vrot.lane.b32.xlu0 %v1757_v47, %s8631_s14  ;;  %v10805_v52 = vpop.permute.xlu1 %1689  ;;  %14123 = vst [vmem:[#allocation26_spill] sm:$0xff] %v10837_v28  ;;  %vm10854_vm8 = vmpackc.low %vm2553_vm1, %vm2551_vm11  ;;  %vm2555_vm1 = vcmp.eq.s32.totalorder %v10799_v13, %v10719_v50  ;;  %vm2557_vm11 = vcmp.eq.s32.totalorder %v10822_v48, %v10719_v50  ;;  %vm2560_vm14 = vcmp.eq.s32.totalorder %v10834_v14, %v10722_v37  ;;  %v14146_v47 = vld [vmem:[#allocation79_spill] sm:$0xff]  ;;  %s8645_s14 = smov 104  }
 0x33b   :  { %14116 = vst [vmem:[#allocation15_spill] sm:$0xff] %v10805_v52  ;;  %vm10866_vm13 = vmpackc.low %vm2558_vm12, %vm2556_vm7  ;;  %vm2562_vm7 = vcmp.eq.s32.totalorder %v10837_v28, %v10722_v37  ;;  %v311_v17 = vadd.f32 %v288_v22, %v223_v8  ;;  %v397_v44 = vadd.f32 %v374_v11, %v309_v46  ;;  %v2129_v9 = vmul.f32 %v14053_v25, %v10625_v5  ;;  %v14141_v8 = vld [vmem:[#allocation73_spill] sm:$0xff]  ;;  %v14145_v22 = vld [vmem:[#allocation78_spill] sm:$0xff] }
 0x33c   :  { %v10845_v18 = vpop.permute.xlu0 %1687  ;;  %2067 = vrot.lane.b32.xlu1 %v2036_v59, %s14127_s5  ;;  %v14131_v59 = vld [vmem:[#allocation68_spill] sm:$0xff]  ;;  %7993 = vmatpush1.bf16.msk.msra.mxu1 %vm10854_vm8, %v14134_v43  ;;  %v462_v46 = vsel %vm13728_vm3, %v14141_v8, %v14140_v58  ;;  %vm10931_vm0 = vmpackc.low %vm2562_vm7, %vm2560_vm14  ;;  %vm2559_vm12 = vcmp.eq.s32.totalorder %v10834_v14, %v10719_v50  ;;  %v14154_v5 = vld [vmem:[#allocation77_spill] sm:$0xff]  ;;  %s8651_s5 = smov 90  }
 0x33d   :  { %14126 = vst [vmem:[#allocation18_spill] sm:$0xff] %v10845_v18  ;;  %v373_v45 = vsel %vm13749_vm2, %v14131_v59, %v14125_v3  ;;  %v10885_v3 = vadd.s32 64, %v13977_v27  ;;  %v10888_v59 = vadd.s32 72, %v13977_v27  ;;  %7829 = vmatprep.subr.msk.bf16.mxu0 %vm10827_vm10, %v14134_v43  ;;  %v14139_v18 = vld [vmem:[#allocation72_spill] sm:$0xff]  ;;  %7995 = vmatprep.subr.msk.bf16.mxu1 %vm10866_vm13, %v14134_v43  ;;  %vm10915_vm10 = vmpackc.low %vm2557_vm11, %vm2555_vm1  ;;  %vm2561_vm1 = vcmp.eq.s32.totalorder %v10837_v28, %v10719_v50  ;;  %v14165_v28 = vld [vmem:[#allocation83_spill] sm:$0xff] }
 0x33e   :  { %1974 = vrot.lane.b32.xlu0 %v1943_v60, %s14135_s22  ;;  %v10878_v39 = vpop.permute.xlu1 %1693  ;;  %v398_v60 = vadd.f32 %v375_v54, %v310_v30  ;;  %v376_v52 = vsel %vm13749_vm2, %v14130_v15, %v14139_v18  ;;  %v463_v30 = vsel %vm13728_vm3, %v14140_v58, %v14145_v22  ;;  %7831 = vmatpush1.bf16.msk.msra.mxu0 %vm10854_vm8, %v14134_v43  ;;  %v10950_v54 = vadd.s32 80, %v13977_v27  ;;  %v14153_v18 = vld [vmem:[#allocation81_spill] sm:$0xff]  ;;  %vm10975_vm8 = vmpackc.low %vm2561_vm1, %vm2559_vm12  ;;  %s8647_s22 = smov 102  }
 0x33f   :  { %14136 = vst [vmem:[#allocation21_spill] sm:$0xff] %v10878_v39  ;;  %14137 = vst [vmem:[#allocation20_spill] sm:$0xff] %v10885_v3  ;;  %v396_v39 = vadd.f32 %v373_v45, %v308_v31  ;;  %v461_v31 = vsel %vm13728_vm3, %v14146_v47, %v14141_v8  ;;  %vm2564_vm11 = vcmp.eq.s32.totalorder %v10885_v3, %v10722_v37  ;;  %v10953_v45 = vadd.s32 88, %v13977_v27 }
 0x340   :  { %14138 = vst [vmem:[#allocation22_spill] sm:$0xff] %v10888_v59  ;;  %v10904_v11 = vpop.permute.xlu0 %1691  ;;  %vm2566_vm14 = vcmp.eq.s32.totalorder %v10888_v59, %v10722_v37  ;;  %14150 = vst [vmem:[#allocation3_spill] sm:$0xff] %v10950_v54  ;;  %v399_v8 = vadd.f32 %v376_v52, %v311_v17  ;;  %v485_v47 = vadd.f32 %v462_v46, %v397_v44  ;;  %7997 = vmatpush1.bf16.msk.msra.mxu1 %vm10915_vm10, %v14134_v43  ;;  %v14158_v17 = vld [vmem:[#allocation80_spill] sm:$0xff]  ;;  %v14177_v46 = vld [vmem:[#allocation95_spill] sm:$0xff] }
 0x341   :  { %14142 = vst [vmem:[#allocation28_spill] sm:$0xff] %v10904_v11  ;;  %14151 = vst [vmem:[#allocation53_spill] sm:$0xff] %v10953_v45  ;;  %v486_v48 = vadd.f32 %v463_v30, %v398_v60  ;;  %v484_v13 = vadd.f32 %v461_v31, %v396_v39  ;;  %v550_v11 = vsel %vm13751_vm4, %v14154_v5, %v14153_v18  ;;  %7999 = vmatprep.subr.msk.bf16.mxu1 %vm10931_vm0, %v14134_v43  ;;  %v14159_v39 = vld [vmem:[#allocation84_spill] sm:$0xff] }
 0x342   :  { %2160 = vrot.lane.b32.xlu0 %v2129_v9, %s14054_s1  ;;  %v10943_v58 = vpop.permute.xlu1 %1780  ;;  %v464_v9 = vsel %vm13728_vm3, %v14145_v22, %v14152_v32  ;;  %v551_v52 = vsel %vm13751_vm4, %v14153_v18, %v14158_v17  ;;  %v549_v60 = vsel %vm13751_vm4, %v14159_v39, %v14154_v5  ;;  %vm10991_vm7 = vmpackc.low %vm2566_vm14, %vm2564_vm11  ;;  %vm2563_vm12 = vcmp.eq.s32.totalorder %v10885_v3, %v10719_v50  ;;  %v14166_v32 = vld [vmem:[#allocation85_spill] sm:$0xff]  ;;  %v14183_v3 = vld [vmem:[#allocation99_spill] sm:$0xff] }
 0x343   :  { %14149 = vst [vmem:[#allocation4_spill] sm:$0xff] %v10943_v58  ;;  %vm2565_vm1 = vcmp.eq.s32.totalorder %v10888_v59, %v10719_v50  ;;  %7833 = vmatprep.subr.msk.bf16.mxu0 %vm10866_vm13, %v14134_v43  ;;  %vm2568_vm3 = vcmp.eq.s32.totalorder %v10950_v54, %v10722_v37  ;;  %vm2570_vm11 = vcmp.eq.s32.totalorder %v10953_v45, %v10722_v37  ;;  %v11009_v18 = vadd.s32 96, %v13977_v27  ;;  %v14174_v59 = vld [vmem:[#allocation92_spill] sm:$0xff] }
 0x344   :  { %v10964_v58 = vpop.permute.xlu0 %1685  ;;  %v11012_v22 = vadd.s32 104, %v13977_v27  ;;  %7835 = vmatpush1.bf16.msk.msra.mxu0 %vm10915_vm10, %v14134_v43  ;;  %v487_v51 = vadd.f32 %v464_v9, %v399_v8  ;;  %v573_v30 = vadd.f32 %v550_v11, %v485_v47  ;;  %8001 = vmatpush1.bf16.msk.msra.mxu1 %vm10975_vm8, %v14134_v43  ;;  %v574_v31 = vadd.f32 %v551_v52, %v486_v48  ;;  %vm11037_vm13 = vmpackc.low %vm2565_vm1, %vm2563_vm12  ;;  %v14170_v48 = vld [vmem:[#allocation89_spill] sm:$0xff] }
 0x345   :  { %14155 = vst [vmem:[#allocation50_spill] sm:$0xff] %v10964_v58  ;;  %14163 = vst [vmem:[#allocation55_spill] sm:$0xff] %v11009_v18  ;;  %v572_v39 = vadd.f32 %v549_v60, %v484_v13  ;;  %v552_v14 = vsel %vm13751_vm4, %v14158_v17, %v14165_v28  ;;  %8003 = vmatprep.subr.msk.bf16.mxu1 %vm10991_vm7, %v14134_v43  ;;  %v639_v11 = vsel %vm636_vm5, %v14166_v32, %v14170_v48  ;;  %v14173_v17 = vld [vmem:[#allocation87_spill] sm:$0xff] }
 0x346   :  { %v11002_v5 = vpop.permute.xlu1 %1784  ;;  %14164 = vst [vmem:[#allocation57_spill] sm:$0xff] %v11012_v22  ;;  %vm11053_vm10 = vmpackc.low %vm2570_vm11, %vm2568_vm3  ;;  %vm2567_vm14 = vcmp.eq.s32.totalorder %v10950_v54, %v10719_v50  ;;  %vm2569_vm12 = vcmp.eq.s32.totalorder %v10953_v45, %v10719_v50  ;;  %7837 = vmatprep.subr.msk.bf16.mxu0 %vm10931_vm0, %v14134_v43  ;;  %vm2572_vm1 = vcmp.eq.s32.totalorder %v11009_v18, %v10722_v37  ;;  %v11071_v47 = vadd.s32 112, %v13977_v27  ;;  %v14182_v54 = vld [vmem:[#allocation96_spill] sm:$0xff] }
 0x347   :  { %14162 = vst [vmem:[#allocation54_spill] sm:$0xff] %v11002_v5  ;;  %v14167_v5 = vld [vmem:[#allocation86_spill] sm:$0xff]  ;;  %vm2574_vm3 = vcmp.eq.s32.totalorder %v11012_v22, %v10722_v37  ;;  %v575_v15 = vadd.f32 %v552_v14, %v487_v51  ;;  %v640_v52 = vsel %vm636_vm5, %v14170_v48, %v14173_v17  ;;  %v662_v60 = vadd.f32 %v639_v11, %v574_v31  ;;  %vm11102_vm0 = vmpackc.low %vm2569_vm12, %vm2567_vm14 }
 0x348   :  { %v638_v58 = vsel %vm636_vm5, %v14167_v5, %v14166_v32  ;;  %v11026_v36 = vpop.permute.xlu0 %1782  ;;  %v637_v25 = vsel %vm636_vm5, %v10377_v12, %v14167_v5  ;;  %v11074_v32 = vadd.s32 120, %v13977_v27  ;;  %7839 = vmatpush1.bf16.msk.msra.mxu0 %vm10975_vm8, %v14134_v43  ;;  %8005 = vmatpush1.bf16.msk.msra.mxu1 %vm11037_vm13, %v14134_v43  ;;  %v726_v44 = vsel %vm13742_vm6, %v14174_v59, %v10389_v26  ;;  %vm11118_vm8 = vmpackc.low %vm2574_vm3, %vm2572_vm1 }
 0x349   :  { %v661_v9 = vadd.f32 %v638_v58, %v573_v30  ;;  %7841 = vmatprep.subr.msk.bf16.mxu0 %vm10991_vm7, %v14134_v43  ;;  %v660_v5 = vadd.f32 %v637_v25, %v572_v39  ;;  %8007 = vmatprep.subr.msk.bf16.mxu1 %vm11053_vm10, %v14134_v43  ;;  %v727_v51 = vsel %vm13742_vm6, %v10389_v26, %v14177_v46  ;;  %vm14184_vm1 = vcmask 793600  }
 0x34a   :  { %v11064_v12 = vpop.permute.xlu1 %1778  ;;  %v725_v30 = vsel %vm13742_vm6, %v10396_v57, %v14174_v59  ;;  %vm2571_vm7 = vcmp.eq.s32.totalorder %v11009_v18, %v10719_v50  ;;  %vm2573_vm11 = vcmp.eq.s32.totalorder %v11012_v22, %v10719_v50  ;;  %vm2576_vm14 = vcmp.eq.s32.totalorder %v11071_v47, %v10722_v37  ;;  %vm14189_vm3 = vmmov %vm14184_vm1 }
 0x34b   :  { %vm2578_vm12 = vcmp.eq.s32.totalorder %v11074_v32, %v10722_v37  ;;  %v11133_v57 = vadd.s32 128, %v13977_v27  ;;  %v11136_v59 = vadd.s32 136, %v13977_v27  ;;  %v663_v39 = vadd.f32 %v640_v52, %v575_v15 }
 0x34c   :  { %v11091_v14 = vpop.permute.xlu0 %1786  ;;  %7843 = vmatpush1.bf16.msk.msra.mxu0 %vm11037_vm13, %v14134_v43  ;;  %v749_v48 = vadd.f32 %v726_v44, %v661_v9  ;;  %8009 = vmatpush1.bf16.msk.msra.mxu1 %vm11102_vm0, %v14134_v43  ;;  %v750_v11 = vadd.f32 %v727_v51, %v662_v60  ;;  %v748_v25 = vadd.f32 %v725_v30, %v660_v5  ;;  %vm11164_vm13 = vmpackc.low %vm2573_vm11, %vm2571_vm7  ;;  %v14187_v9 = vld [vmem:[#allocation100_spill] sm:$0xff]  ;;  %v14194_v51 = vld [vmem:[#allocation98_spill] sm:$0xff] }
 0x34d   :  { %14180 = vst [vmem:[#allocation60_spill] sm:$0xff] %v11133_v57  ;;  %14181 = vst [vmem:[#allocation23_spill] sm:$0xff] %v11136_v59  ;;  %7845 = vmatprep.subr.msk.bf16.mxu0 %vm11053_vm10, %v14134_v43  ;;  %v728_v45 = vsel %vm13742_vm6, %v14177_v46, %v10401_v20  ;;  %v814_v13 = vsel %vm14184_vm1, %v14183_v3, %v14182_v54  ;;  %8011 = vmatprep.subr.msk.bf16.mxu1 %vm11118_vm8, %v14134_v43  ;;  %v14196_v20 = vld [vmem:[#allocation101_spill] sm:$0xff]  ;;  %vm14241_vm6 = vcmask 556032  }
 0x34e   :  { %v11126_v26 = vpop.permute.xlu1 %1875  ;;  %vm14188_vm10 = vmmov %vm14184_vm1  ;;  %v813_v60 = vsel %vm14189_vm3, %v10437_v33, %v14183_v3  ;;  %vm2575_vm7 = vcmp.eq.s32.totalorder %v11071_v47, %v10719_v50  ;;  %vm2577_vm11 = vcmp.eq.s32.totalorder %v11074_v32, %v10719_v50  ;;  %vm2582_vm3 = vcmp.eq.s32.totalorder %v11136_v59, %v10722_v37 }
 0x34f   :  { %v815_v52 = vsel %vm14188_vm10, %v14182_v54, %v14187_v9  ;;  %vm11180_vm1 = vmpackc.low %vm2578_vm12, %vm2576_vm14  ;;  %vm2580_vm10 = vcmp.eq.s32.totalorder %v11133_v57, %v10722_v37  ;;  %v11195_v33 = vadd.s32 144, %v13977_v27  ;;  %v11198_v3 = vadd.s32 152, %v13977_v27 }
 0x350   :  { %v11153_v15 = vpop.permute.xlu0 %1873  ;;  %7847 = vmatpush1.bf16.msk.msra.mxu0 %vm11102_vm0, %v14134_v43  ;;  %v751_v44 = vadd.f32 %v728_v45, %v663_v39  ;;  %v837_v46 = vadd.f32 %v814_v13, %v749_v48  ;;  %8013 = vmatpush1.bf16.msk.msra.mxu1 %vm11164_vm13, %v14134_v43  ;;  %vm14195_vm14 = vcmask 793600   ;;  %v838_v22 = vadd.f32 %v815_v52, %v750_v11  ;;  %vm11226_vm0 = vmpackc.low %vm2577_vm11, %vm2575_vm7  ;;  %v14220_v11 = vld [vmem:[#allocation104_spill] sm:$0xff] }
 0x351   :  { %14192 = vst [vmem:[#allocation61_spill] sm:$0xff] %v11195_v33  ;;  %14193 = vst [vmem:[#allocation66_spill] sm:$0xff] %v11198_v3  ;;  %7849 = vmatprep.subr.msk.bf16.mxu0 %vm11118_vm8, %v14134_v43  ;;  %v816_v30 = vsel %vm14195_vm14, %v14187_v9, %v14194_v51  ;;  %v836_v18 = vadd.f32 %v813_v60, %v748_v25  ;;  %vm14197_vm12 = vcmask 785408   ;;  %8015 = vmatprep.subr.msk.bf16.mxu1 %vm11180_vm1, %v14134_v43 }
 0x352   :  { %v11188_v54 = vpop.permute.xlu1 %1879  ;;  %v902_v58 = vsel %vm14197_vm12, %v14196_v20, %v10449_v62  ;;  %vm14200_vm8 = vmmov %vm14197_vm12  ;;  %vm2579_vm7 = vcmp.eq.s32.totalorder %v11133_v57, %v10719_v50  ;;  %vm2581_vm11 = vcmp.eq.s32.totalorder %v11136_v59, %v10719_v50  ;;  %v839_v25 = vadd.f32 %v816_v30, %v751_v44 }
 0x353   :  { %v903_v39 = vsel %vm14200_vm8, %v10449_v62, %v10444_v10  ;;  %vm14201_vm14 = vmmov %vm14200_vm8  ;;  %vm2584_vm8 = vcmp.eq.s32.totalorder %v11195_v33, %v10722_v37  ;;  %v925_v13 = vadd.f32 %v902_v58, %v837_v46 }
 0x354   :  { %v11215_v45 = vpop.permute.xlu0 %1877  ;;  %v901_v48 = vsel %vm14201_vm14, %v10456_v29, %v14196_v20  ;;  %vm11242_vm12 = vmpackc.low %vm2582_vm3, %vm2580_vm10  ;;  %vm2586_vm14 = vcmp.eq.s32.totalorder %v11198_v3, %v10722_v37  ;;  %v11257_v20 = vadd.s32 160, %v13977_v27  ;;  %v11260_v29 = vadd.s32 168, %v13977_v27  ;;  %7851 = vmatpush1.bf16.msk.msra.mxu0 %vm11164_vm13, %v14134_v43  ;;  %8017 = vmatpush1.bf16.msk.msra.mxu1 %vm11226_vm0, %v14134_v43 }
 0x355   :  { %7853 = vmatprep.subr.msk.bf16.mxu0 %vm11180_vm1, %v14134_v43  ;;  %v926_v9 = vadd.f32 %v903_v39, %v838_v22  ;;  %v924_v52 = vadd.f32 %v901_v48, %v836_v18  ;;  %vm14206_vm10 = vcmask 785408   ;;  %vm14207_vm3 = vcmask 588800   ;;  %8019 = vmatprep.subr.msk.bf16.mxu1 %vm11242_vm12, %v14134_v43  ;;  %vm11288_vm13 = vmpackc.low %vm2581_vm11, %vm2579_vm7 }
 0x356   :  { %v11250_v62 = vpop.permute.xlu1 %1966  ;;  %14204 = vst [vmem:[#allocation67_spill] sm:$0xff] %v11257_v20  ;;  %14205 = vst [vmem:[#allocation62_spill] sm:$0xff] %v11260_v29  ;;  %v904_v60 = vsel %vm14206_vm10, %v10444_v10, %v10461_v35  ;;  %v990_v8 = vsel %vm14207_vm3, %v10475_v24, %v10471_v40  ;;  %vm2583_vm7 = vcmp.eq.s32.totalorder %v11195_v33, %v10719_v50 }
 0x357   :  { %vm14210_vm1 = vmmov %vm14207_vm3  ;;  %vm2585_vm11 = vcmp.eq.s32.totalorder %v11198_v3, %v10719_v50  ;;  %v927_v46 = vadd.f32 %v904_v60, %v839_v25  ;;  %v1013_v30 = vadd.f32 %v990_v8, %v925_v13 }
 0x358   :  { %v11277_v44 = vpop.permute.xlu0 %1871  ;;  %v991_v10 = vsel %vm14210_vm1, %v10471_v40, %v10488_v49  ;;  %vm14211_vm10 = vmmov %vm14210_vm1  ;;  %vm2588_vm1 = vcmp.eq.s32.totalorder %v11257_v20, %v10722_v37  ;;  %7855 = vmatpush1.bf16.msk.msra.mxu0 %vm11226_vm0, %v14134_v43  ;;  %8021 = vmatpush1.bf16.msk.msra.mxu1 %vm11288_vm13, %v14134_v43 }
 0x359   :  { %v989_v22 = vsel %vm14211_vm10, %v10501_v0, %v10475_v24  ;;  %vm11304_vm3 = vmpackc.low %vm2586_vm14, %vm2584_vm8  ;;  %vm2590_vm10 = vcmp.eq.s32.totalorder %v11260_v29, %v10722_v37  ;;  %v11319_v24 = vadd.s32 176, %v13977_v27  ;;  %v11322_v0 = vadd.s32 184, %v13977_v27  ;;  %7857 = vmatprep.subr.msk.bf16.mxu0 %vm11242_vm12, %v14134_v43 }
 0x35a   :  { %v11312_v40 = vpop.permute.xlu1 %1970  ;;  %vm14216_vm8 = vcmask 588800   ;;  %v1014_v39 = vadd.f32 %v991_v10, %v926_v9  ;;  %v1012_v48 = vadd.f32 %v989_v22, %v924_v52  ;;  %vm14217_vm14 = vcmask 580608   ;;  %8023 = vmatprep.subr.msk.bf16.mxu1 %vm11304_vm3, %v14134_v43  ;;  %vm11350_vm0 = vmpackc.low %vm2585_vm11, %vm2583_vm7  ;;  %v14228_v10 = vld [vmem:[#allocation103_spill] sm:$0xff]  ;;  %v14229_v22 = vld [vmem:[#allocation105_spill] sm:$0xff] }
 0x35b   :  { %14214 = vst [vmem:[#allocation65_spill] sm:$0xff] %v11319_v24  ;;  %14215 = vst [vmem:[#allocation68_spill] sm:$0xff] %v11322_v0  ;;  %v992_v58 = vsel %vm14216_vm8, %v10488_v49, %v10481_v61  ;;  %v1078_v31 = vsel %vm14217_vm14, %v10497_v53, %v10514_v55  ;;  %vm2587_vm7 = vcmp.eq.s32.totalorder %v11257_v20, %v10719_v50  ;;  %v14272_v20 = vld [vmem:[#allocation31_spill] sm:$0xff] }
 0x35c   :  { %v11339_v25 = vpop.permute.xlu0 %1968  ;;  %vm14221_vm12 = vmmov %vm14217_vm14  ;;  %vm2589_vm11 = vcmp.eq.s32.totalorder %v11260_v29, %v10719_v50  ;;  %7859 = vmatpush1.bf16.msk.msra.mxu0 %vm11288_vm13, %v14134_v43  ;;  %v1015_v60 = vadd.f32 %v992_v58, %v927_v46  ;;  %8025 = vmatpush1.bf16.msk.msra.mxu1 %vm11350_vm0, %v14134_v43  ;;  %v1101_v33 = vadd.f32 %v1078_v31, %v1013_v30  ;;  %v14234_v30 = vld [vmem:[#allocation106_spill] sm:$0xff] }
 0x35d   :  { %v1079_v13 = vsel %vm14221_vm12, %v10514_v55, %v14220_v11  ;;  %vm14222_vm8 = vmmov %vm14221_vm12  ;;  %vm2592_vm12 = vcmp.eq.s32.totalorder %v11319_v24, %v10722_v37  ;;  %7861 = vmatprep.subr.msk.bf16.mxu0 %vm11304_vm3, %v14134_v43 }
 0x35e   :  { %v1077_v9 = vsel %vm14222_vm8, %v10523_v4, %v10497_v53  ;;  %vm11366_vm14 = vmpackc.low %vm2590_vm10, %vm2588_vm1  ;;  %v11374_v55 = vpop.permute.xlu1 %1964  ;;  %vm2594_vm8 = vcmp.eq.s32.totalorder %v11322_v0, %v10722_v37  ;;  %v11381_v53 = vadd.s32 192, %v13977_v27  ;;  %v11384_v4 = vadd.s32 200, %v13977_v27 }
 0x35f   :  { %vm14227_vm1 = vcmask 580608   ;;  %vm14230_vm10 = vcmask 572416   ;;  %v1102_v18 = vadd.f32 %v1079_v13, %v1014_v39  ;;  %v1100_v59 = vadd.f32 %v1077_v9, %v1012_v48  ;;  %8027 = vmatprep.subr.msk.bf16.mxu1 %vm11366_vm14, %v14134_v43  ;;  %vm11415_vm3 = vmpackc.low %vm2589_vm11, %vm2587_vm7 }
 0x360   :  { %14225 = vst [vmem:[#allocation71_spill] sm:$0xff] %v11381_v53  ;;  %14226 = vst [vmem:[#allocation73_spill] sm:$0xff] %v11384_v4  ;;  %v1080_v8 = vsel %vm14227_vm1, %v14220_v11, %v10527_v34  ;;  %v1166_v3 = vsel %vm14230_vm10, %v14229_v22, %v14228_v10  ;;  %v11404_v58 = vpop.permute.xlu0 %1972  ;;  %vm2591_vm7 = vcmp.eq.s32.totalorder %v11319_v24, %v10719_v50  ;;  %7863 = vmatpush1.bf16.msk.msra.mxu0 %vm11350_vm0, %v14134_v43  ;;  %v14271_v24 = vld [vmem:[#allocation32_spill] sm:$0xff] }
 0x361   :  { %vm14231_vm13 = vmmov %vm14230_vm10  ;;  %vm2593_vm11 = vcmp.eq.s32.totalorder %v11322_v0, %v10719_v50  ;;  %v1189_v11 = vadd.f32 %v1166_v3, %v1101_v33  ;;  %v1342_v3 = vsel %vm14241_vm6, %v10632_v6, %v10628_v23  ;;  %8029 = vmatpush1.bf16.msk.msra.mxu1 %vm11415_vm3, %v14134_v43  ;;  %7865 = vmatprep.subr.msk.bf16.mxu0 %vm11366_vm14, %v14134_v43 }
 0x362   :  { %v1167_v46 = vsel %vm14231_vm13, %v14228_v10, %v10558_v42  ;;  %vm14235_vm1 = vmmov %vm14230_vm10  ;;  %vm14236_vm10 = vcmask 564224   ;;  %v11439_v13 = vpop.permute.xlu1 %2061 }
 0x363   :  { %v1168_v39 = vsel %vm14235_vm1, %v10558_v42, %v14234_v30  ;;  %v1254_v48 = vsel %vm14236_vm10, %v10572_v41, %v10603_v2  ;;  %vm11431_vm13 = vmpackc.low %vm2594_vm8, %vm2592_vm12  ;;  %v1103_v42 = vadd.f32 %v1080_v8, %v1015_v60  ;;  %vm2596_vm1 = vcmp.eq.s32.totalorder %v11381_v53, %v10722_v37 }
 0x364   :  { %vm2598_vm10 = vcmp.eq.s32.totalorder %v11384_v4, %v10722_v37  ;;  %vm14239_vm12 = vcmask 572416   ;;  %vm14240_vm8 = vcmask 564224   ;;  %v1190_v49 = vadd.f32 %v1167_v46, %v1102_v18  ;;  %8031 = vmatprep.subr.msk.bf16.mxu1 %vm11431_vm13, %v14134_v43  ;;  %vm11477_vm6 = vmpackc.low %vm2593_vm11, %vm2591_vm7  ;;  %7867 = vmatpush1.bf16.msk.msra.mxu0 %vm11415_vm3, %v14134_v43 }
 0x365   :  { %v1165_v9 = vsel %vm14239_vm12, %v10582_v63, %v14229_v22  ;;  %v1255_v33 = vsel %vm14240_vm8, %v10603_v2, %v10592_v19  ;;  %v1191_v60 = vadd.f32 %v1168_v39, %v1103_v42  ;;  %v1277_v8 = vadd.f32 %v1254_v48, %v1189_v11  ;;  %vm14242_vm0 = vmmov %vm14240_vm8  ;;  %v11466_v2 = vpop.permute.xlu0 %2059  ;;  %v14251_v42 = vld [vmem:[#allocation7_spill] sm:$0xff]  ;;  %v14253_v11 = vld [vmem:[#allocation13_spill] sm:$0xff]  ;;  %8033 = vmatpush1.bf16.msk.msra.mxu1 %vm11477_vm6, %v14134_v43 }
 0x366   :  { %v1253_v63 = vsel %vm14242_vm0, %v10615_v7, %v10572_v41  ;;  %vm14245_vm14 = vmmov %vm14242_vm0  ;;  %vm14246_vm12 = vcmask 359424   ;;  %vm2595_vm7 = vcmp.eq.s32.totalorder %v11381_v53, %v10719_v50  ;;  %vm2597_vm11 = vcmp.eq.s32.totalorder %v11384_v4, %v10719_v50  ;;  %v11504_v39 = vpop.permute.xlu1 %2065  ;;  %7869 = vmatprep.subr.msk.bf16.mxu0 %vm11431_vm13, %v14134_v43  ;;  %v14262_v4 = vld [vmem:[#allocation69_spill] sm:$0xff] }
 0x367   :  { %v1256_v41 = vsel %vm14245_vm14, %v10592_v19, %v10619_v16  ;;  %v1430_v7 = vsel %vm14246_vm12, %v10648_v21, %v10662_v1  ;;  %vm11493_vm8 = vmpackc.low %vm2598_vm10, %vm2596_vm1  ;;  %v1188_v19 = vadd.f32 %v1165_v9, %v1100_v59  ;;  %v1278_v22 = vadd.f32 %v1255_v33, %v1190_v49  ;;  %v14254_v9 = vld [vmem:[#allocation19_spill] sm:$0xff]  ;;  %v14257_v49 = vld [vmem:[#allocation8_spill] sm:$0xff] }
 0x368   :  { %v1365_v18 = vadd.f32 %v1342_v3, %v1277_v8  ;;  %vm14249_vm0 = vcmask 556032   ;;  %v1527_v33 = vsel %vm1525_vm15, %v14254_v9, %v14253_v11  ;;  %v1279_v5 = vadd.f32 %v1256_v41, %v1191_v60  ;;  %8035 = vmatprep.subr.msk.bf16.mxu1 %vm11493_vm8, %v14134_v43  ;;  %vm11535_vm3 = vmpackc.low %vm2597_vm11, %vm2595_vm7  ;;  %v14259_v8 = vld [vmem:[#allocation11_spill] sm:$0xff]  ;;  %v14261_v41 = vld [vmem:[#allocation12_spill] sm:$0xff]  ;;  %7871 = vmatpush1.bf16.msk.msra.mxu0 %vm11477_vm6, %v14134_v43 }
 0x369   :  { %v1343_v46 = vsel %vm14249_vm0, %v10628_v23, %v10642_v38  ;;  %vm14250_vm1 = vmmov %vm14249_vm0  ;;  %v1276_v23 = vadd.f32 %v1253_v63, %v1188_v19  ;;  %v14263_v53 = vld [vmem:[#allocation25_spill] sm:$0xff]  ;;  %8037 = vmatpush1.bf16.msk.msra.mxu1 %vm11535_vm3, %v14134_v43  ;;  %7873 = vmatprep.subr.msk.bf16.mxu0 %vm11493_vm8, %v14134_v43  ;;  %vm14269_vm6 = vcmask 334848   ;;  %vm14274_vm8 = vcmask 326656  }
 0x36a   :  { %v1344_v48 = vsel %vm14250_vm1, %v10642_v38, %v10638_v56  ;;  %vm14252_vm10 = vmmov %vm14249_vm0  ;;  %v1453_v3 = vadd.f32 %v1430_v7, %v1365_v18  ;;  %v11524_v38 = vpop.permute.xlu0 %2063  ;;  %v1366_v31 = vadd.f32 %v1343_v46, %v1278_v22  ;;  %v1432_v7 = vsel %vm14246_vm12, %v14257_v49, %v14261_v41  ;;  %v11551_v22 = vpop.permute.xlu1 %2152  ;;  %v14265_v46 = vld [vmem:[#allocation30_spill] sm:$0xff] }
 0x36b   :  { %v1341_v59 = vsel %vm14252_vm10, %v14251_v42, %v10632_v6  ;;  %vm14258_vm13 = vmmov %vm14246_vm12  ;;  %v1367_v19 = vadd.f32 %v1344_v48, %v1279_v5  ;;  %v1620_v0 = vsel %vm1618_vm9, %v14263_v53, %v14262_v4  ;;  %v1619_v29 = vsel %vm1618_vm9, %v14271_v24, %v14263_v53  ;;  %v14277_v53 = vld [vmem:[#allocation21_spill] sm:$0xff] }
 0x36c   :  { %v1431_v60 = vsel %vm14258_vm13, %v10662_v1, %v14257_v49  ;;  %vm14260_vm14 = vmmov %vm14246_vm12  ;;  %v1364_v18 = vadd.f32 %v1341_v59, %v1276_v23  ;;  %v1551_v42 = vadd.f32 %v1527_v33, %v1453_v3  ;;  %v14264_v1 = vld [vmem:[#allocation10_spill] sm:$0xff]  ;;  %v14266_v59 = vld [vmem:[#allocation27_spill] sm:$0xff]  ;;  %7875 = vmatpush1.bf16.msk.msra.mxu0 %vm11535_vm3, %v14134_v43  ;;  %vm14281_vm1 = vcmask 130048  }
 0x36d   :  { %v1429_v63 = vsel %vm14260_vm14, %v14259_v8, %v10648_v21  ;;  %v1528_v21 = vsel %vm1525_vm15, %v14253_v11, %v14264_v1  ;;  %v1529_v48 = vsel %vm1525_vm15, %v14264_v1, %v14265_v46  ;;  %v1526_v33 = vsel %vm1525_vm15, %v14266_v59, %v14254_v9  ;;  %v14267_v11 = vld [vmem:[#allocation15_spill] sm:$0xff]  ;;  %v14268_v3 = vld [vmem:[#allocation18_spill] sm:$0xff]  ;;  %vm14276_vm7 = vmmov %vm14269_vm6 }
 0x36e   :  { %v1454_v52 = vadd.f32 %v1431_v60, %v1366_v31  ;;  %v1452_v23 = vadd.f32 %v1429_v63, %v1364_v18  ;;  %v1455_v5 = vadd.f32 %v1432_v7, %v1367_v19  ;;  %v1713_v49 = vsel %vm14269_vm6, %v14268_v3, %v14267_v11  ;;  %v2058_v8 = vpop.permute.xlu0 %2057  ;;  %v14270_v1 = vld [vmem:[#allocation63_spill] sm:$0xff]  ;;  %v14273_v7 = vld [vmem:[#allocation4_spill] sm:$0xff]  ;;  %v2157_v18 = vpop.permute.xlu1 %2156  ;;  %vm14278_vm11 = vmmov %vm14269_vm6 }
 0x36f   :  { %v1621_v9 = vsel %vm1618_vm9, %v14262_v4, %v14270_v1  ;;  %v1644_v59 = vadd.f32 %v1620_v0, %v1551_v42  ;;  %v1622_v10 = vsel %vm1618_vm9, %v14270_v1, %v14272_v20  ;;  %v1806_v19 = vsel %vm14274_vm8, %v14273_v7, %v11026_v36  ;;  %v14275_v4 = vld [vmem:[#allocation28_spill] sm:$0xff]  ;;  %vm14280_vm0 = vmmov %vm14269_vm6 }
 0x370   :  { %v1552_v31 = vadd.f32 %v1528_v21, %v1454_v52  ;;  %v1553_v60 = vadd.f32 %v1529_v48, %v1455_v5  ;;  %v1550_v63 = vadd.f32 %v1526_v33, %v1452_v23  ;;  %v1714_v24 = vsel %vm14276_vm7, %v14267_v11, %v14275_v4  ;;  %v14279_v21 = vld [vmem:[#allocation50_spill] sm:$0xff]  ;;  %vm14283_vm10 = vmmov %vm14274_vm8 }
 0x371   :  { %v1737_v0 = vadd.f32 %v1713_v49, %v1644_v59  ;;  %v1715_v42 = vsel %vm14278_vm11, %v14275_v4, %v14277_v53  ;;  %v1712_v48 = vsel %vm14280_vm0, %v14279_v21, %v14268_v3  ;;  %v1899_v6 = vsel %vm14281_vm1, %v11153_v15, %v11126_v26  ;;  %v14282_v49 = vld [vmem:[#allocation54_spill] sm:$0xff]  ;;  %vm14284_vm3 = vmmov %vm14274_vm8 }
 0x372   :  { %v1645_v33 = vadd.f32 %v1621_v9, %v1552_v31  ;;  %v1643_v52 = vadd.f32 %v1619_v29, %v1550_v63  ;;  %v1646_v23 = vadd.f32 %v1622_v10, %v1553_v60  ;;  %v2155_v5 = vpop.permute.xlu0 %2154  ;;  %v1807_v11 = vsel %vm14283_vm10, %v11026_v36, %v14282_v49  ;;  %vm14285_vm13 = vmmov %vm14284_vm3  ;;  %v2151_v60 = vpop.permute.xlu1 %2150 }
 0x373   :  { %v1830_v1 = vadd.f32 %v1806_v19, %v1737_v0  ;;  %v1805_v59 = vsel %vm14284_vm3, %v11064_v12, %v14273_v7  ;;  %v1808_v3 = vsel %vm14285_vm13, %v14282_v49, %v11091_v14  ;;  %vm14286_vm14 = vcmask 121856   ;;  %vm14287_vm12 = vmmov %vm14281_vm1 }
 0x374   :  { %v1738_v29 = vadd.f32 %v1714_v24, %v1645_v33  ;;  %v1739_v9 = vadd.f32 %v1715_v42, %v1646_v23  ;;  %v1736_v10 = vadd.f32 %v1712_v48, %v1643_v52  ;;  %v1992_v31 = vsel %vm14286_vm14, %v11250_v62, %v11339_v25  ;;  %vm14288_vm6 = vmmov %vm14281_vm1 }
 0x375   :  { %v1923_v63 = vadd.f32 %v1899_v6, %v1830_v1  ;;  %v1900_v36 = vsel %vm14287_vm12, %v11126_v26, %v11215_v45  ;;  %v1901_v12 = vsel %vm14288_vm6, %v11215_v45, %v11188_v54  ;;  %vm14289_vm8 = vmmov %vm14281_vm1  ;;  %vm14290_vm7 = vcmask 113664  }
 0x376   :  { %v1898_v7 = vsel %vm14289_vm8, %v11277_v44, %v11153_v15  ;;  %v1831_v19 = vadd.f32 %v1807_v11, %v1738_v29  ;;  %v1829_v0 = vadd.f32 %v1805_v59, %v1736_v10  ;;  %v1832_v4 = vadd.f32 %v1808_v3, %v1739_v9  ;;  %v11625_v42 = vpop.permute.xlu0 %2158  ;;  %vm14291_vm11 = vmmov %vm14286_vm14  ;;  %v2248_v23 = vpop.permute.xlu1 %2247 }
 0x377   :  { %v2085_v24 = vsel %vm14290_vm7, %v11466_v2, %v11439_v13  ;;  %v1993_v26 = vsel %vm14291_vm11, %v11339_v25, %v11312_v40  ;;  %v2016_v21 = vadd.f32 %v1992_v31, %v1923_v63  ;;  %vm14292_vm0 = vmmov %vm14291_vm11  ;;  %vm14294_vm10 = vcmask 105472  }
 0x378   :  { %v1991_v45 = vsel %vm14292_vm0, %v11374_v55, %v11250_v62  ;;  %vm14293_vm1 = vmmov %vm14292_vm0  ;;  %v1924_v44 = vadd.f32 %v1900_v36, %v1831_v19  ;;  %v1925_v48 = vadd.f32 %v1901_v12, %v1832_v4  ;;  %v1922_v33 = vadd.f32 %v1898_v7, %v1829_v0 }
 0x379   :  { %v1994_v15 = vsel %vm14293_vm1, %v11312_v40, %v11404_v58  ;;  %v2178_v52 = vsel %vm14294_vm10, %v11551_v22, %v2155_v5  ;;  %v2109_v6 = vadd.f32 %v2085_v24, %v2016_v21  ;;  %vm14295_vm3 = vmmov %vm14290_vm7  ;;  %vm14300_vm8 = vcmask 97280  }
 0x37a   :  { %v2086_v25 = vsel %vm14295_vm3, %v11439_v13, %v11524_v38  ;;  %vm14296_vm13 = vmmov %vm14295_vm3  ;;  %v2017_v55 = vadd.f32 %v1993_v26, %v1924_v44  ;;  %v2015_v49 = vadd.f32 %v1991_v45, %v1922_v33  ;;  %v2018_v11 = vadd.f32 %v1994_v15, %v1925_v48  ;;  %v2246_v1 = vpop.permute.xlu0 %2245  ;;  %v11650_v31 = vpop.permute.xlu1 %2251 }
 0x37b   :  { %v2087_v62 = vsel %vm14296_vm13, %v11524_v38, %v11504_v39  ;;  %vm14297_vm14 = vmmov %vm14295_vm3  ;;  %v2202_v3 = vadd.f32 %v2178_v52, %v2109_v6  ;;  %v2271_v9 = vsel %vm14300_vm8, %v2246_v1, %v2248_v23  ;;  %v11653_v38 = vadd.s32 208, %v13977_v27 }
 0x37c   :  { %v2084_v40 = vsel %vm14297_vm14, %v2058_v8, %v11466_v2  ;;  %vm14298_vm12 = vmmov %vm14294_vm10  ;;  %v2110_v13 = vadd.f32 %v2086_v25, %v2017_v55  ;;  %v2111_v10 = vadd.f32 %v2087_v62, %v2018_v11  ;;  %v11656_v63 = vadd.s32 216, %v13977_v27 }
 0x37d   :  { %v2179_v59 = vsel %vm14298_vm12, %v2155_v5, %v2157_v18  ;;  %vm14299_vm6 = vmmov %vm14294_vm10  ;;  %14301 = vst [vmem:[#allocation78_spill] sm:$0xff] %v11653_v38  ;;  %v2108_v2 = vadd.f32 %v2084_v40, %v2015_v49  ;;  %v11660_v5 = vadd.f32 %v2271_v9, %v2202_v3  ;;  %vm2600_vm11 = vcmp.eq.s32.totalorder %v11653_v38, %v10722_v37  ;;  %v14311_v9 = vld [vmem:[#allocation2_spill] sm:$0xff] }
 0x37e   :  { %v2180_v29 = vsel %vm14299_vm6, %v2157_v18, %v11625_v42  ;;  %14302 = vst [vmem:[#allocation79_spill] sm:$0xff] %v11656_v63  ;;  %vm14303_vm7 = vmmov %vm14299_vm6  ;;  %v2203_v36 = vadd.f32 %v2179_v59, %v2110_v13  ;;  %v2250_v12 = vpop.permute.xlu0 %2249  ;;  %vm2602_vm0 = vcmp.eq.s32.totalorder %v11656_v63, %v10722_v37  ;;  %vm2599_vm13 = vcmp.eq.s32.totalorder %v11653_v38, %v10719_v50  ;;  %v8483_v0 = vpop.permute.xlu1 %8482  ;;  %v14312_v13 = vld [vmem:[#allocation35_spill] sm:$0xff] }
 0x37f   :  { %v2177_v8 = vsel %vm14303_vm7, %v2151_v60, %v11551_v22  ;;  %v2204_v18 = vadd.f32 %v2180_v29, %v2111_v10  ;;  %vm14304_vm1 = vmmov %vm14300_vm8  ;;  %vm2601_vm14 = vcmp.eq.s32.totalorder %v11656_v63, %v10719_v50  ;;  %v2486_v4 = vadd.s32 224, %v13977_v27 }
 0x380   :  { %v2272_v7 = vsel %vm14304_vm1, %v2248_v23, %v2250_v12  ;;  %vm14305_vm10 = vmmov %vm14304_vm1  ;;  %v2201_v22 = vadd.f32 %v2177_v8, %v2108_v2  ;;  %v2487_v24 = vadd.s32 232, %v13977_v27  ;;  %v2307_v26 = vmax.f32 %v11660_v5, 0.0 }
 0x381   :  { %v2273_v19 = vsel %vm14305_vm10, %v2250_v12, %v11650_v31  ;;  %vm7876_vm3 = vmpackc.low %vm2602_vm0, %vm2600_vm11  ;;  %v11673_v60 = vadd.f32 %v2272_v7, %v2203_v36  ;;  %v2488_v45 = vadd.s32 240, %v13977_v27  ;;  %v2489_v15 = vadd.s32 248, %v13977_v27  ;;  %v14313_v36 = vld [vmem:[#allocation107_spill] sm:$0xff]  ;;  %v14314_v7 = vld [vmem:[#allocation90_spill] sm:$0xff] }
 0x382   :  { %8039 = vmatprep.subr.msk.bf16.mxu1 %vm7876_vm3, %v14134_v43  ;;  %vm7878_vm12 = vmpackc.low %vm2601_vm14, %vm2599_vm13  ;;  %7877 = vmatprep.subr.msk.bf16.mxu0 %vm7876_vm3, %v14134_v43  ;;  %v11680_v21 = vadd.f32 %v2273_v19, %v2204_v18  ;;  %v8485_v48 = vunpack.i.h.bf16 %v8483_v0  ;;  %v2244_v33 = vpop.permute.xlu0 %2243  ;;  %vm2604_vm6 = vcmp.eq.s32.totalorder %v2486_v4, %v10722_v37  ;;  %vm2606_vm8 = vcmp.eq.s32.totalorder %v2487_v24, %v10722_v37  ;;  %v2353_v12 = vpop.permute.xlu1 %2352 }
 0x383   :  { %8041 = vmatpush1.bf16.msk.msra.mxu1 %vm7878_vm12, %v14134_v43  ;;  %7879 = vmatpush1.bf16.msk.msra.mxu0 %vm7878_vm12, %v14134_v43  ;;  %v2308_v44 = vmax.f32 %v11673_v60, 0.0  ;;  %v8484_v52 = vunpack.i.l.bf16 %v8483_v0  ;;  %vm14306_vm7 = vmmov %vm14304_vm1  ;;  %vm2603_vm0 = vcmp.eq.s32.totalorder %v2486_v4, %v10719_v50  ;;  %vm2605_vm1 = vcmp.eq.s32.totalorder %v2487_v24, %v10719_v50  ;;  %v14316_v24 = vld [vmem:[#allocation49_spill] sm:$0xff] }
 0x384   :  { %v2270_v23 = vsel %vm14306_vm7, %v2244_v33, %v2246_v1  ;;  %vm11690_vm11 = vmpackc.low %vm2606_vm8, %vm2604_vm6  ;;  %vm2608_vm3 = vcmp.eq.s32.totalorder %v2488_v45, %v10722_v37  ;;  %vm2610_vm13 = vcmp.eq.s32.totalorder %v2489_v15, %v10722_v37  ;;  %vm2607_vm14 = vcmp.eq.s32.totalorder %v2488_v45, %v10719_v50 }
 0x385   :  { %v8491_v25 = vpack.i.bf16 %v2308_v44, %v2307_v26  ;;  %v11700_v62 = vadd.f32 %v2270_v23, %v2201_v22  ;;  %8043 = vmatprep.subr.msk.bf16.mxu1 %vm11690_vm11, %v14134_v43  ;;  %vm11705_vm10 = vmpackc.low %vm2605_vm1, %vm2603_vm0  ;;  %v13778_v49 = vmax.f32 %v11680_v21, 0.0  ;;  %vm2609_vm6 = vcmp.eq.s32.totalorder %v2489_v15, %v10719_v50  ;;  %7881 = vmatprep.subr.msk.bf16.mxu0 %vm11690_vm11, %v14134_v43  ;;  %v14315_v22 = vld [vmem:[#allocation9_spill] sm:$0xff]  ;;  %v14318_v15 = vld [vmem:[#allocation48_spill] sm:$0xff] }
 0x386   :  { %v11717_v40 = vpop.permute.xlu0 %8487  ;;  %vm7884_vm12 = vmpackc.low %vm2610_vm13, %vm2608_vm3  ;;  %v2431_v1 = vsel %vm13751_vm4, %v8484_v52, %v8485_v48  ;;  %v2222_v10 = vmul.f32 %v14312_v13, %v14311_v9  ;;  %vm14317_vm7 = vcmask 1039360   ;;  %v2491_v55 = vadd.s32 264, %v13977_v27 }
 0x387   :  { %8045 = vmatpush1.bf16.msk.msra.mxu1 %vm11705_vm10, %v14134_v43  ;;  %v2306_v11 = vmax.f32 %v11700_v62, 0.0  ;;  %8492 = vrot.lane.b32.xlu1 %v8491_v25, %s8613_s2  ;;  %v8490_v59 = vunpack.i.h.bf16 %v11717_v40  ;;  %v8489_v3 = vunpack.i.l.bf16 %v11717_v40  ;;  %vm7886_vm8 = vmpackc.low %vm2609_vm6, %vm2607_vm14  ;;  %v2452_v18 = vmax.f32 %v14313_v36, %v2431_v1 }
 0x388   :  { %8047 = vmatprep.subr.msk.bf16.mxu1 %vm7884_vm12, %v14134_v43  ;;  %7883 = vmatpush1.bf16.msk.msra.mxu0 %vm11705_vm10, %v14134_v43  ;;  %v2364_v45 = vsel %vm14317_vm7, %v14316_v24, %v2353_v12  ;;  %v2490_v25 = vadd.s32 256, %v13977_v27  ;;  %vm2614_vm0 = vcmp.eq.s32.totalorder %v2491_v55, %v10722_v37  ;;  %vm2613_vm3 = vcmp.eq.s32.totalorder %v2491_v55, %v10719_v50  ;;  %vm14327_vm14 = vmmov %vm14317_vm7  ;;  %v14335_v55 = vld [vmem:[#allocation38_spill] sm:$0xff] }
 0x389   :  { %v8496_v29 = vpack.i.bf16 %v2306_v11, %v13778_v49  ;;  %7885 = vmatprep.subr.msk.bf16.mxu0 %vm7884_vm12, %v14134_v43  ;;  %v2430_v2 = vsel %vm13751_vm4, %v8490_v59, %v8484_v52  ;;  %v2432_v8 = vsel %vm13751_vm4, %v8485_v48, %v8489_v3  ;;  %v14319_v48 = vmax.f32 %v14318_v15, 0.0  ;;  %v14320_v52 = vld [vmem:[#allocation5_spill] sm:$0xff]  ;;  %vm14330_vm12 = vmmov %vm14317_vm7 }
 0x38a   :  { %v2453_v19 = vmax.f32 %v14314_v7, %v2432_v8  ;;  %v2451_v0 = vmax.f32 %v14315_v22, %v2430_v2  ;;  %v14321_v23 = vmax.f32 %v14320_v52, 0.0  ;;  %vm2612_vm11 = vcmp.eq.s32.totalorder %v2490_v25, %v10722_v37  ;;  %v14324_v59 = vld [vmem:[#allocation33_spill] sm:$0xff]  ;;  %v183_v13 = vpop.permute.xlu0 %182  ;;  %v14326_v8 = vld [vmem:[#allocation36_spill] sm:$0xff] }
 0x38b   :  { %8049 = vmatpush1.bf16.msk.msra.mxu1 %vm7886_vm8, %v14134_v43  ;;  %2253 = vrot.lane.b32.xlu1 %v2222_v10, %s14058_s26  ;;  %v11755_v33 = vmax.f32 %v14319_v48, %v2364_v45  ;;  %vm2611_vm1 = vcmp.eq.s32.totalorder %v2490_v25, %v10719_v50  ;;  %vm7888_vm10 = vmpackc.low %vm2614_vm0, %vm2612_vm11  ;;  %v14325_v10 = vld [vmem:[#allocation47_spill] sm:$0xff]  ;;  %v202_v36 = vsel %vm14327_vm14, %v183_v13, %v14326_v8  ;;  %v14329_v7 = vld [vmem:[#allocation56_spill] sm:$0xff]  ;;  %vm14332_vm6 = vcmask 1031168  }
 0x38c   :  { %8497 = vrot.lane.b32.xlu0 %v8496_v29, %s8613_s2  ;;  %7887 = vmatpush1.bf16.msk.msra.mxu0 %vm7886_vm8, %v14134_v43  ;;  %v8501_v4 = vpack.i.bf16 %v2453_v19, %v2452_v18  ;;  %v11759_v6 = vmax.f32 %v14321_v23, %v2353_v12  ;;  %vm11772_vm13 = vmpackc.low %vm2613_vm3, %vm2611_vm1  ;;  %v125_v29 = vmul.f32 %v14324_v59, %v14311_v9  ;;  %v14328_v18 = vld [vmem:[#allocation34_spill] sm:$0xff]  ;;  %v14331_v15 = vld [vmem:[#allocation37_spill] sm:$0xff]  ;;  %vm14338_vm7 = vcmask 1014784  }
 0x38d   :  { %8051 = vmatprep.subr.msk.bf16.mxu1 %vm7888_vm10, %v14134_v43  ;;  %7889 = vmatprep.subr.msk.bf16.mxu0 %vm7888_vm10, %v14134_v43  ;;  %v124_v2 = vmul.f32 %v14324_v59, %v14325_v10  ;;  %v201_v19 = vsel %vm14330_vm12, %v14329_v7, %v183_v13  ;;  %v14333_v48 = vld [vmem:[#allocation59_spill] sm:$0xff]  ;;  %vm14334_vm8 = vmmov %vm14332_vm6  ;;  %v14339_v7 = vld [vmem:[#allocation74_spill] sm:$0xff]  ;;  %vm14344_vm0 = vcmask 801792   ;;  %vm14348_vm10 = vcmask 793600  }
 0x38e   :  { %v137_v12 = vadd.f32 %v125_v29, %v14328_v18  ;;  %v359_v45 = vpop.permute.xlu0 %358  ;;  %v14336_v29 = vld [vmem:[#allocation72_spill] sm:$0xff]  ;;  %vm14340_vm11 = vmmov %vm14338_vm7  ;;  %vm14354_vm12 = vcmask 588800   ;;  %v11915_v5 = vadd.s32 512, %v13977_v27  ;;  %v14466_v63 = vmax.f32 %v11680_v21, 0.0 }
 0x38f   :  { %3256 = vrot.lane.b32.xlu1 %v2451_v0, %s8638_s23  ;;  %v136_v22 = vadd.f32 %v124_v2, %v14328_v18  ;;  %v271_v0 = vpop.permute.xlu1 %270  ;;  %v378_v59 = vsel %vm13749_vm2, %v359_v45, %v14335_v55  ;;  %v377_v13 = vsel %vm13749_vm2, %v14336_v29, %v359_v45  ;;  %v14337_v18 = vld [vmem:[#allocation39_spill] sm:$0xff]  ;;  %vm14346_vm1 = vmmov %vm14344_vm0  ;;  %v2528_v1 = vadd.s32 560, %v13977_v27 }
 0x390   :  { %8502 = vrot.lane.b32.xlu0 %v8501_v4, %s8638_s23  ;;  %v225_v4 = vadd.f32 %v202_v36, %v137_v12  ;;  %v290_v9 = vsel %vm14332_vm6, %v271_v0, %v14331_v15  ;;  %v289_v52 = vsel %vm14334_vm8, %v14333_v48, %v271_v0  ;;  %vm14349_vm3 = vmmov %vm14348_vm10  ;;  %vm14357_vm8 = vcmask 580608  }
 0x391   :  { %v224_v24 = vadd.f32 %v201_v19, %v136_v22  ;;  %vm14355_vm6 = vmmov %vm14354_vm12  ;;  %v2532_v40 = vadd.s32 592, %v13977_v27 }
 0x392   :  { %v313_v23 = vadd.f32 %v290_v9, %v225_v4  ;;  %v535_v36 = vpop.permute.xlu0 %534  ;;  %v14341_v4 = vld [vmem:[#allocation40_spill] sm:$0xff] }
 0x393   :  { %2423 = vrot.lane.b32.xlu1 %v11759_v6, %s8617_s18  ;;  %v312_v25 = vadd.f32 %v289_v52, %v224_v24  ;;  %v447_v10 = vpop.permute.xlu1 %446  ;;  %v554_v24 = vsel %vm13751_vm4, %v535_v36, %v14341_v4  ;;  %v553_v15 = vsel %vm13751_vm4, %v14165_v28, %v535_v36  ;;  %v14350_v4 = vld [vmem:[#allocation58_spill] sm:$0xff] }
 0x394   :  { %2421 = vrot.lane.b32.xlu0 %v11755_v33, %s8617_s18  ;;  %v401_v2 = vadd.f32 %v378_v59, %v313_v23  ;;  %v466_v12 = vsel %vm14338_vm7, %v447_v10, %v14337_v18  ;;  %v465_v19 = vsel %vm14340_vm11, %v14339_v7, %v447_v10  ;;  %v14342_v23 = vld [vmem:[#allocation41_spill] sm:$0xff]  ;;  %v14347_v7 = vld [vmem:[#allocation52_spill] sm:$0xff]  ;;  %vm14358_vm7 = vmmov %vm14357_vm8  ;;  %vm14360_vm11 = vcmask 572416  }
 0x395   :  { %v400_v8 = vadd.f32 %v377_v13, %v312_v25  ;;  %v14343_v13 = vld [vmem:[#allocation46_spill] sm:$0xff] }
 0x396   :  { %v489_v22 = vadd.f32 %v466_v12, %v401_v2  ;;  %v711_v52 = vpop.permute.xlu0 %710  ;;  %v14345_v2 = vld [vmem:[#allocation94_spill] sm:$0xff] }
 0x397   :  { %v488_v0 = vadd.f32 %v465_v19, %v400_v8  ;;  %v623_v9 = vpop.permute.xlu1 %622  ;;  %v730_v10 = vsel %vm14344_vm0, %v711_v52, %v14343_v13  ;;  %v729_v8 = vsel %vm14346_vm1, %v14345_v2, %v711_v52  ;;  %vm14361_vm0 = vmmov %vm14360_vm11  ;;  %vm14363_vm1 = vcmask 564224  }
 0x398   :  { %v577_v45 = vadd.f32 %v554_v24, %v489_v22  ;;  %v642_v25 = vsel %vm636_vm5, %v623_v9, %v14342_v23  ;;  %v641_v55 = vsel %vm636_vm5, %v14173_v17, %v623_v9  ;;  %vm14351_vm5 = vcmask 785408   ;;  %v14353_v23 = vld [vmem:[#allocation64_spill] sm:$0xff] }
 0x399   :  { %v576_v48 = vadd.f32 %v553_v15, %v488_v0  ;;  %vm14352_vm14 = vmmov %vm14351_vm5 }
 0x39a   :  { %v665_v59 = vadd.f32 %v642_v25, %v577_v45  ;;  %v887_v12 = vpop.permute.xlu0 %886 }
 0x39b   :  { %v664_v29 = vadd.f32 %v641_v55, %v576_v48  ;;  %v799_v18 = vpop.permute.xlu1 %798  ;;  %v906_v24 = vsel %vm14351_vm5, %v887_v12, %v14350_v4  ;;  %v905_v15 = vsel %vm14352_vm14, %v10461_v35, %v887_v12  ;;  %vm14369_vm14 = vcmask 359424  }
 0x39c   :  { %v753_v28 = vadd.f32 %v730_v10, %v665_v59  ;;  %v818_v19 = vsel %vm14348_vm10, %v799_v18, %v14347_v7  ;;  %v817_v22 = vsel %vm14349_vm3, %v14194_v51, %v799_v18  ;;  %vm14364_vm10 = vmmov %vm14363_vm1  ;;  %vm14366_vm3 = vcmask 556032  }
 0x39d   :  { %v752_v36 = vadd.f32 %v729_v8, %v664_v29  ;;  %v14356_v29 = vld [vmem:[#allocation70_spill] sm:$0xff]  ;;  %vm14367_vm5 = vmmov %vm14366_vm3 }
 0x39e   :  { %v841_v0 = vadd.f32 %v818_v19, %v753_v28  ;;  %v1063_v52 = vpop.permute.xlu0 %1062  ;;  %v14359_v28 = vld [vmem:[#allocation76_spill] sm:$0xff]  ;;  %v14362_v19 = vld [vmem:[#allocation82_spill] sm:$0xff] }
 0x39f   :  { %v840_v17 = vadd.f32 %v817_v22, %v752_v36  ;;  %v975_v9 = vpop.permute.xlu1 %974  ;;  %v1082_v13 = vsel %vm14357_vm8, %v1063_v52, %v14356_v29  ;;  %v1081_v10 = vsel %vm14358_vm7, %v10527_v34, %v1063_v52  ;;  %v14368_v52 = vld [vmem:[#allocation91_spill] sm:$0xff]  ;;  %v14371_v29 = vld [vmem:[#allocation93_spill] sm:$0xff] }
 0x3a0   :  { %v929_v45 = vadd.f32 %v906_v24, %v841_v0  ;;  %v994_v25 = vsel %vm14354_vm12, %v975_v9, %v14353_v23  ;;  %v993_v55 = vsel %vm14355_vm6, %v10481_v61, %v975_v9  ;;  %vm14370_vm12 = vmmov %vm14369_vm14  ;;  %vm14374_vm6 = vcmask 334848  }
 0x3a1   :  { %v928_v48 = vadd.f32 %v905_v15, %v840_v17  ;;  %v14365_v15 = vld [vmem:[#allocation88_spill] sm:$0xff]  ;;  %vm14375_vm8 = vmmov %vm14374_vm6 }
 0x3a2   :  { %v1017_v59 = vadd.f32 %v994_v25, %v929_v45  ;;  %v1239_v18 = vpop.permute.xlu0 %1238 }
 0x3a3   :  { %v1016_v51 = vadd.f32 %v993_v55, %v928_v48  ;;  %v1151_v2 = vpop.permute.xlu1 %1150  ;;  %v1258_v22 = vsel %vm14363_vm1, %v1239_v18, %v14362_v19  ;;  %v1257_v0 = vsel %vm14364_vm10, %v10619_v16, %v1239_v18  ;;  %vm14386_vm10 = vcmask 113664  }
 0x3a4   :  { %v1105_v35 = vadd.f32 %v1082_v13, %v1017_v59  ;;  %v1170_v36 = vsel %vm14360_vm11, %v1151_v2, %v14359_v28  ;;  %v1169_v12 = vsel %vm14361_vm0, %v14234_v30, %v1151_v2  ;;  %vm14383_vm0 = vcmask 121856  }
 0x3a5   :  { %v1104_v8 = vadd.f32 %v1081_v10, %v1016_v51  ;;  %vm14384_vm1 = vmmov %vm14383_vm0 }
 0x3a6   :  { %v1193_v7 = vadd.f32 %v1170_v36, %v1105_v35  ;;  %v1415_v24 = vpop.permute.xlu0 %1414  ;;  %v14372_v35 = vld [vmem:[#allocation97_spill] sm:$0xff] }
 0x3a7   :  { %v1192_v61 = vadd.f32 %v1169_v12, %v1104_v8  ;;  %v1327_v17 = vpop.permute.xlu1 %1326  ;;  %v1434_v23 = vsel %vm14369_vm14, %v1415_v24, %v14368_v52  ;;  %v1433_v25 = vsel %vm14370_vm12, %v14261_v41, %v1415_v24  ;;  %v14382_v52 = vld [vmem:[#allocation42_spill] sm:$0xff]  ;;  %vm13750_vm12 = vcmask 916480  }
 0x3a8   :  { %v1281_v34 = vadd.f32 %v1258_v22, %v1193_v7  ;;  %v1346_v9 = vsel %vm14366_vm3, %v1327_v17, %v14365_v15  ;;  %v1345_v45 = vsel %vm14367_vm5, %v10638_v56, %v1327_v17  ;;  %v14373_v7 = vld [vmem:[#allocation102_spill] sm:$0xff]  ;;  %vm14387_vm3 = vmmov %vm14386_vm10  ;;  %vm14389_vm5 = vcmask 105472  }
 0x3a9   :  { %v1280_v4 = vadd.f32 %v1257_v0, %v1192_v61  ;;  %v14376_v0 = vld [vmem:[#allocation108_spill] sm:$0xff]  ;;  %vm14390_vm14 = vmmov %vm14389_vm5 }
 0x3aa   :  { %v1369_v48 = vadd.f32 %v1346_v9, %v1281_v34  ;;  %v1603_v51 = vpop.permute.xlu0 %1602  ;;  %v14379_v9 = vld [vmem:[#allocation109_spill] sm:$0xff] }
 0x3ab   :  { %v1368_v30 = vadd.f32 %v1345_v45, %v1280_v4  ;;  %v1510_v55 = vpop.permute.xlu1 %1509  ;;  %v1624_v8 = vsel %vm1618_vm9, %v1603_v51, %v14372_v35  ;;  %v1623_v18 = vsel %vm1618_vm9, %v14272_v20, %v1603_v51  ;;  %vm14380_vm9 = vcmask 130048  }
 0x3ac   :  { %v1457_v16 = vadd.f32 %v1434_v23, %v1369_v48  ;;  %v1531_v13 = vsel %vm1525_vm15, %v1510_v55, %v14371_v29  ;;  %v1530_v10 = vsel %vm1525_vm15, %v14265_v46, %v1510_v55  ;;  %vm14377_vm15 = vcmask 326656   ;;  %vm14381_vm11 = vmmov %vm14380_vm9  ;;  %v14385_v29 = vld [vmem:[#allocation43_spill] sm:$0xff] }
 0x3ad   :  { %v1456_v59 = vadd.f32 %v1433_v25, %v1368_v30  ;;  %vm14378_vm7 = vmmov %vm14377_vm15  ;;  %v2492_v35 = vadd.s32 272, %v13977_v27 }
 0x3ae   :  { %v1555_v2 = vadd.f32 %v1531_v13, %v1457_v16  ;;  %v1789_v12 = vpop.permute.xlu0 %1788 }
 0x3af   :  { %v1554_v56 = vadd.f32 %v1530_v10, %v1456_v59  ;;  %v1696_v28 = vpop.permute.xlu1 %1695  ;;  %v1810_v17 = vsel %vm14377_vm15, %v1789_v12, %v14376_v0  ;;  %v1809_v34 = vsel %vm14378_vm7, %v11091_v14, %v1789_v12  ;;  %vm2616_vm15 = vcmp.eq.s32.totalorder %v2492_v35, %v10722_v37 }
 0x3b0   :  { %v1648_v41 = vadd.f32 %v1624_v8, %v1555_v2  ;;  %v1717_v61 = vsel %vm14374_vm6, %v1696_v28, %v14373_v7  ;;  %v1716_v19 = vsel %vm14375_vm8, %v14277_v53, %v1696_v28  ;;  %v2493_v8 = vadd.s32 280, %v13977_v27  ;;  %v14388_v28 = vld [vmem:[#allocation44_spill] sm:$0xff] }
 0x3b1   :  { %v1647_v36 = vadd.f32 %v1623_v18, %v1554_v56  ;;  %v11880_v7 = vadd.s32 288, %v13977_v27  ;;  %vm14391_vm6 = vcmask 1039360   ;;  %vm14393_vm8 = vcmask 97280  }
 0x3b2   :  { %v1741_v22 = vadd.f32 %v1717_v61, %v1648_v41  ;;  %v1975_v15 = vpop.permute.xlu0 %1974  ;;  %v14392_v61 = vld [vmem:[#allocation45_spill] sm:$0xff]  ;;  %vm2618_vm7 = vcmp.eq.s32.totalorder %v2493_v8, %v10722_v37 }
 0x3b3   :  { %v1740_v46 = vadd.f32 %v1716_v19, %v1647_v36  ;;  %v1882_v4 = vpop.permute.xlu1 %1881  ;;  %v1996_v23 = vsel %vm14383_vm0, %v1975_v15, %v14382_v52  ;;  %v1995_v55 = vsel %vm14384_vm1, %v11404_v58, %v1975_v15  ;;  %vm14396_vm0 = vmmov %vm14391_vm6  ;;  %vm2615_vm1 = vcmp.eq.s32.totalorder %v2492_v35, %v10719_v50 }
 0x3b4   :  { %v1834_v20 = vadd.f32 %v1810_v17, %v1741_v22  ;;  %v1903_v45 = vsel %vm14380_vm9, %v1882_v4, %v14379_v9  ;;  %v1902_v48 = vsel %vm14381_vm11, %v11188_v54, %v1882_v4  ;;  %vm14394_vm9 = vmmov %vm14393_vm8  ;;  %v14406_v35 = vmov 0 }
 0x3b5   :  { %v1833_v24 = vadd.f32 %v1809_v34, %v1740_v46  ;;  %vm14395_vm11 = vmmov %vm14391_vm6 }
 0x3b6   :  { %v1927_v30 = vadd.f32 %v1903_v45, %v1834_v20  ;;  %v2161_v59 = vpop.permute.xlu0 %2160 }
 0x3b7   :  { %v1926_v53 = vadd.f32 %v1902_v48, %v1833_v24  ;;  %v2068_v25 = vpop.permute.xlu1 %2067  ;;  %v2182_v58 = vsel %vm14389_vm5, %v2161_v59, %v14388_v28  ;;  %v2181_v41 = vsel %vm14390_vm14, %v11625_v42, %v2161_v59  ;;  %v2495_v42 = vadd.s32 296, %v13977_v27 }
 0x3b8   :  { %v2020_v14 = vadd.f32 %v1996_v23, %v1927_v30  ;;  %v2089_v13 = vsel %vm14386_vm10, %v2068_v25, %v14385_v29  ;;  %v2088_v54 = vsel %vm14387_vm3, %v11504_v39, %v2068_v25  ;;  %vm2617_vm10 = vcmp.eq.s32.totalorder %v2493_v8, %v10719_v50  ;;  %vm11938_vm3 = vmpackc.low %vm2618_vm7, %vm2616_vm15 }
 0x3b9   :  { %v2019_v16 = vadd.f32 %v1995_v55, %v1926_v53  ;;  %vm2620_vm5 = vcmp.eq.s32.totalorder %v11880_v7, %v10722_v37  ;;  %vm2675_vm14 = vcmp.eq.s32.totalorder %v11915_v5, %v10719_v50  ;;  %v2497_v59 = vadd.s32 312, %v13977_v27  ;;  %vm11973_vm7 = vmpackc.low %vm2617_vm10, %vm2615_vm1 }
 0x3ba   :  { %v2113_v56 = vadd.f32 %v2089_v13, %v2020_v14  ;;  %v14408_v8 = vmov 0  ;;  %v2501_v28 = vadd.s32 344, %v13977_v27  ;;  %v8639_v55 = vmov 0.0  }
 0x3bb   :  { %v2112_v18 = vadd.f32 %v2088_v54, %v2019_v16  ;;  %v2496_v16 = vadd.s32 304, %v13977_v27  ;;  %vm2626_vm10 = vcmp.eq.s32.totalorder %v2497_v59, %v10722_v37  ;;  %v14405_v54 = vld [vmem:[#allocation6_spill] sm:$0xff] }
 0x3bc   :  { %v2206_v0 = vadd.f32 %v2182_v58, %v2113_v56 }
 0x3bd   :  { %v2205_v17 = vadd.f32 %v2181_v41, %v2112_v18  ;;  %vm2624_vm1 = vcmp.eq.s32.totalorder %v2496_v16, %v10722_v37  ;;  %v2500_v18 = vadd.s32 336, %v13977_v27  ;;  %v14410_v41 = vmov 0 }
 0x3f9   :  { %v8493_v51 = vpop.permute.xlu1 %8492 }
 0x3fa   :  { %v8495_v10 = vunpack.i.h.bf16 %v8493_v51  ;;  %v8494_v2 = vunpack.i.l.bf16 %v8493_v51  ;;  %v14399_v51 = vmov 0 }
 0x3fc   :  { %v2355_v39 = vsel %vm14391_vm6, %v8494_v2, %v8495_v10 }
 0x3fd   :  { %v2254_v36 = vpop.permute.xlu1 %2253  ;;  %v11898_v24 = vmax.f32 %v2307_v26, %v2355_v39  ;;  %v11918_v26 = vadd.s32 520, %v13977_v27  ;;  %v14414_v39 = vmov 0 }
 0x3fe   :  { %v11877_v12 = vpop.permute.xlu0 %8497  ;;  %v2275_v19 = vsel %vm14393_vm8, %v2254_v36, %v14392_v61  ;;  %v2274_v34 = vsel %vm14394_vm9, %v11650_v31, %v2254_v36  ;;  %vm2622_vm8 = vcmp.eq.s32.totalorder %v2495_v42, %v10722_v37  ;;  %v14412_v36 = vmov 0 }
 0x3ff   :  { %v8500_v22 = vunpack.i.h.bf16 %v11877_v12  ;;  %v8499_v46 = vunpack.i.l.bf16 %v11877_v12  ;;  %v11900_v15 = vadd.f32 %v2275_v19, %v2206_v0  ;;  %v11920_v60 = vadd.f32 %v2274_v34, %v2205_v17  ;;  %vm11984_vm9 = vmpackc.low %vm2622_vm8, %vm2620_vm5 }
 0x400   :  { %vm2677_vm6 = vcmp.eq.s32.totalorder %v11918_v26, %v10719_v50  ;;  %vm2625_vm8 = vcmp.eq.s32.totalorder %v2497_v59, %v10719_v50  ;;  %v14416_v61 = vmov 0  ;;  %v2504_v19 = vadd.s32 368, %v13977_v27 }
 0x401   :  { %v2354_v4 = vsel %vm14395_vm11, %v8500_v22, %v8494_v2  ;;  %v2356_v20 = vsel %vm14396_vm0, %v8495_v10, %v8499_v46  ;;  %v3257_v45 = vpop.permute.xlu1 %3256  ;;  %v13775_v52 = vmax.f32 %v11900_v15, 0.0  ;;  %vm11952_vm15 = vmpackc.low %vm2677_vm6, %vm2675_vm14  ;;  %v13777_v29 = vmax.f32 %v11920_v60, 0.0 }
 0x402   :  { %v11904_v9 = vmax.f32 %v2308_v44, %v2356_v20  ;;  %v11906_v48 = vpop.permute.xlu0 %8502  ;;  %v11910_v31 = vmax.f32 %v2306_v11, %v2354_v4  ;;  %v14400_v51 = vsel %vm11952_vm15, 4294967295, %v14399_v51  ;;  %vm2619_vm11 = vcmp.eq.s32.totalorder %v11880_v7, %v10719_v50  ;;  %vm12008_vm14 = vmpackc.low %vm2626_vm10, %vm2624_vm1 }
 0x403   :  { %v13776_v30 = vunpack.i.h.bf16 %v11906_v48  ;;  %v8504_v53 = vunpack.i.l.bf16 %v11906_v48  ;;  %vm2621_vm0 = vcmp.eq.s32.totalorder %v2495_v42, %v10719_v50  ;;  %v14409_v8 = vsel %vm12008_vm14, 4294967295, %v14408_v8 }
 0x404   :  { %2401 = vrot.lane.b32.xlu1 %v11910_v31, %s8617_s18  ;;  %v8506_v44 = vpack.i.bf16 %v11904_v9, %v11898_v24  ;;  %vm12003_vm5 = vmpackc.low %vm2621_vm0, %vm2619_vm11  ;;  %vm2623_vm6 = vcmp.eq.s32.totalorder %v2496_v16, %v10719_v50  ;;  %v2503_v7 = vadd.s32 360, %v13977_v27  ;;  %v2505_v22 = vadd.s32 376, %v13977_v27 }
 0x405   :  { %v3270_v62 = vsel %vm13750_vm12, %v8504_v53, %v13776_v30  ;;  %v3269_v11 = vsel %vm13750_vm12, %v3257_v45, %v8504_v53  ;;  %v2424_v23 = vpop.permute.xlu1 %2423  ;;  %v14407_v35 = vsel %vm12003_vm5, 4294967295, %v14406_v35  ;;  %vm12025_vm11 = vmpackc.low %vm2625_vm8, %vm2623_vm6  ;;  %vm2631_vm6 = vcmp.eq.s32.totalorder %v2500_v18, %v10719_v50 }
 0x406   :  { %v2422_v25 = vpop.permute.xlu0 %2421  ;;  %3344 = vmatprep.mubr.f32.mxu1 %v3270_v62  ;;  %8507 = vrot.lane.b32.xlu0 %v8506_v44, %s8617_s18  ;;  %v2456_v58 = vmax.f32 %v11759_v6, %v2424_v23  ;;  %v14411_v41 = vsel %vm12025_vm11, 4294967295, %v14410_v41  ;;  %v2502_v6 = vadd.s32 352, %v13977_v27  ;;  %vm2633_vm8 = vcmp.eq.s32.totalorder %v2501_v28, %v10719_v50 }
 0x407   :  { %v2434_v14 = vsel %vm13751_vm4, %v2422_v25, %v2424_v23  ;;  %3345 = vmatmul.mubr.f32.vlgmr.msra.gmra.mrb[0].mxu1 %v3269_v11  ;;  %v2433_v13 = vsel %vm13751_vm4, %v8489_v3, %v2422_v25  ;;  %v2498_v3 = vadd.s32 320, %v13977_v27  ;;  %vm2632_vm4 = vcmp.eq.s32.totalorder %v2500_v18, %v10722_v37 }
 0x408   :  { %2340 = vrot.lane.b32.xlu1 %v13775_v52, %s8613_s2  ;;  %8053 = vmatpush1.bf16.msk.msra.mxu1 %vm11772_vm13, %v14134_v43  ;;  %v2455_v2 = vmax.f32 %v11755_v33, %v2434_v14  ;;  %v2499_v33 = vadd.s32 328, %v13977_v27  ;;  %v2454_v56 = vmax.f32 %v14405_v54, %v2433_v13  ;;  %v14418_v0 = vmov 0 }
 0x409   :  { %8055 = vmatprep.subr.msk.bf16.mxu1 %vm11938_vm3, %v14134_v43  ;;  %vm2628_vm2 = vcmp.eq.s32.totalorder %v2498_v3, %v10722_v37  ;;  %vm2627_vm1 = vcmp.eq.s32.totalorder %v2498_v3, %v10719_v50  ;;  %v14420_v42 = vmov 0  ;;  %v2506_v17 = vadd.s32 384, %v13977_v27 }
 0x40a   :  { %2338 = vrot.lane.b32.xlu0 %v13777_v29, %s8613_s2  ;;  %vm2630_vm12 = vcmp.eq.s32.totalorder %v2499_v33, %v10722_v37  ;;  %vm2629_vm10 = vcmp.eq.s32.totalorder %v2499_v33, %v10719_v50  ;;  %v2507_v34 = vadd.s32 392, %v13977_v27  ;;  %v14422_v4 = vmov 0 }
 0x40b   :  { %vm12030_vm0 = vmpackc.low %vm2630_vm12, %vm2628_vm2  ;;  %v14424_v20 = vmov 0  ;;  %v2508_v45 = vadd.s32 400, %v13977_v27  ;;  %v2509_v53 = vadd.s32 408, %v13977_v27  ;;  %v14426_v44 = vmov 0 }
 0x40c   :  { %3264 = vrot.lane.b32.xlu1 %v2455_v2, %s8638_s23  ;;  %8057 = vmatpush1.bf16.msk.msra.mxu1 %vm11973_vm7, %v14134_v43  ;;  %v14413_v36 = vsel %vm12030_vm0, 4294967295, %v14412_v36  ;;  %vm12046_vm2 = vmpackc.low %vm2629_vm10, %vm2627_vm1  ;;  %vm2635_vm1 = vcmp.eq.s32.totalorder %v2502_v6, %v10719_v50  ;;  %vm2637_vm10 = vcmp.eq.s32.totalorder %v2503_v7, %v10719_v50  ;;  %v14428_v62 = vmov 0 }
 0x40d   :  { %8059 = vmatprep.subr.msk.bf16.mxu1 %vm11984_vm9, %v14134_v43  ;;  %v14415_v39 = vsel %vm12046_vm2, 4294967295, %v14414_v39  ;;  %v2510_v11 = vadd.s32 416, %v13977_v27  ;;  %v2511_v23 = vadd.s32 424, %v13977_v27  ;;  %v14430_v25 = vmov 0 }
 0x40e   :  { %3262 = vrot.lane.b32.xlu0 %v2454_v56, %s8638_s23  ;;  %v14432_v14 = vmov 0  ;;  %v2512_v16 = vadd.s32 432, %v13977_v27  ;;  %v2513_v59 = vadd.s32 440, %v13977_v27  ;;  %v14434_v13 = vmov 0 }
 0x40f   :  { %v14436_v2 = vmov 0  ;;  %v2514_v3 = vadd.s32 448, %v13977_v27  ;;  %v2515_v33 = vadd.s32 456, %v13977_v27  ;;  %v14438_v54 = vmov 0 }
 0x410   :  { %8061 = vmatpush1.bf16.msk.msra.mxu1 %vm12003_vm5, %v14134_v43  ;;  %vm2634_vm5 = vcmp.eq.s32.totalorder %v2501_v28, %v10722_v37  ;;  %v14440_v56 = vmov 0  ;;  %v2516_v18 = vadd.s32 464, %v13977_v27  ;;  %v2517_v28 = vadd.s32 472, %v13977_v27 }
 0x411   :  { %8063 = vmatprep.subr.msk.bf16.mxu1 %vm12008_vm14, %v14134_v43  ;;  %vm12050_vm12 = vmpackc.low %vm2634_vm5, %vm2632_vm4  ;;  %vm2636_vm14 = vcmp.eq.s32.totalorder %v2502_v6, %v10722_v37  ;;  %v14444_v6 = vmov 0  ;;  %v2526_v12 = vadd.s32 544, %v13977_v27  ;;  %v14480_v10 = vmov 0 }
 0x412   :  { %3266 = vrot.lane.b32.xlu0 %v2456_v58, %s8638_s23  ;;  %v14417_v61 = vsel %vm12050_vm12, 4294967295, %v14416_v61  ;;  %vm12066_vm4 = vmpackc.low %vm2633_vm8, %vm2631_vm6  ;;  %vm2639_vm6 = vcmp.eq.s32.totalorder %v2504_v19, %v10719_v50  ;;  %vm2641_vm8 = vcmp.eq.s32.totalorder %v2505_v22, %v10719_v50  ;;  %v14442_v58 = vmov 0 }
 0x413   :  { %v14419_v0 = vsel %vm12066_vm4, 4294967295, %v14418_v0 }
 0x414   :  { %8065 = vmatpush1.bf16.msk.msra.mxu1 %vm12025_vm11, %v14134_v43  ;;  %vm2638_vm11 = vcmp.eq.s32.totalorder %v2503_v7, %v10722_v37  ;;  %v2518_v7 = vadd.s32 480, %v13977_v27 }
 0x415   :  { %8067 = vmatprep.subr.msk.bf16.mxu1 %vm12030_vm0, %v14134_v43  ;;  %vm12070_vm5 = vmpackc.low %vm2638_vm11, %vm2636_vm14  ;;  %vm2640_vm0 = vcmp.eq.s32.totalorder %v2504_v19, %v10722_v37  ;;  %v2519_v19 = vadd.s32 488, %v13977_v27 }
 0x416   :  { %v14421_v42 = vsel %vm12070_vm5, 4294967295, %v14420_v42  ;;  %vm12086_vm14 = vmpackc.low %vm2637_vm10, %vm2635_vm1  ;;  %vm2643_vm1 = vcmp.eq.s32.totalorder %v2506_v17, %v10719_v50  ;;  %vm2645_vm10 = vcmp.eq.s32.totalorder %v2507_v34, %v10719_v50 }
 0x417   :  { %v14423_v4 = vsel %vm12086_vm14, 4294967295, %v14422_v4 }
 0x418   :  { %8069 = vmatpush1.bf16.msk.msra.mxu1 %vm12046_vm2, %v14134_v43  ;;  %vm2642_vm2 = vcmp.eq.s32.totalorder %v2505_v22, %v10722_v37  ;;  %v14446_v22 = vmov 0 }
 0x419   :  { %8071 = vmatprep.subr.msk.bf16.mxu1 %vm12050_vm12, %v14134_v43  ;;  %vm12090_vm11 = vmpackc.low %vm2642_vm2, %vm2640_vm0  ;;  %vm2644_vm12 = vcmp.eq.s32.totalorder %v2506_v17, %v10722_v37  ;;  %v14448_v17 = vmov 0 }
 0x41a   :  { %v14425_v20 = vsel %vm12090_vm11, 4294967295, %v14424_v20  ;;  %vm12106_vm0 = vmpackc.low %vm2641_vm8, %vm2639_vm6  ;;  %vm2647_vm6 = vcmp.eq.s32.totalorder %v2508_v45, %v10719_v50  ;;  %vm2649_vm8 = vcmp.eq.s32.totalorder %v2509_v53, %v10719_v50 }
 0x41b   :  { %v14427_v44 = vsel %vm12106_vm0, 4294967295, %v14426_v44 }
 0x41c   :  { %8073 = vmatpush1.bf16.msk.msra.mxu1 %vm12066_vm4, %v14134_v43  ;;  %vm2646_vm4 = vcmp.eq.s32.totalorder %v2507_v34, %v10722_v37  ;;  %v2520_v34 = vadd.s32 496, %v13977_v27 }
 0x41d   :  { %8075 = vmatprep.subr.msk.bf16.mxu1 %vm12070_vm5, %v14134_v43  ;;  %vm12110_vm2 = vmpackc.low %vm2646_vm4, %vm2644_vm12  ;;  %vm2648_vm5 = vcmp.eq.s32.totalorder %v2508_v45, %v10722_v37  ;;  %v2521_v45 = vadd.s32 504, %v13977_v27 }
 0x41e   :  { %v14429_v62 = vsel %vm12110_vm2, 4294967295, %v14428_v62  ;;  %vm12126_vm12 = vmpackc.low %vm2645_vm10, %vm2643_vm1  ;;  %vm2651_vm1 = vcmp.eq.s32.totalorder %v2510_v11, %v10719_v50  ;;  %vm2653_vm10 = vcmp.eq.s32.totalorder %v2511_v23, %v10719_v50 }
 0x41f   :  { %v14431_v25 = vsel %vm12126_vm12, 4294967295, %v14430_v25 }
 0x420   :  { %8077 = vmatpush1.bf16.msk.msra.mxu1 %vm12086_vm14, %v14134_v43  ;;  %vm2650_vm14 = vcmp.eq.s32.totalorder %v2509_v53, %v10722_v37  ;;  %v14450_v53 = vmov 0 }
 0x421   :  { %8079 = vmatprep.subr.msk.bf16.mxu1 %vm12090_vm11, %v14134_v43  ;;  %vm12130_vm4 = vmpackc.low %vm2650_vm14, %vm2648_vm5  ;;  %vm2652_vm11 = vcmp.eq.s32.totalorder %v2510_v11, %v10722_v37  ;;  %v3502_v11 = vld [vmem:[%s13453_s3] sm:$0xff] }
 0x422   :  { %v14433_v14 = vsel %vm12130_vm4, 4294967295, %v14432_v14  ;;  %vm12146_vm5 = vmpackc.low %vm2649_vm8, %vm2647_vm6  ;;  %vm2655_vm6 = vcmp.eq.s32.totalorder %v2512_v16, %v10719_v50  ;;  %vm2657_vm8 = vcmp.eq.s32.totalorder %v2513_v59, %v10719_v50 }
 0x423   :  { %v14435_v13 = vsel %vm12146_vm5, 4294967295, %v14434_v13 }
 0x424   :  { %8081 = vmatpush1.bf16.msk.msra.mxu1 %vm12106_vm0, %v14134_v43  ;;  %vm2654_vm0 = vcmp.eq.s32.totalorder %v2511_v23, %v10722_v37 }
 0x425   :  { %8083 = vmatprep.subr.msk.bf16.mxu1 %vm12110_vm2, %v14134_v43  ;;  %vm12150_vm14 = vmpackc.low %vm2654_vm0, %vm2652_vm11  ;;  %vm2656_vm2 = vcmp.eq.s32.totalorder %v2512_v16, %v10722_v37 }
 0x426   :  { %v14437_v2 = vsel %vm12150_vm14, 4294967295, %v14436_v2  ;;  %vm12166_vm11 = vmpackc.low %vm2653_vm10, %vm2651_vm1  ;;  %vm2659_vm1 = vcmp.eq.s32.totalorder %v2514_v3, %v10719_v50  ;;  %vm2661_vm10 = vcmp.eq.s32.totalorder %v2515_v33, %v10719_v50 }
 0x427   :  { %v14439_v54 = vsel %vm12166_vm11, 4294967295, %v14438_v54 }
 0x428   :  { %8085 = vmatpush1.bf16.msk.msra.mxu1 %vm12126_vm12, %v14134_v43  ;;  %vm2658_vm12 = vcmp.eq.s32.totalorder %v2513_v59, %v10722_v37  ;;  %v3504_v59 = vld [vmem:[%s13453_s3 + $0x10] sm:$0xff] }
 0x429   :  { %8087 = vmatprep.subr.msk.bf16.mxu1 %vm12130_vm4, %v14134_v43  ;;  %vm12170_vm0 = vmpackc.low %vm2658_vm12, %vm2656_vm2  ;;  %vm2660_vm4 = vcmp.eq.s32.totalorder %v2514_v3, %v10722_v37  ;;  %v14460_v3 = vmov 0 }
 0x42a   :  { %v14441_v56 = vsel %vm12170_vm0, 4294967295, %v14440_v56  ;;  %vm12186_vm2 = vmpackc.low %vm2657_vm8, %vm2655_vm6  ;;  %vm2663_vm6 = vcmp.eq.s32.totalorder %v2516_v18, %v10719_v50  ;;  %vm2665_vm8 = vcmp.eq.s32.totalorder %v2517_v28, %v10719_v50 }
 0x42b   :  { %v14443_v58 = vsel %vm12186_vm2, 4294967295, %v14442_v58 }
 0x42c   :  { %8089 = vmatpush1.bf16.msk.msra.mxu1 %vm12146_vm5, %v14134_v43  ;;  %vm2662_vm5 = vcmp.eq.s32.totalorder %v2515_v33, %v10722_v37 }
 0x42d   :  { %8091 = vmatprep.subr.msk.bf16.mxu1 %vm12150_vm14, %v14134_v43  ;;  %vm12190_vm12 = vmpackc.low %vm2662_vm5, %vm2660_vm4  ;;  %vm2664_vm14 = vcmp.eq.s32.totalorder %v2516_v18, %v10722_v37 }
 0x42e   :  { %v14445_v6 = vsel %vm12190_vm12, 4294967295, %v14444_v6  ;;  %vm12206_vm4 = vmpackc.low %vm2661_vm10, %vm2659_vm1  ;;  %vm2667_vm1 = vcmp.eq.s32.totalorder %v2518_v7, %v10719_v50  ;;  %vm2669_vm10 = vcmp.eq.s32.totalorder %v2519_v19, %v10719_v50 }
 0x42f   :  { %v14447_v22 = vsel %vm12206_vm4, 4294967295, %v14446_v22 }
 0x430   :  { %8093 = vmatpush1.bf16.msk.msra.mxu1 %vm12166_vm11, %v14134_v43  ;;  %vm2666_vm11 = vcmp.eq.s32.totalorder %v2517_v28, %v10722_v37 }
 0x431   :  { %8095 = vmatprep.subr.msk.bf16.mxu1 %vm12170_vm0, %v14134_v43  ;;  %vm12210_vm5 = vmpackc.low %vm2666_vm11, %vm2664_vm14  ;;  %vm2668_vm0 = vcmp.eq.s32.totalorder %v2518_v7, %v10722_v37  ;;  %v2524_v7 = vadd.s32 528, %v13977_v27 }
 0x432   :  { %v14449_v17 = vsel %vm12210_vm5, 4294967295, %v14448_v17  ;;  %vm12226_vm14 = vmpackc.low %vm2665_vm8, %vm2663_vm6  ;;  %vm2671_vm6 = vcmp.eq.s32.totalorder %v2520_v34, %v10719_v50  ;;  %vm2673_vm8 = vcmp.eq.s32.totalorder %v2521_v45, %v10719_v50 }
 0x433   :  { %v14451_v53 = vsel %vm12226_vm14, 4294967295, %v14450_v53 }
 0x434   :  { %8097 = vmatpush1.bf16.msk.msra.mxu1 %vm12186_vm2, %v14134_v43  ;;  %vm2670_vm2 = vcmp.eq.s32.totalorder %v2519_v19, %v10722_v37 }
 0x435   :  { %8099 = vmatprep.subr.msk.bf16.mxu1 %vm12190_vm12, %v14134_v43  ;;  %vm12230_vm11 = vmpackc.low %vm2670_vm2, %vm2668_vm0  ;;  %vm2672_vm12 = vcmp.eq.s32.totalorder %v2520_v34, %v10722_v37 }
 0x436   :  { %vm12244_vm0 = vmpackc.low %vm2669_vm10, %vm2667_vm1  ;;  %vm14464_vm1 = vcmask 1039360  }
 0x437   :  { %vm14465_vm10 = vmmov %vm14464_vm1 }
 0x438   :  { %8101 = vmatpush1.bf16.msk.msra.mxu1 %vm12206_vm4, %v14134_v43  ;;  %vm2674_vm4 = vcmp.eq.s32.totalorder %v2521_v45, %v10722_v37  ;;  %v2525_v45 = vadd.s32 536, %v13977_v27 }
 0x439   :  { %8103 = vmatprep.subr.msk.bf16.mxu1 %vm12210_vm5, %v14134_v43  ;;  %vm12248_vm2 = vmpackc.low %vm2674_vm4, %vm2672_vm12  ;;  %vm2676_vm5 = vcmp.eq.s32.totalorder %v11915_v5, %v10722_v37 }
 0x43a   :  { %vm12264_vm12 = vmpackc.low %vm2673_vm8, %vm2671_vm6  ;;  %vm2680_vm6 = vcmp.eq.s32.totalorder %v2524_v7, %v10722_v37 }
 0x43b   :  { %vm14469_vm8 = vmmov %vm14464_vm1 }
 0x43c   :  { %8105 = vmatpush1.bf16.msk.msra.mxu1 %vm12226_vm14, %v14134_v43  ;;  %vm2678_vm14 = vcmp.eq.s32.totalorder %v11918_v26, %v10722_v37 }
 0x43d   :  { %8107 = vmatprep.subr.msk.bf16.mxu1 %vm12230_vm11, %v14134_v43  ;;  %vm12268_vm4 = vmpackc.low %vm2678_vm14, %vm2676_vm5  ;;  %vm14462_vm5 = vcmask 818176  }
 0x43e   :  { %v14461_v3 = vsel %vm12268_vm4, 4294967295, %v14460_v3  ;;  %vm14463_vm14 = vmmov %vm14462_vm5 }
 0x440   :  { %8109 = vmatpush1.bf16.msk.msra.mxu1 %vm12244_vm0, %v14134_v43 }
 0x441   :  { %8111 = vmatprep.subr.msk.bf16.mxu1 %vm12248_vm2, %v14134_v43 }
 0x444   :  { %8113 = vmatpush1.bf16.msk.msra.mxu1 %vm12264_vm12, %v14134_v43 }
 0x445   :  { %8115 = vmatprep.subr.msk.bf16.mxu1 %vm12268_vm4, %v14134_v43 }
 0x476   :  { %v2402_v5 = vpop.permute.xlu1 %2401 }
 0x478   :  { %v12278_v26 = vpop.permute.xlu0 %8507 }
 0x479   :  { %v13782_v33 = vunpack.i.h.bf16 %v12278_v26  ;;  %v8509_v18 = vunpack.i.l.bf16 %v12278_v26 }
 0x47a   :  { %v2341_v28 = vpop.permute.xlu1 %2340 }
 0x47b   :  { %v2426_v19 = vsel %vm14462_vm5, %v8509_v18, %v13782_v33  ;;  %v2425_v34 = vsel %vm14463_vm14, %v2402_v5, %v8509_v18  ;;  %v14467_v33 = vmax.f32 %v11920_v60, 0.0  ;;  %vm2682_vm5 = vcmp.eq.s32.totalorder %v2525_v45, %v10722_v37 }
 0x47c   :  { %v2339_v52 = vpop.permute.xlu0 %2338  ;;  %v2447_v30 = vmax.f32 %v11898_v24, %v2426_v19  ;;  %v2446_v29 = vmax.f32 %v11910_v31, %v2425_v34  ;;  %v14468_v24 = vld [vmem:[#allocation51_spill] sm:$0xff]  ;;  %vm14470_vm14 = vcmask 916480   ;;  %v14473_v60 = vmax.f32 %v11900_v15, 0.0 }
 0x47d   :  { %v2357_v49 = vsel %vm14464_vm1, %v8499_v46, %v2339_v52  ;;  %v2358_v38 = vsel %vm14465_vm10, %v2339_v52, %v2341_v28  ;;  %v2359_v31 = vsel %vm14469_vm8, %v2341_v28, %v14468_v24  ;;  %v2527_v46 = vadd.s32 552, %v13977_v27  ;;  %vm14472_vm1 = vmmov %vm14470_vm14 }
 0x47e   :  { %v12296_v57 = vmax.f32 %v14466_v63, %v2357_v49  ;;  %v12300_v5 = vmax.f32 %v14467_v33, %v2358_v38  ;;  %3101 = vmatprep.mubr.f32.mxu0 %v2447_v30  ;;  %v12308_v21 = vpop.permute.xlu1 %3264  ;;  %v14471_v49 = vunpack.i.h.bf16 %v11906_v48  ;;  %v2382_v52 = vmax.f32 %v14473_v60, %v2359_v31  ;;  %vm12326_vm10 = vmpackc.low %vm2682_vm5, %vm2680_vm6 }
 0x47f   :  { %3102 = vmatmul.mubr.f32.vlgmr.msra.gmra.mrb[0].mxu0 %v2446_v29  ;;  %v14474_v29 = vmov 0  ;;  %vm2679_vm8 = vcmp.eq.s32.totalorder %v2524_v7, %v10719_v50  ;;  %v2529_v15 = vadd.s32 568, %v13977_v27  ;;  %v14476_v48 = vmov 0 }
 0x480   :  { %2409 = vrot.lane.b32.xlu0 %v12300_v5, %s8617_s18  ;;  %2407 = vrot.lane.b32.xlu1 %v12296_v57, %s8617_s18  ;;  %v3263_v38 = vpop.permute.xlu0 %3262  ;;  %v14475_v29 = vsel %vm12326_vm10, 4294967295, %v14474_v29  ;;  %v14478_v33 = vmov 0  ;;  %vm2683_vm5 = vcmp.eq.s32.totalorder %v2526_v12, %v10719_v50  ;;  %v2530_v18 = vadd.s32 576, %v13977_v27 }
 0x481   :  { %v3272_v63 = vsel %vm14470_vm14, %v3263_v38, %v12308_v21  ;;  %v3271_v30 = vsel %vm14472_vm1, %v14471_v49, %v3263_v38  ;;  %7891 = vmatpush1.bf16.msk.msra.mxu0 %vm11772_vm13, %v14134_v43  ;;  %vm2681_vm14 = vcmp.eq.s32.totalorder %v2525_v45, %v10719_v50  ;;  %vm2684_vm13 = vcmp.eq.s32.totalorder %v2526_v12, %v10722_v37  ;;  %v3514_v12 = vld [vmem:[%s13453_s3 + $0x60] sm:$0xff] }
 0x482   :  { %3415 = vmatprep.mubr.f32.mxu1 %v3272_v63  ;;  %7893 = vmatprep.subr.msk.bf16.mxu0 %vm11938_vm3, %v14134_v43  ;;  %vm2686_vm1 = vcmp.eq.s32.totalorder %v2527_v46, %v10722_v37  ;;  %vm12346_vm3 = vmpackc.low %vm2681_vm14, %vm2679_vm8  ;;  %vm2688_vm8 = vcmp.eq.s32.totalorder %v2528_v1, %v10722_v37  ;;  %vm2690_vm14 = vcmp.eq.s32.totalorder %v2529_v15, %v10722_v37  ;;  %v2531_v28 = vadd.s32 584, %v13977_v27 }
 0x483   :  { %3416 = vmatmul.mubr.f32.vlgmr.msra.gmra.mrb[0].mxu1 %v3271_v30  ;;  %v14477_v48 = vsel %vm12346_vm3, 4294967295, %v14476_v48  ;;  %vm12351_vm6 = vmpackc.low %vm2686_vm1, %vm2684_vm13  ;;  %v14482_v7 = vmov 0  ;;  %vm2687_vm1 = vcmp.eq.s32.totalorder %v2528_v1, %v10719_v50  ;;  %v2533_v19 = vadd.s32 600, %v13977_v27 }
 0x484   :  { %8117 = vmatpush1.bf16.msk.msra.mxu1 %vm11952_vm15, %v14134_v43  ;;  %2411 = vrot.lane.b32.xlu1 %v2382_v52, %s8617_s18  ;;  %v14479_v33 = vsel %vm12351_vm6, 4294967295, %v14478_v33  ;;  %vm2685_vm15 = vcmp.eq.s32.totalorder %v2527_v46, %v10719_v50  ;;  %vm12377_vm13 = vmpackc.low %vm2690_vm14, %vm2688_vm8  ;;  %v14488_v34 = vmov 0  ;;  %vm2691_vm14 = vcmp.eq.s32.totalorder %v2530_v18, %v10719_v50  ;;  %v3506_v52 = vld [vmem:[%s13453_s3 + $0x20] sm:$0xff] }
 0x485   :  { %8119 = vmatprep.subr.msk.bf16.mxu1 %vm12326_vm10, %v14134_v43  ;;  %3486 = vmatprep.mubr.f32.mxu1 %v8639_v55  ;;  %v14483_v7 = vsel %vm12377_vm13, 4294967295, %v14482_v7  ;;  %vm2696_vm10 = vcmp.eq.s32.totalorder %v2532_v40, %v10722_v37  ;;  %v2535_v45 = vadd.s32 616, %v13977_v27  ;;  %v2537_v24 = vadd.s32 632, %v13977_v27 }
 0x486   :  { %7895 = vmatpush1.bf16.msk.msra.mxu0 %vm11973_vm7, %v14134_v43  ;;  %vm12373_vm7 = vmpackc.low %vm2685_vm15, %vm2683_vm5  ;;  %vm2694_vm15 = vcmp.eq.s32.totalorder %v2531_v28, %v10722_v37  ;;  %vm14485_vm5 = vnez %v14409_v8  ;;  %v2534_v8 = vadd.s32 608, %v13977_v27  ;;  %v14494_v31 = vmov 0 }
 0x487   :  { %7897 = vmatprep.subr.msk.bf16.mxu0 %vm11984_vm9, %v14134_v43  ;;  %v14481_v10 = vsel %vm12373_vm7, 4294967295, %v14480_v10  ;;  %vm2689_vm9 = vcmp.eq.s32.totalorder %v2529_v15, %v10719_v50  ;;  %vm2705_vm4 = vcmp.eq.s32.totalorder %v2537_v24, %v10719_v50 }
 0x488   :  { %8121 = vmatpush1.bf16.msk.msra.mxu1 %vm12346_vm3, %v14134_v43  ;;  %vm14484_vm3 = vnez %v14407_v35  ;;  %vm12399_vm8 = vmpackc.low %vm2689_vm9, %vm2687_vm1  ;;  %v14486_v35 = vmov 0  ;;  %vm2695_vm9 = vcmp.eq.s32.totalorder %v2532_v40, %v10719_v50  ;;  %v7123_v38 = vsel %vm2705_vm4, 1.0, %v8639_v55  ;;  %v3509_v40 = vld [vmem:[%s13453_s3 + $0x38] sm:$0xff] }
 0x489   :  { %8123 = vmatprep.subr.msk.bf16.mxu1 %vm12351_vm6, %v14134_v43  ;;  %vm2692_vm6 = vcmp.eq.s32.totalorder %v2530_v18, %v10722_v37  ;;  %v14487_v35 = vsel %vm12399_vm8, 4294967295, %v14486_v35  ;;  %v3508_v18 = vld [vmem:[%s13453_s3 + $0x30] sm:$0xff] }
 0x48a   :  { %7899 = vmatpush1.bf16.msk.msra.mxu0 %vm14484_vm3, %v14134_v43  ;;  %vm12403_vm3 = vmpackc.low %vm2694_vm15, %vm2692_vm6  ;;  %vm14491_vm6 = vnez %v14413_v36  ;;  %vm2697_vm15 = vcmp.eq.s32.totalorder %v2533_v19, %v10719_v50  ;;  %v2536_v36 = vadd.s32 624, %v13977_v27 }
 0x48b   :  { %7901 = vmatprep.subr.msk.bf16.mxu0 %vm14485_vm5, %v14134_v43  ;;  %v14489_v34 = vsel %vm12403_vm3, 4294967295, %v14488_v34  ;;  %vm2693_vm5 = vcmp.eq.s32.totalorder %v2531_v28, %v10719_v50 }
 0x48c   :  { %8125 = vmatpush1.bf16.msk.msra.mxu1 %vm12373_vm7, %v14134_v43  ;;  %vm14490_vm7 = vnez %v14411_v41  ;;  %v14492_v41 = vmov 0 }
 0x48d   :  { %8127 = vmatprep.subr.msk.bf16.mxu1 %vm12377_vm13, %v14134_v43  ;;  %vm2698_vm13 = vcmp.eq.s32.totalorder %v2533_v19, %v10722_v37  ;;  %v3510_v19 = vld [vmem:[%s13453_s3 + $0x40] sm:$0xff] }
 0x48e   :  { %7903 = vmatpush1.bf16.msk.msra.mxu0 %vm14490_vm7, %v14134_v43  ;;  %vm12426_vm7 = vmpackc.low %vm2693_vm5, %vm2691_vm14  ;;  %vm2706_vm14 = vcmp.eq.s32.totalorder %v2537_v24, %v10722_v37  ;;  %vm2699_vm5 = vcmp.eq.s32.totalorder %v2534_v8, %v10719_v50  ;;  %v3512_v24 = vld [vmem:[%s13453_s3 + $0x50] sm:$0xff] }
 0x48f   :  { %7905 = vmatprep.subr.msk.bf16.mxu0 %vm14491_vm6, %v14134_v43  ;;  %v14493_v41 = vsel %vm12426_vm7, 4294967295, %v14492_v41  ;;  %vm12430_vm1 = vmpackc.low %vm2698_vm13, %vm2696_vm10  ;;  %vm14496_vm6 = vnez %v14415_v39  ;;  %vm14497_vm10 = vnez %v14417_v61  ;;  %v7124_v61 = vsel %vm2706_vm14, 1.0, %v8639_v55  ;;  %v3513_v39 = vld [vmem:[%s13453_s3 + $0x58] sm:$0xff] }
 0x490   :  { %8129 = vmatpush1.bf16.msk.msra.mxu1 %vm12399_vm8, %v14134_v43  ;;  %v14495_v31 = vsel %vm12430_vm1, 4294967295, %v14494_v31  ;;  %vm2700_vm8 = vcmp.eq.s32.totalorder %v2534_v8, %v10722_v37  ;;  %vm12452_vm13 = vmpackc.low %vm2697_vm15, %vm2695_vm9  ;;  %vm2704_vm9 = vcmp.eq.s32.totalorder %v2536_v36, %v10722_v37  ;;  %vm3030_vm15 = vcmask 1046528  }
 0x491   :  { %8131 = vmatprep.subr.msk.bf16.mxu1 %vm12403_vm3, %v14134_v43  ;;  %vm2702_vm3 = vcmp.eq.s32.totalorder %v2535_v45, %v10722_v37  ;;  %vm14509_vm14 = vnez %v14425_v20 }
 0x492   :  { %7907 = vmatpush1.bf16.msk.msra.mxu0 %vm14496_vm6, %v14134_v43  ;;  %vm12457_vm6 = vmpackc.low %vm2702_vm3, %vm2700_vm8 }
 0x493   :  { %7909 = vmatprep.subr.msk.bf16.mxu0 %vm14497_vm10, %v14134_v43  ;;  %vm2701_vm10 = vcmp.eq.s32.totalorder %v2535_v45, %v10719_v50  ;;  %vm12484_vm3 = vmpackc.low %vm3030_vm15, %vm2704_vm9  ;;  %vm14514_vm9 = vcmask 916480   ;;  %v3511_v45 = vld [vmem:[%s13453_s3 + $0x48] sm:$0xff] }
 0x494   :  { %8133 = vmatpush1.bf16.msk.msra.mxu1 %vm12426_vm7, %v14134_v43  ;;  %vm14502_vm7 = vnez %v14419_v0  ;;  %vm12477_vm8 = vmpackc.low %vm2701_vm10, %vm2699_vm5  ;;  %v8640_v0 = vmov 1.0   ;;  %vm14512_vm5 = vnez %v14427_v44  ;;  %vm14513_vm10 = vnez %v14429_v62 }
 0x495   :  { %8135 = vmatprep.subr.msk.bf16.mxu1 %vm12430_vm1, %v14134_v43  ;;  %vm14503_vm1 = vnez %v14421_v42  ;;  %v7980_v37 = vpack.c.bf16 %v7124_v61, %v8640_v0  ;;  %v7983_v63 = vpack.c.bf16 %v7123_v38, %v8640_v0  ;;  %v3515_v38 = vld [vmem:[%s13453_s3 + $0x68] sm:$0xff]  ;;  %v3516_v42 = vld [vmem:[%s13453_s3 + $0x70] sm:$0xff] }
 0x496   :  { %7911 = vmatpush1.bf16.msk.msra.mxu0 %vm14502_vm7, %v14134_v43  ;;  %vm2703_vm7 = vcmp.eq.s32.totalorder %v2536_v36, %v10719_v50 }
 0x497   :  { %7913 = vmatprep.subr.msk.bf16.mxu0 %vm14503_vm1, %v14134_v43  ;;  %vm14508_vm1 = vnez %v14423_v4  ;;  %vm12502_vm4 = vmpackc.low %vm3030_vm15, %vm2703_vm7  ;;  %v3267_v4 = vpop.permute.xlu0 %3266  ;;  %vm14515_vm7 = vnez %v14431_v25  ;;  %v14528_v25 = vunpack.i.h.bf16 %v12278_v26 }
 0x498   :  { %8137 = vmatpush1.bf16.msk.msra.mxu1 %vm12452_vm13, %v14134_v43  ;;  %v3273_v20 = vsel %vm14514_vm9, %v12308_v21, %v3267_v4  ;;  %vm14520_vm9 = vnez %v14439_v54  ;;  %v3505_v21 = vld [vmem:[%s13453_s3 + $0x18] sm:$0xff] }
 0x499   :  { %8139 = vmatprep.subr.msk.bf16.mxu1 %vm12457_vm6, %v14134_v43 }
 0x49a   :  { %7915 = vmatpush1.bf16.msk.msra.mxu0 %vm14508_vm1, %v14134_v43  ;;  %vm14516_vm1 = vcmask 1039360  }
 0x49b   :  { %7917 = vmatprep.subr.msk.bf16.mxu0 %vm14509_vm14, %v14134_v43  ;;  %vm14517_vm14 = vnez %v14433_v14 }
 0x49c   :  { %8141 = vmatpush1.bf16.msk.msra.mxu1 %vm12477_vm8, %v14134_v43 }
 0x49d   :  { %8144 = vmatprep.subr.msk.bf16.mxu1 %vm12484_vm3, %v7980_v37 }
 0x49e   :  { %7919 = vmatpush1.bf16.msk.msra.mxu0 %vm14512_vm5, %v14134_v43  ;;  %vm14518_vm5 = vnez %v14435_v13 }
 0x49f   :  { %7921 = vmatprep.subr.msk.bf16.mxu0 %vm14513_vm10, %v14134_v43  ;;  %vm14519_vm10 = vnez %v14437_v2 }
 0x4a0   :  { %8147 = vmatpush1.bf16.msk.msra.mxu1 %vm12502_vm4, %v7983_v63 }
 0x4a2   :  { %7923 = vmatpush1.bf16.msk.msra.mxu0 %vm14515_vm7, %v14134_v43  ;;  %vm14521_vm7 = vnez %v14441_v56 }
 0x4a3   :  { %7446 = vmatmul.mubr.msk.f32.vlgmr.msra.gmra.mrb[0].mxu1 %vm14516_vm1, %v3273_v20  ;;  %7925 = vmatprep.subr.msk.bf16.mxu0 %vm14517_vm14, %v14134_v43  ;;  %vm14522_vm1 = vnez %v14443_v58  ;;  %vm14523_vm14 = vnez %v14445_v6  ;;  %v3517_v20 = vld [vmem:[%s13453_s3 + $0x78] sm:$0xff] }
 0x4a4   :  { %3642 = vmatprep.mubr.f32.mxu1 %v8639_v55 }
 0x4a6   :  { %7927 = vmatpush1.bf16.msk.msra.mxu0 %vm14518_vm5, %v14134_v43  ;;  %vm14524_vm5 = vnez %v14447_v22 }
 0x4a7   :  { %7929 = vmatprep.subr.msk.bf16.mxu0 %vm14519_vm10, %v14134_v43  ;;  %vm14525_vm10 = vnez %v14449_v17 }
 0x4aa   :  { %7931 = vmatpush1.bf16.msk.msra.mxu0 %vm14520_vm9, %v14134_v43  ;;  %vm14526_vm9 = vnez %v14451_v53 }
 0x4ab   :  { %7933 = vmatprep.subr.msk.bf16.mxu0 %vm14521_vm7, %v14134_v43  ;;  %vm14527_vm7 = vnez %v14461_v3 }
 0x4ae   :  { %7935 = vmatpush1.bf16.msk.msra.mxu0 %vm14522_vm1, %v14134_v43 }
 0x4af   :  { %7937 = vmatprep.subr.msk.bf16.mxu0 %vm14523_vm14, %v14134_v43  ;;  %vm14534_vm14 = vnez %v14479_v33 }
 0x4b2   :  { %7939 = vmatpush1.bf16.msk.msra.mxu0 %vm14524_vm5, %v14134_v43  ;;  %vm14535_vm5 = vnez %v14481_v10 }
 0x4b3   :  { %7941 = vmatprep.subr.msk.bf16.mxu0 %vm14525_vm10, %v14134_v43  ;;  %vm14536_vm10 = vnez %v14483_v7 }
 0x4b6   :  { %7943 = vmatpush1.bf16.msk.msra.mxu0 %vm14526_vm9, %v14134_v43  ;;  %vm14537_vm9 = vnez %v14487_v35 }
 0x4b7   :  { %7945 = vmatprep.subr.msk.bf16.mxu0 %vm12230_vm11, %v14134_v43  ;;  %vm14529_vm11 = vcmask 818176  }
 0x4b8   :  { %vm14530_vm1 = vmmov %vm14529_vm11 }
 0x4ba   :  { %7947 = vmatpush1.bf16.msk.msra.mxu0 %vm12244_vm0, %v14134_v43  ;;  %vm14531_vm0 = vnez %v14400_v51 }
 0x4bb   :  { %7949 = vmatprep.subr.msk.bf16.mxu0 %vm12248_vm2, %v14134_v43  ;;  %vm14532_vm2 = vnez %v14475_v29 }
 0x4be   :  { %7951 = vmatpush1.bf16.msk.msra.mxu0 %vm12264_vm12, %v14134_v43  ;;  %vm14533_vm12 = vnez %v14477_v48  ;;  %v3507_v48 = vld [vmem:[%s13453_s3 + $0x28] sm:$0xff] }
 0x4bf   :  { %7953 = vmatprep.subr.msk.bf16.mxu0 %vm14527_vm7, %v14134_v43  ;;  %vm14538_vm7 = vnez %v14489_v34 }
 0x4f2   :  { %v2408_v44 = vpop.permute.xlu1 %2407  ;;  %v2410_v62 = vpop.permute.xlu0 %2409 }
 0x4f3   :  { %v2427_v14 = vsel %vm14529_vm11, %v14528_v25, %v2408_v44  ;;  %v2428_v13 = vsel %vm14530_vm1, %v2408_v44, %v2410_v62  ;;  %vm14539_vm11 = vnez %v14493_v41  ;;  %vm14540_vm1 = vnez %v14495_v31  ;;  %v3518_v44 = vld [vmem:[%s13453_s3 + $0x80] sm:$0xff] }
 0x4f4   :  { %v2448_v2 = vmax.f32 %v11904_v9, %v2427_v14  ;;  %v2449_v54 = vmax.f32 %v12296_v57, %v2428_v13  ;;  %v3519_v14 = vld [vmem:[%s13453_s3 + $0x88] sm:$0xff]  ;;  %v3520_v13 = vld [vmem:[%s13453_s3 + $0x90] sm:$0xff] }
 0x4f6   :  { %3172 = vmatprep.mubr.f32.mxu0 %v2449_v54  ;;  %v2412_v57 = vpop.permute.xlu1 %2411  ;;  %v3552_v54 = vld [vmem:[%s13454_s4] sm:$0xff] }
 0x4f7   :  { %3173 = vmatmul.mubr.f32.vlgmr.msra.gmra.mrb[0].mxu0 %v2448_v2  ;;  %v3521_v2 = vld [vmem:[%s13453_s3 + $0x98] sm:$0xff] }
 0x4f8   :  { %7955 = vmatpush1.bf16.msk.msra.mxu0 %vm14531_vm0, %v14134_v43  ;;  %3243 = vmatprep.mubr.f32.mxu0 %v8639_v55  ;;  %vm14541_vm0 = vcmask 818176  }
 0x4f9   :  { %7957 = vmatprep.subr.msk.bf16.mxu0 %vm14532_vm2, %v14134_v43  ;;  %v2429_v9 = vsel %vm14541_vm0, %v2410_v62, %v2412_v57  ;;  %vm14546_vm2 = vcmask 1031168   ;;  %vm4533_vm0 = vcmask 850944  }
 0x4fa   :  { %v2450_v51 = vmax.f32 %v12300_v5, %v2429_v9 }
 0x4fc   :  { %7959 = vmatpush1.bf16.msk.msra.mxu0 %vm14533_vm12, %v14134_v43 }
 0x4fd   :  { %7961 = vmatprep.subr.msk.bf16.mxu0 %vm14534_vm14, %v14134_v43  ;;  %vm14548_vm14 = vcmask 1022976  }
 0x500   :  { %7963 = vmatpush1.bf16.msk.msra.mxu0 %vm14535_vm5, %v14134_v43  ;;  %vm14549_vm5 = vcmask 1014784  }
 0x501   :  { %7965 = vmatprep.subr.msk.bf16.mxu0 %vm14536_vm10, %v14134_v43  ;;  %vm4047_vm10 = vcmask 949248  }
 0x504   :  { %7967 = vmatpush1.bf16.msk.msra.mxu0 %vm14537_vm9, %v14134_v43  ;;  %vm4144_vm9 = vcmask 941056  }
 0x505   :  { %7969 = vmatprep.subr.msk.bf16.mxu0 %vm14538_vm7, %v14134_v43  ;;  %vm4241_vm7 = vcmask 932864  }
 0x508   :  { %7971 = vmatpush1.bf16.msk.msra.mxu0 %vm14539_vm11, %v14134_v43  ;;  %vm4338_vm11 = vcmask 924672  }
 0x509   :  { %7973 = vmatprep.subr.msk.bf16.mxu0 %vm14540_vm1, %v14134_v43  ;;  %vm14550_vm1 = vcmask 916480  }
 0x50c   :  { %7975 = vmatpush1.bf16.msk.msra.mxu0 %vm12452_vm13, %v14134_v43  ;;  %vm14542_vm13 = vcmask 1039360  }
 0x50d   :  { %7977 = vmatprep.subr.msk.bf16.mxu0 %vm12457_vm6, %v14134_v43  ;;  %vm3571_vm6 = vcmask 1045504  }
 0x510   :  { %7979 = vmatpush1.bf16.msk.msra.mxu0 %vm12477_vm8, %v14134_v43  ;;  %vm14543_vm8 = vcmask 130048  }
 0x511   :  { %7982 = vmatprep.subr.msk.bf16.mxu0 %vm12484_vm3, %v7980_v37  ;;  %vm3564_vm3 = vcmask 48128   ;;  %vm14547_vm12 = vmmov %vm14543_vm8 }
 0x514   :  { %7985 = vmatpush1.bf16.msk.msra.mxu0 %vm12502_vm4, %v7983_v63  ;;  %vm14545_vm4 = vmmov %vm14542_vm13 }
 0x517   :  { %7285 = vmatmul.mubr.msk.f32.vlgmr.msra.gmra.mrb[0].mxu0 %vm14542_vm13, %v2450_v51  ;;  %v3503_v51 = vld [vmem:[%s13453_s3 + $0x8] sm:$0xff]  ;;  %vm4633_vm13 = vcmask 842752  }
 0x518   :  { %3738 = vmatprep.mubr.f32.mxu0 %v8639_v55 }
 0x576   :  { %v3488_v56 = vpop.f32.mrb[0].mxu1 }
 0x577   :  { %3495 = vrot.lane.b32.xlu0 %v3488_v56, %s8632_s27  ;;  %v3490_v58 = vpop.f32.mrb[1].mxu1 }
 0x5e9   :  { %v3496_v22 = vpop.permute.xlu0 %3495 }
 0x5ea   :  { %v12621_v6 = vpop.f32.mrb[0].mxu0 }
 0x5eb   :  { %3659 = vrot.lane.b32.xlu1 %v12621_v6, %s8613_s2  ;;  %v3247_v17 = vpop.f32.mrb[1].mxu0 }
 0x5ec   :  { %v12626_v53 = vsel %vm14543_vm8, %v3247_v17, %v3496_v22  ;;  %vm4733_vm8 = vcmask 834560  }
 0x5ed   :  { %3661 = vrot.lane.b32.xlu0 %v12626_v53, %s8613_s2  ;;  %7447 = vmatprep.subr.msk.mxu1 %vm3571_vm6, %v12626_v53 }
 0x5ee   :  { %7448 = vmatpush1.msk.msra.mxu1 %vm3571_vm6, %v12621_v6 }
 0x5ef   :  { %3755 = vrot.lane.b32.xlu1 %v12621_v6, %s8614_s15  ;;  %7449 = vmatmul.mubr.msk.f32.vlgmr.msra.gmra.mrb[2].mxu1 %vm3564_vm3, %v3502_v11  ;;  %v3522_v11 = vld [vmem:[%s13453_s3 + $0xa0] sm:$0xff] }
 0x5f0   :  { %3648 = vmatprep.mubr.f32.mxu1 %v8639_v55 }
 0x5f1   :  { %3757 = vrot.lane.b32.xlu0 %v12626_v53, %s8614_s15 }
 0x5f3   :  { %3497 = vrot.lane.b32.xlu1 %v3490_v58, %s8632_s27  ;;  %s8642_s27 = smov 115   ;;  %7450 = vmatmul.mubr.msk.f32.gmra.mrb[4].mxu1 %vm3564_vm3, %v3503_v51  ;;  %v3553_v58 = vld [vmem:[%s13454_s4 + $0x8] sm:$0xff]  ;;  %s8663_s4 = smov 122  }
 0x5f5   :  { %3851 = vrot.lane.b32.xlu0 %v12621_v6, %s8615_s16 }
 0x5f7   :  { %3853 = vrot.lane.b32.xlu1 %v12626_v53, %s8615_s16  ;;  %s8644_s16 = smov 113  }
 0x5f9   :  { %3947 = vrot.lane.b32.xlu0 %v12621_v6, %s14544_s28 }
 0x5fb   :  { %3949 = vrot.lane.b32.xlu1 %v12626_v53, %s14544_s28 }
 0x5fd   :  { %4043 = vrot.lane.b32.xlu0 %v12621_v6, %s8641_s29 }
 0x5ff   :  { %4045 = vrot.lane.b32.xlu1 %v12626_v53, %s8641_s29 }
 0x601   :  { %4140 = vrot.lane.b32.xlu0 %v12621_v6, %s8642_s27 }
 0x603   :  { %4142 = vrot.lane.b32.xlu1 %v12626_v53, %s8642_s27  ;;  %s8649_s27 = smov 92  }
 0x605   :  { %4237 = vrot.lane.b32.xlu0 %v12621_v6, %s8643_s30 }
 0x607   :  { %4239 = vrot.lane.b32.xlu1 %v12626_v53, %s8643_s30 }
 0x609   :  { %4334 = vrot.lane.b32.xlu0 %v12621_v6, %s8644_s16 }
 0x60b   :  { %4336 = vrot.lane.b32.xlu1 %v12626_v53, %s8644_s16 }
 0x60d   :  { %4431 = vrot.lane.b32.xlu0 %v12621_v6, %s8638_s23 }
 0x60f   :  { %4433 = vrot.lane.b32.xlu1 %v12626_v53, %s8638_s23 }
 0x611   :  { %4529 = vrot.lane.b32.xlu0 %v12626_v53, %s8645_s14 }
 0x615   :  { %4527 = vrot.lane.b32.xlu0 %v12621_v6, %s8645_s14 }
 0x65d   :  { %v3660_v23 = vpop.permute.xlu1 %3659 }
 0x65f   :  { %v3662_v16 = vpop.permute.xlu0 %3661 }
 0x660   :  { %v3663_v3 = vsel %vm14545_vm4, %v3660_v23, %v3662_v16  ;;  %7451 = vmatprep.subr.msk.mxu0 %vm3571_vm6, %v3662_v16  ;;  %vm4833_vm4 = vcmask 826368  }
 0x661   :  { %v3756_v26 = vpop.permute.xlu1 %3755  ;;  %7452 = vmatpush1.msk.msra.mxu0 %vm3571_vm6, %v3663_v3 }
 0x662   :  { %7453 = vmatmul.mubr.msk.f32.vlgmr.msra.gmra.mrb[2].mxu0 %vm3564_vm3, %v3504_v59 }
 0x663   :  { %v3758_v5 = vpop.permute.xlu0 %3757  ;;  %3744 = vmatprep.mubr.f32.mxu0 %v8639_v55 }
 0x664   :  { %v3759_v49 = vsel %vm14546_vm2, %v3756_v26, %v3758_v5  ;;  %7455 = vmatprep.subr.msk.mxu0 %vm3571_vm6, %v3758_v5  ;;  %v3523_v26 = vld [vmem:[%s13453_s3 + $0xa8] sm:$0xff]  ;;  %vm14551_vm2 = vcmask 818176  }
 0x665   :  { %v3498_v30 = vpop.permute.xlu1 %3497  ;;  %7456 = vmatpush1.msk.msra.mxu0 %vm3571_vm6, %v3759_v49 }
 0x666   :  { %v12687_v60 = vsel %vm14547_vm12, %v3496_v22, %v3498_v30  ;;  %7454 = vmatmul.mubr.msk.f32.gmra.mrb[4].mxu0 %vm3564_vm3, %v3505_v21  ;;  %v3524_v30 = vld [vmem:[%s13453_s3 + $0xb0] sm:$0xff]  ;;  %vm5032_vm12 = vcmask 752640  }
 0x667   :  { %4531 = vrot.lane.b32.xlu1 %v12687_v60, %s8645_s14  ;;  %4631 = vrot.lane.b32.xlu0 %v12687_v60, %s8646_s17  ;;  %v3852_v29 = vpop.permute.xlu0 %3851 }
 0x668   :  { %3834 = vmatprep.mubr.f32.mxu0 %v8639_v55 }
 0x669   :  { %v3854_v1 = vpop.permute.xlu1 %3853 }
 0x66a   :  { %v3855_v15 = vsel %vm14548_vm14, %v3852_v29, %v3854_v1  ;;  %7457 = vmatmul.mubr.msk.f32.vlgmr.msra.gmra.mrb[2].mxu0 %vm3564_vm3, %v3506_v52  ;;  %7459 = vmatprep.subr.msk.mxu0 %vm3571_vm6, %v3854_v1  ;;  %v3525_v1 = vld [vmem:[%s13453_s3 + $0xb8] sm:$0xff]  ;;  %vm14552_vm14 = vmmov %vm14551_vm2 }
 0x66b   :  { %4629 = vrot.lane.b32.xlu1 %v12626_v53, %s8646_s17  ;;  %4729 = vrot.lane.b32.xlu0 %v12626_v53, %s8647_s22  ;;  %v3948_v28 = vpop.permute.xlu0 %3947 }
 0x66c   :  { %7460 = vmatpush1.msk.msra.mxu0 %vm3571_vm6, %v3855_v15  ;;  %3840 = vmatprep.mubr.f32.mxu0 %v8639_v55 }
 0x66d   :  { %v3950_v33 = vpop.permute.xlu1 %3949 }
 0x66e   :  { %7458 = vmatmul.mubr.msk.f32.gmra.mrb[4].mxu0 %vm3564_vm3, %v3507_v48  ;;  %7463 = vmatprep.subr.msk.mxu0 %vm3571_vm6, %v3950_v33  ;;  %v3951_v7 = vsel %vm14549_vm5, %v3948_v28, %v3950_v33  ;;  %v3526_v28 = vld [vmem:[%s13453_s3 + $0xc0] sm:$0xff]  ;;  %vm5132_vm5 = vcmask 744448  }
 0x66f   :  { %4627 = vrot.lane.b32.xlu1 %v12621_v6, %s8646_s17  ;;  %4727 = vrot.lane.b32.xlu0 %v12621_v6, %s8647_s22  ;;  %v4044_v35 = vpop.permute.xlu0 %4043 }
 0x670   :  { %3930 = vmatprep.mubr.f32.mxu0 %v8639_v55 }
 0x671   :  { %v4046_v10 = vpop.permute.xlu1 %4045 }
 0x672   :  { %7461 = vmatmul.mubr.msk.f32.vlgmr.msra.gmra.mrb[2].mxu0 %vm3564_vm3, %v3508_v18  ;;  %v4048_v34 = vsel %vm4047_vm10, %v4044_v35, %v4046_v10 }
 0x673   :  { %7464 = vmatpush1.msk.msra.mxu0 %vm3571_vm6, %v3951_v7  ;;  %4731 = vrot.lane.b32.xlu1 %v12687_v60, %s8647_s22  ;;  %v4141_v41 = vpop.permute.xlu0 %4140 }
 0x674   :  { %4831 = vrot.lane.b32.xlu0 %v12687_v60, %s8648_s25  ;;  %7467 = vmatprep.subr.msk.mxu0 %vm3571_vm6, %v4046_v10 }
 0x675   :  { %3936 = vmatprep.mubr.f32.mxu0 %v8639_v55  ;;  %v4143_v8 = vpop.permute.xlu1 %4142 }
 0x676   :  { %7462 = vmatmul.mubr.msk.f32.gmra.mrb[4].mxu0 %vm3564_vm3, %v3509_v40  ;;  %v4145_v31 = vsel %vm4144_vm9, %v4141_v41, %v4143_v8  ;;  %vm5232_vm9 = vcmask 736256  }
 0x677   :  { %4829 = vrot.lane.b32.xlu1 %v12626_v53, %s8648_s25  ;;  %4026 = vmatprep.mubr.f32.mxu0 %v8639_v55  ;;  %v4238_v61 = vpop.permute.xlu0 %4237 }
 0x678   :  { %4929 = vrot.lane.b32.xlu0 %v12626_v53, %s8617_s18 }
 0x679   :  { %v4240_v36 = vpop.permute.xlu1 %4239 }
 0x67a   :  { %7465 = vmatmul.mubr.msk.f32.vlgmr.msra.gmra.mrb[2].mxu0 %vm3564_vm3, %v3510_v19  ;;  %v4242_v46 = vsel %vm4241_vm7, %v4238_v61, %v4240_v36  ;;  %v3527_v19 = vld [vmem:[%s13453_s3 + $0xc8] sm:$0xff]  ;;  %vm5332_vm7 = vcmask 728064  }
 0x67b   :  { %7468 = vmatpush1.msk.msra.mxu0 %vm3571_vm6, %v4048_v34  ;;  %4827 = vrot.lane.b32.xlu1 %v12621_v6, %s8648_s25  ;;  %v4335_v63 = vpop.permute.xlu0 %4334  ;;  %s8657_s25 = smov 77  }
 0x67c   :  { %4927 = vrot.lane.b32.xlu0 %v12621_v6, %s8617_s18  ;;  %7471 = vmatprep.subr.msk.mxu0 %vm3571_vm6, %v4143_v8 }
 0x67d   :  { %4032 = vmatprep.mubr.f32.mxu0 %v8639_v55  ;;  %v4337_v37 = vpop.permute.xlu1 %4336 }
 0x67e   :  { %7466 = vmatmul.mubr.msk.f32.gmra.mrb[4].mxu0 %vm3564_vm3, %v3511_v45  ;;  %v4339_v50 = vsel %vm4338_vm11, %v4335_v63, %v4337_v37  ;;  %v3528_v45 = vld [vmem:[%s13453_s3 + $0xd0] sm:$0xff]  ;;  %v3531_v63 = vld [vmem:[%s13453_s3 + $0xe8] sm:$0xff]  ;;  %vm5432_vm11 = vcmask 719872  }
 0x67f   :  { %4931 = vrot.lane.b32.xlu1 %v12687_v60, %s8617_s18  ;;  %4123 = vmatprep.mubr.f32.mxu0 %v8639_v55  ;;  %v4432_v62 = vpop.permute.xlu0 %4431 }
 0x680   :  { %5030 = vrot.lane.b32.xlu0 %v12687_v60, %s8649_s27 }
 0x681   :  { %v4434_v4 = vpop.permute.xlu1 %4433 }
 0x682   :  { %7469 = vmatmul.mubr.msk.f32.vlgmr.msra.gmra.mrb[2].mxu0 %vm3564_vm3, %v3512_v24  ;;  %v4435_v25 = vsel %vm14550_vm1, %v4432_v62, %v4434_v4  ;;  %vm5532_vm1 = vcmask 654336  }
 0x683   :  { %7472 = vmatpush1.msk.msra.mxu0 %vm3571_vm6, %v4145_v31  ;;  %5028 = vrot.lane.b32.xlu1 %v12626_v53, %s8649_s27  ;;  %v4530_v56 = vpop.permute.xlu0 %4529 }
 0x684   :  { %5128 = vrot.lane.b32.xlu0 %v12626_v53, %s8650_s24  ;;  %7475 = vmatprep.subr.msk.mxu0 %vm3571_vm6, %v4240_v36 }
 0x685   :  { %4129 = vmatprep.mubr.f32.mxu0 %v8639_v55 }
 0x686   :  { %7470 = vmatmul.mubr.msk.f32.gmra.mrb[4].mxu0 %vm3564_vm3, %v3513_v39  ;;  %v3529_v39 = vld [vmem:[%s13453_s3 + $0xd8] sm:$0xff] }
 0x687   :  { %5026 = vrot.lane.b32.xlu1 %v12621_v6, %s8649_s27  ;;  %4220 = vmatprep.mubr.f32.mxu0 %v8639_v55  ;;  %s8652_s27 = smov 89  }
 0x688   :  { %5126 = vrot.lane.b32.xlu0 %v12621_v6, %s8650_s24 }
 0x68a   :  { %7473 = vmatmul.mubr.msk.f32.vlgmr.msra.gmra.mrb[2].mxu0 %vm3564_vm3, %v3514_v12 }
 0x68b   :  { %7476 = vmatpush1.msk.msra.mxu0 %vm3571_vm6, %v4242_v46  ;;  %5130 = vrot.lane.b32.xlu1 %v12687_v60, %s8650_s24  ;;  %s8656_s24 = smov 78   ;;  %v3530_v46 = vld [vmem:[%s13453_s3 + $0xe0] sm:$0xff] }
 0x68c   :  { %5230 = vrot.lane.b32.xlu0 %v12687_v60, %s8651_s5  ;;  %7479 = vmatprep.subr.msk.mxu0 %vm3571_vm6, %v4337_v37 }
 0x68d   :  { %4226 = vmatprep.mubr.f32.mxu0 %v8639_v55 }
 0x68e   :  { %7474 = vmatmul.mubr.msk.f32.gmra.mrb[4].mxu0 %vm3564_vm3, %v3515_v38 }
 0x68f   :  { %5228 = vrot.lane.b32.xlu1 %v12626_v53, %s8651_s5  ;;  %4317 = vmatprep.mubr.f32.mxu0 %v8639_v55 }
 0x690   :  { %5328 = vrot.lane.b32.xlu0 %v12626_v53, %s8652_s27 }
 0x692   :  { %7477 = vmatmul.mubr.msk.f32.vlgmr.msra.gmra.mrb[2].mxu0 %vm3564_vm3, %v3516_v42 }
 0x693   :  { %7480 = vmatpush1.msk.msra.mxu0 %vm3571_vm6, %v4339_v50  ;;  %5226 = vrot.lane.b32.xlu1 %v12621_v6, %s8651_s5  ;;  %s8654_s5 = smov 80  }
 0x694   :  { %5326 = vrot.lane.b32.xlu0 %v12621_v6, %s8652_s27  ;;  %7483 = vmatprep.subr.msk.mxu0 %vm3571_vm6, %v4434_v4 }
 0x695   :  { %4323 = vmatprep.mubr.f32.mxu0 %v8639_v55 }
 0x696   :  { %7478 = vmatmul.mubr.msk.f32.gmra.mrb[4].mxu0 %vm3564_vm3, %v3517_v20  ;;  %v3532_v20 = vld [vmem:[%s13453_s3 + $0xf0] sm:$0xff] }
 0x697   :  { %5330 = vrot.lane.b32.xlu1 %v12687_v60, %s8652_s27  ;;  %4414 = vmatprep.mubr.f32.mxu0 %v8639_v55 }
 0x698   :  { %5430 = vrot.lane.b32.xlu0 %v12687_v60, %s8653_s19 }
 0x69a   :  { %7481 = vmatmul.mubr.msk.f32.vlgmr.msra.gmra.mrb[2].mxu0 %vm3564_vm3, %v3518_v44 }
 0x69b   :  { %7484 = vmatpush1.msk.msra.mxu0 %vm3571_vm6, %v4435_v25  ;;  %5428 = vrot.lane.b32.xlu1 %v12626_v53, %s8653_s19 }
 0x69c   :  { %5528 = vrot.lane.b32.xlu0 %v12626_v53, %s8654_s5  ;;  %4420 = vmatprep.mubr.f32.mxu0 %v8639_v55 }
 0x69e   :  { %7482 = vmatmul.mubr.msk.f32.gmra.mrb[4].mxu0 %vm3564_vm3, %v3519_v14 }
 0x69f   :  { %5426 = vrot.lane.b32.xlu1 %v12621_v6, %s8653_s19  ;;  %4510 = vmatprep.mubr.f32.mxu0 %v8639_v55  ;;  %s8658_s19 = smov 76  }
 0x6a0   :  { %5526 = vrot.lane.b32.xlu0 %v12621_v6, %s8654_s5 }
 0x6a2   :  { %7485 = vmatmul.mubr.msk.f32.vlgmr.msra.gmra.mrb[2].mxu0 %vm3564_vm3, %v3520_v13  ;;  %v3533_v13 = vld [vmem:[%s13453_s3 + $0xf8] sm:$0xff] }
 0x6a3   :  { %5530 = vrot.lane.b32.xlu1 %v12687_v60, %s8654_s5  ;;  %4516 = vmatprep.mubr.f32.mxu0 %v8639_v55 }
 0x6a4   :  { %5630 = vrot.lane.b32.xlu0 %v12687_v60, %s8655_s0 }
 0x6a6   :  { %7486 = vmatmul.mubr.msk.f32.gmra.mrb[4].mxu0 %vm3564_vm3, %v3521_v2 }
 0x6a7   :  { %5628 = vrot.lane.b32.xlu1 %v12626_v53, %s8655_s0  ;;  %4610 = vmatprep.mubr.f32.mxu0 %v8639_v55 }
 0x6a8   :  { %5728 = vrot.lane.b32.xlu0 %v12626_v53, %s8656_s24 }
 0x6ab   :  { %5626 = vrot.lane.b32.xlu1 %v12621_v6, %s8655_s0 }
 0x6ac   :  { %5726 = vrot.lane.b32.xlu0 %v12621_v6, %s8656_s24 }
 0x6af   :  { %5730 = vrot.lane.b32.xlu1 %v12687_v60, %s8656_s24  ;;  %s8664_s24 = smov 120  }
 0x6b0   :  { %5830 = vrot.lane.b32.xlu0 %v12687_v60, %s8657_s25 }
 0x6b3   :  { %5828 = vrot.lane.b32.xlu1 %v12626_v53, %s8657_s25 }
 0x6b4   :  { %5928 = vrot.lane.b32.xlu0 %v12626_v53, %s8658_s19 }
 0x6b7   :  { %5826 = vrot.lane.b32.xlu1 %v12621_v6, %s8657_s25 }
 0x6b8   :  { %5926 = vrot.lane.b32.xlu0 %v12621_v6, %s8658_s19  ;;  %v4528_v6 = vpop.permute.xlu0 %4527 }
 0x6b9   :  { %v4534_v23 = vsel %vm4533_vm0, %v4528_v6, %v4530_v56 }
 0x6bb   :  { %5930 = vrot.lane.b32.xlu1 %v12687_v60, %s8658_s19 }
 0x6bc   :  { %3561 = vperm.xlu0 %8511, %v3553_v58  }
 0x6bf   :  { %3556 = vperm.xlu1 %8475, %v3552_v54   ;;  %v3534_v54 = vld [vmem:[%s13453_s3 + $0x100] sm:$0xff] }
 0x6c2   :  { %v12842_v57 = vpop.f32.mrb[2].mxu1 }
 0x6c3   :  { %v12844_v9 = vpop.f32.mrb[3].mxu1 }
 0x6d9   :  { %v4532_v22 = vpop.permute.xlu1 %4531  ;;  %v4632_v17 = vpop.permute.xlu0 %4631 }
 0x6da   :  { %v4535_v53 = vsel %vm4533_vm0, %v4530_v56, %v4532_v22  ;;  %v3535_v22 = vld [vmem:[%s13453_s3 + $0x108] sm:$0xff]  ;;  %vm5632_vm0 = vcmask 646144  }
 0x6db   :  { %7487 = vmatprep.subr.msk.mxu0 %vm3571_vm6, %v4535_v53 }
 0x6dc   :  { %7488 = vmatpush1.msk.msra.mxu0 %vm3571_vm6, %v4534_v23 }
 0x6dd   :  { %v4630_v16 = vpop.permute.xlu1 %4629  ;;  %7489 = vmatmul.mubr.msk.f32.vlgmr.msra.gmra.mrb[2].mxu0 %vm3564_vm3, %v3522_v11  ;;  %v4730_v59 = vpop.permute.xlu0 %4729  ;;  %v3536_v11 = vld [vmem:[%s13453_s3 + $0x110] sm:$0xff] }
 0x6de   :  { %v4635_v3 = vsel %vm4633_vm13, %v4630_v16, %v4632_v17  ;;  %4616 = vmatprep.mubr.f32.mxu0 %v8639_v55 }
 0x6df   :  { %7491 = vmatprep.subr.msk.mxu0 %vm3571_vm6, %v4635_v3 }
 0x6e1   :  { %v4628_v5 = vpop.permute.xlu1 %4627  ;;  %7490 = vmatmul.mubr.msk.f32.gmra.mrb[4].mxu0 %vm3564_vm3, %v3523_v26  ;;  %v4728_v21 = vpop.permute.xlu0 %4727 }
 0x6e2   :  { %v4634_v49 = vsel %vm4633_vm13, %v4628_v5, %v4630_v16  ;;  %4710 = vmatprep.mubr.f32.mxu0 %v8639_v55  ;;  %v4734_v15 = vsel %vm4733_vm8, %v4728_v21, %v4730_v59  ;;  %v3538_v5 = vld [vmem:[%s13453_s3 + $0x120] sm:$0xff]  ;;  %vm5732_vm13 = vcmask 637952  }
 0x6e3   :  { %7492 = vmatpush1.msk.msra.mxu0 %vm3571_vm6, %v4634_v49 }
 0x6e5   :  { %v4732_v60 = vpop.permute.xlu1 %4731  ;;  %7493 = vmatmul.mubr.msk.f32.vlgmr.msra.gmra.mrb[2].mxu0 %vm3564_vm3, %v3524_v30 }
 0x6e6   :  { %v4735_v52 = vsel %vm4733_vm8, %v4730_v59, %v4732_v60  ;;  %v4832_v29 = vpop.permute.xlu0 %4831  ;;  %4716 = vmatprep.mubr.f32.mxu0 %v8639_v55  ;;  %v3537_v59 = vld [vmem:[%s13453_s3 + $0x118] sm:$0xff]  ;;  %vm5832_vm8 = vcmask 629760  }
 0x6e7   :  { %7495 = vmatprep.subr.msk.mxu0 %vm3571_vm6, %v4735_v52  ;;  %v3539_v52 = vld [vmem:[%s13453_s3 + $0x128] sm:$0xff] }
 0x6e8   :  { %7496 = vmatpush1.msk.msra.mxu0 %vm3571_vm6, %v4734_v15 }
 0x6e9   :  { %v4830_v48 = vpop.permute.xlu1 %4829  ;;  %7494 = vmatmul.mubr.msk.f32.gmra.mrb[4].mxu0 %vm3564_vm3, %v3525_v1 }
 0x6ea   :  { %v4835_v33 = vsel %vm4833_vm4, %v4830_v48, %v4832_v29  ;;  %v4930_v18 = vpop.permute.xlu0 %4929  ;;  %4810 = vmatprep.mubr.f32.mxu0 %v8639_v55  ;;  %v3540_v29 = vld [vmem:[%s13453_s3 + $0x130] sm:$0xff] }
 0x6eb   :  { %7499 = vmatprep.subr.msk.mxu0 %vm3571_vm6, %v4835_v33 }
 0x6ed   :  { %v4828_v10 = vpop.permute.xlu1 %4827  ;;  %7497 = vmatmul.mubr.msk.f32.vlgmr.msra.gmra.mrb[2].mxu0 %vm3564_vm3, %v3526_v28 }
 0x6ee   :  { %v4834_v7 = vsel %vm4833_vm4, %v4828_v10, %v4830_v48  ;;  %v4928_v40 = vpop.permute.xlu0 %4927  ;;  %4816 = vmatprep.mubr.f32.mxu0 %v8639_v55  ;;  %vm5932_vm4 = vcmask 621568  }
 0x6ef   :  { %7500 = vmatpush1.msk.msra.mxu0 %vm3571_vm6, %v4834_v7  ;;  %v4933_v24 = vsel %vm14552_vm14, %v4928_v40, %v4930_v18  ;;  %v3542_v7 = vld [vmem:[%s13453_s3 + $0x140] sm:$0xff] }
 0x6f1   :  { %v4932_v35 = vpop.permute.xlu1 %4931  ;;  %7498 = vmatmul.mubr.msk.f32.gmra.mrb[4].mxu0 %vm3564_vm3, %v3527_v19 }
 0x6f2   :  { %v4934_v34 = vsel %vm14551_vm2, %v4930_v18, %v4932_v35  ;;  %v5031_v8 = vpop.permute.xlu0 %5030  ;;  %4910 = vmatprep.mubr.f32.mxu0 %v8639_v55  ;;  %v3541_v18 = vld [vmem:[%s13453_s3 + $0x138] sm:$0xff]  ;;  %v3543_v35 = vld [vmem:[%s13453_s3 + $0x148] sm:$0xff] }
 0x6f3   :  { %7503 = vmatprep.subr.msk.mxu0 %vm3571_vm6, %v4934_v34 }
 0x6f5   :  { %v5029_v41 = vpop.permute.xlu1 %5028  ;;  %7501 = vmatmul.mubr.msk.f32.vlgmr.msra.gmra.mrb[2].mxu0 %vm3564_vm3, %v3528_v45  ;;  %v3544_v45 = vld [vmem:[%s13453_s3 + $0x150] sm:$0xff] }
 0x6f6   :  { %v5034_v31 = vsel %vm5032_vm12, %v5029_v41, %v5031_v8  ;;  %7504 = vmatpush1.msk.msra.mxu0 %vm3571_vm6, %v4933_v24  ;;  %v5129_v36 = vpop.permute.xlu0 %5128  ;;  %4916 = vmatprep.mubr.f32.mxu0 %v8639_v55 }
 0x6f7   :  { %7507 = vmatprep.subr.msk.mxu0 %vm3571_vm6, %v5034_v31 }
 0x6f9   :  { %v5027_v12 = vpop.permute.xlu1 %5026  ;;  %7502 = vmatmul.mubr.msk.f32.gmra.mrb[4].mxu0 %vm3564_vm3, %v3529_v39  ;;  %v3545_v39 = vld [vmem:[%s13453_s3 + $0x158] sm:$0xff] }
 0x6fa   :  { %v5127_v61 = vpop.permute.xlu0 %5126  ;;  %5009 = vmatprep.mubr.f32.mxu0 %v8639_v55  ;;  %v5033_v37 = vsel %vm5032_vm12, %v5027_v12, %v5029_v41  ;;  %v3546_v12 = vld [vmem:[%s13453_s3 + $0x160] sm:$0xff] }
 0x6fb   :  { %v5133_v44 = vsel %vm5132_vm5, %v5127_v61, %v5129_v36 }
 0x6fd   :  { %v5131_v38 = vpop.permute.xlu1 %5130  ;;  %7505 = vmatmul.mubr.msk.f32.vlgmr.msra.gmra.mrb[2].mxu0 %vm3564_vm3, %v3530_v46 }
 0x6fe   :  { %v5134_v42 = vsel %vm5132_vm5, %v5129_v36, %v5131_v38  ;;  %7508 = vmatpush1.msk.msra.mxu0 %vm3571_vm6, %v5033_v37  ;;  %5015 = vmatprep.mubr.f32.mxu0 %v8639_v55  ;;  %v5231_v50 = vpop.permute.xlu0 %5230 }
 0x6ff   :  { %7511 = vmatprep.subr.msk.mxu0 %vm3571_vm6, %v5134_v42  ;;  %v3547_v42 = vld [vmem:[%s13453_s3 + $0x168] sm:$0xff] }
 0x701   :  { %v5229_v4 = vpop.permute.xlu1 %5228  ;;  %7506 = vmatmul.mubr.msk.f32.gmra.mrb[4].mxu0 %vm3564_vm3, %v3531_v63 }
 0x702   :  { %5109 = vmatprep.mubr.f32.mxu0 %v8639_v55  ;;  %v5329_v62 = vpop.permute.xlu0 %5328  ;;  %v5234_v14 = vsel %vm5232_vm9, %v5229_v4, %v5231_v50  ;;  %v3548_v50 = vld [vmem:[%s13453_s3 + $0x170] sm:$0xff] }
 0x705   :  { %v5227_v25 = vpop.permute.xlu1 %5226  ;;  %7509 = vmatmul.mubr.msk.f32.vlgmr.msra.gmra.mrb[2].mxu0 %vm3564_vm3, %v3532_v20  ;;  %v3549_v20 = vld [vmem:[%s13453_s3 + $0x178] sm:$0xff] }
 0x706   :  { %7512 = vmatpush1.msk.msra.mxu0 %vm3571_vm6, %v5133_v44  ;;  %5115 = vmatprep.mubr.f32.mxu0 %v8639_v55  ;;  %v5327_v51 = vpop.permute.xlu0 %5326  ;;  %v5233_v56 = vsel %vm5232_vm9, %v5227_v25, %v5229_v4  ;;  %v3550_v44 = vld [vmem:[%s13453_s3 + $0x180] sm:$0xff]  ;;  %v3650_v25 = vpop.f32.mrb[4].mxu1 }
 0x707   :  { %7515 = vmatprep.subr.msk.mxu0 %vm3571_vm6, %v5234_v14  ;;  %v5333_v23 = vsel %vm5332_vm7, %v5327_v51, %v5329_v62  ;;  %v3652_v14 = vpop.f32.mrb[5].mxu1  ;;  %v13038_v51 = vld [vmem:[%s13455_s6] ss:$0 sm:$0xff]  ;;  %s8661_s6 = smov 108  }
 0x709   :  { %v5331_v2 = vpop.permute.xlu1 %5330  ;;  %7510 = vmatmul.mubr.msk.f32.gmra.mrb[4].mxu0 %vm3564_vm3, %v3533_v13 }
 0x70a   :  { %5209 = vmatprep.mubr.f32.mxu0 %v8639_v55  ;;  %v5334_v6 = vsel %vm5332_vm7, %v5329_v62, %v5331_v2  ;;  %v5431_v17 = vpop.permute.xlu0 %5430  ;;  %v3551_v62 = vld [vmem:[%s13453_s3 + $0x188] sm:$0xff]  ;;  %s8660_s3 = smov 110  }
 0x70d   :  { %v5429_v58 = vpop.permute.xlu1 %5428  ;;  %7513 = vmatmul.mubr.msk.f32.vlgmr.msra.gmra.mrb[2].mxu0 %vm3564_vm3, %v3534_v54 }
 0x70e   :  { %7516 = vmatpush1.msk.msra.mxu0 %vm3571_vm6, %v5233_v56  ;;  %5215 = vmatprep.mubr.f32.mxu0 %v8639_v55  ;;  %v5434_v16 = vsel %vm5432_vm11, %v5429_v58, %v5431_v17  ;;  %v5529_v3 = vpop.permute.xlu0 %5528 }
 0x70f   :  { %7519 = vmatprep.subr.msk.mxu0 %vm3571_vm6, %v5334_v6 }
 0x711   :  { %v5427_v53 = vpop.permute.xlu1 %5426  ;;  %7514 = vmatmul.mubr.msk.f32.gmra.mrb[4].mxu0 %vm3564_vm3, %v3535_v22 }
 0x712   :  { %5309 = vmatprep.mubr.f32.mxu0 %v8639_v55  ;;  %v5433_v21 = vsel %vm5432_vm11, %v5427_v53, %v5429_v58  ;;  %v5527_v49 = vpop.permute.xlu0 %5526 }
 0x713   :  { %v5533_v48 = vsel %vm5532_vm1, %v5527_v49, %v5529_v3 }
 0x715   :  { %7517 = vmatmul.mubr.msk.f32.vlgmr.msra.gmra.mrb[2].mxu0 %vm3564_vm3, %v3536_v11  ;;  %v5531_v26 = vpop.permute.xlu1 %5530 }
 0x716   :  { %7520 = vmatpush1.msk.msra.mxu0 %vm3571_vm6, %v5333_v23  ;;  %5315 = vmatprep.mubr.f32.mxu0 %v8639_v55  ;;  %v5534_v60 = vsel %vm5532_vm1, %v5529_v3, %v5531_v26  ;;  %v5631_v1 = vpop.permute.xlu0 %5630  ;;  %v14555_v3 = vld [vmem:[#allocation14_spill] sm:$0xff] }
 0x717   :  { %7523 = vmatprep.subr.msk.mxu0 %vm3571_vm6, %v5434_v16  ;;  %vm6082_vm14 = vcmp.eq.s32.totalorder %v14555_v3, %v13038_v51  ;;  %v6373_v3 = vld [vmem:[%s13457_s8 + $0x18] sm:$0xff] }
 0x719   :  { %7518 = vmatmul.mubr.msk.f32.gmra.mrb[4].mxu0 %vm3564_vm3, %v3537_v59  ;;  %v5629_v30 = vpop.permute.xlu1 %5628  ;;  %v8659_v59 = vmov 0.0|0.0  }
 0x71a   :  { %5409 = vmatprep.mubr.f32.mxu0 %v8639_v55  ;;  %v5634_v33 = vsel %vm5632_vm0, %v5629_v30, %v5631_v1  ;;  %v5729_v28 = vpop.permute.xlu0 %5728  ;;  %8148 = vmatprep.subr.bf16.mxu1 %v8659_v59  ;;  %v14559_v1 = vld [vmem:[#allocation26_spill] sm:$0xff] }
 0x71d   :  { %7521 = vmatmul.mubr.msk.f32.vlgmr.msra.gmra.mrb[2].mxu0 %vm3564_vm3, %v3538_v5  ;;  %v5627_v15 = vpop.permute.xlu1 %5626 }
 0x71e   :  { %7524 = vmatpush1.msk.msra.mxu0 %vm3571_vm6, %v5433_v21  ;;  %5415 = vmatprep.mubr.f32.mxu0 %v8639_v55  ;;  %v5633_v40 = vsel %vm5632_vm0, %v5627_v15, %v5629_v30  ;;  %v5727_v34 = vpop.permute.xlu0 %5726  ;;  %v14556_v30 = vld [vmem:[#allocation16_spill] sm:$0xff]  ;;  %vm6086_vm0 = vcmp.eq.s32.totalorder %v14559_v1, %v13038_v51  ;;  %v6383_v1 = vld [vmem:[%s13457_s8 + $0x68] sm:$0xff] }
 0x71f   :  { %7527 = vmatprep.subr.msk.mxu0 %vm3571_vm6, %v5534_v60  ;;  %v5733_v24 = vsel %vm5732_vm13, %v5727_v34, %v5729_v28  ;;  %vm6083_vm9 = vcmp.eq.s32.totalorder %v14556_v30, %v13038_v51  ;;  %v14557_v60 = vld [vmem:[#allocation17_spill] sm:$0xff]  ;;  %v14560_v15 = vld [vmem:[#allocation20_spill] sm:$0xff]  ;;  %v6379_v30 = vld [vmem:[%s13457_s8 + $0x48] sm:$0xff] }
 0x720   :  { %vm6084_vm7 = vcmp.eq.s32.totalorder %v14557_v60, %v13038_v51  ;;  %v14572_v34 = vld [vmem:[#allocation65_spill] sm:$0xff]  ;;  %v6382_v60 = vld [vmem:[%s13457_s8 + $0x60] sm:$0xff] }
 0x721   :  { %7522 = vmatmul.mubr.msk.f32.gmra.mrb[4].mxu0 %vm3564_vm3, %v3539_v52  ;;  %v5731_v10 = vpop.permute.xlu1 %5730  ;;  %vm8155_vm11 = vmpackc.low %vm6084_vm7, %vm6083_vm9  ;;  %vm6093_vm7 = vcmp.eq.s32.totalorder %v11071_v47, %v13038_v51  ;;  %v14568_v47 = vld [vmem:[#allocation61_spill] sm:$0xff] }
 0x722   :  { %5509 = vmatprep.mubr.f32.mxu0 %v8639_v55  ;;  %v5734_v19 = vsel %vm5732_vm13, %v5729_v28, %v5731_v10  ;;  %v5831_v41 = vpop.permute.xlu0 %5830  ;;  %v14564_v28 = vld [vmem:[#allocation55_spill] sm:$0xff]  ;;  %v14565_v10 = vld [vmem:[#allocation57_spill] sm:$0xff] }
 0x725   :  { %7525 = vmatmul.mubr.msk.f32.vlgmr.msra.gmra.mrb[2].mxu0 %vm3564_vm3, %v3540_v29  ;;  %v5829_v8 = vpop.permute.xlu1 %5828  ;;  %v14558_v29 = vld [vmem:[#allocation24_spill] sm:$0xff] }
 0x726   :  { %7528 = vmatpush1.msk.msra.mxu0 %vm3571_vm6, %v5533_v48  ;;  %5515 = vmatprep.mubr.f32.mxu0 %v8639_v55  ;;  %v5834_v36 = vsel %vm5832_vm8, %v5829_v8, %v5831_v41  ;;  %v5929_v46 = vpop.permute.xlu0 %5928  ;;  %vm6085_vm1 = vcmp.eq.s32.totalorder %v14558_v29, %v13038_v51  ;;  %v14561_v48 = vld [vmem:[#allocation22_spill] sm:$0xff]  ;;  %v14576_v41 = vld [vmem:[#allocation79_spill] sm:$0xff]  ;;  %v6384_v29 = vld [vmem:[%s13457_s8 + $0x70] sm:$0xff] }
 0x727   :  { %7531 = vmatprep.subr.msk.mxu0 %vm3571_vm6, %v5634_v33  ;;  %vm8158_vm13 = vmpackc.low %vm6086_vm0, %vm6085_vm1  ;;  %v14562_v33 = vld [vmem:[#allocation3_spill] sm:$0xff] }
 0x729   :  { %7526 = vmatmul.mubr.msk.f32.gmra.mrb[4].mxu0 %vm3564_vm3, %v3541_v18  ;;  %v5827_v31 = vpop.permute.xlu1 %5826  ;;  %v14563_v18 = vld [vmem:[#allocation53_spill] sm:$0xff] }
 0x72a   :  { %5609 = vmatprep.mubr.f32.mxu0 %v8639_v55  ;;  %v5833_v37 = vsel %vm5832_vm8, %v5827_v31, %v5829_v8  ;;  %v5927_v63 = vpop.permute.xlu0 %5926  ;;  %vm6087_vm8 = vcmp.eq.s32.totalorder %v14560_v15, %v13038_v51  ;;  %v14573_v8 = vld [vmem:[#allocation68_spill] sm:$0xff]  ;;  %v14577_v31 = vld [vmem:[#allocation78_spill] sm:$0xff]  ;;  %v6627_v15 = vld [vmem:[%s13458_s10 + $0x8] sm:$0xff] }
 0x72b   :  { %v5933_v4 = vsel %vm5932_vm4, %v5927_v63, %v5929_v46 }
 0x72d   :  { %7529 = vmatmul.mubr.msk.f32.vlgmr.msra.gmra.mrb[2].mxu0 %vm3564_vm3, %v3542_v7  ;;  %v5931_v61 = vpop.permute.xlu1 %5930  ;;  %v14566_v7 = vld [vmem:[#allocation60_spill] sm:$0xff] }
 0x72e   :  { %7532 = vmatpush1.msk.msra.mxu0 %vm3571_vm6, %v5633_v40  ;;  %5615 = vmatprep.mubr.f32.mxu0 %v8639_v55  ;;  %v5934_v38 = vsel %vm5932_vm4, %v5929_v46, %v5931_v61  ;;  %vm6088_vm4 = vcmp.eq.s32.totalorder %v14561_v48, %v13038_v51  ;;  %vm6095_vm0 = vcmp.eq.s32.totalorder %v14566_v7, %v13038_v51  ;;  %v14567_v40 = vld [vmem:[#allocation23_spill] sm:$0xff]  ;;  %v6626_v48 = vld [vmem:[%s13458_s10] sm:$0xff]  ;;  %v6633_v7 = vld [vmem:[%s13458_s10 + $0x38] sm:$0xff] }
 0x72f   :  { %7535 = vmatprep.subr.msk.mxu0 %vm3571_vm6, %v5734_v19  ;;  %v14570_v19 = vld [vmem:[#allocation67_spill] sm:$0xff] }
 0x731   :  { %7530 = vmatmul.mubr.msk.f32.gmra.mrb[4].mxu0 %vm3564_vm3, %v3543_v35  ;;  %v14571_v35 = vld [vmem:[#allocation62_spill] sm:$0xff] }
 0x732   :  { %5709 = vmatprep.mubr.f32.mxu0 %v8639_v55 }
 0x735   :  { %7533 = vmatmul.mubr.msk.f32.vlgmr.msra.gmra.mrb[2].mxu0 %vm3564_vm3, %v3544_v45  ;;  %v14574_v45 = vld [vmem:[#allocation71_spill] sm:$0xff] }
 0x736   :  { %7536 = vmatpush1.msk.msra.mxu0 %vm3571_vm6, %v5733_v24  ;;  %5715 = vmatprep.mubr.f32.mxu0 %v8639_v55  ;;  %v14575_v24 = vld [vmem:[#allocation73_spill] sm:$0xff] }
 0x737   :  { %7539 = vmatprep.subr.msk.mxu0 %vm3571_vm6, %v5834_v36 }
 0x739   :  { %7534 = vmatmul.mubr.msk.f32.gmra.mrb[4].mxu0 %vm3564_vm3, %v3545_v39 }
 0x73a   :  { %5809 = vmatprep.mubr.f32.mxu0 %v8639_v55 }
 0x73b   :  { %v3562_v2 = vpop.permute.xlu0 %3561 }
 0x73c   :  { %v3657_v17 = vadd.f32 %v3650_v25, %v3562_v2  ;;  %v3658_v11 = vadd.f32 %v3652_v14, %v3562_v2 }
 0x73d   :  { %7537 = vmatmul.mubr.msk.f32.vlgmr.msra.gmra.mrb[2].mxu0 %vm3564_vm3, %v3546_v12 }
 0x73e   :  { %7540 = vmatpush1.msk.msra.mxu0 %vm3571_vm6, %v5833_v37  ;;  %5815 = vmatprep.mubr.f32.mxu0 %v8639_v55  ;;  %v3557_v13 = vpop.permute.xlu1 %3556 }
 0x73f   :  { %7543 = vmatprep.subr.msk.mxu0 %vm3571_vm6, %v5934_v38  ;;  %v3655_v54 = vadd.f32 %v12842_v57, %v3557_v13  ;;  %v3656_v56 = vadd.f32 %v12844_v9, %v3557_v13  ;;  %v14553_v57 = vld [vmem:[#allocation75_spill] sm:$0xff]  ;;  %v14554_v9 = vld [vmem:[#allocation29_spill] sm:$0xff] }
 0x740   :  { %vm6081_vm12 = vcmp.eq.s32.totalorder %v14554_v9, %v13038_v51  ;;  %v6374_v9 = vld [vmem:[%s13457_s8 + $0x20] sm:$0xff] }
 0x741   :  { %7538 = vmatmul.mubr.msk.f32.gmra.mrb[4].mxu0 %vm3564_vm3, %v3547_v42  ;;  %vm8152_vm5 = vmpackc.low %vm6082_vm14, %vm6081_vm12  ;;  %vm6091_vm14 = vcmp.eq.s32.totalorder %v14564_v28, %v13038_v51  ;;  %v6631_v28 = vld [vmem:[%s13458_s10 + $0x28] sm:$0xff] }
 0x742   :  { %5909 = vmatprep.mubr.f32.mxu0 %v8639_v55 }
 0x745   :  { %7541 = vmatmul.mubr.msk.f32.vlgmr.msra.gmra.mrb[2].mxu0 %vm3564_vm3, %v3548_v50 }
 0x746   :  { %7544 = vmatpush1.msk.msra.mxu0 %vm3571_vm6, %v5933_v4  ;;  %5915 = vmatprep.mubr.f32.mxu0 %v8639_v55  ;;  %vm6079_vm6 = vcmp.eq.s32.totalorder %v13977_v27, %v13038_v51 }
 0x749   :  { %7542 = vmatmul.mubr.msk.f32.gmra.mrb[4].mxu0 %vm3564_vm3, %v3549_v20 }
 0x74a   :  { %6009 = vmatprep.mubr.f32.mxu0 %v8639_v55 }
 0x74d   :  { %7545 = vmatmul.mubr.msk.f32.vlgmr.msra.gmra.mrb[2].mxu0 %vm3564_vm3, %v3550_v44 }
 0x74e   :  { %6015 = vmatprep.mubr.f32.mxu0 %v8639_v55 }
 0x751   :  { %7546 = vmatmul.mubr.msk.f32.gmra.mrb[4].mxu0 %vm3564_vm3, %v3551_v62  ;;  %vm6080_vm3 = vcmp.eq.s32.totalorder %v14553_v57, %v13038_v51  ;;  %v6372_v57 = vld [vmem:[%s13457_s8 + $0x10] sm:$0xff] }
 0x752   :  { %vm8149_vm2 = vmpackc.low %vm6080_vm3, %vm6079_vm6  ;;  %vm6089_vm3 = vcmp.eq.s32.totalorder %v14562_v33, %v13038_v51  ;;  %v6629_v33 = vld [vmem:[%s13458_s10 + $0x18] sm:$0xff] }
 0x753   :  { %8150 = vmatpush1.bf16.msk.msra.mxu1 %vm8149_vm2, %v14134_v43  ;;  %vm8161_vm6 = vmpackc.low %vm6088_vm4, %vm6087_vm8  ;;  %vm6090_vm2 = vcmp.eq.s32.totalorder %v14563_v18, %v13038_v51  ;;  %vm6097_vm4 = vcmp.eq.s32.totalorder %v14568_v47, %v13038_v51  ;;  %v6628_v18 = vld [vmem:[%s13458_s10 + $0x10] sm:$0xff]  ;;  %v6635_v47 = vld [vmem:[%s13458_s10 + $0x48] sm:$0xff] }
 0x754   :  { %8151 = vmatprep.subr.bf16.mxu1 %v8659_v59  ;;  %vm8164_vm12 = vmpackc.low %vm6090_vm2, %vm6089_vm3  ;;  %vm6099_vm2 = vcmp.eq.s32.totalorder %v14570_v19, %v13038_v51  ;;  %v6859_v19 = vld [vmem:[%s13459_s12] sm:$0xff] }
 0x757   :  { %8153 = vmatpush1.bf16.msk.msra.mxu1 %vm8152_vm5, %v14134_v43  ;;  %vm6092_vm5 = vcmp.eq.s32.totalorder %v14565_v10, %v13038_v51  ;;  %v6630_v10 = vld [vmem:[%s13458_s10 + $0x20] sm:$0xff] }
 0x758   :  { %8154 = vmatprep.subr.bf16.mxu1 %v8659_v59  ;;  %vm8167_vm9 = vmpackc.low %vm6092_vm5, %vm6091_vm14  ;;  %vm6101_vm5 = vcmp.eq.s32.totalorder %v14572_v34, %v13038_v51  ;;  %v6860_v34 = vld [vmem:[%s13459_s12 + $0x8] sm:$0x3] }
 0x75b   :  { %8156 = vmatpush1.bf16.msk.msra.mxu1 %vm8155_vm11, %v14134_v43  ;;  %vm6094_vm11 = vcmp.eq.s32.totalorder %v11074_v32, %v13038_v51  ;;  %v14569_v32 = vld [vmem:[#allocation66_spill] sm:$0xff] }
 0x75c   :  { %8157 = vmatprep.subr.bf16.mxu1 %v8659_v59  ;;  %vm8170_vm1 = vmpackc.low %vm6094_vm11, %vm6093_vm7  ;;  %vm6103_vm11 = vcmp.eq.s32.totalorder %v14574_v45, %v13038_v51 }
 0x75f   :  { %8159 = vmatpush1.bf16.msk.msra.mxu1 %vm8158_vm13, %v14134_v43  ;;  %vm6096_vm13 = vcmp.eq.s32.totalorder %v14567_v40, %v13038_v51  ;;  %v6632_v40 = vld [vmem:[%s13458_s10 + $0x30] sm:$0xff] }
 0x760   :  { %8160 = vmatprep.subr.bf16.mxu1 %v8659_v59  ;;  %vm8173_vm8 = vmpackc.low %vm6096_vm13, %vm6095_vm0  ;;  %vm6106_vm13 = vcmp.eq.s32.totalorder %v14576_v41, %v13038_v51 }
 0x761   :  { %v7575_v36 = vsel %vm6106_vm13, 1.0, %v8639_v55 }
 0x762   :  { %v8188_v39 = vpack.c.bf16 %v7575_v36, %v8640_v0 }
 0x763   :  { %8162 = vmatpush1.bf16.msk.msra.mxu1 %vm8161_vm6, %v14134_v43  ;;  %vm6098_vm6 = vcmp.eq.s32.totalorder %v14569_v32, %v13038_v51  ;;  %v6634_v32 = vld [vmem:[%s13458_s10 + $0x40] sm:$0xff] }
 0x764   :  { %8163 = vmatprep.subr.bf16.mxu1 %v8659_v59  ;;  %vm8176_vm3 = vmpackc.low %vm6098_vm6, %vm6097_vm4  ;;  %vm14578_vm6 = vcmask 1039360  }
 0x767   :  { %8165 = vmatpush1.bf16.msk.msra.mxu1 %vm8164_vm12, %v14134_v43  ;;  %vm6100_vm12 = vcmp.eq.s32.totalorder %v14571_v35, %v13038_v51  ;;  %v6636_v35 = vld [vmem:[%s13458_s10 + $0x50] sm:$0xf] }
 0x768   :  { %8166 = vmatprep.subr.bf16.mxu1 %v8659_v59  ;;  %vm8179_vm14 = vmpackc.low %vm6100_vm12, %vm6099_vm2  ;;  %vm6692_vm2 = vcmask 982016   ;;  %vm6871_vm12 = vcmask 687104  }
 0x76b   :  { %8168 = vmatpush1.bf16.msk.msra.mxu1 %vm8167_vm9, %v14134_v43  ;;  %vm6102_vm9 = vcmp.eq.s32.totalorder %v14573_v8, %v13038_v51 }
 0x76c   :  { %8169 = vmatprep.subr.bf16.mxu1 %v8659_v59  ;;  %vm8182_vm7 = vmpackc.low %vm6102_vm9, %vm6101_vm5  ;;  %vm6959_vm5 = vcmask 9216   ;;  %vm6957_vm9 = vcmask 15360  }
 0x76f   :  { %8171 = vmatpush1.bf16.msk.msra.mxu1 %vm8170_vm1, %v14134_v43  ;;  %vm6104_vm1 = vcmp.eq.s32.totalorder %v14575_v24, %v13038_v51 }
 0x770   :  { %8172 = vmatprep.subr.bf16.mxu1 %v8659_v59  ;;  %vm8185_vm0 = vmpackc.low %vm6104_vm1, %vm6103_vm11 }
 0x773   :  { %8174 = vmatpush1.bf16.msk.msra.mxu1 %vm8173_vm8, %v14134_v43  ;;  %vm6105_vm8 = vcmp.eq.s32.totalorder %v14577_v31, %v13038_v51 }
 0x774   :  { %8175 = vmatprep.subr.bf16.mxu1 %v8659_v59  ;;  %vm8189_vm4 = vmpackc.low %vm3030_vm15, %vm6105_vm8  ;;  %vm6163_vm15 = vcmask 777216  }
 0x777   :  { %8177 = vmatpush1.bf16.msk.msra.mxu1 %vm8176_vm3, %v14134_v43  ;;  %vm14579_vm3 = vmmov %vm14578_vm6 }
 0x778   :  { %8178 = vmatprep.subr.bf16.mxu1 %v8659_v59 }
 0x77b   :  { %8180 = vmatpush1.bf16.msk.msra.mxu1 %vm8179_vm14, %v14134_v43  ;;  %vm6878_vm14 = vcmask 1043456  }
 0x77c   :  { %8181 = vmatprep.subr.bf16.mxu1 %v8659_v59 }
 0x77f   :  { %8183 = vmatpush1.bf16.msk.msra.mxu1 %vm8182_vm7, %v14134_v43 }
 0x780   :  { %8184 = vmatprep.subr.bf16.mxu1 %v8659_v59 }
 0x783   :  { %8186 = vmatpush1.bf16.msk.msra.mxu1 %vm8185_vm0, %v14134_v43 }
 0x784   :  { %8187 = vmatprep.subr.bf16.mxu1 %v8659_v59 }
 0x787   :  { %8190 = vmatpush1.bf16.msk.msra.mxu1 %vm8189_vm4, %v8188_v39 }
 0x820   :  { %v6011_v58 = vpop.f32.mrb[2].mxu0 }
 0x821   :  { %v13041_v6 = vadd.f32 %v6011_v58, %v3655_v54  ;;  %v6013_v22 = vpop.f32.mrb[3].mxu0 }
 0x822   :  { %v13043_v53 = vadd.f32 %v6013_v22, %v3656_v56 }
 0x823   :  { %v6026_v23 = vmax.f32 %v13041_v6, 0.0 }
 0x824   :  { %v6017_v16 = vpop.f32.mrb[4].mxu0  ;;  %v6027_v21 = vmax.f32 %v13043_v53, 0.0 }
 0x825   :  { %v13055_v26 = vadd.f32 %v6017_v16, %v3657_v17  ;;  %v6019_v5 = vpop.f32.mrb[5].mxu0  ;;  %6034 = vrot.lane.b32.xlu1 %v6026_v23, %s8613_s2  ;;  %v6371_v16 = vld [vmem:[%s13457_s8 + $0x8] sm:$0xff] }
 0x826   :  { %v13061_v27 = vadd.f32 %v6019_v5, %v3658_v11  ;;  %v6341_v11 = vld [vmem:[%s13456_s7 + $0x8] sm:$0xff] }
 0x827   :  { %v6028_v49 = vmax.f32 %v13055_v26, 0.0  ;;  %v6376_v26 = vld [vmem:[%s13457_s8 + $0x30] sm:$0xff]  ;;  %v6375_v5 = vld [vmem:[%s13457_s8 + $0x28] sm:$0xff] }
 0x828   :  { %v6029_v52 = vmax.f32 %v13061_v27, 0.0  ;;  %v6378_v27 = vld [vmem:[%s13457_s8 + $0x40] sm:$0xff] }
 0x829   :  { %6036 = vrot.lane.b32.xlu1 %v6027_v21, %s8613_s2  ;;  %6038 = vrot.lane.b32.xlu0 %v6028_v49, %s8613_s2 }
 0x82d   :  { %6040 = vrot.lane.b32.xlu1 %v6029_v52, %s8613_s2  ;;  %s8662_s2 = smov 106  }
 0x897   :  { %v6035_v12 = vpop.permute.xlu1 %6034 }
 0x89b   :  { %v6037_v61 = vpop.permute.xlu1 %6036  ;;  %v6039_v38 = vpop.permute.xlu0 %6038 }
 0x89c   :  { %v6042_v46 = vsel %vm14578_vm6, %v6035_v12, %v6037_v61  ;;  %v6049_v43 = vmax.f32 %v6027_v21, %v6037_v61  ;;  %v6377_v21 = vld [vmem:[%s13457_s8 + $0x38] sm:$0xff] }
 0x89d   :  { %v6048_v37 = vmax.f32 %v6026_v23, %v6042_v46  ;;  %v6370_v23 = vld [vmem:[%s13457_s8] sm:$0xff] }
 0x89e   :  { %6058 = vrot.lane.b32.xlu1 %v6049_v43, %s8641_s29 }
 0x89f   :  { %6056 = vrot.lane.b32.xlu0 %v6048_v37, %s8641_s29  ;;  %v6041_v42 = vpop.permute.xlu1 %6040 }
 0x8a0   :  { %v6043_v0 = vsel %vm14579_vm3, %v6039_v38, %v6041_v42  ;;  %v6051_v63 = vmax.f32 %v6029_v52, %v6041_v42  ;;  %v6381_v52 = vld [vmem:[%s13457_s8 + $0x58] sm:$0xff] }
 0x8a1   :  { %v6050_v50 = vmax.f32 %v6028_v49, %v6043_v0  ;;  %v6380_v49 = vld [vmem:[%s13457_s8 + $0x50] sm:$0xff] }
 0x8a2   :  { %6062 = vrot.lane.b32.xlu1 %v6051_v63, %s8641_s29 }
 0x8a3   :  { %6060 = vrot.lane.b32.xlu0 %v6050_v50, %s8641_s29 }
 0x910   :  { %v6059_v4 = vpop.permute.xlu1 %6058 }
 0x911   :  { %v6071_v20 = vmax.f32 %v6049_v43, %v6059_v4  ;;  %v6057_v44 = vpop.permute.xlu0 %6056 }
 0x912   :  { %v6064_v62 = vsel %vm4047_vm10, %v6057_v44, %v6059_v4 }
 0x913   :  { %v6070_v25 = vmax.f32 %v6048_v37, %v6064_v62  ;;  %7604 = vmatprep.mubr.msk.f32.mxu1 %vm6163_vm15, %v6071_v20 }
 0x914   :  { %v6063_v14 = vpop.permute.xlu1 %6062 }
 0x915   :  { %v6073_v13 = vmax.f32 %v6051_v63, %v6063_v14  ;;  %v6061_v2 = vpop.permute.xlu0 %6060  ;;  %6238 = vmatmul.mubr.f32.vlgmr.msra.gmra.mrb[6].mxu1 %v6070_v25 }
 0x916   :  { %v6065_v54 = vsel %vm4047_vm10, %v6061_v2, %v6063_v14  ;;  %vm8666_vm10 = vmmov 0  }
 0x917   :  { %v6072_v51 = vmax.f32 %v6050_v50, %v6065_v54  ;;  %7605 = vmatprep.mubr.msk.f32.mxu1 %vm6163_vm15, %v6073_v13 }
 0x919   :  { %6243 = vmatmul.mubr.f32.gmra.mrb[8].mxu1 %v6072_v51 }
 0x91a   :  { %6524 = vmatprep.mubr.f32.mxu1 %v6341_v11 }
 0x9e8   :  { %v13167_v56 = vpop.f32.mrb[6].mxu1 }
 0x9e9   :  { %v6241_v58 = vpop.f32.mrb[7].mxu1 }
 0x9ec   :  { %v13169_v6 = vpop.f32.mrb[8].mxu1 }
 0x9ed   :  { %v6246_v22 = vpop.f32.mrb[9].mxu1  ;;  %v8517_v17 = vpack.i.bf16 %v13169_v6, %v13167_v56  ;;  %v8193_v53 = vpack.c.bf16 %v13169_v6, %v13167_v56 }
 0x9ef   :  { %8518 = vrot.lane.b32.xlu1 %v8517_v17, %s8660_s3  ;;  %8513 = vrot.lane.b32.xlu0 %v8517_v17, %s8638_s23  ;;  %s8665_s23 = smov 118  }
 0x9f3   :  { %8528 = vrot.lane.b32.xlu1 %v8517_v17, %s8661_s6  ;;  %8523 = vrot.lane.b32.xlu0 %v8517_v17, %s8614_s15 }
 0x9f7   :  { %8538 = vrot.lane.b32.xlu1 %v8517_v17, %s8662_s2  ;;  %8533 = vrot.lane.b32.xlu0 %v8517_v17, %s14544_s28 }
 0x9fb   :  { %8548 = vrot.lane.b32.xlu1 %v8517_v17, %s8645_s14  ;;  %8543 = vrot.lane.b32.xlu0 %v8517_v17, %s8663_s4 }
 0x9ff   :  { %8558 = vrot.lane.b32.xlu1 %v8517_v17, %s8647_s22  ;;  %8553 = vrot.lane.b32.xlu0 %v8517_v17, %s8664_s24 }
 0xa03   :  { %8568 = vrot.lane.b32.xlu1 %v8517_v17, %s8617_s18  ;;  %8563 = vrot.lane.b32.xlu0 %v8517_v17, %s8665_s23 }
 0xa07   :  { %8578 = vrot.lane.b32.xlu1 %v8517_v17, %s8619_s20  ;;  %8573 = vrot.lane.b32.xlu0 %v8517_v17, %s8641_s29 }
 0xa0b   :  { %6387 = vperm.xlu1 %8475, %v6370_v23   ;;  %8583 = vrot.lane.b32.xlu0 %v8517_v17, %s8643_s30 }
 0xa0f   :  { %6397 = vperm.xlu1 %8475, %v6372_v57   ;;  %6392 = vperm.xlu0 %8511, %v6371_v16  }
 0xa13   :  { %6407 = vperm.xlu1 %8475, %v6374_v9   ;;  %6402 = vperm.xlu0 %8511, %v6373_v3  }
 0xa17   :  { %6417 = vperm.xlu1 %8475, %v6376_v26   ;;  %6412 = vperm.xlu0 %8511, %v6375_v5  }
 0xa1b   :  { %6427 = vperm.xlu1 %8475, %v6378_v27   ;;  %6422 = vperm.xlu0 %8511, %v6377_v21  }
 0xa1f   :  { %6437 = vperm.xlu1 %8475, %v6380_v49   ;;  %6432 = vperm.xlu0 %8511, %v6379_v30  }
 0xa23   :  { %6447 = vperm.xlu1 %8475, %v6382_v60   ;;  %6442 = vperm.xlu0 %8511, %v6381_v52  }
 0xa27   :  { %6457 = vperm.xlu1 %8475, %v6384_v29   ;;  %6452 = vperm.xlu0 %8511, %v6383_v1  }
 0xa2b   :  { %6644 = vperm.xlu1 %8475, %v6627_v15   ;;  %6639 = vperm.xlu0 %8511, %v6626_v48  }
 0xa2f   :  { %6654 = vperm.xlu1 %8475, %v6629_v33   ;;  %6649 = vperm.xlu0 %8511, %v6628_v18  }
 0xa33   :  { %6664 = vperm.xlu1 %8475, %v6631_v28   ;;  %6659 = vperm.xlu0 %8511, %v6630_v10  }
 0xa37   :  { %6674 = vperm.xlu1 %8475, %v6633_v7   ;;  %6669 = vperm.xlu0 %8511, %v6632_v40  }
 0xa3b   :  { %6684 = vperm.xlu1 %8475, %v6635_v47   ;;  %6679 = vperm.xlu0 %8511, %v6634_v32  }
 0xa3f   :  { %6863 = vperm.xlu1 %8475, %v6859_v19   ;;  %6689 = vperm.xlu0 %8511, %v6636_v35   ;;  %v6340_v35 = vld [vmem:[%s13456_s7] sm:$0xff] }
 0xa43   :  { %6868 = vperm.xlu0 %8511, %v6860_v34   ;;  %v6343_v34 = vld [vmem:[%s13456_s7 + $0x18] sm:$0xff] }
 0xa61   :  { %v8519_v8 = vpop.permute.xlu1 %8518  ;;  %v8514_v45 = vpop.permute.xlu0 %8513 }
 0xa62   :  { %v8521_v24 = vunpack.i.h.bf16 %v8519_v8  ;;  %v8520_v41 = vunpack.i.l.bf16 %v8519_v8  ;;  %v8516_v31 = vunpack.i.h.bf16 %v8514_v45  ;;  %v8515_v36 = vunpack.i.l.bf16 %v8514_v45  ;;  %v6342_v8 = vld [vmem:[%s13456_s7 + $0x10] sm:$0xff]  ;;  %v6345_v45 = vld [vmem:[%s13456_s7 + $0x28] sm:$0xff] }
 0xa64   :  { %v8191_v39 = vpack.c.bf16 %v8516_v31, %v8515_v36  ;;  %v8195_v12 = vpack.c.bf16 %v8521_v24, %v8520_v41  ;;  %v6344_v24 = vld [vmem:[%s13456_s7 + $0x20] sm:$0xff]  ;;  %v6347_v41 = vld [vmem:[%s13456_s7 + $0x38] sm:$0xff]  ;;  %v6346_v31 = vld [vmem:[%s13456_s7 + $0x30] sm:$0xff] }
 0xa65   :  { %v8529_v61 = vpop.permute.xlu1 %8528  ;;  %v8524_v46 = vpop.permute.xlu0 %8523  ;;  %v6349_v36 = vld [vmem:[%s13456_s7 + $0x48] sm:$0xff] }
 0xa66   :  { %v8531_v43 = vunpack.i.h.bf16 %v8529_v61  ;;  %v8530_v37 = vunpack.i.l.bf16 %v8529_v61  ;;  %v8526_v38 = vunpack.i.h.bf16 %v8524_v46  ;;  %v8525_v42 = vunpack.i.l.bf16 %v8524_v46  ;;  %8192 = vmatprep.subr.bf16.mxu1 %v8191_v39  ;;  %v6348_v39 = vld [vmem:[%s13456_s7 + $0x40] sm:$0xff]  ;;  %v6350_v61 = vld [vmem:[%s13456_s7 + $0x50] sm:$0xff]  ;;  %v6353_v46 = vld [vmem:[%s13456_s7 + $0x68] sm:$0xff] }
 0xa67   :  { %8194 = vmatpush3.bf16.msra.mxu1 %v8193_v53 }
 0xa68   :  { %v8197_v0 = vpack.c.bf16 %v8526_v38, %v8525_v42  ;;  %8196 = vmatprep.subr.bf16.mxu1 %v8195_v12  ;;  %v8199_v63 = vpack.c.bf16 %v8531_v43, %v8530_v37  ;;  %v6351_v12 = vld [vmem:[%s13456_s7 + $0x58] sm:$0xff]  ;;  %v6352_v43 = vld [vmem:[%s13456_s7 + $0x60] sm:$0xff]  ;;  %v6354_v38 = vld [vmem:[%s13456_s7 + $0x70] sm:$0xff] }
 0xa69   :  { %v8539_v50 = vpop.permute.xlu1 %8538  ;;  %v8534_v4 = vpop.permute.xlu0 %8533  ;;  %v6355_v37 = vld [vmem:[%s13456_s7 + $0x78] sm:$0xff]  ;;  %v6357_v42 = vld [vmem:[%s13456_s7 + $0x88] sm:$0xff] }
 0xa6a   :  { %v8541_v20 = vunpack.i.h.bf16 %v8539_v50  ;;  %v8540_v44 = vunpack.i.l.bf16 %v8539_v50  ;;  %v8536_v62 = vunpack.i.h.bf16 %v8534_v4  ;;  %v8535_v25 = vunpack.i.l.bf16 %v8534_v4  ;;  %v6358_v50 = vld [vmem:[%s13456_s7 + $0x90] sm:$0xff]  ;;  %v6361_v4 = vld [vmem:[%s13456_s7 + $0xa8] sm:$0xff] }
 0xa6b   :  { %8198 = vmatpush3.bf16.msra.mxu1 %v8197_v0  ;;  %v6356_v0 = vld [vmem:[%s13456_s7 + $0x80] sm:$0xff] }
 0xa6c   :  { %v8201_v14 = vpack.c.bf16 %v8536_v62, %v8535_v25  ;;  %8200 = vmatprep.subr.bf16.mxu1 %v8199_v63  ;;  %v8203_v13 = vpack.c.bf16 %v8541_v20, %v8540_v44  ;;  %v6359_v63 = vld [vmem:[%s13456_s7 + $0x98] sm:$0xff]  ;;  %v6360_v20 = vld [vmem:[%s13456_s7 + $0xa0] sm:$0xff]  ;;  %v6362_v62 = vld [vmem:[%s13456_s7 + $0xb0] sm:$0xff] }
 0xa6d   :  { %v8549_v2 = vpop.permute.xlu1 %8548  ;;  %v8544_v54 = vpop.permute.xlu0 %8543  ;;  %v6363_v44 = vld [vmem:[%s13456_s7 + $0xb8] sm:$0xff]  ;;  %v6365_v25 = vld [vmem:[%s13456_s7 + $0xc8] sm:$0xff] }
 0xa6e   :  { %v8551_v51 = vunpack.i.h.bf16 %v8549_v2  ;;  %v8550_v58 = vunpack.i.l.bf16 %v8549_v2  ;;  %v8546_v22 = vunpack.i.h.bf16 %v8544_v54  ;;  %v8545_v56 = vunpack.i.l.bf16 %v8544_v54  ;;  %v6366_v2 = vld [vmem:[%s13456_s7 + $0xd0] sm:$0xff]  ;;  %v6369_v54 = vld [vmem:[%s13456_s7 + $0xe8] sm:$0xff] }
 0xa6f   :  { %8202 = vmatpush3.bf16.msra.mxu1 %v8201_v14  ;;  %v6364_v14 = vld [vmem:[%s13456_s7 + $0xc0] sm:$0xff] }
 0xa70   :  { %v8205_v6 = vpack.c.bf16 %v8546_v22, %v8545_v56  ;;  %8204 = vmatprep.subr.bf16.mxu1 %v8203_v13  ;;  %v8207_v17 = vpack.c.bf16 %v8551_v51, %v8550_v58  ;;  %v6367_v13 = vld [vmem:[%s13456_s7 + $0xd8] sm:$0xff]  ;;  %v6368_v51 = vld [vmem:[%s13456_s7 + $0xe0] sm:$0xff] }
 0xa71   :  { %v8559_v53 = vpop.permute.xlu1 %8558  ;;  %v8554_v11 = vpop.permute.xlu0 %8553 }
 0xa72   :  { %v8561_v23 = vunpack.i.h.bf16 %v8559_v53  ;;  %v8560_v57 = vunpack.i.l.bf16 %v8559_v53  ;;  %v8556_v16 = vunpack.i.h.bf16 %v8554_v11  ;;  %v8555_v9 = vunpack.i.l.bf16 %v8554_v11 }
 0xa73   :  { %8206 = vmatpush3.bf16.msra.mxu1 %v8205_v6 }
 0xa74   :  { %v8209_v3 = vpack.c.bf16 %v8556_v16, %v8555_v9  ;;  %8208 = vmatprep.subr.bf16.mxu1 %v8207_v17  ;;  %v8211_v26 = vpack.c.bf16 %v8561_v23, %v8560_v57 }
 0xa75   :  { %v8569_v5 = vpop.permute.xlu1 %8568  ;;  %v8564_v27 = vpop.permute.xlu0 %8563 }
 0xa76   :  { %v8571_v21 = vunpack.i.h.bf16 %v8569_v5  ;;  %v8570_v49 = vunpack.i.l.bf16 %v8569_v5  ;;  %v8566_v30 = vunpack.i.h.bf16 %v8564_v27  ;;  %v8565_v60 = vunpack.i.l.bf16 %v8564_v27 }
 0xa77   :  { %8210 = vmatpush3.bf16.msra.mxu1 %v8209_v3 }
 0xa78   :  { %v8213_v52 = vpack.c.bf16 %v8566_v30, %v8565_v60  ;;  %8212 = vmatprep.subr.bf16.mxu1 %v8211_v26  ;;  %v8215_v29 = vpack.c.bf16 %v8571_v21, %v8570_v49 }
 0xa79   :  { %v8579_v1 = vpop.permute.xlu1 %8578  ;;  %v8574_v15 = vpop.permute.xlu0 %8573 }
 0xa7a   :  { %v8581_v48 = vunpack.i.h.bf16 %v8579_v1  ;;  %v8580_v33 = vunpack.i.l.bf16 %v8579_v1  ;;  %v8576_v18 = vunpack.i.h.bf16 %v8574_v15  ;;  %v8575_v28 = vunpack.i.l.bf16 %v8574_v15 }
 0xa7b   :  { %8214 = vmatpush3.bf16.msra.mxu1 %v8213_v52 }
 0xa7c   :  { %v8217_v10 = vpack.c.bf16 %v8576_v18, %v8575_v28  ;;  %8216 = vmatprep.subr.bf16.mxu1 %v8215_v29  ;;  %v8219_v40 = vpack.c.bf16 %v8581_v48, %v8580_v33 }
 0xa7d   :  { %v8584_v7 = vpop.permute.xlu0 %8583 }
 0xa7e   :  { %v8586_v47 = vunpack.i.h.bf16 %v8584_v7  ;;  %v8585_v32 = vunpack.i.l.bf16 %v8584_v7 }
 0xa7f   :  { %8218 = vmatpush3.bf16.msra.mxu1 %v8217_v10 }
 0xa80   :  { %v8221_v19 = vpack.c.bf16 %v8586_v47, %v8585_v32  ;;  %8220 = vmatprep.subr.bf16.mxu1 %v8219_v40 }
 0xa83   :  { %8222 = vmatpush3.bf16.msra.mxu1 %v8221_v19 }
 0xa84   :  { %8223 = vmatprep.subr.bf16.mxu1 %v8659_v59 }
 0xa86   :  { %6525 = vmatmul.mubr.f32.vlgmr.msra.gmra.mrb[10].mxu1 %v6340_v35 }
 0xa87   :  { %6529 = vmatprep.mubr.f32.mxu1 %v6343_v34 }
 0xa8a   :  { %6530 = vmatmul.mubr.f32.gmra.mrb[12].mxu1 %v6342_v8  ;;  %v6388_v17 = vpop.permute.xlu1 %6387 }
 0xa8b   :  { %6534 = vmatprep.mubr.f32.mxu1 %v6345_v45 }
 0xa8e   :  { %6535 = vmatmul.mubr.f32.gmra.mrb[14].mxu1 %v6344_v24  ;;  %v6393_v57 = vpop.permute.xlu0 %6392  ;;  %v6398_v30 = vpop.permute.xlu1 %6397 }
 0xa8f   :  { %6539 = vmatprep.mubr.f32.mxu1 %v6347_v41 }
 0xa92   :  { %6540 = vmatmul.mubr.f32.gmra.mrb[16].mxu1 %v6346_v31  ;;  %v6403_v1 = vpop.permute.xlu0 %6402  ;;  %v6408_v47 = vpop.permute.xlu1 %6407 }
 0xa93   :  { %6544 = vmatprep.mubr.f32.mxu1 %v6349_v36 }
 0xa96   :  { %6545 = vmatmul.mubr.f32.gmra.mrb[18].mxu1 %v6348_v39  ;;  %v6413_v34 = vpop.permute.xlu0 %6412 }
 0xa97   :  { %6549 = vmatprep.mubr.f32.mxu1 %v6351_v12 }
 0xa9a   :  { %6550 = vmatmul.mubr.f32.gmra.mrb[20].mxu1 %v6350_v61  ;;  %v6418_v61 = vpop.permute.xlu1 %6417 }
 0xa9b   :  { %6554 = vmatprep.mubr.f32.mxu1 %v6353_v46 }
 0xa9e   :  { %6555 = vmatmul.mubr.f32.gmra.mrb[22].mxu1 %v6352_v43 }
 0xa9f   :  { %6559 = vmatprep.mubr.f32.mxu1 %v6355_v37 }
 0xaa2   :  { %6560 = vmatmul.mubr.f32.gmra.mrb[24].mxu1 %v6354_v38  ;;  %v6423_v38 = vpop.permute.xlu0 %6422 }
 0xaa3   :  { %6564 = vmatprep.mubr.f32.mxu1 %v6357_v42 }
 0xaa6   :  { %6565 = vmatmul.mubr.f32.gmra.mrb[26].mxu1 %v6356_v0 }
 0xaa7   :  { %6569 = vmatprep.mubr.f32.mxu1 %v6359_v63 }
 0xaaa   :  { %6570 = vmatmul.mubr.f32.gmra.mrb[28].mxu1 %v6358_v50 }
 0xaab   :  { %6574 = vmatprep.mubr.f32.mxu1 %v6361_v4 }
 0xaae   :  { %6575 = vmatmul.mubr.f32.gmra.mrb[30].mxu1 %v6360_v20 }
 0xaaf   :  { %6579 = vmatprep.mubr.f32.mxu1 %v6363_v44 }
 0xab2   :  { %6580 = vmatmul.mubr.f32.gmra.mrb[32].mxu1 %v6362_v62 }
 0xab3   :  { %6584 = vmatprep.mubr.f32.mxu1 %v6365_v25  ;;  %v6428_v25 = vpop.permute.xlu1 %6427 }
 0xab6   :  { %6585 = vmatmul.mubr.f32.gmra.mrb[34].mxu1 %v6364_v14 }
 0xab7   :  { %6589 = vmatprep.mubr.f32.mxu1 %v6367_v13 }
 0xaba   :  { %6590 = vmatmul.mubr.f32.gmra.mrb[36].mxu1 %v6366_v2 }
 0xabb   :  { %6594 = vmatprep.mubr.f32.mxu1 %v6369_v54  ;;  %v6433_v54 = vpop.permute.xlu0 %6432 }
 0xabe   :  { %6595 = vmatmul.mubr.f32.gmra.mrb[38].mxu1 %v6368_v51 }
 0xabf   :  { %7766 = vmatprep.mubr.msk.f32.mxu1 %vm8666_vm10, %v8639_v55 }
 0xb59   :  { %v7652_v58 = vpop.f32.mrb[10].mxu1 }
 0xb5a   :  { %v7653_v22 = vpop.f32.mrb[11].mxu1 }
 0xb5b   :  { %v7654_v56 = vadd.f32 %v7653_v22, %v7652_v58 }
 0xb5d   :  { %v7655_v6 = vpop.f32.mrb[12].mxu1  ;;  %v6527_v11 = vadd.f32 %v7654_v56, %v6388_v17 }
 0xb5e   :  { %v7656_v53 = vpop.f32.mrb[13].mxu1 }
 0xb5f   :  { %v7657_v23 = vadd.f32 %v7656_v53, %v7655_v6  ;;  %v6600_v26 = vmax.f32 %v6527_v11, 0.0 }
 0xb61   :  { %v6532_v16 = vadd.f32 %v7657_v23, %v6393_v57  ;;  %v7658_v9 = vpop.f32.mrb[14].mxu1  ;;  %v6438_v23 = vpop.permute.xlu1 %6437 }
 0xb62   :  { %v7659_v3 = vpop.f32.mrb[15].mxu1 }
 0xb63   :  { %v6601_v5 = vmax.f32 %v6532_v16, 0.0  ;;  %v7660_v27 = vadd.f32 %v7659_v3, %v7658_v9  ;;  %v6443_v3 = vpop.permute.xlu0 %6442 }
 0xb65   :  { %v8224_v21 = vpack.c.bf16 %v6601_v5, %v6600_v26  ;;  %v7661_v49 = vpop.f32.mrb[16].mxu1  ;;  %v6537_v52 = vadd.f32 %v7660_v27, %v6398_v30 }
 0xb66   :  { %v7662_v60 = vpop.f32.mrb[17].mxu1 }
 0xb67   :  { %v7663_v29 = vadd.f32 %v7662_v60, %v7661_v49  ;;  %8225 = vmatpush3.bf16.msra.mxu1 %v8224_v21  ;;  %v6602_v18 = vmax.f32 %v6537_v52, 0.0 }
 0xb68   :  { %8226 = vmatprep.subr.bf16.mxu1 %v8659_v59 }
 0xb69   :  { %v6542_v15 = vadd.f32 %v7663_v29, %v6403_v1  ;;  %v7664_v48 = vpop.f32.mrb[18].mxu1  ;;  %v6448_v29 = vpop.permute.xlu1 %6447 }
 0xb6a   :  { %v7665_v33 = vpop.f32.mrb[19].mxu1 }
 0xb6b   :  { %v6603_v28 = vmax.f32 %v6542_v15, 0.0  ;;  %v7666_v10 = vadd.f32 %v7665_v33, %v7664_v48  ;;  %v6453_v33 = vpop.permute.xlu0 %6452 }
 0xb6d   :  { %v8227_v7 = vpack.c.bf16 %v6603_v28, %v6602_v18  ;;  %v7667_v40 = vpop.f32.mrb[20].mxu1  ;;  %v6547_v19 = vadd.f32 %v7666_v10, %v6408_v47 }
 0xb6e   :  { %v7668_v32 = vpop.f32.mrb[21].mxu1 }
 0xb6f   :  { %v7669_v35 = vadd.f32 %v7668_v32, %v7667_v40  ;;  %8228 = vmatpush3.bf16.msra.mxu1 %v8227_v7  ;;  %v6604_v41 = vmax.f32 %v6547_v19, 0.0  ;;  %v6458_v32 = vpop.permute.xlu1 %6457 }
 0xb70   :  { %8229 = vmatprep.subr.bf16.mxu1 %v8659_v59 }
 0xb71   :  { %v6552_v8 = vadd.f32 %v7669_v35, %v6413_v34  ;;  %v7670_v45 = vpop.f32.mrb[22].mxu1 }
 0xb72   :  { %v7671_v24 = vpop.f32.mrb[23].mxu1 }
 0xb73   :  { %v6605_v31 = vmax.f32 %v6552_v8, 0.0  ;;  %v7672_v36 = vadd.f32 %v7671_v24, %v7670_v45  ;;  %v6615_v8 = vld [vmem:[%s13460_s9] sm:$0xff]  ;;  %v6617_v45 = vld [vmem:[%s13460_s9 + $0x10] sm:$0xff]  ;;  %v6618_v24 = vld [vmem:[%s13460_s9 + $0x18] sm:$0xff] }
 0xb75   :  { %v8230_v39 = vpack.c.bf16 %v6605_v31, %v6604_v41  ;;  %v7673_v12 = vpop.f32.mrb[24].mxu1  ;;  %v6557_v43 = vadd.f32 %v7672_v36, %v6418_v61  ;;  %v6619_v41 = vld [vmem:[%s13460_s9 + $0x20] sm:$0xff]  ;;  %v6620_v31 = vld [vmem:[%s13460_s9 + $0x28] sm:$0xff]  ;;  %v6621_v36 = vld [vmem:[%s13460_s9 + $0x30] sm:$0xff] }
 0xb76   :  { %v7674_v46 = vpop.f32.mrb[25].mxu1  ;;  %v6624_v61 = vld [vmem:[%s13460_s9 + $0x48] sm:$0xff] }
 0xb77   :  { %v7675_v37 = vadd.f32 %v7674_v46, %v7673_v12  ;;  %8231 = vmatpush3.bf16.msra.mxu1 %v8230_v39  ;;  %v6606_v50 = vmax.f32 %v6557_v43, 0.0  ;;  %v6622_v39 = vld [vmem:[%s13460_s9 + $0x38] sm:$0xff]  ;;  %v6623_v12 = vld [vmem:[%s13460_s9 + $0x40] sm:$0xff]  ;;  %v6625_v46 = vld [vmem:[%s13460_s9 + $0x50] sm:$0xf] }
 0xb78   :  { %8232 = vmatprep.subr.bf16.mxu1 %v8659_v59  ;;  %v6857_v43 = vld [vmem:[%s13461_s11] sm:$0xff] }
 0xb79   :  { %v6562_v42 = vadd.f32 %v7675_v37, %v6423_v38  ;;  %v7676_v0 = vpop.f32.mrb[26].mxu1 }
 0xb7a   :  { %v7677_v63 = vpop.f32.mrb[27].mxu1 }
 0xb7b   :  { %v6607_v4 = vmax.f32 %v6562_v42, 0.0  ;;  %v7678_v20 = vadd.f32 %v7677_v63, %v7676_v0  ;;  %v6640_v42 = vpop.permute.xlu0 %6639  ;;  %v6645_v63 = vpop.permute.xlu1 %6644 }
 0xb7d   :  { %v8233_v44 = vpack.c.bf16 %v6607_v4, %v6606_v50  ;;  %v7679_v62 = vpop.f32.mrb[28].mxu1  ;;  %v6567_v13 = vadd.f32 %v7678_v20, %v6428_v25 }
 0xb7e   :  { %v7680_v14 = vpop.f32.mrb[29].mxu1 }
 0xb7f   :  { %v7681_v2 = vadd.f32 %v7680_v14, %v7679_v62  ;;  %8234 = vmatpush3.bf16.msra.mxu1 %v8233_v44  ;;  %v6608_v56 = vmax.f32 %v6567_v13, 0.0  ;;  %v6650_v13 = vpop.permute.xlu0 %6649 }
 0xb80   :  { %8235 = vmatprep.subr.bf16.mxu1 %v8659_v59 }
 0xb81   :  { %v6572_v51 = vadd.f32 %v7681_v2, %v6433_v54  ;;  %v7682_v58 = vpop.f32.mrb[30].mxu1  ;;  %v6655_v54 = vpop.permute.xlu1 %6654 }
 0xb82   :  { %v7683_v22 = vpop.f32.mrb[31].mxu1 }
 0xb83   :  { %v6609_v6 = vmax.f32 %v6572_v51, 0.0  ;;  %v7684_v17 = vadd.f32 %v7683_v22, %v7682_v58 }
 0xb85   :  { %v8236_v53 = vpack.c.bf16 %v6609_v6, %v6608_v56  ;;  %v7685_v11 = vpop.f32.mrb[32].mxu1  ;;  %v6577_v16 = vadd.f32 %v7684_v17, %v6438_v23  ;;  %v6660_v23 = vpop.permute.xlu0 %6659 }
 0xb86   :  { %v7686_v57 = vpop.f32.mrb[33].mxu1 }
 0xb87   :  { %v7687_v9 = vadd.f32 %v7686_v57, %v7685_v11  ;;  %8237 = vmatpush3.bf16.msra.mxu1 %v8236_v53  ;;  %v6610_v21 = vmax.f32 %v6577_v16, 0.0  ;;  %v6665_v16 = vpop.permute.xlu1 %6664 }
 0xb88   :  { %8238 = vmatprep.subr.bf16.mxu1 %v8659_v59 }
 0xb89   :  { %v6582_v26 = vadd.f32 %v7687_v9, %v6443_v3  ;;  %v7688_v5 = vpop.f32.mrb[34].mxu1 }
 0xb8a   :  { %v7689_v27 = vpop.f32.mrb[35].mxu1 }
 0xb8b   :  { %v6611_v49 = vmax.f32 %v6582_v26, 0.0  ;;  %v7690_v30 = vadd.f32 %v7689_v27, %v7688_v5 }
 0xb8d   :  { %v8239_v60 = vpack.c.bf16 %v6611_v49, %v6610_v21  ;;  %v7691_v52 = vpop.f32.mrb[36].mxu1  ;;  %v6587_v15 = vadd.f32 %v7690_v30, %v6448_v29  ;;  %v6675_v29 = vpop.permute.xlu1 %6674 }
 0xb8e   :  { %v7692_v1 = vpop.f32.mrb[37].mxu1 }
 0xb8f   :  { %v7693_v48 = vadd.f32 %v7692_v1, %v7691_v52  ;;  %8240 = vmatpush3.bf16.msra.mxu1 %v8239_v60  ;;  %v6612_v7 = vmax.f32 %v6587_v15, 0.0  ;;  %v6670_v60 = vpop.permute.xlu0 %6669 }
 0xb90   :  { %8241 = vmatprep.subr.bf16.mxu1 %v8659_v59  ;;  %v6616_v59 = vld [vmem:[%s13460_s9 + $0x8] sm:$0xff] }
 0xb91   :  { %v6592_v18 = vadd.f32 %v7693_v48, %v6453_v33  ;;  %v7694_v28 = vpop.f32.mrb[38].mxu1 }
 0xb92   :  { %v7695_v10 = vpop.f32.mrb[39].mxu1 }
 0xb93   :  { %v6613_v40 = vmax.f32 %v6592_v18, 0.0  ;;  %v7696_v47 = vadd.f32 %v7695_v10, %v7694_v28 }
 0xb95   :  { %v8242_v19 = vpack.c.bf16 %v6613_v40, %v6612_v7  ;;  %v6597_v35 = vadd.f32 %v7696_v47, %v6458_v32  ;;  %v6680_v40 = vpop.permute.xlu0 %6679  ;;  %v6685_v32 = vpop.permute.xlu1 %6684 }
 0xb97   :  { %8243 = vmatpush3.bf16.msra.mxu1 %v8242_v19  ;;  %v6614_v34 = vmax.f32 %v6597_v35, 0.0 }
 0xb98   :  { %7764 = vmatprep.subr.mxu1 %v8639_v55 }
 0xb9b   :  { %7765 = vmatpush3.msra.mxu1 %v6614_v34 }
 0xb9c   :  { %7767 = vmatmul.mubr.msk.f32.vlgmr.msra.gmra.mrb[40].mxu1 %vm6692_vm2, %v6615_v8 }
 0xb9d   :  { %7769 = vmatprep.mubr.msk.f32.mxu1 %vm8666_vm10, %v8639_v55 }
 0xba0   :  { %7770 = vmatmul.mubr.msk.f32.gmra.mrb[42].mxu1 %vm6692_vm2, %v6616_v59 }
 0xba1   :  { %7772 = vmatprep.mubr.msk.f32.mxu1 %vm8666_vm10, %v8639_v55 }
 0xba4   :  { %7773 = vmatmul.mubr.msk.f32.gmra.mrb[44].mxu1 %vm6692_vm2, %v6617_v45  ;;  %v6690_v45 = vpop.permute.xlu0 %6689 }
 0xba5   :  { %7775 = vmatprep.mubr.msk.f32.mxu1 %vm8666_vm10, %v8639_v55 }
 0xba8   :  { %7776 = vmatmul.mubr.msk.f32.gmra.mrb[46].mxu1 %vm6692_vm2, %v6618_v24 }
 0xba9   :  { %7778 = vmatprep.mubr.msk.f32.mxu1 %vm8666_vm10, %v8639_v55 }
 0xbac   :  { %7779 = vmatmul.mubr.msk.f32.gmra.mrb[48].mxu1 %vm6692_vm2, %v6619_v41 }
 0xbad   :  { %7781 = vmatprep.mubr.msk.f32.mxu1 %vm8666_vm10, %v8639_v55 }
 0xbb0   :  { %7782 = vmatmul.mubr.msk.f32.gmra.mrb[50].mxu1 %vm6692_vm2, %v6620_v31 }
 0xbb1   :  { %7784 = vmatprep.mubr.msk.f32.mxu1 %vm8666_vm10, %v8639_v55 }
 0xbb4   :  { %7785 = vmatmul.mubr.msk.f32.gmra.mrb[52].mxu1 %vm6692_vm2, %v6621_v36 }
 0xbb5   :  { %7787 = vmatprep.mubr.msk.f32.mxu1 %vm8666_vm10, %v8639_v55 }
 0xbb8   :  { %7788 = vmatmul.mubr.msk.f32.gmra.mrb[54].mxu1 %vm6692_vm2, %v6622_v39 }
 0xbb9   :  { %7790 = vmatprep.mubr.msk.f32.mxu1 %vm8666_vm10, %v8639_v55 }
 0xbbc   :  { %7791 = vmatmul.mubr.msk.f32.gmra.mrb[56].mxu1 %vm6692_vm2, %v6623_v12  ;;  %v6858_v12 = vld [vmem:[%s13461_s11 + $0x8] sm:$0x3] }
 0xbbd   :  { %7793 = vmatprep.mubr.msk.f32.mxu1 %vm8666_vm10, %v8639_v55 }
 0xbc0   :  { %7794 = vmatmul.mubr.msk.f32.gmra.mrb[58].mxu1 %vm6692_vm2, %v6624_v61  ;;  %v6869_v61 = vpop.permute.xlu0 %6868 }
 0xbc1   :  { %7796 = vmatprep.mubr.msk.f32.mxu1 %vm8666_vm10, %v8639_v55 }
 0xbc4   :  { %7797 = vmatmul.mubr.msk.f32.gmra.mrb[60].mxu1 %vm6692_vm2, %v6625_v46 }
 0xbc5   :  { %7821 = vmatprep.mubr.msk.f32.mxu1 %vm6871_vm12, %v6857_v43  ;;  %v6864_v43 = vpop.permute.xlu1 %6863 }
 0xc6f   :  { %v6792_v37 = vpop.f32.mrb[40].mxu1 }
 0xc70   :  { %v7768_v38 = vpop.f32.mrb[41].mxu1  ;;  %v6793_v0 = vadd.f32 %v6792_v37, %v6640_v42 }
 0xc72   :  { %v6846_v20 = vmax.f32 %v6793_v0, 0.0 }
 0xc73   :  { %v6797_v50 = vpop.f32.mrb[42].mxu1 }
 0xc74   :  { %v6798_v55 = vadd.f32 %v6797_v50, %v6645_v63  ;;  %v7771_v4 = vpop.f32.mrb[43].mxu1 }
 0xc76   :  { %v6847_v44 = vmax.f32 %v6798_v55, 0.0 }
 0xc77   :  { %v6802_v62 = vpop.f32.mrb[44].mxu1 }
 0xc78   :  { %v8244_v25 = vpack.c.bf16 %v6847_v44, %v6846_v20  ;;  %v7774_v14 = vpop.f32.mrb[45].mxu1  ;;  %v6803_v2 = vadd.f32 %v6802_v62, %v6650_v13 }
 0xc7a   :  { %8245 = vmatprep.subr.bf16.mxu1 %v8244_v25  ;;  %v6848_v56 = vmax.f32 %v6803_v2, 0.0 }
 0xc7b   :  { %v6807_v51 = vpop.f32.mrb[46].mxu1  ;;  %8247 = vmatpush3.bf16.msra.mxu1 %v8244_v25 }
 0xc7c   :  { %v6808_v58 = vadd.f32 %v6807_v51, %v6655_v54  ;;  %v7777_v22 = vpop.f32.mrb[47].mxu1 }
 0xc7e   :  { %v6849_v6 = vmax.f32 %v6808_v58, 0.0 }
 0xc7f   :  { %v6812_v17 = vpop.f32.mrb[48].mxu1 }
 0xc80   :  { %v8248_v53 = vpack.c.bf16 %v6849_v6, %v6848_v56  ;;  %v7780_v11 = vpop.f32.mrb[49].mxu1  ;;  %v6813_v57 = vadd.f32 %v6812_v17, %v6660_v23 }
 0xc82   :  { %8249 = vmatprep.subr.bf16.mxu1 %v8248_v53  ;;  %v6850_v5 = vmax.f32 %v6813_v57, 0.0 }
 0xc83   :  { %v6817_v9 = vpop.f32.mrb[50].mxu1  ;;  %8251 = vmatpush3.bf16.msra.mxu1 %v8248_v53 }
 0xc84   :  { %v6818_v3 = vadd.f32 %v6817_v9, %v6665_v16  ;;  %v7783_v26 = vpop.f32.mrb[51].mxu1 }
 0xc86   :  { %v6851_v27 = vmax.f32 %v6818_v3, 0.0 }
 0xc87   :  { %v6822_v21 = vpop.f32.mrb[52].mxu1 }
 0xc88   :  { %v8252_v49 = vpack.c.bf16 %v6851_v27, %v6850_v5  ;;  %v7786_v30 = vpop.f32.mrb[53].mxu1  ;;  %v6823_v52 = vadd.f32 %v6822_v21, %v6670_v60 }
 0xc8a   :  { %8253 = vmatprep.subr.bf16.mxu1 %v8252_v49  ;;  %v6852_v33 = vmax.f32 %v6823_v52, 0.0 }
 0xc8b   :  { %v6827_v1 = vpop.f32.mrb[54].mxu1  ;;  %8255 = vmatpush3.bf16.msra.mxu1 %v8252_v49 }
 0xc8c   :  { %v6828_v15 = vadd.f32 %v6827_v1, %v6675_v29  ;;  %v7789_v48 = vpop.f32.mrb[55].mxu1 }
 0xc8e   :  { %v6853_v18 = vmax.f32 %v6828_v15, 0.0 }
 0xc8f   :  { %v6832_v28 = vpop.f32.mrb[56].mxu1 }
 0xc90   :  { %v8256_v10 = vpack.c.bf16 %v6853_v18, %v6852_v33  ;;  %v7792_v7 = vpop.f32.mrb[57].mxu1  ;;  %v6833_v47 = vadd.f32 %v6832_v28, %v6680_v40 }
 0xc92   :  { %8257 = vmatprep.subr.bf16.mxu1 %v8256_v10  ;;  %v6854_v8 = vmax.f32 %v6833_v47, 0.0 }
 0xc93   :  { %v6837_v19 = vpop.f32.mrb[58].mxu1  ;;  %8259 = vmatpush3.bf16.msra.mxu1 %v8256_v10 }
 0xc94   :  { %v6838_v35 = vadd.f32 %v6837_v19, %v6685_v32  ;;  %v7795_v34 = vpop.f32.mrb[59].mxu1 }
 0xc96   :  { %v6855_v59 = vmax.f32 %v6838_v35, 0.0 }
 0xc97   :  { %v6842_v24 = vpop.f32.mrb[60].mxu1 }
 0xc98   :  { %v8260_v41 = vpack.c.bf16 %v6855_v59, %v6854_v8  ;;  %v6843_v31 = vadd.f32 %v6842_v24, %v6690_v45  ;;  %v7798_v36 = vpop.f32.mrb[61].mxu1 }
 0xc9a   :  { %v6856_v39 = vmax.f32 %v6843_v31, 0.0  ;;  %8261 = vmatprep.subr.bf16.mxu1 %v8260_v41 }
 0xc9b   :  { %8263 = vmatpush3.bf16.msra.mxu1 %v8260_v41 }
 0xc9c   :  { %7819 = vmatprep.subr.msk.mxu1 %vm6878_vm14, %v6856_v39 }
 0xc9f   :  { %7820 = vmatpush3.msk.msra.mxu1 %vm6878_vm14, %v6856_v39 }
 0xca0   :  { %7822 = vmatmul.mubr.msk.f32.vlgmr.msra.gmra.mrb[62].mxu1 %vm6871_vm12, %v6858_v12 }
 0xd73   :  { %v7823_v46 = vpop.f32.mrb[62].mxu1 }
 0xd74   :  { %v6954_v37 = vadd.f32 %v7823_v46, %v6869_v61  ;;  %v6948_v38 = vpop.f32.mrb[63].mxu1 }
 0xd75   :  { %v6949_v42 = vadd.f32 %v6948_v38, %v6864_v43 }
 0xd76   :  { %6960 = vst.msk [vmem:[%s13462_s13 + $0x8] sm:$0x3] %vm6959_vm5, %v6954_v37 }
 0xd77   :  { %6958 = vst.msk [vmem:[%s13462_s13] sm:$0xff] %vm6957_vm9, %v6949_v42 }

</bundles_post_ra>
